<compile_context>
chip_gen: v7x
topology: tpu7x:2x2x1
jax: 0.10.0
libtpu: 0.0.40
codegen_flags: <defaults>
</compile_context>

<pallas_src>
import functools

import numpy as np
import jax
import jax.numpy as jnp
from jax.experimental import pallas as pl
from jax.experimental.pallas import tpu as pltpu


MXU_DTYPE = jnp.bfloat16   # dtype of MXU operands (weights / matmul inputs)


# =============================================================================
# Synthetic parameters in PyTorch layout (Conv: (Cout,Cin,3,3); Linear: (out,in))
# =============================================================================
def init_params(key, *, obs_size=64, baseplanes=8, after_compression_flat_size=128,
                hidden_size=32, output_dim=3):
    input_channels = 6 + 2 + 2                      # rgb_pair + 2 * depth_pair (torch code)
    chans = [input_channels, baseplanes, baseplanes,
             baseplanes * 2, baseplanes * 4, baseplanes * 8]
    final_spatial = obs_size // 32                  # final_spatial_compress = 1/32
    num_comp = int(round(after_compression_flat_size / (final_spatial * final_spatial)))

    keys = jax.random.split(key, 3 * len(chans) + 8)
    it = iter(range(len(keys)))

    def nk():
        return keys[next(it)]

    backbone = []
    for cin, cout in zip(chans[:-1], chans[1:]):
        w = jax.random.normal(nk(), (cout, cin, 3, 3), jnp.float32) * np.sqrt(2.0 / (9 * cin))
        g = 1.0 + 0.1 * jax.random.normal(nk(), (cout,), jnp.float32)
        b = 0.1 * jax.random.normal(nk(), (cout,), jnp.float32)
        backbone.append((w, g, b))

    wc = jax.random.normal(nk(), (num_comp, chans[-1], 3, 3), jnp.float32) \
        * np.sqrt(2.0 / (9 * chans[-1]))
    gc = 1.0 + 0.1 * jax.random.normal(nk(), (num_comp,), jnp.float32)
    bc = 0.1 * jax.random.normal(nk(), (num_comp,), jnp.float32)

    flat_in = num_comp * final_spatial * final_spatial
    fc_w = jax.random.normal(nk(), (hidden_size, flat_in), jnp.float32) * np.sqrt(2.0 / flat_in)
    fc_b = 0.1 * jax.random.normal(nk(), (hidden_size,), jnp.float32)
    head_w = jax.random.normal(nk(), (output_dim, hidden_size), jnp.float32) / np.sqrt(hidden_size)
    head_b = jnp.zeros((output_dim,), jnp.float32)

    return {'backbone': backbone, 'compression': (wc, gc, bc),
            'fc_w': fc_w, 'fc_b': fc_b, 'head_w': head_w, 'head_b': head_b,
            'meta': {'obs_size': obs_size, 'num_comp': num_comp,
                     'hidden': hidden_size, 'out_dim': output_dim}}


# =============================================================================
# Pure-JAX f32 reference (same forward semantics) - used to validate the kernel
# =============================================================================
def reference_forward(params, obs, eps=1e-5):
    obs = obs.astype(jnp.float32)
    rgb = obs[..., :6] / 255.0
    act = obs[..., -1:]
    dep = obs[..., -3:-1]
    x = jnp.concatenate([rgb[..., :3], act, dep[..., :1],
                         rgb[..., 3:6], act, dep[..., 1:2]], axis=-1)

    def conv_gn_relu(x, w_oihw, g, b, stride):
        y = jax.lax.conv_general_dilated(
            x, jnp.transpose(w_oihw, (2, 3, 1, 0)), (stride, stride), ((1, 1), (1, 1)),
            dimension_numbers=('NHWC', 'HWIO', 'NHWC'),
            precision=jax.lax.Precision.HIGHEST)
        mu = jnp.mean(y, axis=(1, 2, 3), keepdims=True)
        var = jnp.mean(jnp.square(y - mu), axis=(1, 2, 3), keepdims=True)
        y = (y - mu) * jax.lax.rsqrt(var + eps) * g + b
        return jnp.maximum(y, 0.0)

    for (w, g, b) in params['backbone']:
        x = conv_gn_relu(x, w, g, b, 2)
    wc, gc, bc = params['compression']
    x = conv_gn_relu(x, wc, gc, bc, 1)
    feats = jnp.transpose(x, (0, 3, 1, 2)).reshape(x.shape[0], -1)        # NCHW flatten
    h = jnp.maximum(feats @ params['fc_w'].T + params['fc_b'], 0.0)
    return h @ params['head_w'].T + params['head_b']


# =============================================================================
# Host-side folding into the banded row-matmul kernel format
# =============================================================================
def fold_params(params):
    obs_size = params['meta']['obs_size']
    assert obs_size == 64, "folded kernel is specialized to 64x64 observations (2x2 final map)"
    obs_ch = 9

    def hwio(w):                                    # (Cout,Cin,3,3) -> (3,3,Cin,Cout)
        return np.transpose(np.asarray(w, np.float32), (2, 3, 1, 0))

    def band_weights_stride2(k, w_in):
        """Fold a 3x3 stride-2 pad-1 conv into two (2*w*cin, (w/2)*cout) row matrices."""
        _, _, cin, cout = k.shape
        w_out = w_in // 2
        rw = w_in * cin
        w_lo = np.zeros((2 * rw, w_out * cout), np.float32)
        w_hi = np.zeros((2 * rw, w_out * cout), np.float32)
        for ow in range(w_out):
            for kw in range(3):
                iw = 2 * ow - 1 + kw
                if iw < 0 or iw >= w_in:
                    continue                          # left-pad column folded away
                cs = slice(ow * cout, (ow + 1) * cout)
                w_lo[rw + iw * cin: rw + (iw + 1) * cin, cs] = k[0, kw]   # input row 2oi-1
                w_hi[iw * cin:(iw + 1) * cin, cs] = k[1, kw]              # input row 2oi
                w_hi[rw + iw * cin: rw + (iw + 1) * cin, cs] = k[2, kw]   # input row 2oi+1
        return w_lo, w_hi

    # ---- layer 0: fold /255 rgb scaling + torch channel assembly into the conv weight.
    # x channels: [r0,r1,r2, act, d0, r3,r4,r5, act, d1]; obs channels: [r0..r5, d0, d1, act]
    k0 = hwio(params['backbone'][0][0])              # (3,3,10,cout)
    c0 = k0.shape[-1]
    s = 1.0 / 255.0
    k0e = np.zeros((3, 3, obs_ch, c0), np.float32)
    k0e[:, :, 0] = k0[:, :, 0] * s
    k0e[:, :, 1] = k0[:, :, 1] * s
    k0e[:, :, 2] = k0[:, :, 2] * s
    k0e[:, :, 3] = k0[:, :, 5] * s
    k0e[:, :, 4] = k0[:, :, 6] * s
    k0e[:, :, 5] = k0[:, :, 7] * s
    k0e[:, :, 6] = k0[:, :, 4]                       # d0
    k0e[:, :, 7] = k0[:, :, 9]                       # d1
    k0e[:, :, 8] = k0[:, :, 3] + k0[:, :, 8]         # act (used twice)

    flat = []
    layer_dims = []
    kernels = [k0e] + [hwio(w) for (w, _, _) in params['backbone'][1:]]
    h = obs_size
    for L, k in enumerate(kernels):
        cin, cout = k.shape[2], k.shape[3]
        w_lo, w_hi = band_weights_stride2(k, h)
        wo = h // 2
        g = np.tile(np.asarray(params['backbone'][L][1], np.float32), wo)[None, :]
        b = np.tile(np.asarray(params['backbone'][L][2], np.float32), wo)[None, :]
        flat += [jnp.asarray(w_lo, MXU_DTYPE), jnp.asarray(w_hi, MXU_DTYPE),
                 jnp.asarray(g), jnp.asarray(b)]
        layer_dims.append((h // 2, 2 * h * cin, wo * cout))
        h = wo

    # ---- parity (even/odd output row) matrices used to repack rows between layers
    for (nr, _, _) in layer_dims[:-1]:
        sel = np.zeros((2, nr // 2, nr), np.float32)
        r = np.arange(nr // 2)
        sel[0, r, 2 * r] = 1.0
        sel[1, r, 2 * r + 1] = 1.0
        flat.append(jnp.asarray(sel, MXU_DTYPE))

    # ---- compression head: 3x3 stride-1 pad-1 conv on the 2x2 map folded to two blocks
    wc, gc, bc = params['compression']
    kc = hwio(wc)                                    # (3,3,64,num_comp)
    cin_c, num_comp = kc.shape[2], kc.shape[3]
    wc_rows = np.zeros((2, 2 * cin_c, 4 * num_comp), np.float32)
    for ih in range(2):
        for iw in range(2):
            for oh in range(2):
                for ow in range(2):
                    kh, kw = ih - oh + 1, iw - ow + 1
                    wc_rows[ih, iw * cin_c:(iw + 1) * cin_c,
                            (oh * 2 + ow) * num_comp:(oh * 2 + ow + 1) * num_comp] = kc[kh, kw]
    gc_t = np.tile(np.asarray(gc, np.float32), 4)[None, :]
    bc_t = np.tile(np.asarray(bc, np.float32), 4)[None, :]
    flat += [jnp.asarray(wc_rows[0], MXU_DTYPE), jnp.asarray(wc_rows[1], MXU_DTYPE),
             jnp.asarray(gc_t), jnp.asarray(bc_t)]

    # ---- visual_fc / output_head; PyTorch NCHW flatten order folded into fc_w rows
    fc_w = np.asarray(params['fc_w'], np.float32)    # (hidden, num_comp*4)
    hidden = fc_w.shape[0]
    fcw_k = fc_w.T.reshape(num_comp, 4, hidden).transpose(1, 0, 2).reshape(4 * num_comp, hidden)
    flat += [jnp.asarray(fcw_k, MXU_DTYPE),
             jnp.asarray(np.asarray(params['fc_b'], np.float32)[None, :]),
             jnp.asarray(np.asarray(params['head_w'], np.float32).T, MXU_DTYPE),
             jnp.asarray(np.asarray(params['head_b'], np.float32)[None, :])]

    meta = {'obs_size': obs_size, 'obs_channels': obs_ch, 'layer_dims': tuple(layer_dims),
            'num_comp': num_comp, 'hidden': hidden,
            'out_dim': int(np.asarray(params['head_w']).shape[0])}
    return {'flat': flat, 'meta': meta}


# =============================================================================
# Fused kernel: whole network for a block of `batch` samples per grid step
# =============================================================================
def _vo_kernel(*refs, batch, eps, layer_dims):
    f32 = jnp.float32
    mxu = MXU_DTYPE
    n_layers = len(layer_dims)

    # ---- parse refs (inputs, output, scratch) -------------------------------
    obs_ref = refs[0]
    pos = 1
    layer_p = []
    for _ in range(n_layers):
        layer_p.append(refs[pos:pos + 4])            # (W_lo, W_hi, gamma_tiled, beta_tiled)
        pos += 4
    sel_refs = refs[pos:pos + n_layers - 1]; pos += n_layers - 1
    wc0_ref, wc1_ref, gc_ref, bc_ref = refs[pos:pos + 4]; pos += 4
    fcw_ref, fcb_ref, hw_ref, hb_ref = refs[pos:pos + 4]; pos += 4
    out_ref = refs[pos]; pos += 1
    act_scr = refs[pos:pos + n_layers]; pos += n_layers
    comp_scr = refs[pos]

    # ---- halos: one zero packed-row per layer scratch (a few KB; interiors are
    # fully overwritten below, so nothing else needs initialization).
    for L in range(n_layers):
        act_scr[L][:, 0:1, :] = jnp.zeros((batch, 1, act_scr[L].shape[2]), f32)

    # stage observations into the padded layer-0 scratch (rows 1..)
    act_scr[0][:, 1:, :] = obs_ref[...]

    # ---- backbone: 5 x [stride-2 3x3 conv (banded row matmuls) + GN(1) + ReLU] ----
    x_tail = [None] * batch
    for L in range(n_layers):
        nr, _, wprime = layer_dims[L]
        w_lo_ref, w_hi_ref, g_ref, bt_ref = layer_p[L]
        sref = act_scr[L]
        for b_i in range(batch):
            prev = sref[b_i, 0:nr, :].astype(mxu)          # packed rows oi   (kh = 0 taps)
            cur = sref[b_i, 1:nr + 1, :].astype(mxu)       # packed rows oi+1 (kh = 1,2 taps)
            o = (jnp.dot(cur, w_hi_ref[...], preferred_element_type=f32)
                 + jnp.dot(prev, w_lo_ref[...], preferred_element_type=f32))   # (nr, wprime)
            # GroupNorm(1, C) over the whole per-sample map (biased var) + ReLU
            mu = jnp.mean(o)
            var = jnp.mean(jnp.square(o - mu))
            o = (o - mu) * jax.lax.rsqrt(var + eps) * g_ref[...] + bt_ref[...]
            o = jnp.maximum(o, 0.0)
            if L + 1 < n_layers:
                # repack: pair adjacent output rows into the next layer's packed rows
                half = nr // 2
                o16 = o.astype(mxu)
                even = jnp.dot(sel_refs[L][0], o16, preferred_element_type=f32)
                odd = jnp.dot(sel_refs[L][1], o16, preferred_element_type=f32)
                nxt = act_scr[L + 1]
                nxt[b_i, 1:1 + half, 0:wprime] = even
                nxt[b_i, 1:1 + half, wprime:2 * wprime] = odd
            else:
                x_tail[b_i] = o                             # (2, 2*C_final)

    # ---- compression head: 3x3 stride-1 conv on the 2x2 map (folded) + GN(1) + ReLU
    for b_i in range(batch):
        o16 = x_tail[b_i].astype(mxu)
        c = (jnp.dot(o16[0:1, :], wc0_ref[...], preferred_element_type=f32)
             + jnp.dot(o16[1:2, :], wc1_ref[...], preferred_element_type=f32))  # (1, 4*num_comp)
        mu = jnp.mean(c)
        var = jnp.mean(jnp.square(c - mu))
        c = (c - mu) * jax.lax.rsqrt(var + eps) * gc_ref[...] + bc_ref[...]
        comp_scr[b_i:b_i + 1, :] = jnp.maximum(c, 0.0)

    # ---- batched epilogue: visual_fc (Flatten folded into weights, Dropout = identity)
    # + output_head
    feats = comp_scr[...].astype(mxu)                       # (batch, 4*num_comp)
    hid = jnp.dot(feats, fcw_ref[...], preferred_element_type=f32) + fcb_ref[...]
    hid = jnp.maximum(hid, 0.0).astype(mxu)
    out = jnp.dot(hid, hw_ref[...], preferred_element_type=f32) + hb_ref[...]
    out_ref[...] = out.astype(out_ref.dtype)


# =============================================================================
# Wrapper
# =============================================================================
def _pick_block(n, max_b):
    b = min(n, max_b)
    while n % b:
        b -= 1
    return b


def visual_odometry_cnn_forward(kparams, observation_pairs, *, eps=1e-5,
                                max_batch_per_step=8):
    meta = kparams['meta']
    flat = kparams['flat']
    n, hh, ww, cobs = observation_pairs.shape
    assert hh == meta['obs_size'] and ww == meta['obs_size'] and cobs == meta['obs_channels']
    bsz = _pick_block(n, max_batch_per_step)
    layer_dims = meta['layer_dims']

    # Free reshape (no transpose / pad / extra HBM pass): pack each pair of adjacent
    # image rows into one matmul row of width 2*W*C.
    obs_rows = observation_pairs.astype(jnp.float32).reshape(n, hh // 2, 2 * ww * cobs)

    def _const_spec(a):
        return pl.BlockSpec(a.shape, lambda i, nd=a.ndim: (0,) * nd)

    in_specs = [pl.BlockSpec((bsz, hh // 2, 2 * ww * cobs), lambda i: (i, 0, 0))]
    in_specs += [_const_spec(a) for a in flat]

    scratch_shapes = [pltpu.VMEM((bsz, nr + 1, trw), jnp.float32)
                      for (nr, trw, _) in layer_dims]
    scratch_shapes.append(pltpu.VMEM((bsz, 4 * meta['num_comp']), jnp.float32))

    kern = functools.partial(_vo_kernel, batch=bsz, eps=eps, layer_dims=layer_dims)

    out = pl.pallas_call(
        kern,
        out_shape=jax.ShapeDtypeStruct((n, meta['out_dim']), jnp.float32),
        grid=(n // bsz,),
        in_specs=in_specs,
        out_specs=pl.BlockSpec((bsz, meta['out_dim']), lambda i: (i, 0)),
        scratch_shapes=scratch_shapes,
        compiler_params=pltpu.CompilerParams(dimension_semantics=("parallel",)),
    )(obs_rows, *flat)
    return out


# =============================================================================
if __name__ == "__main__":
    key = jax.random.PRNGKey(0)
    k_obs, k_par = jax.random.split(key)

    # batch=2, 64x64 observation pairs, 9 channels (6 rgb pair + 2 depth pair + 1 action)
    obs = jax.random.uniform(k_obs, (2, 64, 64, 9), jnp.float32, minval=0.0, maxval=255.0)

    params = init_params(k_par, obs_size=64, baseplanes=8,
                         after_compression_flat_size=128, hidden_size=32, output_dim=3)
    kparams = fold_params(params)

    fwd = jax.jit(functools.partial(visual_odometry_cnn_forward, kparams))
    out = jax.block_until_ready(fwd(obs))

    assert out.shape == (2, 3), out.shape
    assert out.dtype == jnp.float32
    assert bool(jnp.all(jnp.isfinite(out)))

    ref = reference_forward(params, obs)
    np.testing.assert_allclose(np.asarray(out), np.asarray(ref), rtol=5e-2, atol=5e-2)

    print("KERNEL_OK")
</pallas_src>

<mosaic_0001>
module attributes {stable_mosaic.version = 11 : i64} {
  func.func @_vo_kernel(%arg0: i32, %arg1: memref<2x32x1152xf32, #tpu.memory_space<vmem>>, %arg2: memref<1152x256xbf16, #tpu.memory_space<vmem>>, %arg3: memref<1152x256xbf16, #tpu.memory_space<vmem>>, %arg4: memref<1x256xf32, #tpu.memory_space<vmem>>, %arg5: memref<1x256xf32, #tpu.memory_space<vmem>>, %arg6: memref<512x128xbf16, #tpu.memory_space<vmem>>, %arg7: memref<512x128xbf16, #tpu.memory_space<vmem>>, %arg8: memref<1x128xf32, #tpu.memory_space<vmem>>, %arg9: memref<1x128xf32, #tpu.memory_space<vmem>>, %arg10: memref<256x128xbf16, #tpu.memory_space<vmem>>, %arg11: memref<256x128xbf16, #tpu.memory_space<vmem>>, %arg12: memref<1x128xf32, #tpu.memory_space<vmem>>, %arg13: memref<1x128xf32, #tpu.memory_space<vmem>>, %arg14: memref<256x128xbf16, #tpu.memory_space<vmem>>, %arg15: memref<256x128xbf16, #tpu.memory_space<vmem>>, %arg16: memref<1x128xf32, #tpu.memory_space<vmem>>, %arg17: memref<1x128xf32, #tpu.memory_space<vmem>>, %arg18: memref<256x128xbf16, #tpu.memory_space<vmem>>, %arg19: memref<256x128xbf16, #tpu.memory_space<vmem>>, %arg20: memref<1x128xf32, #tpu.memory_space<vmem>>, %arg21: memref<1x128xf32, #tpu.memory_space<vmem>>, %arg22: memref<2x16x32xbf16, #tpu.memory_space<vmem>>, %arg23: memref<2x8x16xbf16, #tpu.memory_space<vmem>>, %arg24: memref<2x4x8xbf16, #tpu.memory_space<vmem>>, %arg25: memref<2x2x4xbf16, #tpu.memory_space<vmem>>, %arg26: memref<128x128xbf16, #tpu.memory_space<vmem>>, %arg27: memref<128x128xbf16, #tpu.memory_space<vmem>>, %arg28: memref<1x128xf32, #tpu.memory_space<vmem>>, %arg29: memref<1x128xf32, #tpu.memory_space<vmem>>, %arg30: memref<128x32xbf16, #tpu.memory_space<vmem>>, %arg31: memref<1x32xf32, #tpu.memory_space<vmem>>, %arg32: memref<32x3xbf16, #tpu.memory_space<vmem>>, %arg33: memref<1x3xf32, #tpu.memory_space<vmem>>, %arg34: memref<2x3xf32, #tpu.memory_space<vmem>>, %arg35: memref<2x33x1152xf32, #tpu.memory_space<vmem>>, %arg36: memref<2x17x512xf32, #tpu.memory_space<vmem>>, %arg37: memref<2x9x256xf32, #tpu.memory_space<vmem>>, %arg38: memref<2x5x256xf32, #tpu.memory_space<vmem>>, %arg39: memref<2x3x256xf32, #tpu.memory_space<vmem>>, %arg40: memref<2x128xf32, #tpu.memory_space<vmem>>) attributes {dimension_semantics = [#tpu.dimension_semantics<parallel>], iteration_bounds = array<i64: 1>, scalar_prefetch = 0 : i64, scratch_operands = 6 : i64, tpu.core_type = #tpu.core_type<tc>, window_params = [{transform_indices = @transform_0, window_bounds = array<i64: 2, 32, 1152>}, {pipeline_mode = #tpu.pipeline_mode<synchronous>, transform_indices = @transform_1, window_bounds = array<i64: 1152, 256>}, {pipeline_mode = #tpu.pipeline_mode<synchronous>, transform_indices = @transform_2, window_bounds = array<i64: 1152, 256>}, {pipeline_mode = #tpu.pipeline_mode<synchronous>, transform_indices = @transform_3, window_bounds = array<i64: 1, 256>}, {pipeline_mode = #tpu.pipeline_mode<synchronous>, transform_indices = @transform_4, window_bounds = array<i64: 1, 256>}, {pipeline_mode = #tpu.pipeline_mode<synchronous>, transform_indices = @transform_5, window_bounds = array<i64: 512, 128>}, {pipeline_mode = #tpu.pipeline_mode<synchronous>, transform_indices = @transform_6, window_bounds = array<i64: 512, 128>}, {pipeline_mode = #tpu.pipeline_mode<synchronous>, transform_indices = @transform_7, window_bounds = array<i64: 1, 128>}, {pipeline_mode = #tpu.pipeline_mode<synchronous>, transform_indices = @transform_8, window_bounds = array<i64: 1, 128>}, {pipeline_mode = #tpu.pipeline_mode<synchronous>, transform_indices = @transform_9, window_bounds = array<i64: 256, 128>}, {pipeline_mode = #tpu.pipeline_mode<synchronous>, transform_indices = @transform_10, window_bounds = array<i64: 256, 128>}, {pipeline_mode = #tpu.pipeline_mode<synchronous>, transform_indices = @transform_11, window_bounds = array<i64: 1, 128>}, {pipeline_mode = #tpu.pipeline_mode<synchronous>, transform_indices = @transform_12, window_bounds = array<i64: 1, 128>}, {pipeline_mode = #tpu.pipeline_mode<synchronous>, transform_indices = @transform_13, window_bounds = array<i64: 256, 128>}, {pipeline_mode = #tpu.pipeline_mode<synchronous>, transform_indices = @transform_14, window_bounds = array<i64: 256, 128>}, {pipeline_mode = #tpu.pipeline_mode<synchronous>, transform_indices = @transform_15, window_bounds = array<i64: 1, 128>}, {pipeline_mode = #tpu.pipeline_mode<synchronous>, transform_indices = @transform_16, window_bounds = array<i64: 1, 128>}, {pipeline_mode = #tpu.pipeline_mode<synchronous>, transform_indices = @transform_17, window_bounds = array<i64: 256, 128>}, {pipeline_mode = #tpu.pipeline_mode<synchronous>, transform_indices = @transform_18, window_bounds = array<i64: 256, 128>}, {pipeline_mode = #tpu.pipeline_mode<synchronous>, transform_indices = @transform_19, window_bounds = array<i64: 1, 128>}, {pipeline_mode = #tpu.pipeline_mode<synchronous>, transform_indices = @transform_20, window_bounds = array<i64: 1, 128>}, {pipeline_mode = #tpu.pipeline_mode<synchronous>, transform_indices = @transform_21, window_bounds = array<i64: 2, 16, 32>}, {pipeline_mode = #tpu.pipeline_mode<synchronous>, transform_indices = @transform_22, window_bounds = array<i64: 2, 8, 16>}, {pipeline_mode = #tpu.pipeline_mode<synchronous>, transform_indices = @transform_23, window_bounds = array<i64: 2, 4, 8>}, {pipeline_mode = #tpu.pipeline_mode<synchronous>, transform_indices = @transform_24, window_bounds = array<i64: 2, 2, 4>}, {pipeline_mode = #tpu.pipeline_mode<synchronous>, transform_indices = @transform_25, window_bounds = array<i64: 128, 128>}, {pipeline_mode = #tpu.pipeline_mode<synchronous>, transform_indices = @transform_26, window_bounds = array<i64: 128, 128>}, {pipeline_mode = #tpu.pipeline_mode<synchronous>, transform_indices = @transform_27, window_bounds = array<i64: 1, 128>}, {pipeline_mode = #tpu.pipeline_mode<synchronous>, transform_indices = @transform_28, window_bounds = array<i64: 1, 128>}, {pipeline_mode = #tpu.pipeline_mode<synchronous>, transform_indices = @transform_29, window_bounds = array<i64: 128, 32>}, {pipeline_mode = #tpu.pipeline_mode<synchronous>, transform_indices = @transform_30, window_bounds = array<i64: 1, 32>}, {pipeline_mode = #tpu.pipeline_mode<synchronous>, transform_indices = @transform_31, window_bounds = array<i64: 32, 3>}, {pipeline_mode = #tpu.pipeline_mode<synchronous>, transform_indices = @transform_32, window_bounds = array<i64: 1, 3>}, {transform_indices = @transform_33, window_bounds = array<i64: 2, 3>}]} {
    %cst = arith.constant 0.000000e+00 : f32
    %0 = vector.broadcast %cst : f32 to vector<2x1x1152xf32>
    %c0 = arith.constant 0 : index
    %c0_0 = arith.constant 0 : index
    %c0_1 = arith.constant 0 : index
    %1 = vector.load %arg35[%c0, %c0_0, %c0_1] : memref<2x33x1152xf32, #tpu.memory_space<vmem>>, vector<2x1x1152xf32>
    tpu.vector_store %arg35[%c0, %c0_0, %c0_1], %0 {strides = array<i32>} : memref<2x33x1152xf32, #tpu.memory_space<vmem>>, vector<2x1x1152xf32>,
    %cst_2 = arith.constant 0.000000e+00 : f32
    %2 = vector.broadcast %cst_2 : f32 to vector<2x1x512xf32>
    %c0_3 = arith.constant 0 : index
    %c0_4 = arith.constant 0 : index
    %c0_5 = arith.constant 0 : index
    %3 = vector.load %arg36[%c0_3, %c0_4, %c0_5] : memref<2x17x512xf32, #tpu.memory_space<vmem>>, vector<2x1x512xf32>
    tpu.vector_store %arg36[%c0_3, %c0_4, %c0_5], %2 {strides = array<i32>} : memref<2x17x512xf32, #tpu.memory_space<vmem>>, vector<2x1x512xf32>,
    %cst_6 = arith.constant 0.000000e+00 : f32
    %4 = vector.broadcast %cst_6 : f32 to vector<2x1x256xf32>
    %c0_7 = arith.constant 0 : index
    %c0_8 = arith.constant 0 : index
    %c0_9 = arith.constant 0 : index
    %5 = vector.load %arg37[%c0_7, %c0_8, %c0_9] : memref<2x9x256xf32, #tpu.memory_space<vmem>>, vector<2x1x256xf32>
    tpu.vector_store %arg37[%c0_7, %c0_8, %c0_9], %4 {strides = array<i32>} : memref<2x9x256xf32, #tpu.memory_space<vmem>>, vector<2x1x256xf32>,
    %cst_10 = arith.constant 0.000000e+00 : f32
    %6 = vector.broadcast %cst_10 : f32 to vector<2x1x256xf32>
    %c0_11 = arith.constant 0 : index
    %c0_12 = arith.constant 0 : index
    %c0_13 = arith.constant 0 : index
    %7 = vector.load %arg38[%c0_11, %c0_12, %c0_13] : memref<2x5x256xf32, #tpu.memory_space<vmem>>, vector<2x1x256xf32>
    tpu.vector_store %arg38[%c0_11, %c0_12, %c0_13], %6 {strides = array<i32>} : memref<2x5x256xf32, #tpu.memory_space<vmem>>, vector<2x1x256xf32>,
    %cst_14 = arith.constant 0.000000e+00 : f32
    %8 = vector.broadcast %cst_14 : f32 to vector<2x1x256xf32>
    %c0_15 = arith.constant 0 : index
    %c0_16 = arith.constant 0 : index
    %c0_17 = arith.constant 0 : index
    %9 = vector.load %arg39[%c0_15, %c0_16, %c0_17] : memref<2x3x256xf32, #tpu.memory_space<vmem>>, vector<2x1x256xf32>
    tpu.vector_store %arg39[%c0_15, %c0_16, %c0_17], %8 {strides = array<i32>} : memref<2x3x256xf32, #tpu.memory_space<vmem>>, vector<2x1x256xf32>,
    %c0_18 = arith.constant 0 : index
    %c0_19 = arith.constant 0 : index
    %c0_20 = arith.constant 0 : index
    %10 = vector.load %arg1[%c0_18, %c0_19, %c0_20] : memref<2x32x1152xf32, #tpu.memory_space<vmem>>, vector<2x32x1152xf32>
    %c0_21 = arith.constant 0 : index
    %c1 = arith.constant 1 : index
    %c0_22 = arith.constant 0 : index
    %11 = vector.load %arg35[%c0_21, %c1, %c0_22] : memref<2x33x1152xf32, #tpu.memory_space<vmem>>, vector<2x32x1152xf32>
    tpu.vector_store %arg35[%c0_21, %c1, %c0_22], %10 {strides = array<i32>} : memref<2x33x1152xf32, #tpu.memory_space<vmem>>, vector<2x32x1152xf32>,
    %c0_23 = arith.constant 0 : index
    %c0_24 = arith.constant 0 : index
    %c0_25 = arith.constant 0 : index
    %12 = vector.load %arg35[%c0_23, %c0_24, %c0_25] : memref<2x33x1152xf32, #tpu.memory_space<vmem>>, vector<1x32x1152xf32>
    %13 = vector.shape_cast %12 : vector<1x32x1152xf32> to vector<32x1152xf32>
    %14 = arith.truncf %13 : vector<32x1152xf32> to vector<32x1152xbf16>
    %c0_26 = arith.constant 0 : index
    %c1_27 = arith.constant 1 : index
    %c0_28 = arith.constant 0 : index
    %15 = vector.load %arg35[%c0_26, %c1_27, %c0_28] : memref<2x33x1152xf32, #tpu.memory_space<vmem>>, vector<1x32x1152xf32>
    %16 = vector.shape_cast %15 : vector<1x32x1152xf32> to vector<32x1152xf32>
    %17 = arith.truncf %16 : vector<32x1152xf32> to vector<32x1152xbf16>
    %c0_29 = arith.constant 0 : index
    %c0_30 = arith.constant 0 : index
    %18 = vector.load %arg3[%c0_29, %c0_30] : memref<1152x256xbf16, #tpu.memory_space<vmem>>, vector<1152x256xbf16>
    %cst_31 = arith.constant dense<0.000000e+00> : vector<32x256xf32>
    %19 = tpu.matmul %17, %18, %cst_31 {dimension_numbers = #tpu.dot_dimension_numbers<[1], [0], [0], [1], [0, 0, 1, 1], [], []>} : vector<32x1152xbf16>, vector<1152x256xbf16>, vector<32x256xf32> -> vector<32x256xf32>
    %c0_32 = arith.constant 0 : index
    %c0_33 = arith.constant 0 : index
    %20 = vector.load %arg2[%c0_32, %c0_33] : memref<1152x256xbf16, #tpu.memory_space<vmem>>, vector<1152x256xbf16>
    %cst_34 = arith.constant dense<0.000000e+00> : vector<32x256xf32>
    %21 = tpu.matmul %14, %20, %cst_34 {dimension_numbers = #tpu.dot_dimension_numbers<[1], [0], [0], [1], [0, 0, 1, 1], [], []>} : vector<32x1152xbf16>, vector<1152x256xbf16>, vector<32x256xf32> -> vector<32x256xf32>
    %22 = arith.addf %19, %21 : vector<32x256xf32>
    %23 = vector.shape_cast %22 : vector<32x256xf32> to vector<1x32x256xf32>
    %cst_35 = arith.constant dense<0.000000e+00> : vector<1xf32>
    %24 = vector.multi_reduction <add>, %23, %cst_35 [1, 2] : vector<1x32x256xf32> to vector<1xf32>
    %25 = vector.shape_cast %24 : vector<1xf32> to vector<1x1x1xf32>
    %26 = vector.extract %25[0, 0, 0] : f32 from vector<1x1x1xf32>
    %cst_36 = arith.constant 8.192000e+03 : f32
    %27 = arith.divf %26, %cst_36 : f32
    %28 = vector.broadcast %27 : f32 to vector<32x256xf32>
    %29 = arith.subf %22, %28 : vector<32x256xf32>
    %30 = arith.mulf %29, %29 : vector<32x256xf32>
    %31 = vector.shape_cast %30 : vector<32x256xf32> to vector<1x32x256xf32>
    %cst_37 = arith.constant dense<0.000000e+00> : vector<1xf32>
    %32 = vector.multi_reduction <add>, %31, %cst_37 [1, 2] : vector<1x32x256xf32> to vector<1xf32>
    %33 = vector.shape_cast %32 : vector<1xf32> to vector<1x1x1xf32>
    %34 = vector.extract %33[0, 0, 0] : f32 from vector<1x1x1xf32>
    %cst_38 = arith.constant 8.192000e+03 : f32
    %35 = arith.divf %34, %cst_38 : f32
    %36 = vector.broadcast %27 : f32 to vector<32x256xf32>
    %37 = arith.subf %22, %36 : vector<32x256xf32>
    %cst_39 = arith.constant 9.99999974E-6 : f32
    %38 = arith.addf %35, %cst_39 : f32
    %39 = math.rsqrt %38 : f32
    %40 = vector.broadcast %39 : f32 to vector<32x256xf32>
    %41 = arith.mulf %37, %40 : vector<32x256xf32>
    %c0_40 = arith.constant 0 : index
    %c0_41 = arith.constant 0 : index
    %42 = vector.load %arg4[%c0_40, %c0_41] : memref<1x256xf32, #tpu.memory_space<vmem>>, vector<1x256xf32>
    %43 = vector.broadcast %42 : vector<1x256xf32> to vector<32x256xf32>
    %44 = arith.mulf %41, %43 : vector<32x256xf32>
    %c0_42 = arith.constant 0 : index
    %c0_43 = arith.constant 0 : index
    %45 = vector.load %arg5[%c0_42, %c0_43] : memref<1x256xf32, #tpu.memory_space<vmem>>, vector<1x256xf32>
    %46 = vector.broadcast %45 : vector<1x256xf32> to vector<32x256xf32>
    %47 = arith.addf %44, %46 : vector<32x256xf32>
    %cst_44 = arith.constant 0.000000e+00 : f32
    %48 = vector.broadcast %cst_44 : f32 to vector<32x256xf32>
    %49 = arith.maximumf %47, %48 : vector<32x256xf32>
    %50 = arith.truncf %49 : vector<32x256xf32> to vector<32x256xbf16>
    %c0_45 = arith.constant 0 : index
    %c0_46 = arith.constant 0 : index
    %c0_47 = arith.constant 0 : index
    %51 = vector.load %arg22[%c0_45, %c0_46, %c0_47] : memref<2x16x32xbf16, #tpu.memory_space<vmem>>, vector<1x16x32xbf16>
    %52 = vector.shape_cast %51 : vector<1x16x32xbf16> to vector<16x32xbf16>
    %cst_48 = arith.constant dense<0.000000e+00> : vector<16x256xf32>
    %53 = tpu.matmul %52, %50, %cst_48 {dimension_numbers = #tpu.dot_dimension_numbers<[1], [0], [0], [1], [0, 0, 1, 1], [], []>} : vector<16x32xbf16>, vector<32x256xbf16>, vector<16x256xf32> -> vector<16x256xf32>
    %c1_49 = arith.constant 1 : index
    %c0_50 = arith.constant 0 : index
    %c0_51 = arith.constant 0 : index
    %54 = vector.load %arg22[%c1_49, %c0_50, %c0_51] : memref<2x16x32xbf16, #tpu.memory_space<vmem>>, vector<1x16x32xbf16>
    %55 = vector.shape_cast %54 : vector<1x16x32xbf16> to vector<16x32xbf16>
    %cst_52 = arith.constant dense<0.000000e+00> : vector<16x256xf32>
    %56 = tpu.matmul %55, %50, %cst_52 {dimension_numbers = #tpu.dot_dimension_numbers<[1], [0], [0], [1], [0, 0, 1, 1], [], []>} : vector<16x32xbf16>, vector<32x256xbf16>, vector<16x256xf32> -> vector<16x256xf32>
    %c0_53 = arith.constant 0 : index
    %c1_54 = arith.constant 1 : index
    %c0_55 = arith.constant 0 : index
    %57 = vector.load %arg36[%c0_53, %c1_54, %c0_55] : memref<2x17x512xf32, #tpu.memory_space<vmem>>, vector<1x16x256xf32>
    %58 = vector.shape_cast %57 : vector<1x16x256xf32> to vector<16x256xf32>
    %59 = vector.shape_cast %53 : vector<16x256xf32> to vector<1x16x256xf32>
    tpu.vector_store %arg36[%c0_53, %c1_54, %c0_55], %59 {strides = array<i32>} : memref<2x17x512xf32, #tpu.memory_space<vmem>>, vector<1x16x256xf32>,
    %c0_56 = arith.constant 0 : index
    %c1_57 = arith.constant 1 : index
    %c256 = arith.constant 256 : index
    %60 = vector.load %arg36[%c0_56, %c1_57, %c256] : memref<2x17x512xf32, #tpu.memory_space<vmem>>, vector<1x16x256xf32>
    %61 = vector.shape_cast %60 : vector<1x16x256xf32> to vector<16x256xf32>
    %62 = vector.shape_cast %56 : vector<16x256xf32> to vector<1x16x256xf32>
    tpu.vector_store %arg36[%c0_56, %c1_57, %c256], %62 {strides = array<i32>} : memref<2x17x512xf32, #tpu.memory_space<vmem>>, vector<1x16x256xf32>,
    %c1_58 = arith.constant 1 : index
    %c0_59 = arith.constant 0 : index
    %c0_60 = arith.constant 0 : index
    %63 = vector.load %arg35[%c1_58, %c0_59, %c0_60] : memref<2x33x1152xf32, #tpu.memory_space<vmem>>, vector<1x32x1152xf32>
    %64 = vector.shape_cast %63 : vector<1x32x1152xf32> to vector<32x1152xf32>
    %65 = arith.truncf %64 : vector<32x1152xf32> to vector<32x1152xbf16>
    %c1_61 = arith.constant 1 : index
    %c1_62 = arith.constant 1 : index
    %c0_63 = arith.constant 0 : index
    %66 = vector.load %arg35[%c1_61, %c1_62, %c0_63] : memref<2x33x1152xf32, #tpu.memory_space<vmem>>, vector<1x32x1152xf32>
    %67 = vector.shape_cast %66 : vector<1x32x1152xf32> to vector<32x1152xf32>
    %68 = arith.truncf %67 : vector<32x1152xf32> to vector<32x1152xbf16>
    %c0_64 = arith.constant 0 : index
    %c0_65 = arith.constant 0 : index
    %69 = vector.load %arg3[%c0_64, %c0_65] : memref<1152x256xbf16, #tpu.memory_space<vmem>>, vector<1152x256xbf16>
    %cst_66 = arith.constant dense<0.000000e+00> : vector<32x256xf32>
    %70 = tpu.matmul %68, %69, %cst_66 {dimension_numbers = #tpu.dot_dimension_numbers<[1], [0], [0], [1], [0, 0, 1, 1], [], []>} : vector<32x1152xbf16>, vector<1152x256xbf16>, vector<32x256xf32> -> vector<32x256xf32>
    %c0_67 = arith.constant 0 : index
    %c0_68 = arith.constant 0 : index
    %71 = vector.load %arg2[%c0_67, %c0_68] : memref<1152x256xbf16, #tpu.memory_space<vmem>>, vector<1152x256xbf16>
    %cst_69 = arith.constant dense<0.000000e+00> : vector<32x256xf32>
    %72 = tpu.matmul %65, %71, %cst_69 {dimension_numbers = #tpu.dot_dimension_numbers<[1], [0], [0], [1], [0, 0, 1, 1], [], []>} : vector<32x1152xbf16>, vector<1152x256xbf16>, vector<32x256xf32> -> vector<32x256xf32>
    %73 = arith.addf %70, %72 : vector<32x256xf32>
    %74 = vector.shape_cast %73 : vector<32x256xf32> to vector<1x32x256xf32>
    %cst_70 = arith.constant dense<0.000000e+00> : vector<1xf32>
    %75 = vector.multi_reduction <add>, %74, %cst_70 [1, 2] : vector<1x32x256xf32> to vector<1xf32>
    %76 = vector.shape_cast %75 : vector<1xf32> to vector<1x1x1xf32>
    %77 = vector.extract %76[0, 0, 0] : f32 from vector<1x1x1xf32>
    %cst_71 = arith.constant 8.192000e+03 : f32
    %78 = arith.divf %77, %cst_71 : f32
    %79 = vector.broadcast %78 : f32 to vector<32x256xf32>
    %80 = arith.subf %73, %79 : vector<32x256xf32>
    %81 = arith.mulf %80, %80 : vector<32x256xf32>
    %82 = vector.shape_cast %81 : vector<32x256xf32> to vector<1x32x256xf32>
    %cst_72 = arith.constant dense<0.000000e+00> : vector<1xf32>
    %83 = vector.multi_reduction <add>, %82, %cst_72 [1, 2] : vector<1x32x256xf32> to vector<1xf32>
    %84 = vector.shape_cast %83 : vector<1xf32> to vector<1x1x1xf32>
    %85 = vector.extract %84[0, 0, 0] : f32 from vector<1x1x1xf32>
    %cst_73 = arith.constant 8.192000e+03 : f32
    %86 = arith.divf %85, %cst_73 : f32
    %87 = vector.broadcast %78 : f32 to vector<32x256xf32>
    %88 = arith.subf %73, %87 : vector<32x256xf32>
    %cst_74 = arith.constant 9.99999974E-6 : f32
    %89 = arith.addf %86, %cst_74 : f32
    %90 = math.rsqrt %89 : f32
    %91 = vector.broadcast %90 : f32 to vector<32x256xf32>
    %92 = arith.mulf %88, %91 : vector<32x256xf32>
    %c0_75 = arith.constant 0 : index
    %c0_76 = arith.constant 0 : index
    %93 = vector.load %arg4[%c0_75, %c0_76] : memref<1x256xf32, #tpu.memory_space<vmem>>, vector<1x256xf32>
    %94 = vector.broadcast %93 : vector<1x256xf32> to vector<32x256xf32>
    %95 = arith.mulf %92, %94 : vector<32x256xf32>
    %c0_77 = arith.constant 0 : index
    %c0_78 = arith.constant 0 : index
    %96 = vector.load %arg5[%c0_77, %c0_78] : memref<1x256xf32, #tpu.memory_space<vmem>>, vector<1x256xf32>
    %97 = vector.broadcast %96 : vector<1x256xf32> to vector<32x256xf32>
    %98 = arith.addf %95, %97 : vector<32x256xf32>
    %cst_79 = arith.constant 0.000000e+00 : f32
    %99 = vector.broadcast %cst_79 : f32 to vector<32x256xf32>
    %100 = arith.maximumf %98, %99 : vector<32x256xf32>
    %101 = arith.truncf %100 : vector<32x256xf32> to vector<32x256xbf16>
    %c0_80 = arith.constant 0 : index
    %c0_81 = arith.constant 0 : index
    %c0_82 = arith.constant 0 : index
    %102 = vector.load %arg22[%c0_80, %c0_81, %c0_82] : memref<2x16x32xbf16, #tpu.memory_space<vmem>>, vector<1x16x32xbf16>
    %103 = vector.shape_cast %102 : vector<1x16x32xbf16> to vector<16x32xbf16>
    %cst_83 = arith.constant dense<0.000000e+00> : vector<16x256xf32>
    %104 = tpu.matmul %103, %101, %cst_83 {dimension_numbers = #tpu.dot_dimension_numbers<[1], [0], [0], [1], [0, 0, 1, 1], [], []>} : vector<16x32xbf16>, vector<32x256xbf16>, vector<16x256xf32> -> vector<16x256xf32>
    %c1_84 = arith.constant 1 : index
    %c0_85 = arith.constant 0 : index
    %c0_86 = arith.constant 0 : index
    %105 = vector.load %arg22[%c1_84, %c0_85, %c0_86] : memref<2x16x32xbf16, #tpu.memory_space<vmem>>, vector<1x16x32xbf16>
    %106 = vector.shape_cast %105 : vector<1x16x32xbf16> to vector<16x32xbf16>
    %cst_87 = arith.constant dense<0.000000e+00> : vector<16x256xf32>
    %107 = tpu.matmul %106, %101, %cst_87 {dimension_numbers = #tpu.dot_dimension_numbers<[1], [0], [0], [1], [0, 0, 1, 1], [], []>} : vector<16x32xbf16>, vector<32x256xbf16>, vector<16x256xf32> -> vector<16x256xf32>
    %c1_88 = arith.constant 1 : index
    %c1_89 = arith.constant 1 : index
    %c0_90 = arith.constant 0 : index
    %108 = vector.load %arg36[%c1_88, %c1_89, %c0_90] : memref<2x17x512xf32, #tpu.memory_space<vmem>>, vector<1x16x256xf32>
    %109 = vector.shape_cast %108 : vector<1x16x256xf32> to vector<16x256xf32>
    %110 = vector.shape_cast %104 : vector<16x256xf32> to vector<1x16x256xf32>
    tpu.vector_store %arg36[%c1_88, %c1_89, %c0_90], %110 {strides = array<i32>} : memref<2x17x512xf32, #tpu.memory_space<vmem>>, vector<1x16x256xf32>,
    %c1_91 = arith.constant 1 : index
    %c1_92 = arith.constant 1 : index
    %c256_93 = arith.constant 256 : index
    %111 = vector.load %arg36[%c1_91, %c1_92, %c256_93] : memref<2x17x512xf32, #tpu.memory_space<vmem>>, vector<1x16x256xf32>
    %112 = vector.shape_cast %111 : vector<1x16x256xf32> to vector<16x256xf32>
    %113 = vector.shape_cast %107 : vector<16x256xf32> to vector<1x16x256xf32>
    tpu.vector_store %arg36[%c1_91, %c1_92, %c256_93], %113 {strides = array<i32>} : memref<2x17x512xf32, #tpu.memory_space<vmem>>, vector<1x16x256xf32>,
    %c0_94 = arith.constant 0 : index
    %c0_95 = arith.constant 0 : index
    %c0_96 = arith.constant 0 : index
    %114 = vector.load %arg36[%c0_94, %c0_95, %c0_96] : memref<2x17x512xf32, #tpu.memory_space<vmem>>, vector<1x16x512xf32>
    %115 = vector.shape_cast %114 : vector<1x16x512xf32> to vector<16x512xf32>
    %116 = arith.truncf %115 : vector<16x512xf32> to vector<16x512xbf16>
    %c0_97 = arith.constant 0 : index
    %c1_98 = arith.constant 1 : index
    %c0_99 = arith.constant 0 : index
    %117 = vector.load %arg36[%c0_97, %c1_98, %c0_99] : memref<2x17x512xf32, #tpu.memory_space<vmem>>, vector<1x16x512xf32>
    %118 = vector.shape_cast %117 : vector<1x16x512xf32> to vector<16x512xf32>
    %119 = arith.truncf %118 : vector<16x512xf32> to vector<16x512xbf16>
    %c0_100 = arith.constant 0 : index
    %c0_101 = arith.constant 0 : index
    %120 = vector.load %arg7[%c0_100, %c0_101] : memref<512x128xbf16, #tpu.memory_space<vmem>>, vector<512x128xbf16>
    %cst_102 = arith.constant dense<0.000000e+00> : vector<16x128xf32>
    %121 = tpu.matmul %119, %120, %cst_102 {dimension_numbers = #tpu.dot_dimension_numbers<[1], [0], [0], [1], [0, 0, 1, 1], [], []>} : vector<16x512xbf16>, vector<512x128xbf16>, vector<16x128xf32> -> vector<16x128xf32>
    %c0_103 = arith.constant 0 : index
    %c0_104 = arith.constant 0 : index
    %122 = vector.load %arg6[%c0_103, %c0_104] : memref<512x128xbf16, #tpu.memory_space<vmem>>, vector<512x128xbf16>
    %cst_105 = arith.constant dense<0.000000e+00> : vector<16x128xf32>
    %123 = tpu.matmul %116, %122, %cst_105 {dimension_numbers = #tpu.dot_dimension_numbers<[1], [0], [0], [1], [0, 0, 1, 1], [], []>} : vector<16x512xbf16>, vector<512x128xbf16>, vector<16x128xf32> -> vector<16x128xf32>
    %124 = arith.addf %121, %123 : vector<16x128xf32>
    %125 = vector.shape_cast %124 : vector<16x128xf32> to vector<1x16x128xf32>
    %cst_106 = arith.constant dense<0.000000e+00> : vector<1xf32>
    %126 = vector.multi_reduction <add>, %125, %cst_106 [1, 2] : vector<1x16x128xf32> to vector<1xf32>
    %127 = vector.shape_cast %126 : vector<1xf32> to vector<1x1x1xf32>
    %128 = vector.extract %127[0, 0, 0] : f32 from vector<1x1x1xf32>
    %cst_107 = arith.constant 2.048000e+03 : f32
    %129 = arith.divf %128, %cst_107 : f32
    %130 = vector.broadcast %129 : f32 to vector<16x128xf32>
    %131 = arith.subf %124, %130 : vector<16x128xf32>
    %132 = arith.mulf %131, %131 : vector<16x128xf32>
    %133 = vector.shape_cast %132 : vector<16x128xf32> to vector<1x16x128xf32>
    %cst_108 = arith.constant dense<0.000000e+00> : vector<1xf32>
    %134 = vector.multi_reduction <add>, %133, %cst_108 [1, 2] : vector<1x16x128xf32> to vector<1xf32>
    %135 = vector.shape_cast %134 : vector<1xf32> to vector<1x1x1xf32>
    %136 = vector.extract %135[0, 0, 0] : f32 from vector<1x1x1xf32>
    %cst_109 = arith.constant 2.048000e+03 : f32
    %137 = arith.divf %136, %cst_109 : f32
    %138 = vector.broadcast %129 : f32 to vector<16x128xf32>
    %139 = arith.subf %124, %138 : vector<16x128xf32>
    %cst_110 = arith.constant 9.99999974E-6 : f32
    %140 = arith.addf %137, %cst_110 : f32
    %141 = math.rsqrt %140 : f32
    %142 = vector.broadcast %141 : f32 to vector<16x128xf32>
    %143 = arith.mulf %139, %142 : vector<16x128xf32>
    %c0_111 = arith.constant 0 : index
    %c0_112 = arith.constant 0 : index
    %144 = vector.load %arg8[%c0_111, %c0_112] : memref<1x128xf32, #tpu.memory_space<vmem>>, vector<1x128xf32>
    %145 = vector.broadcast %144 : vector<1x128xf32> to vector<16x128xf32>
    %146 = arith.mulf %143, %145 : vector<16x128xf32>
    %c0_113 = arith.constant 0 : index
    %c0_114 = arith.constant 0 : index
    %147 = vector.load %arg9[%c0_113, %c0_114] : memref<1x128xf32, #tpu.memory_space<vmem>>, vector<1x128xf32>
    %148 = vector.broadcast %147 : vector<1x128xf32> to vector<16x128xf32>
    %149 = arith.addf %146, %148 : vector<16x128xf32>
    %cst_115 = arith.constant 0.000000e+00 : f32
    %150 = vector.broadcast %cst_115 : f32 to vector<16x128xf32>
    %151 = arith.maximumf %149, %150 : vector<16x128xf32>
    %152 = arith.truncf %151 : vector<16x128xf32> to vector<16x128xbf16>
    %c0_116 = arith.constant 0 : index
    %c0_117 = arith.constant 0 : index
    %c0_118 = arith.constant 0 : index
    %153 = vector.load %arg23[%c0_116, %c0_117, %c0_118] : memref<2x8x16xbf16, #tpu.memory_space<vmem>>, vector<1x8x16xbf16>
    %154 = vector.shape_cast %153 : vector<1x8x16xbf16> to vector<8x16xbf16>
    %cst_119 = arith.constant dense<0.000000e+00> : vector<8x128xf32>
    %155 = tpu.matmul %154, %152, %cst_119 {dimension_numbers = #tpu.dot_dimension_numbers<[1], [0], [0], [1], [0, 0, 1, 1], [], []>} : vector<8x16xbf16>, vector<16x128xbf16>, vector<8x128xf32> -> vector<8x128xf32>
    %c1_120 = arith.constant 1 : index
    %c0_121 = arith.constant 0 : index
    %c0_122 = arith.constant 0 : index
    %156 = vector.load %arg23[%c1_120, %c0_121, %c0_122] : memref<2x8x16xbf16, #tpu.memory_space<vmem>>, vector<1x8x16xbf16>
    %157 = vector.shape_cast %156 : vector<1x8x16xbf16> to vector<8x16xbf16>
    %cst_123 = arith.constant dense<0.000000e+00> : vector<8x128xf32>
    %158 = tpu.matmul %157, %152, %cst_123 {dimension_numbers = #tpu.dot_dimension_numbers<[1], [0], [0], [1], [0, 0, 1, 1], [], []>} : vector<8x16xbf16>, vector<16x128xbf16>, vector<8x128xf32> -> vector<8x128xf32>
    %c0_124 = arith.constant 0 : index
    %c1_125 = arith.constant 1 : index
    %c0_126 = arith.constant 0 : index
    %159 = vector.load %arg37[%c0_124, %c1_125, %c0_126] : memref<2x9x256xf32, #tpu.memory_space<vmem>>, vector<1x8x128xf32>
    %160 = vector.shape_cast %159 : vector<1x8x128xf32> to vector<8x128xf32>
    %161 = vector.shape_cast %155 : vector<8x128xf32> to vector<1x8x128xf32>
    tpu.vector_store %arg37[%c0_124, %c1_125, %c0_126], %161 {strides = array<i32>} : memref<2x9x256xf32, #tpu.memory_space<vmem>>, vector<1x8x128xf32>,
    %c0_127 = arith.constant 0 : index
    %c1_128 = arith.constant 1 : index
    %c128 = arith.constant 128 : index
    %162 = vector.load %arg37[%c0_127, %c1_128, %c128] : memref<2x9x256xf32, #tpu.memory_space<vmem>>, vector<1x8x128xf32>
    %163 = vector.shape_cast %162 : vector<1x8x128xf32> to vector<8x128xf32>
    %164 = vector.shape_cast %158 : vector<8x128xf32> to vector<1x8x128xf32>
    tpu.vector_store %arg37[%c0_127, %c1_128, %c128], %164 {strides = array<i32>} : memref<2x9x256xf32, #tpu.memory_space<vmem>>, vector<1x8x128xf32>,
    %c1_129 = arith.constant 1 : index
    %c0_130 = arith.constant 0 : index
    %c0_131 = arith.constant 0 : index
    %165 = vector.load %arg36[%c1_129, %c0_130, %c0_131] : memref<2x17x512xf32, #tpu.memory_space<vmem>>, vector<1x16x512xf32>
    %166 = vector.shape_cast %165 : vector<1x16x512xf32> to vector<16x512xf32>
    %167 = arith.truncf %166 : vector<16x512xf32> to vector<16x512xbf16>
    %c1_132 = arith.constant 1 : index
    %c1_133 = arith.constant 1 : index
    %c0_134 = arith.constant 0 : index
    %168 = vector.load %arg36[%c1_132, %c1_133, %c0_134] : memref<2x17x512xf32, #tpu.memory_space<vmem>>, vector<1x16x512xf32>
    %169 = vector.shape_cast %168 : vector<1x16x512xf32> to vector<16x512xf32>
    %170 = arith.truncf %169 : vector<16x512xf32> to vector<16x512xbf16>
    %c0_135 = arith.constant 0 : index
    %c0_136 = arith.constant 0 : index
    %171 = vector.load %arg7[%c0_135, %c0_136] : memref<512x128xbf16, #tpu.memory_space<vmem>>, vector<512x128xbf16>
    %cst_137 = arith.constant dense<0.000000e+00> : vector<16x128xf32>
    %172 = tpu.matmul %170, %171, %cst_137 {dimension_numbers = #tpu.dot_dimension_numbers<[1], [0], [0], [1], [0, 0, 1, 1], [], []>} : vector<16x512xbf16>, vector<512x128xbf16>, vector<16x128xf32> -> vector<16x128xf32>
    %c0_138 = arith.constant 0 : index
    %c0_139 = arith.constant 0 : index
    %173 = vector.load %arg6[%c0_138, %c0_139] : memref<512x128xbf16, #tpu.memory_space<vmem>>, vector<512x128xbf16>
    %cst_140 = arith.constant dense<0.000000e+00> : vector<16x128xf32>
    %174 = tpu.matmul %167, %173, %cst_140 {dimension_numbers = #tpu.dot_dimension_numbers<[1], [0], [0], [1], [0, 0, 1, 1], [], []>} : vector<16x512xbf16>, vector<512x128xbf16>, vector<16x128xf32> -> vector<16x128xf32>
    %175 = arith.addf %172, %174 : vector<16x128xf32>
    %176 = vector.shape_cast %175 : vector<16x128xf32> to vector<1x16x128xf32>
    %cst_141 = arith.constant dense<0.000000e+00> : vector<1xf32>
    %177 = vector.multi_reduction <add>, %176, %cst_141 [1, 2] : vector<1x16x128xf32> to vector<1xf32>
    %178 = vector.shape_cast %177 : vector<1xf32> to vector<1x1x1xf32>
    %179 = vector.extract %178[0, 0, 0] : f32 from vector<1x1x1xf32>
    %cst_142 = arith.constant 2.048000e+03 : f32
    %180 = arith.divf %179, %cst_142 : f32
    %181 = vector.broadcast %180 : f32 to vector<16x128xf32>
    %182 = arith.subf %175, %181 : vector<16x128xf32>
    %183 = arith.mulf %182, %182 : vector<16x128xf32>
    %184 = vector.shape_cast %183 : vector<16x128xf32> to vector<1x16x128xf32>
    %cst_143 = arith.constant dense<0.000000e+00> : vector<1xf32>
    %185 = vector.multi_reduction <add>, %184, %cst_143 [1, 2] : vector<1x16x128xf32> to vector<1xf32>
    %186 = vector.shape_cast %185 : vector<1xf32> to vector<1x1x1xf32>
    %187 = vector.extract %186[0, 0, 0] : f32 from vector<1x1x1xf32>
    %cst_144 = arith.constant 2.048000e+03 : f32
    %188 = arith.divf %187, %cst_144 : f32
    %189 = vector.broadcast %180 : f32 to vector<16x128xf32>
    %190 = arith.subf %175, %189 : vector<16x128xf32>
    %cst_145 = arith.constant 9.99999974E-6 : f32
    %191 = arith.addf %188, %cst_145 : f32
    %192 = math.rsqrt %191 : f32
    %193 = vector.broadcast %192 : f32 to vector<16x128xf32>
    %194 = arith.mulf %190, %193 : vector<16x128xf32>
    %c0_146 = arith.constant 0 : index
    %c0_147 = arith.constant 0 : index
    %195 = vector.load %arg8[%c0_146, %c0_147] : memref<1x128xf32, #tpu.memory_space<vmem>>, vector<1x128xf32>
    %196 = vector.broadcast %195 : vector<1x128xf32> to vector<16x128xf32>
    %197 = arith.mulf %194, %196 : vector<16x128xf32>
    %c0_148 = arith.constant 0 : index
    %c0_149 = arith.constant 0 : index
    %198 = vector.load %arg9[%c0_148, %c0_149] : memref<1x128xf32, #tpu.memory_space<vmem>>, vector<1x128xf32>
    %199 = vector.broadcast %198 : vector<1x128xf32> to vector<16x128xf32>
    %200 = arith.addf %197, %199 : vector<16x128xf32>
    %cst_150 = arith.constant 0.000000e+00 : f32
    %201 = vector.broadcast %cst_150 : f32 to vector<16x128xf32>
    %202 = arith.maximumf %200, %201 : vector<16x128xf32>
    %203 = arith.truncf %202 : vector<16x128xf32> to vector<16x128xbf16>
    %c0_151 = arith.constant 0 : index
    %c0_152 = arith.constant 0 : index
    %c0_153 = arith.constant 0 : index
    %204 = vector.load %arg23[%c0_151, %c0_152, %c0_153] : memref<2x8x16xbf16, #tpu.memory_space<vmem>>, vector<1x8x16xbf16>
    %205 = vector.shape_cast %204 : vector<1x8x16xbf16> to vector<8x16xbf16>
    %cst_154 = arith.constant dense<0.000000e+00> : vector<8x128xf32>
    %206 = tpu.matmul %205, %203, %cst_154 {dimension_numbers = #tpu.dot_dimension_numbers<[1], [0], [0], [1], [0, 0, 1, 1], [], []>} : vector<8x16xbf16>, vector<16x128xbf16>, vector<8x128xf32> -> vector<8x128xf32>
    %c1_155 = arith.constant 1 : index
    %c0_156 = arith.constant 0 : index
    %c0_157 = arith.constant 0 : index
    %207 = vector.load %arg23[%c1_155, %c0_156, %c0_157] : memref<2x8x16xbf16, #tpu.memory_space<vmem>>, vector<1x8x16xbf16>
    %208 = vector.shape_cast %207 : vector<1x8x16xbf16> to vector<8x16xbf16>
    %cst_158 = arith.constant dense<0.000000e+00> : vector<8x128xf32>
    %209 = tpu.matmul %208, %203, %cst_158 {dimension_numbers = #tpu.dot_dimension_numbers<[1], [0], [0], [1], [0, 0, 1, 1], [], []>} : vector<8x16xbf16>, vector<16x128xbf16>, vector<8x128xf32> -> vector<8x128xf32>
    %c1_159 = arith.constant 1 : index
    %c1_160 = arith.constant 1 : index
    %c0_161 = arith.constant 0 : index
    %210 = vector.load %arg37[%c1_159, %c1_160, %c0_161] : memref<2x9x256xf32, #tpu.memory_space<vmem>>, vector<1x8x128xf32>
    %211 = vector.shape_cast %210 : vector<1x8x128xf32> to vector<8x128xf32>
    %212 = vector.shape_cast %206 : vector<8x128xf32> to vector<1x8x128xf32>
    tpu.vector_store %arg37[%c1_159, %c1_160, %c0_161], %212 {strides = array<i32>} : memref<2x9x256xf32, #tpu.memory_space<vmem>>, vector<1x8x128xf32>,
    %c1_162 = arith.constant 1 : index
    %c1_163 = arith.constant 1 : index
    %c128_164 = arith.constant 128 : index
    %213 = vector.load %arg37[%c1_162, %c1_163, %c128_164] : memref<2x9x256xf32, #tpu.memory_space<vmem>>, vector<1x8x128xf32>
    %214 = vector.shape_cast %213 : vector<1x8x128xf32> to vector<8x128xf32>
    %215 = vector.shape_cast %209 : vector<8x128xf32> to vector<1x8x128xf32>
    tpu.vector_store %arg37[%c1_162, %c1_163, %c128_164], %215 {strides = array<i32>} : memref<2x9x256xf32, #tpu.memory_space<vmem>>, vector<1x8x128xf32>,
    %c0_165 = arith.constant 0 : index
    %c0_166 = arith.constant 0 : index
    %c0_167 = arith.constant 0 : index
    %216 = vector.load %arg37[%c0_165, %c0_166, %c0_167] : memref<2x9x256xf32, #tpu.memory_space<vmem>>, vector<1x8x256xf32>
    %217 = vector.shape_cast %216 : vector<1x8x256xf32> to vector<8x256xf32>
    %218 = arith.truncf %217 : vector<8x256xf32> to vector<8x256xbf16>
    %c0_168 = arith.constant 0 : index
    %c1_169 = arith.constant 1 : index
    %c0_170 = arith.constant 0 : index
    %219 = vector.load %arg37[%c0_168, %c1_169, %c0_170] : memref<2x9x256xf32, #tpu.memory_space<vmem>>, vector<1x8x256xf32>
    %220 = vector.shape_cast %219 : vector<1x8x256xf32> to vector<8x256xf32>
    %221 = arith.truncf %220 : vector<8x256xf32> to vector<8x256xbf16>
    %c0_171 = arith.constant 0 : index
    %c0_172 = arith.constant 0 : index
    %222 = vector.load %arg11[%c0_171, %c0_172] : memref<256x128xbf16, #tpu.memory_space<vmem>>, vector<256x128xbf16>
    %cst_173 = arith.constant dense<0.000000e+00> : vector<8x128xf32>
    %223 = tpu.matmul %221, %222, %cst_173 {dimension_numbers = #tpu.dot_dimension_numbers<[1], [0], [0], [1], [0, 0, 1, 1], [], []>} : vector<8x256xbf16>, vector<256x128xbf16>, vector<8x128xf32> -> vector<8x128xf32>
    %c0_174 = arith.constant 0 : index
    %c0_175 = arith.constant 0 : index
    %224 = vector.load %arg10[%c0_174, %c0_175] : memref<256x128xbf16, #tpu.memory_space<vmem>>, vector<256x128xbf16>
    %cst_176 = arith.constant dense<0.000000e+00> : vector<8x128xf32>
    %225 = tpu.matmul %218, %224, %cst_176 {dimension_numbers = #tpu.dot_dimension_numbers<[1], [0], [0], [1], [0, 0, 1, 1], [], []>} : vector<8x256xbf16>, vector<256x128xbf16>, vector<8x128xf32> -> vector<8x128xf32>
    %226 = arith.addf %223, %225 : vector<8x128xf32>
    %227 = vector.shape_cast %226 : vector<8x128xf32> to vector<1x8x128xf32>
    %cst_177 = arith.constant dense<0.000000e+00> : vector<1xf32>
    %228 = vector.multi_reduction <add>, %227, %cst_177 [1, 2] : vector<1x8x128xf32> to vector<1xf32>
    %229 = vector.shape_cast %228 : vector<1xf32> to vector<1x1x1xf32>
    %230 = vector.extract %229[0, 0, 0] : f32 from vector<1x1x1xf32>
    %cst_178 = arith.constant 1.024000e+03 : f32
    %231 = arith.divf %230, %cst_178 : f32
    %232 = vector.broadcast %231 : f32 to vector<8x128xf32>
    %233 = arith.subf %226, %232 : vector<8x128xf32>
    %234 = arith.mulf %233, %233 : vector<8x128xf32>
    %235 = vector.shape_cast %234 : vector<8x128xf32> to vector<1x8x128xf32>
    %cst_179 = arith.constant dense<0.000000e+00> : vector<1xf32>
    %236 = vector.multi_reduction <add>, %235, %cst_179 [1, 2] : vector<1x8x128xf32> to vector<1xf32>
    %237 = vector.shape_cast %236 : vector<1xf32> to vector<1x1x1xf32>
    %238 = vector.extract %237[0, 0, 0] : f32 from vector<1x1x1xf32>
    %cst_180 = arith.constant 1.024000e+03 : f32
    %239 = arith.divf %238, %cst_180 : f32
    %240 = vector.broadcast %231 : f32 to vector<8x128xf32>
    %241 = arith.subf %226, %240 : vector<8x128xf32>
    %cst_181 = arith.constant 9.99999974E-6 : f32
    %242 = arith.addf %239, %cst_181 : f32
    %243 = math.rsqrt %242 : f32
    %244 = vector.broadcast %243 : f32 to vector<8x128xf32>
    %245 = arith.mulf %241, %244 : vector<8x128xf32>
    %c0_182 = arith.constant 0 : index
    %c0_183 = arith.constant 0 : index
    %246 = vector.load %arg12[%c0_182, %c0_183] : memref<1x128xf32, #tpu.memory_space<vmem>>, vector<1x128xf32>
    %247 = vector.broadcast %246 : vector<1x128xf32> to vector<8x128xf32>
    %248 = arith.mulf %245, %247 : vector<8x128xf32>
    %c0_184 = arith.constant 0 : index
    %c0_185 = arith.constant 0 : index
    %249 = vector.load %arg13[%c0_184, %c0_185] : memref<1x128xf32, #tpu.memory_space<vmem>>, vector<1x128xf32>
    %250 = vector.broadcast %249 : vector<1x128xf32> to vector<8x128xf32>
    %251 = arith.addf %248, %250 : vector<8x128xf32>
    %cst_186 = arith.constant 0.000000e+00 : f32
    %252 = vector.broadcast %cst_186 : f32 to vector<8x128xf32>
    %253 = arith.maximumf %251, %252 : vector<8x128xf32>
    %254 = arith.truncf %253 : vector<8x128xf32> to vector<8x128xbf16>
    %c0_187 = arith.constant 0 : index
    %c0_188 = arith.constant 0 : index
    %c0_189 = arith.constant 0 : index
    %255 = vector.load %arg24[%c0_187, %c0_188, %c0_189] : memref<2x4x8xbf16, #tpu.memory_space<vmem>>, vector<1x4x8xbf16>
    %256 = vector.shape_cast %255 : vector<1x4x8xbf16> to vector<4x8xbf16>
    %cst_190 = arith.constant dense<0.000000e+00> : vector<4x128xf32>
    %257 = tpu.matmul %256, %254, %cst_190 {dimension_numbers = #tpu.dot_dimension_numbers<[1], [0], [0], [1], [0, 0, 1, 1], [], []>} : vector<4x8xbf16>, vector<8x128xbf16>, vector<4x128xf32> -> vector<4x128xf32>
    %c1_191 = arith.constant 1 : index
    %c0_192 = arith.constant 0 : index
    %c0_193 = arith.constant 0 : index
    %258 = vector.load %arg24[%c1_191, %c0_192, %c0_193] : memref<2x4x8xbf16, #tpu.memory_space<vmem>>, vector<1x4x8xbf16>
    %259 = vector.shape_cast %258 : vector<1x4x8xbf16> to vector<4x8xbf16>
    %cst_194 = arith.constant dense<0.000000e+00> : vector<4x128xf32>
    %260 = tpu.matmul %259, %254, %cst_194 {dimension_numbers = #tpu.dot_dimension_numbers<[1], [0], [0], [1], [0, 0, 1, 1], [], []>} : vector<4x8xbf16>, vector<8x128xbf16>, vector<4x128xf32> -> vector<4x128xf32>
    %c0_195 = arith.constant 0 : index
    %c1_196 = arith.constant 1 : index
    %c0_197 = arith.constant 0 : index
    %261 = vector.load %arg38[%c0_195, %c1_196, %c0_197] : memref<2x5x256xf32, #tpu.memory_space<vmem>>, vector<1x4x128xf32>
    %262 = vector.shape_cast %261 : vector<1x4x128xf32> to vector<4x128xf32>
    %263 = vector.shape_cast %257 : vector<4x128xf32> to vector<1x4x128xf32>
    tpu.vector_store %arg38[%c0_195, %c1_196, %c0_197], %263 {strides = array<i32>} : memref<2x5x256xf32, #tpu.memory_space<vmem>>, vector<1x4x128xf32>,
    %c0_198 = arith.constant 0 : index
    %c1_199 = arith.constant 1 : index
    %c128_200 = arith.constant 128 : index
    %264 = vector.load %arg38[%c0_198, %c1_199, %c128_200] : memref<2x5x256xf32, #tpu.memory_space<vmem>>, vector<1x4x128xf32>
    %265 = vector.shape_cast %264 : vector<1x4x128xf32> to vector<4x128xf32>
    %266 = vector.shape_cast %260 : vector<4x128xf32> to vector<1x4x128xf32>
    tpu.vector_store %arg38[%c0_198, %c1_199, %c128_200], %266 {strides = array<i32>} : memref<2x5x256xf32, #tpu.memory_space<vmem>>, vector<1x4x128xf32>,
    %c1_201 = arith.constant 1 : index
    %c0_202 = arith.constant 0 : index
    %c0_203 = arith.constant 0 : index
    %267 = vector.load %arg37[%c1_201, %c0_202, %c0_203] : memref<2x9x256xf32, #tpu.memory_space<vmem>>, vector<1x8x256xf32>
    %268 = vector.shape_cast %267 : vector<1x8x256xf32> to vector<8x256xf32>
    %269 = arith.truncf %268 : vector<8x256xf32> to vector<8x256xbf16>
    %c1_204 = arith.constant 1 : index
    %c1_205 = arith.constant 1 : index
    %c0_206 = arith.constant 0 : index
    %270 = vector.load %arg37[%c1_204, %c1_205, %c0_206] : memref<2x9x256xf32, #tpu.memory_space<vmem>>, vector<1x8x256xf32>
    %271 = vector.shape_cast %270 : vector<1x8x256xf32> to vector<8x256xf32>
    %272 = arith.truncf %271 : vector<8x256xf32> to vector<8x256xbf16>
    %c0_207 = arith.constant 0 : index
    %c0_208 = arith.constant 0 : index
    %273 = vector.load %arg11[%c0_207, %c0_208] : memref<256x128xbf16, #tpu.memory_space<vmem>>, vector<256x128xbf16>
    %cst_209 = arith.constant dense<0.000000e+00> : vector<8x128xf32>
    %274 = tpu.matmul %272, %273, %cst_209 {dimension_numbers = #tpu.dot_dimension_numbers<[1], [0], [0], [1], [0, 0, 1, 1], [], []>} : vector<8x256xbf16>, vector<256x128xbf16>, vector<8x128xf32> -> vector<8x128xf32>
    %c0_210 = arith.constant 0 : index
    %c0_211 = arith.constant 0 : index
    %275 = vector.load %arg10[%c0_210, %c0_211] : memref<256x128xbf16, #tpu.memory_space<vmem>>, vector<256x128xbf16>
    %cst_212 = arith.constant dense<0.000000e+00> : vector<8x128xf32>
    %276 = tpu.matmul %269, %275, %cst_212 {dimension_numbers = #tpu.dot_dimension_numbers<[1], [0], [0], [1], [0, 0, 1, 1], [], []>} : vector<8x256xbf16>, vector<256x128xbf16>, vector<8x128xf32> -> vector<8x128xf32>
    %277 = arith.addf %274, %276 : vector<8x128xf32>
    %278 = vector.shape_cast %277 : vector<8x128xf32> to vector<1x8x128xf32>
    %cst_213 = arith.constant dense<0.000000e+00> : vector<1xf32>
    %279 = vector.multi_reduction <add>, %278, %cst_213 [1, 2] : vector<1x8x128xf32> to vector<1xf32>
    %280 = vector.shape_cast %279 : vector<1xf32> to vector<1x1x1xf32>
    %281 = vector.extract %280[0, 0, 0] : f32 from vector<1x1x1xf32>
    %cst_214 = arith.constant 1.024000e+03 : f32
    %282 = arith.divf %281, %cst_214 : f32
    %283 = vector.broadcast %282 : f32 to vector<8x128xf32>
    %284 = arith.subf %277, %283 : vector<8x128xf32>
    %285 = arith.mulf %284, %284 : vector<8x128xf32>
    %286 = vector.shape_cast %285 : vector<8x128xf32> to vector<1x8x128xf32>
    %cst_215 = arith.constant dense<0.000000e+00> : vector<1xf32>
    %287 = vector.multi_reduction <add>, %286, %cst_215 [1, 2] : vector<1x8x128xf32> to vector<1xf32>
    %288 = vector.shape_cast %287 : vector<1xf32> to vector<1x1x1xf32>
    %289 = vector.extract %288[0, 0, 0] : f32 from vector<1x1x1xf32>
    %cst_216 = arith.constant 1.024000e+03 : f32
    %290 = arith.divf %289, %cst_216 : f32
    %291 = vector.broadcast %282 : f32 to vector<8x128xf32>
    %292 = arith.subf %277, %291 : vector<8x128xf32>
    %cst_217 = arith.constant 9.99999974E-6 : f32
    %293 = arith.addf %290, %cst_217 : f32
    %294 = math.rsqrt %293 : f32
    %295 = vector.broadcast %294 : f32 to vector<8x128xf32>
    %296 = arith.mulf %292, %295 : vector<8x128xf32>
    %c0_218 = arith.constant 0 : index
    %c0_219 = arith.constant 0 : index
    %297 = vector.load %arg12[%c0_218, %c0_219] : memref<1x128xf32, #tpu.memory_space<vmem>>, vector<1x128xf32>
    %298 = vector.broadcast %297 : vector<1x128xf32> to vector<8x128xf32>
    %299 = arith.mulf %296, %298 : vector<8x128xf32>
    %c0_220 = arith.constant 0 : index
    %c0_221 = arith.constant 0 : index
    %300 = vector.load %arg13[%c0_220, %c0_221] : memref<1x128xf32, #tpu.memory_space<vmem>>, vector<1x128xf32>
    %301 = vector.broadcast %300 : vector<1x128xf32> to vector<8x128xf32>
    %302 = arith.addf %299, %301 : vector<8x128xf32>
    %cst_222 = arith.constant 0.000000e+00 : f32
    %303 = vector.broadcast %cst_222 : f32 to vector<8x128xf32>
    %304 = arith.maximumf %302, %303 : vector<8x128xf32>
    %305 = arith.truncf %304 : vector<8x128xf32> to vector<8x128xbf16>
    %c0_223 = arith.constant 0 : index
    %c0_224 = arith.constant 0 : index
    %c0_225 = arith.constant 0 : index
    %306 = vector.load %arg24[%c0_223, %c0_224, %c0_225] : memref<2x4x8xbf16, #tpu.memory_space<vmem>>, vector<1x4x8xbf16>
    %307 = vector.shape_cast %306 : vector<1x4x8xbf16> to vector<4x8xbf16>
    %cst_226 = arith.constant dense<0.000000e+00> : vector<4x128xf32>
    %308 = tpu.matmul %307, %305, %cst_226 {dimension_numbers = #tpu.dot_dimension_numbers<[1], [0], [0], [1], [0, 0, 1, 1], [], []>} : vector<4x8xbf16>, vector<8x128xbf16>, vector<4x128xf32> -> vector<4x128xf32>
    %c1_227 = arith.constant 1 : index
    %c0_228 = arith.constant 0 : index
    %c0_229 = arith.constant 0 : index
    %309 = vector.load %arg24[%c1_227, %c0_228, %c0_229] : memref<2x4x8xbf16, #tpu.memory_space<vmem>>, vector<1x4x8xbf16>
    %310 = vector.shape_cast %309 : vector<1x4x8xbf16> to vector<4x8xbf16>
    %cst_230 = arith.constant dense<0.000000e+00> : vector<4x128xf32>
    %311 = tpu.matmul %310, %305, %cst_230 {dimension_numbers = #tpu.dot_dimension_numbers<[1], [0], [0], [1], [0, 0, 1, 1], [], []>} : vector<4x8xbf16>, vector<8x128xbf16>, vector<4x128xf32> -> vector<4x128xf32>
    %c1_231 = arith.constant 1 : index
    %c1_232 = arith.constant 1 : index
    %c0_233 = arith.constant 0 : index
    %312 = vector.load %arg38[%c1_231, %c1_232, %c0_233] : memref<2x5x256xf32, #tpu.memory_space<vmem>>, vector<1x4x128xf32>
    %313 = vector.shape_cast %312 : vector<1x4x128xf32> to vector<4x128xf32>
    %314 = vector.shape_cast %308 : vector<4x128xf32> to vector<1x4x128xf32>
    tpu.vector_store %arg38[%c1_231, %c1_232, %c0_233], %314 {strides = array<i32>} : memref<2x5x256xf32, #tpu.memory_space<vmem>>, vector<1x4x128xf32>,
    %c1_234 = arith.constant 1 : index
    %c1_235 = arith.constant 1 : index
    %c128_236 = arith.constant 128 : index
    %315 = vector.load %arg38[%c1_234, %c1_235, %c128_236] : memref<2x5x256xf32, #tpu.memory_space<vmem>>, vector<1x4x128xf32>
    %316 = vector.shape_cast %315 : vector<1x4x128xf32> to vector<4x128xf32>
    %317 = vector.shape_cast %311 : vector<4x128xf32> to vector<1x4x128xf32>
    tpu.vector_store %arg38[%c1_234, %c1_235, %c128_236], %317 {strides = array<i32>} : memref<2x5x256xf32, #tpu.memory_space<vmem>>, vector<1x4x128xf32>,
    %c0_237 = arith.constant 0 : index
    %c0_238 = arith.constant 0 : index
    %c0_239 = arith.constant 0 : index
    %318 = vector.load %arg38[%c0_237, %c0_238, %c0_239] : memref<2x5x256xf32, #tpu.memory_space<vmem>>, vector<1x4x256xf32>
    %319 = vector.shape_cast %318 : vector<1x4x256xf32> to vector<4x256xf32>
    %320 = arith.truncf %319 : vector<4x256xf32> to vector<4x256xbf16>
    %c0_240 = arith.constant 0 : index
    %c1_241 = arith.constant 1 : index
    %c0_242 = arith.constant 0 : index
    %321 = vector.load %arg38[%c0_240, %c1_241, %c0_242] : memref<2x5x256xf32, #tpu.memory_space<vmem>>, vector<1x4x256xf32>
    %322 = vector.shape_cast %321 : vector<1x4x256xf32> to vector<4x256xf32>
    %323 = arith.truncf %322 : vector<4x256xf32> to vector<4x256xbf16>
    %c0_243 = arith.constant 0 : index
    %c0_244 = arith.constant 0 : index
    %324 = vector.load %arg15[%c0_243, %c0_244] : memref<256x128xbf16, #tpu.memory_space<vmem>>, vector<256x128xbf16>
    %cst_245 = arith.constant dense<0.000000e+00> : vector<4x128xf32>
    %325 = tpu.matmul %323, %324, %cst_245 {dimension_numbers = #tpu.dot_dimension_numbers<[1], [0], [0], [1], [0, 0, 1, 1], [], []>} : vector<4x256xbf16>, vector<256x128xbf16>, vector<4x128xf32> -> vector<4x128xf32>
    %c0_246 = arith.constant 0 : index
    %c0_247 = arith.constant 0 : index
    %326 = vector.load %arg14[%c0_246, %c0_247] : memref<256x128xbf16, #tpu.memory_space<vmem>>, vector<256x128xbf16>
    %cst_248 = arith.constant dense<0.000000e+00> : vector<4x128xf32>
    %327 = tpu.matmul %320, %326, %cst_248 {dimension_numbers = #tpu.dot_dimension_numbers<[1], [0], [0], [1], [0, 0, 1, 1], [], []>} : vector<4x256xbf16>, vector<256x128xbf16>, vector<4x128xf32> -> vector<4x128xf32>
    %328 = arith.addf %325, %327 : vector<4x128xf32>
    %329 = vector.shape_cast %328 : vector<4x128xf32> to vector<1x4x128xf32>
    %cst_249 = arith.constant dense<0.000000e+00> : vector<1xf32>
    %330 = vector.multi_reduction <add>, %329, %cst_249 [1, 2] : vector<1x4x128xf32> to vector<1xf32>
    %331 = vector.shape_cast %330 : vector<1xf32> to vector<1x1x1xf32>
    %332 = vector.extract %331[0, 0, 0] : f32 from vector<1x1x1xf32>
    %cst_250 = arith.constant 5.120000e+02 : f32
    %333 = arith.divf %332, %cst_250 : f32
    %334 = vector.broadcast %333 : f32 to vector<4x128xf32>
    %335 = arith.subf %328, %334 : vector<4x128xf32>
    %336 = arith.mulf %335, %335 : vector<4x128xf32>
    %337 = vector.shape_cast %336 : vector<4x128xf32> to vector<1x4x128xf32>
    %cst_251 = arith.constant dense<0.000000e+00> : vector<1xf32>
    %338 = vector.multi_reduction <add>, %337, %cst_251 [1, 2] : vector<1x4x128xf32> to vector<1xf32>
    %339 = vector.shape_cast %338 : vector<1xf32> to vector<1x1x1xf32>
    %340 = vector.extract %339[0, 0, 0] : f32 from vector<1x1x1xf32>
    %cst_252 = arith.constant 5.120000e+02 : f32
    %341 = arith.divf %340, %cst_252 : f32
    %342 = vector.broadcast %333 : f32 to vector<4x128xf32>
    %343 = arith.subf %328, %342 : vector<4x128xf32>
    %cst_253 = arith.constant 9.99999974E-6 : f32
    %344 = arith.addf %341, %cst_253 : f32
    %345 = math.rsqrt %344 : f32
    %346 = vector.broadcast %345 : f32 to vector<4x128xf32>
    %347 = arith.mulf %343, %346 : vector<4x128xf32>
    %c0_254 = arith.constant 0 : index
    %c0_255 = arith.constant 0 : index
    %348 = vector.load %arg16[%c0_254, %c0_255] : memref<1x128xf32, #tpu.memory_space<vmem>>, vector<1x128xf32>
    %349 = vector.broadcast %348 : vector<1x128xf32> to vector<4x128xf32>
    %350 = arith.mulf %347, %349 : vector<4x128xf32>
    %c0_256 = arith.constant 0 : index
    %c0_257 = arith.constant 0 : index
    %351 = vector.load %arg17[%c0_256, %c0_257] : memref<1x128xf32, #tpu.memory_space<vmem>>, vector<1x128xf32>
    %352 = vector.broadcast %351 : vector<1x128xf32> to vector<4x128xf32>
    %353 = arith.addf %350, %352 : vector<4x128xf32>
    %cst_258 = arith.constant 0.000000e+00 : f32
    %354 = vector.broadcast %cst_258 : f32 to vector<4x128xf32>
    %355 = arith.maximumf %353, %354 : vector<4x128xf32>
    %356 = arith.truncf %355 : vector<4x128xf32> to vector<4x128xbf16>
    %c0_259 = arith.constant 0 : index
    %c0_260 = arith.constant 0 : index
    %c0_261 = arith.constant 0 : index
    %357 = vector.load %arg25[%c0_259, %c0_260, %c0_261] : memref<2x2x4xbf16, #tpu.memory_space<vmem>>, vector<1x2x4xbf16>
    %358 = vector.shape_cast %357 : vector<1x2x4xbf16> to vector<2x4xbf16>
    %cst_262 = arith.constant dense<0.000000e+00> : vector<2x128xf32>
    %359 = tpu.matmul %358, %356, %cst_262 {dimension_numbers = #tpu.dot_dimension_numbers<[1], [0], [0], [1], [0, 0, 1, 1], [], []>} : vector<2x4xbf16>, vector<4x128xbf16>, vector<2x128xf32> -> vector<2x128xf32>
    %c1_263 = arith.constant 1 : index
    %c0_264 = arith.constant 0 : index
    %c0_265 = arith.constant 0 : index
    %360 = vector.load %arg25[%c1_263, %c0_264, %c0_265] : memref<2x2x4xbf16, #tpu.memory_space<vmem>>, vector<1x2x4xbf16>
    %361 = vector.shape_cast %360 : vector<1x2x4xbf16> to vector<2x4xbf16>
    %cst_266 = arith.constant dense<0.000000e+00> : vector<2x128xf32>
    %362 = tpu.matmul %361, %356, %cst_266 {dimension_numbers = #tpu.dot_dimension_numbers<[1], [0], [0], [1], [0, 0, 1, 1], [], []>} : vector<2x4xbf16>, vector<4x128xbf16>, vector<2x128xf32> -> vector<2x128xf32>
    %c0_267 = arith.constant 0 : index
    %c1_268 = arith.constant 1 : index
    %c0_269 = arith.constant 0 : index
    %363 = vector.load %arg39[%c0_267, %c1_268, %c0_269] : memref<2x3x256xf32, #tpu.memory_space<vmem>>, vector<1x2x128xf32>
    %364 = vector.shape_cast %363 : vector<1x2x128xf32> to vector<2x128xf32>
    %365 = vector.shape_cast %359 : vector<2x128xf32> to vector<1x2x128xf32>
    tpu.vector_store %arg39[%c0_267, %c1_268, %c0_269], %365 {strides = array<i32>} : memref<2x3x256xf32, #tpu.memory_space<vmem>>, vector<1x2x128xf32>,
    %c0_270 = arith.constant 0 : index
    %c1_271 = arith.constant 1 : index
    %c128_272 = arith.constant 128 : index
    %366 = vector.load %arg39[%c0_270, %c1_271, %c128_272] : memref<2x3x256xf32, #tpu.memory_space<vmem>>, vector<1x2x128xf32>
    %367 = vector.shape_cast %366 : vector<1x2x128xf32> to vector<2x128xf32>
    %368 = vector.shape_cast %362 : vector<2x128xf32> to vector<1x2x128xf32>
    tpu.vector_store %arg39[%c0_270, %c1_271, %c128_272], %368 {strides = array<i32>} : memref<2x3x256xf32, #tpu.memory_space<vmem>>, vector<1x2x128xf32>,
    %c1_273 = arith.constant 1 : index
    %c0_274 = arith.constant 0 : index
    %c0_275 = arith.constant 0 : index
    %369 = vector.load %arg38[%c1_273, %c0_274, %c0_275] : memref<2x5x256xf32, #tpu.memory_space<vmem>>, vector<1x4x256xf32>
    %370 = vector.shape_cast %369 : vector<1x4x256xf32> to vector<4x256xf32>
    %371 = arith.truncf %370 : vector<4x256xf32> to vector<4x256xbf16>
    %c1_276 = arith.constant 1 : index
    %c1_277 = arith.constant 1 : index
    %c0_278 = arith.constant 0 : index
    %372 = vector.load %arg38[%c1_276, %c1_277, %c0_278] : memref<2x5x256xf32, #tpu.memory_space<vmem>>, vector<1x4x256xf32>
    %373 = vector.shape_cast %372 : vector<1x4x256xf32> to vector<4x256xf32>
    %374 = arith.truncf %373 : vector<4x256xf32> to vector<4x256xbf16>
    %c0_279 = arith.constant 0 : index
    %c0_280 = arith.constant 0 : index
    %375 = vector.load %arg15[%c0_279, %c0_280] : memref<256x128xbf16, #tpu.memory_space<vmem>>, vector<256x128xbf16>
    %cst_281 = arith.constant dense<0.000000e+00> : vector<4x128xf32>
    %376 = tpu.matmul %374, %375, %cst_281 {dimension_numbers = #tpu.dot_dimension_numbers<[1], [0], [0], [1], [0, 0, 1, 1], [], []>} : vector<4x256xbf16>, vector<256x128xbf16>, vector<4x128xf32> -> vector<4x128xf32>
    %c0_282 = arith.constant 0 : index
    %c0_283 = arith.constant 0 : index
    %377 = vector.load %arg14[%c0_282, %c0_283] : memref<256x128xbf16, #tpu.memory_space<vmem>>, vector<256x128xbf16>
    %cst_284 = arith.constant dense<0.000000e+00> : vector<4x128xf32>
    %378 = tpu.matmul %371, %377, %cst_284 {dimension_numbers = #tpu.dot_dimension_numbers<[1], [0], [0], [1], [0, 0, 1, 1], [], []>} : vector<4x256xbf16>, vector<256x128xbf16>, vector<4x128xf32> -> vector<4x128xf32>
    %379 = arith.addf %376, %378 : vector<4x128xf32>
    %380 = vector.shape_cast %379 : vector<4x128xf32> to vector<1x4x128xf32>
    %cst_285 = arith.constant dense<0.000000e+00> : vector<1xf32>
    %381 = vector.multi_reduction <add>, %380, %cst_285 [1, 2] : vector<1x4x128xf32> to vector<1xf32>
    %382 = vector.shape_cast %381 : vector<1xf32> to vector<1x1x1xf32>
    %383 = vector.extract %382[0, 0, 0] : f32 from vector<1x1x1xf32>
    %cst_286 = arith.constant 5.120000e+02 : f32
    %384 = arith.divf %383, %cst_286 : f32
    %385 = vector.broadcast %384 : f32 to vector<4x128xf32>
    %386 = arith.subf %379, %385 : vector<4x128xf32>
    %387 = arith.mulf %386, %386 : vector<4x128xf32>
    %388 = vector.shape_cast %387 : vector<4x128xf32> to vector<1x4x128xf32>
    %cst_287 = arith.constant dense<0.000000e+00> : vector<1xf32>
    %389 = vector.multi_reduction <add>, %388, %cst_287 [1, 2] : vector<1x4x128xf32> to vector<1xf32>
    %390 = vector.shape_cast %389 : vector<1xf32> to vector<1x1x1xf32>
    %391 = vector.extract %390[0, 0, 0] : f32 from vector<1x1x1xf32>
    %cst_288 = arith.constant 5.120000e+02 : f32
    %392 = arith.divf %391, %cst_288 : f32
    %393 = vector.broadcast %384 : f32 to vector<4x128xf32>
    %394 = arith.subf %379, %393 : vector<4x128xf32>
    %cst_289 = arith.constant 9.99999974E-6 : f32
    %395 = arith.addf %392, %cst_289 : f32
    %396 = math.rsqrt %395 : f32
    %397 = vector.broadcast %396 : f32 to vector<4x128xf32>
    %398 = arith.mulf %394, %397 : vector<4x128xf32>
    %c0_290 = arith.constant 0 : index
    %c0_291 = arith.constant 0 : index
    %399 = vector.load %arg16[%c0_290, %c0_291] : memref<1x128xf32, #tpu.memory_space<vmem>>, vector<1x128xf32>
    %400 = vector.broadcast %399 : vector<1x128xf32> to vector<4x128xf32>
    %401 = arith.mulf %398, %400 : vector<4x128xf32>
    %c0_292 = arith.constant 0 : index
    %c0_293 = arith.constant 0 : index
    %402 = vector.load %arg17[%c0_292, %c0_293] : memref<1x128xf32, #tpu.memory_space<vmem>>, vector<1x128xf32>
    %403 = vector.broadcast %402 : vector<1x128xf32> to vector<4x128xf32>
    %404 = arith.addf %401, %403 : vector<4x128xf32>
    %cst_294 = arith.constant 0.000000e+00 : f32
    %405 = vector.broadcast %cst_294 : f32 to vector<4x128xf32>
    %406 = arith.maximumf %404, %405 : vector<4x128xf32>
    %407 = arith.truncf %406 : vector<4x128xf32> to vector<4x128xbf16>
    %c0_295 = arith.constant 0 : index
    %c0_296 = arith.constant 0 : index
    %c0_297 = arith.constant 0 : index
    %408 = vector.load %arg25[%c0_295, %c0_296, %c0_297] : memref<2x2x4xbf16, #tpu.memory_space<vmem>>, vector<1x2x4xbf16>
    %409 = vector.shape_cast %408 : vector<1x2x4xbf16> to vector<2x4xbf16>
    %cst_298 = arith.constant dense<0.000000e+00> : vector<2x128xf32>
    %410 = tpu.matmul %409, %407, %cst_298 {dimension_numbers = #tpu.dot_dimension_numbers<[1], [0], [0], [1], [0, 0, 1, 1], [], []>} : vector<2x4xbf16>, vector<4x128xbf16>, vector<2x128xf32> -> vector<2x128xf32>
    %c1_299 = arith.constant 1 : index
    %c0_300 = arith.constant 0 : index
    %c0_301 = arith.constant 0 : index
    %411 = vector.load %arg25[%c1_299, %c0_300, %c0_301] : memref<2x2x4xbf16, #tpu.memory_space<vmem>>, vector<1x2x4xbf16>
    %412 = vector.shape_cast %411 : vector<1x2x4xbf16> to vector<2x4xbf16>
    %cst_302 = arith.constant dense<0.000000e+00> : vector<2x128xf32>
    %413 = tpu.matmul %412, %407, %cst_302 {dimension_numbers = #tpu.dot_dimension_numbers<[1], [0], [0], [1], [0, 0, 1, 1], [], []>} : vector<2x4xbf16>, vector<4x128xbf16>, vector<2x128xf32> -> vector<2x128xf32>
    %c1_303 = arith.constant 1 : index
    %c1_304 = arith.constant 1 : index
    %c0_305 = arith.constant 0 : index
    %414 = vector.load %arg39[%c1_303, %c1_304, %c0_305] : memref<2x3x256xf32, #tpu.memory_space<vmem>>, vector<1x2x128xf32>
    %415 = vector.shape_cast %414 : vector<1x2x128xf32> to vector<2x128xf32>
    %416 = vector.shape_cast %410 : vector<2x128xf32> to vector<1x2x128xf32>
    tpu.vector_store %arg39[%c1_303, %c1_304, %c0_305], %416 {strides = array<i32>} : memref<2x3x256xf32, #tpu.memory_space<vmem>>, vector<1x2x128xf32>,
    %c1_306 = arith.constant 1 : index
    %c1_307 = arith.constant 1 : index
    %c128_308 = arith.constant 128 : index
    %417 = vector.load %arg39[%c1_306, %c1_307, %c128_308] : memref<2x3x256xf32, #tpu.memory_space<vmem>>, vector<1x2x128xf32>
    %418 = vector.shape_cast %417 : vector<1x2x128xf32> to vector<2x128xf32>
    %419 = vector.shape_cast %413 : vector<2x128xf32> to vector<1x2x128xf32>
    tpu.vector_store %arg39[%c1_306, %c1_307, %c128_308], %419 {strides = array<i32>} : memref<2x3x256xf32, #tpu.memory_space<vmem>>, vector<1x2x128xf32>,
    %c0_309 = arith.constant 0 : index
    %c0_310 = arith.constant 0 : index
    %c0_311 = arith.constant 0 : index
    %420 = vector.load %arg39[%c0_309, %c0_310, %c0_311] : memref<2x3x256xf32, #tpu.memory_space<vmem>>, vector<1x2x256xf32>
    %421 = vector.shape_cast %420 : vector<1x2x256xf32> to vector<2x256xf32>
    %422 = arith.truncf %421 : vector<2x256xf32> to vector<2x256xbf16>
    %c0_312 = arith.constant 0 : index
    %c1_313 = arith.constant 1 : index
    %c0_314 = arith.constant 0 : index
    %423 = vector.load %arg39[%c0_312, %c1_313, %c0_314] : memref<2x3x256xf32, #tpu.memory_space<vmem>>, vector<1x2x256xf32>
    %424 = vector.shape_cast %423 : vector<1x2x256xf32> to vector<2x256xf32>
    %425 = arith.truncf %424 : vector<2x256xf32> to vector<2x256xbf16>
    %c0_315 = arith.constant 0 : index
    %c0_316 = arith.constant 0 : index
    %426 = vector.load %arg19[%c0_315, %c0_316] : memref<256x128xbf16, #tpu.memory_space<vmem>>, vector<256x128xbf16>
    %cst_317 = arith.constant dense<0.000000e+00> : vector<2x128xf32>
    %427 = tpu.matmul %425, %426, %cst_317 {dimension_numbers = #tpu.dot_dimension_numbers<[1], [0], [0], [1], [0, 0, 1, 1], [], []>} : vector<2x256xbf16>, vector<256x128xbf16>, vector<2x128xf32> -> vector<2x128xf32>
    %c0_318 = arith.constant 0 : index
    %c0_319 = arith.constant 0 : index
    %428 = vector.load %arg18[%c0_318, %c0_319] : memref<256x128xbf16, #tpu.memory_space<vmem>>, vector<256x128xbf16>
    %cst_320 = arith.constant dense<0.000000e+00> : vector<2x128xf32>
    %429 = tpu.matmul %422, %428, %cst_320 {dimension_numbers = #tpu.dot_dimension_numbers<[1], [0], [0], [1], [0, 0, 1, 1], [], []>} : vector<2x256xbf16>, vector<256x128xbf16>, vector<2x128xf32> -> vector<2x128xf32>
    %430 = arith.addf %427, %429 : vector<2x128xf32>
    %431 = vector.shape_cast %430 : vector<2x128xf32> to vector<1x2x128xf32>
    %cst_321 = arith.constant dense<0.000000e+00> : vector<1xf32>
    %432 = vector.multi_reduction <add>, %431, %cst_321 [1, 2] : vector<1x2x128xf32> to vector<1xf32>
    %433 = vector.shape_cast %432 : vector<1xf32> to vector<1x1x1xf32>
    %434 = vector.extract %433[0, 0, 0] : f32 from vector<1x1x1xf32>
    %cst_322 = arith.constant 2.560000e+02 : f32
    %435 = arith.divf %434, %cst_322 : f32
    %436 = vector.broadcast %435 : f32 to vector<2x128xf32>
    %437 = arith.subf %430, %436 : vector<2x128xf32>
    %438 = arith.mulf %437, %437 : vector<2x128xf32>
    %439 = vector.shape_cast %438 : vector<2x128xf32> to vector<1x2x128xf32>
    %cst_323 = arith.constant dense<0.000000e+00> : vector<1xf32>
    %440 = vector.multi_reduction <add>, %439, %cst_323 [1, 2] : vector<1x2x128xf32> to vector<1xf32>
    %441 = vector.shape_cast %440 : vector<1xf32> to vector<1x1x1xf32>
    %442 = vector.extract %441[0, 0, 0] : f32 from vector<1x1x1xf32>
    %cst_324 = arith.constant 2.560000e+02 : f32
    %443 = arith.divf %442, %cst_324 : f32
    %444 = vector.broadcast %435 : f32 to vector<2x128xf32>
    %445 = arith.subf %430, %444 : vector<2x128xf32>
    %cst_325 = arith.constant 9.99999974E-6 : f32
    %446 = arith.addf %443, %cst_325 : f32
    %447 = math.rsqrt %446 : f32
    %448 = vector.broadcast %447 : f32 to vector<2x128xf32>
    %449 = arith.mulf %445, %448 : vector<2x128xf32>
    %c0_326 = arith.constant 0 : index
    %c0_327 = arith.constant 0 : index
    %450 = vector.load %arg20[%c0_326, %c0_327] : memref<1x128xf32, #tpu.memory_space<vmem>>, vector<1x128xf32>
    %451 = vector.broadcast %450 : vector<1x128xf32> to vector<2x128xf32>
    %452 = arith.mulf %449, %451 : vector<2x128xf32>
    %c0_328 = arith.constant 0 : index
    %c0_329 = arith.constant 0 : index
    %453 = vector.load %arg21[%c0_328, %c0_329] : memref<1x128xf32, #tpu.memory_space<vmem>>, vector<1x128xf32>
    %454 = vector.broadcast %453 : vector<1x128xf32> to vector<2x128xf32>
    %455 = arith.addf %452, %454 : vector<2x128xf32>
    %cst_330 = arith.constant 0.000000e+00 : f32
    %456 = vector.broadcast %cst_330 : f32 to vector<2x128xf32>
    %457 = arith.maximumf %455, %456 : vector<2x128xf32>
    %c1_331 = arith.constant 1 : index
    %c0_332 = arith.constant 0 : index
    %c0_333 = arith.constant 0 : index
    %458 = vector.load %arg39[%c1_331, %c0_332, %c0_333] : memref<2x3x256xf32, #tpu.memory_space<vmem>>, vector<1x2x256xf32>
    %459 = vector.shape_cast %458 : vector<1x2x256xf32> to vector<2x256xf32>
    %460 = arith.truncf %459 : vector<2x256xf32> to vector<2x256xbf16>
    %c1_334 = arith.constant 1 : index
    %c1_335 = arith.constant 1 : index
    %c0_336 = arith.constant 0 : index
    %461 = vector.load %arg39[%c1_334, %c1_335, %c0_336] : memref<2x3x256xf32, #tpu.memory_space<vmem>>, vector<1x2x256xf32>
    %462 = vector.shape_cast %461 : vector<1x2x256xf32> to vector<2x256xf32>
    %463 = arith.truncf %462 : vector<2x256xf32> to vector<2x256xbf16>
    %c0_337 = arith.constant 0 : index
    %c0_338 = arith.constant 0 : index
    %464 = vector.load %arg19[%c0_337, %c0_338] : memref<256x128xbf16, #tpu.memory_space<vmem>>, vector<256x128xbf16>
    %cst_339 = arith.constant dense<0.000000e+00> : vector<2x128xf32>
    %465 = tpu.matmul %463, %464, %cst_339 {dimension_numbers = #tpu.dot_dimension_numbers<[1], [0], [0], [1], [0, 0, 1, 1], [], []>} : vector<2x256xbf16>, vector<256x128xbf16>, vector<2x128xf32> -> vector<2x128xf32>
    %c0_340 = arith.constant 0 : index
    %c0_341 = arith.constant 0 : index
    %466 = vector.load %arg18[%c0_340, %c0_341] : memref<256x128xbf16, #tpu.memory_space<vmem>>, vector<256x128xbf16>
    %cst_342 = arith.constant dense<0.000000e+00> : vector<2x128xf32>
    %467 = tpu.matmul %460, %466, %cst_342 {dimension_numbers = #tpu.dot_dimension_numbers<[1], [0], [0], [1], [0, 0, 1, 1], [], []>} : vector<2x256xbf16>, vector<256x128xbf16>, vector<2x128xf32> -> vector<2x128xf32>
    %468 = arith.addf %465, %467 : vector<2x128xf32>
    %469 = vector.shape_cast %468 : vector<2x128xf32> to vector<1x2x128xf32>
    %cst_343 = arith.constant dense<0.000000e+00> : vector<1xf32>
    %470 = vector.multi_reduction <add>, %469, %cst_343 [1, 2] : vector<1x2x128xf32> to vector<1xf32>
    %471 = vector.shape_cast %470 : vector<1xf32> to vector<1x1x1xf32>
    %472 = vector.extract %471[0, 0, 0] : f32 from vector<1x1x1xf32>
    %cst_344 = arith.constant 2.560000e+02 : f32
    %473 = arith.divf %472, %cst_344 : f32
    %474 = vector.broadcast %473 : f32 to vector<2x128xf32>
    %475 = arith.subf %468, %474 : vector<2x128xf32>
    %476 = arith.mulf %475, %475 : vector<2x128xf32>
    %477 = vector.shape_cast %476 : vector<2x128xf32> to vector<1x2x128xf32>
    %cst_345 = arith.constant dense<0.000000e+00> : vector<1xf32>
    %478 = vector.multi_reduction <add>, %477, %cst_345 [1, 2] : vector<1x2x128xf32> to vector<1xf32>
    %479 = vector.shape_cast %478 : vector<1xf32> to vector<1x1x1xf32>
    %480 = vector.extract %479[0, 0, 0] : f32 from vector<1x1x1xf32>
    %cst_346 = arith.constant 2.560000e+02 : f32
    %481 = arith.divf %480, %cst_346 : f32
    %482 = vector.broadcast %473 : f32 to vector<2x128xf32>
    %483 = arith.subf %468, %482 : vector<2x128xf32>
    %cst_347 = arith.constant 9.99999974E-6 : f32
    %484 = arith.addf %481, %cst_347 : f32
    %485 = math.rsqrt %484 : f32
    %486 = vector.broadcast %485 : f32 to vector<2x128xf32>
    %487 = arith.mulf %483, %486 : vector<2x128xf32>
    %c0_348 = arith.constant 0 : index
    %c0_349 = arith.constant 0 : index
    %488 = vector.load %arg20[%c0_348, %c0_349] : memref<1x128xf32, #tpu.memory_space<vmem>>, vector<1x128xf32>
    %489 = vector.broadcast %488 : vector<1x128xf32> to vector<2x128xf32>
    %490 = arith.mulf %487, %489 : vector<2x128xf32>
    %c0_350 = arith.constant 0 : index
    %c0_351 = arith.constant 0 : index
    %491 = vector.load %arg21[%c0_350, %c0_351] : memref<1x128xf32, #tpu.memory_space<vmem>>, vector<1x128xf32>
    %492 = vector.broadcast %491 : vector<1x128xf32> to vector<2x128xf32>
    %493 = arith.addf %490, %492 : vector<2x128xf32>
    %cst_352 = arith.constant 0.000000e+00 : f32
    %494 = vector.broadcast %cst_352 : f32 to vector<2x128xf32>
    %495 = arith.maximumf %493, %494 : vector<2x128xf32>
    %496 = arith.truncf %457 : vector<2x128xf32> to vector<2x128xbf16>
    %497 = vector.extract_strided_slice %496 {offsets = [0, 0], sizes = [1, 128], strides = [1, 1]} : vector<2x128xbf16> to vector<1x128xbf16>
    %c0_353 = arith.constant 0 : index
    %c0_354 = arith.constant 0 : index
    %498 = vector.load %arg26[%c0_353, %c0_354] : memref<128x128xbf16, #tpu.memory_space<vmem>>, vector<128x128xbf16>
    %cst_355 = arith.constant dense<0.000000e+00> : vector<1x128xf32>
    %499 = tpu.matmul %497, %498, %cst_355 {dimension_numbers = #tpu.dot_dimension_numbers<[1], [0], [0], [1], [0, 0, 1, 1], [], []>} : vector<1x128xbf16>, vector<128x128xbf16>, vector<1x128xf32> -> vector<1x128xf32>
    %500 = vector.extract_strided_slice %496 {offsets = [1, 0], sizes = [1, 128], strides = [1, 1]} : vector<2x128xbf16> to vector<1x128xbf16>
    %c0_356 = arith.constant 0 : index
    %c0_357 = arith.constant 0 : index
    %501 = vector.load %arg27[%c0_356, %c0_357] : memref<128x128xbf16, #tpu.memory_space<vmem>>, vector<128x128xbf16>
    %cst_358 = arith.constant dense<0.000000e+00> : vector<1x128xf32>
    %502 = tpu.matmul %500, %501, %cst_358 {dimension_numbers = #tpu.dot_dimension_numbers<[1], [0], [0], [1], [0, 0, 1, 1], [], []>} : vector<1x128xbf16>, vector<128x128xbf16>, vector<1x128xf32> -> vector<1x128xf32>
    %503 = arith.addf %499, %502 : vector<1x128xf32>
    %504 = vector.shape_cast %503 : vector<1x128xf32> to vector<1x1x128xf32>
    %cst_359 = arith.constant dense<0.000000e+00> : vector<1xf32>
    %505 = vector.multi_reduction <add>, %504, %cst_359 [1, 2] : vector<1x1x128xf32> to vector<1xf32>
    %506 = vector.shape_cast %505 : vector<1xf32> to vector<1x1x1xf32>
    %507 = vector.extract %506[0, 0, 0] : f32 from vector<1x1x1xf32>
    %cst_360 = arith.constant 1.280000e+02 : f32
    %508 = arith.divf %507, %cst_360 : f32
    %509 = vector.broadcast %508 : f32 to vector<1x128xf32>
    %510 = arith.subf %503, %509 : vector<1x128xf32>
    %511 = arith.mulf %510, %510 : vector<1x128xf32>
    %512 = vector.shape_cast %511 : vector<1x128xf32> to vector<1x1x128xf32>
    %cst_361 = arith.constant dense<0.000000e+00> : vector<1xf32>
    %513 = vector.multi_reduction <add>, %512, %cst_361 [1, 2] : vector<1x1x128xf32> to vector<1xf32>
    %514 = vector.shape_cast %513 : vector<1xf32> to vector<1x1x1xf32>
    %515 = vector.extract %514[0, 0, 0] : f32 from vector<1x1x1xf32>
    %cst_362 = arith.constant 1.280000e+02 : f32
    %516 = arith.divf %515, %cst_362 : f32
    %517 = vector.broadcast %508 : f32 to vector<1x128xf32>
    %518 = arith.subf %503, %517 : vector<1x128xf32>
    %cst_363 = arith.constant 9.99999974E-6 : f32
    %519 = arith.addf %516, %cst_363 : f32
    %520 = math.rsqrt %519 : f32
    %521 = vector.broadcast %520 : f32 to vector<1x128xf32>
    %522 = arith.mulf %518, %521 : vector<1x128xf32>
    %c0_364 = arith.constant 0 : index
    %c0_365 = arith.constant 0 : index
    %523 = vector.load %arg28[%c0_364, %c0_365] : memref<1x128xf32, #tpu.memory_space<vmem>>, vector<1x128xf32>
    %524 = arith.mulf %522, %523 : vector<1x128xf32>
    %c0_366 = arith.constant 0 : index
    %c0_367 = arith.constant 0 : index
    %525 = vector.load %arg29[%c0_366, %c0_367] : memref<1x128xf32, #tpu.memory_space<vmem>>, vector<1x128xf32>
    %526 = arith.addf %524, %525 : vector<1x128xf32>
    %cst_368 = arith.constant 0.000000e+00 : f32
    %527 = vector.broadcast %cst_368 : f32 to vector<1x128xf32>
    %528 = arith.maximumf %526, %527 : vector<1x128xf32>
    %c0_369 = arith.constant 0 : index
    %c0_370 = arith.constant 0 : index
    %529 = vector.load %arg40[%c0_369, %c0_370] : memref<2x128xf32, #tpu.memory_space<vmem>>, vector<1x128xf32>
    tpu.vector_store %arg40[%c0_369, %c0_370], %528 {strides = array<i32>} : memref<2x128xf32, #tpu.memory_space<vmem>>, vector<1x128xf32>,
    %530 = arith.truncf %495 : vector<2x128xf32> to vector<2x128xbf16>
    %531 = vector.extract_strided_slice %530 {offsets = [0, 0], sizes = [1, 128], strides = [1, 1]} : vector<2x128xbf16> to vector<1x128xbf16>
    %c0_371 = arith.constant 0 : index
    %c0_372 = arith.constant 0 : index
    %532 = vector.load %arg26[%c0_371, %c0_372] : memref<128x128xbf16, #tpu.memory_space<vmem>>, vector<128x128xbf16>
    %cst_373 = arith.constant dense<0.000000e+00> : vector<1x128xf32>
    %533 = tpu.matmul %531, %532, %cst_373 {dimension_numbers = #tpu.dot_dimension_numbers<[1], [0], [0], [1], [0, 0, 1, 1], [], []>} : vector<1x128xbf16>, vector<128x128xbf16>, vector<1x128xf32> -> vector<1x128xf32>
    %534 = vector.extract_strided_slice %530 {offsets = [1, 0], sizes = [1, 128], strides = [1, 1]} : vector<2x128xbf16> to vector<1x128xbf16>
    %c0_374 = arith.constant 0 : index
    %c0_375 = arith.constant 0 : index
    %535 = vector.load %arg27[%c0_374, %c0_375] : memref<128x128xbf16, #tpu.memory_space<vmem>>, vector<128x128xbf16>
    %cst_376 = arith.constant dense<0.000000e+00> : vector<1x128xf32>
    %536 = tpu.matmul %534, %535, %cst_376 {dimension_numbers = #tpu.dot_dimension_numbers<[1], [0], [0], [1], [0, 0, 1, 1], [], []>} : vector<1x128xbf16>, vector<128x128xbf16>, vector<1x128xf32> -> vector<1x128xf32>
    %537 = arith.addf %533, %536 : vector<1x128xf32>
    %538 = vector.shape_cast %537 : vector<1x128xf32> to vector<1x1x128xf32>
    %cst_377 = arith.constant dense<0.000000e+00> : vector<1xf32>
    %539 = vector.multi_reduction <add>, %538, %cst_377 [1, 2] : vector<1x1x128xf32> to vector<1xf32>
    %540 = vector.shape_cast %539 : vector<1xf32> to vector<1x1x1xf32>
    %541 = vector.extract %540[0, 0, 0] : f32 from vector<1x1x1xf32>
    %cst_378 = arith.constant 1.280000e+02 : f32
    %542 = arith.divf %541, %cst_378 : f32
    %543 = vector.broadcast %542 : f32 to vector<1x128xf32>
    %544 = arith.subf %537, %543 : vector<1x128xf32>
    %545 = arith.mulf %544, %544 : vector<1x128xf32>
    %546 = vector.shape_cast %545 : vector<1x128xf32> to vector<1x1x128xf32>
    %cst_379 = arith.constant dense<0.000000e+00> : vector<1xf32>
    %547 = vector.multi_reduction <add>, %546, %cst_379 [1, 2] : vector<1x1x128xf32> to vector<1xf32>
    %548 = vector.shape_cast %547 : vector<1xf32> to vector<1x1x1xf32>
    %549 = vector.extract %548[0, 0, 0] : f32 from vector<1x1x1xf32>
    %cst_380 = arith.constant 1.280000e+02 : f32
    %550 = arith.divf %549, %cst_380 : f32
    %551 = vector.broadcast %542 : f32 to vector<1x128xf32>
    %552 = arith.subf %537, %551 : vector<1x128xf32>
    %cst_381 = arith.constant 9.99999974E-6 : f32
    %553 = arith.addf %550, %cst_381 : f32
    %554 = math.rsqrt %553 : f32
    %555 = vector.broadcast %554 : f32 to vector<1x128xf32>
    %556 = arith.mulf %552, %555 : vector<1x128xf32>
    %c0_382 = arith.constant 0 : index
    %c0_383 = arith.constant 0 : index
    %557 = vector.load %arg28[%c0_382, %c0_383] : memref<1x128xf32, #tpu.memory_space<vmem>>, vector<1x128xf32>
    %558 = arith.mulf %556, %557 : vector<1x128xf32>
    %c0_384 = arith.constant 0 : index
    %c0_385 = arith.constant 0 : index
    %559 = vector.load %arg29[%c0_384, %c0_385] : memref<1x128xf32, #tpu.memory_space<vmem>>, vector<1x128xf32>
    %560 = arith.addf %558, %559 : vector<1x128xf32>
    %cst_386 = arith.constant 0.000000e+00 : f32
    %561 = vector.broadcast %cst_386 : f32 to vector<1x128xf32>
    %562 = arith.maximumf %560, %561 : vector<1x128xf32>
    %c1_387 = arith.constant 1 : index
    %c0_388 = arith.constant 0 : index
    %563 = vector.load %arg40[%c1_387, %c0_388] : memref<2x128xf32, #tpu.memory_space<vmem>>, vector<1x128xf32>
    tpu.vector_store %arg40[%c1_387, %c0_388], %562 {strides = array<i32>} : memref<2x128xf32, #tpu.memory_space<vmem>>, vector<1x128xf32>,
    %c0_389 = arith.constant 0 : index
    %c0_390 = arith.constant 0 : index
    %564 = vector.load %arg40[%c0_389, %c0_390] : memref<2x128xf32, #tpu.memory_space<vmem>>, vector<2x128xf32>
    %565 = arith.truncf %564 : vector<2x128xf32> to vector<2x128xbf16>
    %c0_391 = arith.constant 0 : index
    %c0_392 = arith.constant 0 : index
    %566 = vector.load %arg30[%c0_391, %c0_392] : memref<128x32xbf16, #tpu.memory_space<vmem>>, vector<128x32xbf16>
    %cst_393 = arith.constant dense<0.000000e+00> : vector<2x32xf32>
    %567 = tpu.matmul %565, %566, %cst_393 {dimension_numbers = #tpu.dot_dimension_numbers<[1], [0], [0], [1], [0, 0, 1, 1], [], []>} : vector<2x128xbf16>, vector<128x32xbf16>, vector<2x32xf32> -> vector<2x32xf32>
    %c0_394 = arith.constant 0 : index
    %c0_395 = arith.constant 0 : index
    %568 = vector.load %arg31[%c0_394, %c0_395] : memref<1x32xf32, #tpu.memory_space<vmem>>, vector<1x32xf32>
    %569 = vector.broadcast %568 : vector<1x32xf32> to vector<2x32xf32>
    %570 = arith.addf %567, %569 : vector<2x32xf32>
    %cst_396 = arith.constant 0.000000e+00 : f32
    %571 = vector.broadcast %cst_396 : f32 to vector<2x32xf32>
    %572 = arith.maximumf %570, %571 : vector<2x32xf32>
    %573 = arith.truncf %572 : vector<2x32xf32> to vector<2x32xbf16>
    %c0_397 = arith.constant 0 : index
    %c0_398 = arith.constant 0 : index
    %574 = vector.load %arg32[%c0_397, %c0_398] : memref<32x3xbf16, #tpu.memory_space<vmem>>, vector<32x3xbf16>
    %cst_399 = arith.constant dense<0.000000e+00> : vector<2x3xf32>
    %575 = tpu.matmul %573, %574, %cst_399 {dimension_numbers = #tpu.dot_dimension_numbers<[1], [0], [0], [1], [0, 0, 1, 1], [], []>} : vector<2x32xbf16>, vector<32x3xbf16>, vector<2x3xf32> -> vector<2x3xf32>
    %c0_400 = arith.constant 0 : index
    %c0_401 = arith.constant 0 : index
    %576 = vector.load %arg33[%c0_400, %c0_401] : memref<1x3xf32, #tpu.memory_space<vmem>>, vector<1x3xf32>
    %577 = vector.broadcast %576 : vector<1x3xf32> to vector<2x3xf32>
    %578 = arith.addf %575, %577 : vector<2x3xf32>
    %c0_402 = arith.constant 0 : index
    %c0_403 = arith.constant 0 : index
    %579 = vector.load %arg34[%c0_402, %c0_403] : memref<2x3xf32, #tpu.memory_space<vmem>>, vector<2x3xf32>
    tpu.vector_store %arg34[%c0_402, %c0_403], %578 {strides = array<i32>} : memref<2x3xf32, #tpu.memory_space<vmem>>, vector<2x3xf32>,
    return
  }
  func.func @transform_0(%arg0: i32) -> (i32, i32, i32) {
    %c0_i32 = arith.constant 0 : i32
    %c0_i32_0 = arith.constant 0 : i32
    %c0_i32_1 = arith.constant 0 : i32
    return %arg0, %c0_i32, %c0_i32_0 : i32, i32, i32
  }
  func.func @transform_1(%arg0: i32) -> (i32, i32) {
    %c0_i32 = arith.constant 0 : i32
    %c0_i32_0 = arith.constant 0 : i32
    %c0_i32_1 = arith.constant 0 : i32
    return %c0_i32, %c0_i32_0 : i32, i32
  }
  func.func @transform_2(%arg0: i32) -> (i32, i32) {
    %c0_i32 = arith.constant 0 : i32
    %c0_i32_0 = arith.constant 0 : i32
    %c0_i32_1 = arith.constant 0 : i32
    return %c0_i32, %c0_i32_0 : i32, i32
  }
  func.func @transform_3(%arg0: i32) -> (i32, i32) {
    %c0_i32 = arith.constant 0 : i32
    %c0_i32_0 = arith.constant 0 : i32
    %c0_i32_1 = arith.constant 0 : i32
    return %c0_i32, %c0_i32_0 : i32, i32
  }
  func.func @transform_4(%arg0: i32) -> (i32, i32) {
    %c0_i32 = arith.constant 0 : i32
    %c0_i32_0 = arith.constant 0 : i32
    %c0_i32_1 = arith.constant 0 : i32
    return %c0_i32, %c0_i32_0 : i32, i32
  }
  func.func @transform_5(%arg0: i32) -> (i32, i32) {
    %c0_i32 = arith.constant 0 : i32
    %c0_i32_0 = arith.constant 0 : i32
    %c0_i32_1 = arith.constant 0 : i32
    return %c0_i32, %c0_i32_0 : i32, i32
  }
  func.func @transform_6(%arg0: i32) -> (i32, i32) {
    %c0_i32 = arith.constant 0 : i32
    %c0_i32_0 = arith.constant 0 : i32
    %c0_i32_1 = arith.constant 0 : i32
    return %c0_i32, %c0_i32_0 : i32, i32
  }
  func.func @transform_7(%arg0: i32) -> (i32, i32) {
    %c0_i32 = arith.constant 0 : i32
    %c0_i32_0 = arith.constant 0 : i32
    %c0_i32_1 = arith.constant 0 : i32
    return %c0_i32, %c0_i32_0 : i32, i32
  }
  func.func @transform_8(%arg0: i32) -> (i32, i32) {
    %c0_i32 = arith.constant 0 : i32
    %c0_i32_0 = arith.constant 0 : i32
    %c0_i32_1 = arith.constant 0 : i32
    return %c0_i32, %c0_i32_0 : i32, i32
  }
  func.func @transform_9(%arg0: i32) -> (i32, i32) {
    %c0_i32 = arith.constant 0 : i32
    %c0_i32_0 = arith.constant 0 : i32
    %c0_i32_1 = arith.constant 0 : i32
    return %c0_i32, %c0_i32_0 : i32, i32
  }
  func.func @transform_10(%arg0: i32) -> (i32, i32) {
    %c0_i32 = arith.constant 0 : i32
    %c0_i32_0 = arith.constant 0 : i32
    %c0_i32_1 = arith.constant 0 : i32
    return %c0_i32, %c0_i32_0 : i32, i32
  }
  func.func @transform_11(%arg0: i32) -> (i32, i32) {
    %c0_i32 = arith.constant 0 : i32
    %c0_i32_0 = arith.constant 0 : i32
    %c0_i32_1 = arith.constant 0 : i32
    return %c0_i32, %c0_i32_0 : i32, i32
  }
  func.func @transform_12(%arg0: i32) -> (i32, i32) {
    %c0_i32 = arith.constant 0 : i32
    %c0_i32_0 = arith.constant 0 : i32
    %c0_i32_1 = arith.constant 0 : i32
    return %c0_i32, %c0_i32_0 : i32, i32
  }
  func.func @transform_13(%arg0: i32) -> (i32, i32) {
    %c0_i32 = arith.constant 0 : i32
    %c0_i32_0 = arith.constant 0 : i32
    %c0_i32_1 = arith.constant 0 : i32
    return %c0_i32, %c0_i32_0 : i32, i32
  }
  func.func @transform_14(%arg0: i32) -> (i32, i32) {
    %c0_i32 = arith.constant 0 : i32
    %c0_i32_0 = arith.constant 0 : i32
    %c0_i32_1 = arith.constant 0 : i32
    return %c0_i32, %c0_i32_0 : i32, i32
  }
  func.func @transform_15(%arg0: i32) -> (i32, i32) {
    %c0_i32 = arith.constant 0 : i32
    %c0_i32_0 = arith.constant 0 : i32
    %c0_i32_1 = arith.constant 0 : i32
    return %c0_i32, %c0_i32_0 : i32, i32
  }
  func.func @transform_16(%arg0: i32) -> (i32, i32) {
    %c0_i32 = arith.constant 0 : i32
    %c0_i32_0 = arith.constant 0 : i32
    %c0_i32_1 = arith.constant 0 : i32
    return %c0_i32, %c0_i32_0 : i32, i32
  }
  func.func @transform_17(%arg0: i32) -> (i32, i32) {
    %c0_i32 = arith.constant 0 : i32
    %c0_i32_0 = arith.constant 0 : i32
    %c0_i32_1 = arith.constant 0 : i32
    return %c0_i32, %c0_i32_0 : i32, i32
  }
  func.func @transform_18(%arg0: i32) -> (i32, i32) {
    %c0_i32 = arith.constant 0 : i32
    %c0_i32_0 = arith.constant 0 : i32
    %c0_i32_1 = arith.constant 0 : i32
    return %c0_i32, %c0_i32_0 : i32, i32
  }
  func.func @transform_19(%arg0: i32) -> (i32, i32) {
    %c0_i32 = arith.constant 0 : i32
    %c0_i32_0 = arith.constant 0 : i32
    %c0_i32_1 = arith.constant 0 : i32
    return %c0_i32, %c0_i32_0 : i32, i32
  }
  func.func @transform_20(%arg0: i32) -> (i32, i32) {
    %c0_i32 = arith.constant 0 : i32
    %c0_i32_0 = arith.constant 0 : i32
    %c0_i32_1 = arith.constant 0 : i32
    return %c0_i32, %c0_i32_0 : i32, i32
  }
  func.func @transform_21(%arg0: i32) -> (i32, i32, i32) {
    %c0_i32 = arith.constant 0 : i32
    %c0_i32_0 = arith.constant 0 : i32
    %c0_i32_1 = arith.constant 0 : i32
    %c0_i32_2 = arith.constant 0 : i32
    return %c0_i32, %c0_i32_0, %c0_i32_1 : i32, i32, i32
  }
  func.func @transform_22(%arg0: i32) -> (i32, i32, i32) {
    %c0_i32 = arith.constant 0 : i32
    %c0_i32_0 = arith.constant 0 : i32
    %c0_i32_1 = arith.constant 0 : i32
    %c0_i32_2 = arith.constant 0 : i32
    return %c0_i32, %c0_i32_0, %c0_i32_1 : i32, i32, i32
  }
  func.func @transform_23(%arg0: i32) -> (i32, i32, i32) {
    %c0_i32 = arith.constant 0 : i32
    %c0_i32_0 = arith.constant 0 : i32
    %c0_i32_1 = arith.constant 0 : i32
    %c0_i32_2 = arith.constant 0 : i32
    return %c0_i32, %c0_i32_0, %c0_i32_1 : i32, i32, i32
  }
  func.func @transform_24(%arg0: i32) -> (i32, i32, i32) {
    %c0_i32 = arith.constant 0 : i32
    %c0_i32_0 = arith.constant 0 : i32
    %c0_i32_1 = arith.constant 0 : i32
    %c0_i32_2 = arith.constant 0 : i32
    return %c0_i32, %c0_i32_0, %c0_i32_1 : i32, i32, i32
  }
  func.func @transform_25(%arg0: i32) -> (i32, i32) {
    %c0_i32 = arith.constant 0 : i32
    %c0_i32_0 = arith.constant 0 : i32
    %c0_i32_1 = arith.constant 0 : i32
    return %c0_i32, %c0_i32_0 : i32, i32
  }
  func.func @transform_26(%arg0: i32) -> (i32, i32) {
    %c0_i32 = arith.constant 0 : i32
    %c0_i32_0 = arith.constant 0 : i32
    %c0_i32_1 = arith.constant 0 : i32
    return %c0_i32, %c0_i32_0 : i32, i32
  }
  func.func @transform_27(%arg0: i32) -> (i32, i32) {
    %c0_i32 = arith.constant 0 : i32
    %c0_i32_0 = arith.constant 0 : i32
    %c0_i32_1 = arith.constant 0 : i32
    return %c0_i32, %c0_i32_0 : i32, i32
  }
  func.func @transform_28(%arg0: i32) -> (i32, i32) {
    %c0_i32 = arith.constant 0 : i32
    %c0_i32_0 = arith.constant 0 : i32
    %c0_i32_1 = arith.constant 0 : i32
    return %c0_i32, %c0_i32_0 : i32, i32
  }
  func.func @transform_29(%arg0: i32) -> (i32, i32) {
    %c0_i32 = arith.constant 0 : i32
    %c0_i32_0 = arith.constant 0 : i32
    %c0_i32_1 = arith.constant 0 : i32
    return %c0_i32, %c0_i32_0 : i32, i32
  }
  func.func @transform_30(%arg0: i32) -> (i32, i32) {
    %c0_i32 = arith.constant 0 : i32
    %c0_i32_0 = arith.constant 0 : i32
    %c0_i32_1 = arith.constant 0 : i32
    return %c0_i32, %c0_i32_0 : i32, i32
  }
  func.func @transform_31(%arg0: i32) -> (i32, i32) {
    %c0_i32 = arith.constant 0 : i32
    %c0_i32_0 = arith.constant 0 : i32
    %c0_i32_1 = arith.constant 0 : i32
    return %c0_i32, %c0_i32_0 : i32, i32
  }
  func.func @transform_32(%arg0: i32) -> (i32, i32) {
    %c0_i32 = arith.constant 0 : i32
    %c0_i32_0 = arith.constant 0 : i32
    %c0_i32_1 = arith.constant 0 : i32
    return %c0_i32, %c0_i32_0 : i32, i32
  }
  func.func @transform_33(%arg0: i32) -> (i32, i32) {
    %c0_i32 = arith.constant 0 : i32
    %c0_i32_0 = arith.constant 0 : i32
    return %arg0, %c0_i32 : i32, i32
  }
}

</mosaic_0001>

<bundles_post_ra>
// kernel: visual_odometry_cnn_forward.1
= control target key start
LH: loop header
LB: loop body
LE: loop exit
PB: predicated region body
PF: predicated region fallthrough
CT: control target
= control target key end

     0   :  { %s14624_s6 = smov 1   ;;  %s14625_s10 = smov 2   ;;  %s16620_s0 = inlined_call_operand.smem [shape: u32[34], index: -1, kind: input, shape index: {}] }
   0x1   :  { %s14669_s5 = sld [smem:[%s16620_s0]]   ;;  %s14626_s14 = smov 3  }
   0x2   :  { %s14674_s9 = sld [smem:[%s16620_s0 + %s14624_s6]]   ;;  %s14627_s18 = smov 4  }
   0x3   :  { %s14679_s13 = sld [smem:[%s16620_s0 + %s14625_s10]]   ;;  %s14628_s22 = smov 5  }
   0x4   :  { %s14684_s17 = sld [smem:[%s16620_s0 + %s14626_s14]]   ;;  %s14629_s26 = smov 6  }
   0x5   :  { %s14689_s21 = sld [smem:[%s16620_s0 + %s14627_s18]]   ;;  %s14630_s30 = smov 7  }
   0x6   :  { %s14694_s25 = sld [smem:[%s16620_s0 + %s14628_s22]]   ;;  %s14631_s4 = smov 8  }
   0x7   :  { %s14699_s29 = sld [smem:[%s16620_s0 + %s14629_s26]]   ;;  %s14632_s10 = smov 9  }
   0x8   :  { %s14704_s3 = sld [smem:[%s16620_s0 + %s14630_s30]]   ;;  %s14633_s15 = smov 10  }
   0x9   :  { %s14709_s8 = sld [smem:[%s16620_s0 + %s14631_s4]]   ;;  %s14634_s20 = smov 11  }
   0xa   :  { %s14714_s14 = sld [smem:[%s16620_s0 + %s14632_s10]]   ;;  %s14635_s26 = smov 12  }
   0xb   :  { %s14719_s19 = sld [smem:[%s16620_s0 + %s14633_s15]]   ;;  %s14636_s1 = smov 13  }
   0xc   :  { %s14724_s24 = sld [smem:[%s16620_s0 + %s14634_s20]]   ;;  %s14637_s7 = smov 14  }
   0xd   :  { %s14729_s30 = sld [smem:[%s16620_s0 + %s14635_s26]]   ;;  %s14638_s15 = smov 15  }
   0xe   :  { %s14734_s6 = sld [smem:[%s16620_s0 + %s14636_s1]]   ;;  %s14639_s22 = smov 16  }
   0xf   :  { %s14739_s12 = sld [smem:[%s16620_s0 + %s14637_s7]]   ;;  %s14640_s28 = smov 17  }
  0x10   :  { %s14744_s20 = sld [smem:[%s16620_s0 + %s14638_s15]]   ;;  %s14641_s7 = smov 18  }
  0x11   :  { %s14749_s27 = sld [smem:[%s16620_s0 + %s14639_s22]]   ;;  %s14642_s15 = smov 19  }
  0x12   :  { %s14754_s4 = sld [smem:[%s16620_s0 + %s14640_s28]]   ;;  %s14643_s22 = smov 20  }
  0x13   :  { %16632 = sst [smem:[#allocation11_spill]] %s14729_s30  ;;  %s14644_s28 = smov 21  }
  0x14   :  { %16633 = sst [smem:[#allocation12_spill]] %s14734_s6 }
  0x15   :  { %16634 = sst [smem:[#allocation13_spill]] %s14739_s12 }
  0x16   :  { %16635 = sst [smem:[#allocation14_spill]] %s14744_s20 }
  0x17   :  { %16636 = sst [smem:[#allocation15_spill]] %s14749_s27 }
  0x18   :  { %16637 = sst [smem:[#allocation16_spill]] %s14754_s4 }
  0x19   :  { %s14759_s12 = sld [smem:[%s16620_s0 + %s14641_s7]]   ;;  %s14645_s7 = smov 22  }
  0x1a   :  { %s14764_s20 = sld [smem:[%s16620_s0 + %s14642_s15]]   ;;  %s14646_s15 = smov 23  }
  0x1b   :  { %s14769_s27 = sld [smem:[%s16620_s0 + %s14643_s22]]   ;;  %s14647_s22 = smov 24  }
  0x1c   :  { %s14774_s4 = sld [smem:[%s16620_s0 + %s14644_s28]]   ;;  %s14648_s28 = smov 25  }
  0x1d   :  { %s14794_s6 = sld [smem:[%s16620_s0 + %s14648_s28]]   ;;  %s14652_s28 = smov 29  }
  0x1f   :  { %16638 = sst [smem:[#allocation17_spill]] %s14759_s12 }
  0x20   :  { %16639 = sst [smem:[#allocation18_spill]] %s14764_s20 }
  0x21   :  { %16640 = sst [smem:[#allocation19_spill]] %s14769_s27 }
  0x22   :  { %s14779_s12 = sld [smem:[%s16620_s0 + %s14645_s7]]   ;;  %s14649_s7 = smov 26  }
  0x23   :  { %s14784_s20 = sld [smem:[%s16620_s0 + %s14646_s15]]   ;;  %s14650_s15 = smov 27  }
  0x24   :  { %s14789_s27 = sld [smem:[%s16620_s0 + %s14647_s22]]   ;;  %s14651_s22 = smov 28  }
  0x25   :  { %16643 = sst [smem:[#allocation22_spill]] %s14794_s6 }
  0x26   :  { %s14799_s30 = sld [smem:[%s16620_s0 + %s14649_s7]]   ;;  %s14653_s7 = smov 30  }
  0x27   :  { %s14814_s6 = sld [smem:[%s16620_s0 + %s14652_s28]]   ;;  %s14656_s28 = smov 33  }
  0x29   :  { %16641 = sst [smem:[#allocation20_spill]] %s14784_s20 }
  0x2a   :  { %16642 = sst [smem:[#allocation21_spill]] %s14789_s27 }
  0x2b   :  { %s14804_s20 = sld [smem:[%s16620_s0 + %s14650_s15]]   ;;  %s14654_s15 = smov 31  }
  0x2c   :  { %16644 = sst [smem:[#allocation23_spill]] %s14799_s30 }
  0x2d   :  { %s14809_s27 = sld [smem:[%s16620_s0 + %s14651_s22]]   ;;  %s14655_s22 = smov 32  }
  0x2e   :  { %16647 = sst [smem:[#allocation26_spill]] %s14814_s6 }
  0x2f   :  { %s14819_s30 = sld [smem:[%s16620_s0 + %s14653_s7]]  }
  0x30   :  { %s14834_s6 = sld [smem:[%s16620_s0 + %s14656_s28]]  }
  0x31   :  { %16645 = sst [smem:[#allocation24_spill]] %s14804_s20 }
  0x32   :  { %s14824_s20 = sld [smem:[%s16620_s0 + %s14654_s15]]  }
  0x33   :  { %16646 = sst [smem:[#allocation25_spill]] %s14809_s27 }
  0x34   :  { %s14829_s27 = sld [smem:[%s16620_s0 + %s14655_s22]]  }
  0x35   :  { %v13356_v0 = vld [vmem:[%s14674_s9 + $0x4] ss:$8 sps:$4 sm:$0xff]   ;;  %v13358_v1 = vld [vmem:[%s14674_s9] ss:$8 sps:$4 sm:$0xff]   ;;  %v14657_v2 = vmov 0.0   ;;  %v187_v15 = vld [vmem:[%s14669_s5 + $0x50] sm:$0xff] }
  0x36   :  { %140 = vst [vmem:[#allocation2] ss:$8 sm:$0xf] %v14657_v2  ;;  %141 = vst [vmem:[#allocation2] ss:$8 sm:$0xf0] %v14657_v2  ;;  %1726 = vmatprep.subr.bf16.mxu0 %v13356_v0 }
  0x37   :  { %150 = vst [vmem:[#allocation2 + $0x168] ss:$8 sm:$0xf] %v14657_v2  ;;  %151 = vst [vmem:[#allocation2 + $0x168] ss:$8 sm:$0xf0] %v14657_v2  ;;  %1727 = vmatpush1.bf16.msra.mxu0 %v13358_v1 }
  0x38   :  { %v13359_v3 = vld [vmem:[%s14674_s9 + $0x14] ss:$8 sps:$4 sm:$0xff]   ;;  %v13361_v4 = vld [vmem:[%s14674_s9 + $0x10] ss:$8 sps:$4 sm:$0xff]   ;;  %v13362_v5 = vld [vmem:[%s14674_s9 + $0x24] ss:$8 sps:$4 sm:$0xff]  }
  0x39   :  { %1728 = vmatprep.subr.bf16.mxu0 %v13359_v3  ;;  %v13364_v6 = vld [vmem:[%s14674_s9 + $0x20] ss:$8 sps:$4 sm:$0xff]   ;;  %v13365_v7 = vld [vmem:[%s14674_s9 + $0x34] ss:$8 sps:$4 sm:$0xff]   ;;  %v13367_v8 = vld [vmem:[%s14674_s9 + $0x30] ss:$8 sps:$4 sm:$0xff]  }
  0x3a   :  { %v13368_v9 = vld [vmem:[%s14674_s9 + $0x44] ss:$8 sps:$4 sm:$0xff]   ;;  %v13370_v10 = vld [vmem:[%s14674_s9 + $0x40] ss:$8 sps:$4 sm:$0xff]   ;;  %v13371_v11 = vld [vmem:[%s14674_s9 + $0x54] ss:$8 sps:$4 sm:$0xff]  }
  0x3b   :  { %1729 = vmatpush1.bf16.msra.mxu0 %v13361_v4  ;;  %v13373_v12 = vld [vmem:[%s14674_s9 + $0x50] ss:$8 sps:$4 sm:$0xff]   ;;  %v13374_v13 = vld [vmem:[%s14674_s9 + $0x64] ss:$8 sps:$4 sm:$0xff]   ;;  %vm321_vm0 = vcmask 1040384   ;;  %v333_v17 = vrot.slane %v187_v15, 7 }
  0x3c   :  { %1730 = vmatprep.subr.bf16.mxu0 %v13362_v5  ;;  %v178_v14 = vld [vmem:[%s14669_s5 + $0x8] sm:$0xff]  ;;  %v177_v19 = vld [vmem:[%s14669_s5] sm:$0xff]  ;;  %v13377_v21 = vld [vmem:[%s14674_s9 + $0x74] ss:$8 sps:$4 sm:$0xff]   ;;  %vm1991_vm2 = vsmask.f32 7424 }
  0x3d   :  { %v323_v16 = vrot.slane %v178_v14, 7  ;;  %v13376_v18 = vld [vmem:[%s14674_s9 + $0x60] ss:$8 sps:$4 sm:$0xff]   ;;  %v322_v23 = vrot.slane %v177_v19, 7  ;;  %v13379_v26 = vld [vmem:[%s14674_s9 + $0x70] ss:$8 sps:$4 sm:$0xff]  }
  0x3e   :  { %v186_v20 = vld [vmem:[%s14669_s5 + $0x48] sm:$0xff]  ;;  %v13383_v30 = vld [vmem:[%s14674_s9 + $0x94] ss:$8 sps:$4 sm:$0xff]   ;;  %v13385_v32 = vld [vmem:[%s14674_s9 + $0x90] ss:$8 sps:$4 sm:$0xff]  }
  0x3f   :  { %1731 = vmatpush1.bf16.msra.mxu0 %v13364_v6  ;;  %v334_v22 = vsel %vm321_vm0, %v323_v16, %v333_v17  ;;  %539 = vst [vmem:[#allocation2 + $0x8] sm:$0xfe] %v323_v16  ;;  %v331_v24 = vrot.slane %v186_v20, 7  ;;  %538 = vst [vmem:[#allocation2] sm:$0xfe] %v322_v23  ;;  %v196_v37 = vld [vmem:[%s14669_s5 + $0x98] sm:$0xff] }
  0x40   :  { %1732 = vmatprep.subr.bf16.mxu0 %v13365_v7  ;;  %548 = vst [vmem:[#allocation2 + $0x50] sm:$0xff] %v334_v22  ;;  %v13380_v27 = vld [vmem:[%s14674_s9 + $0x84] ss:$8 sps:$4 sm:$0xff]   ;;  %v13382_v28 = vld [vmem:[%s14674_s9 + $0x80] ss:$8 sps:$4 sm:$0xff]   ;;  %v351_v40 = vrot.slane %v196_v37, 7 }
  0x41   :  { %v14861_v25 = vsel %vm321_vm0, %v322_v23, %v331_v24  ;;  %v13386_v33 = vld [vmem:[%s14674_s9 + $0xa4] ss:$8 sps:$4 sm:$0xff]   ;;  %v13388_v34 = vld [vmem:[%s14674_s9 + $0xa0] ss:$8 sps:$4 sm:$0xff]   ;;  %v13389_v35 = vld [vmem:[%s14674_s9 + $0xb4] ss:$8 sps:$4 sm:$0xff]  }
  0x42   :  { %547 = vst [vmem:[#allocation2 + $0x48] sm:$0xff] %v14861_v25  ;;  %v13391_v36 = vld [vmem:[%s14674_s9 + $0xb0] ss:$8 sps:$4 sm:$0xff]   ;;  %v205_v38 = vld [vmem:[%s14669_s5 + $0xe0] sm:$0xff]  ;;  %v352_v44 = vsel %vm321_vm0, %v333_v17, %v351_v40  ;;  %v13395_v51 = vld [vmem:[%s14674_s9 + $0xd4] ss:$8 sps:$4 sm:$0xff]  }
  0x43   :  { %1733 = vmatpush1.bf16.msra.mxu0 %v13367_v8  ;;  %v13392_v39 = vld [vmem:[%s14674_s9 + $0xc4] ss:$8 sps:$4 sm:$0xff]   ;;  %v369_v41 = vrot.slane %v205_v38, 7  ;;  %v195_v42 = vld [vmem:[%s14669_s5 + $0x90] sm:$0xff]  ;;  %v204_v43 = vld [vmem:[%s14669_s5 + $0xd8] sm:$0xff] }
  0x44   :  { %1734 = vmatprep.subr.bf16.mxu0 %v13368_v9  ;;  %v349_v46 = vrot.slane %v195_v42, 7  ;;  %v367_v47 = vrot.slane %v204_v43, 7  ;;  %v13394_v48 = vld [vmem:[%s14674_s9 + $0xc0] ss:$8 sps:$4 sm:$0xff]   ;;  %v180_v49 = vld [vmem:[%s14669_s5 + $0x18] sm:$0xff]  ;;  %v179_v56 = vld [vmem:[%s14669_s5 + $0x10] sm:$0xff] }
  0x45   :  { %v370_v45 = vsel %vm321_vm0, %v351_v40, %v369_v41  ;;  %575 = vst [vmem:[#allocation2 + $0x128] sm:$0x1] %v369_v41  ;;  %v189_v50 = vld [vmem:[%s14669_s5 + $0x60] sm:$0xff]  ;;  %v325_v54 = vrot.slane %v180_v49, 7  ;;  %v188_v57 = vld [vmem:[%s14669_s5 + $0x58] sm:$0xff]  ;;  %v324_v59 = vrot.slane %v179_v56, 7 }
  0x46   :  { %v629_v29 = vld [vmem:[#allocation2 + $0x8] sm:$0xff]  ;;  %v350_v52 = vsel %vm321_vm0, %v331_v24, %v349_v46  ;;  %v368_v53 = vsel %vm321_vm0, %v349_v46, %v367_v47  ;;  %574 = vst [vmem:[#allocation2 + $0x120] sm:$0x1] %v367_v47  ;;  %v337_v55 = vrot.slane %v189_v50, 7  ;;  %v335_v60 = vrot.slane %v188_v57, 7  ;;  %v628_v4 = vld [vmem:[#allocation2] sm:$0xff] }
  0x47   :  { %1735 = vmatpush1.bf16.msra.mxu0 %v13370_v10  ;;  %v665_v31 = vpack.c.bf16 %v334_v22, %v629_v29  ;;  %541 = vst [vmem:[#allocation2 + $0x18] sm:$0xfe] %v325_v54  ;;  %v13397_v61 = vld [vmem:[%s14674_s9 + $0xd0] ss:$8 sps:$4 sm:$0xff]   ;;  %v13398_v62 = vld [vmem:[%s14674_s9 + $0xe4] ss:$8 sps:$4 sm:$0xff]   ;;  %v664_v6 = vpack.c.bf16 %v14861_v25, %v628_v4  ;;  %v14901_v8 = vpack.c.bf16 %v370_v45, %v352_v44 }
  0x48   :  { %1736 = vmatprep.subr.bf16.mxu0 %v13371_v11  ;;  %v338_v58 = vsel %vm321_vm0, %v325_v54, %v337_v55  ;;  %v14892_v63 = vsel %vm321_vm0, %v324_v59, %v335_v60  ;;  %540 = vst [vmem:[#allocation2 + $0x10] sm:$0xfe] %v324_v59  ;;  %v13400_v0 = vld [vmem:[%s14674_s9 + $0xe0] ss:$8 sps:$4 sm:$0xff]   ;;  %v13401_v1 = vld [vmem:[%s14674_s9 + $0xf4] ss:$8 sps:$4 sm:$0xff]   ;;  %v14909_v15 = vpack.c.bf16 %v368_v53, %v350_v52 }
  0x49   :  { %1758 = vmatprep.mubr.bf16.mxu0 %v665_v31  ;;  %550 = vst [vmem:[#allocation2 + $0x60] sm:$0xff] %v338_v58  ;;  %549 = vst [vmem:[#allocation2 + $0x58] sm:$0xff] %v14892_v63  ;;  %v13403_v3 = vld [vmem:[%s14674_s9 + $0xf0] ss:$8 sps:$4 sm:$0xff]   ;;  %v13406_v5 = vld [vmem:[%s14674_s9 + $0x104] ss:$8 sps:$4 sm:$0xff]  }
  0x4a   :  { %v13404_v7 = vld [vmem:[%s14674_s9 + $0x100] ss:$8 sps:$4 sm:$0xff]   ;;  %v13409_v9 = vld [vmem:[%s14674_s9 + $0x114] ss:$8 sps:$4 sm:$0xff]   ;;  %v13407_v10 = vld [vmem:[%s14674_s9 + $0x110] ss:$8 sps:$4 sm:$0xff]  }
  0x4b   :  { %1737 = vmatpush1.bf16.msra.mxu0 %v13373_v12  ;;  %v13412_v11 = vld [vmem:[%s14674_s9 + $0x124] ss:$8 sps:$4 sm:$0xff]   ;;  %v207_v14 = vld [vmem:[%s14669_s5 + $0xf0] sm:$0xff]  ;;  %v13410_v19 = vld [vmem:[%s14674_s9 + $0x120] ss:$8 sps:$4 sm:$0xff]  }
  0x4c   :  { %1738 = vmatprep.subr.bf16.mxu0 %v13374_v13  ;;  %v198_v13 = vld [vmem:[%s14669_s5 + $0xa8] sm:$0xff]  ;;  %v373_v17 = vrot.slane %v207_v14, 7  ;;  %v13415_v23 = vld [vmem:[%s14674_s9 + $0x134] ss:$8 sps:$4 sm:$0xff]   ;;  %v13419_v43 = vld [vmem:[%s14674_s9 + $0x150] ss:$8 sps:$4 sm:$0xff]  }
  0x4d   :  { %v355_v16 = vrot.slane %v198_v13, 7  ;;  %v14926_v29 = vld [vmem:[%s14669_s5 + $0x70] sm:$0xff]  ;;  %v13418_v37 = vld [vmem:[%s14674_s9 + $0x144] ss:$8 sps:$4 sm:$0xff]   ;;  %v13416_v41 = vld [vmem:[%s14674_s9 + $0x140] ss:$8 sps:$4 sm:$0xff]  }
  0x4e   :  { %v631_v12 = vld [vmem:[#allocation2 + $0x18] sm:$0xff]  ;;  %577 = vst [vmem:[#allocation2 + $0x138] sm:$0x1] %v373_v17  ;;  %v13424_v44 = vld [vmem:[%s14674_s9 + $0x164] ss:$8 sps:$4 sm:$0xff]  }
  0x4f   :  { %1739 = vmatpush1.bf16.msra.mxu0 %v13376_v18  ;;  %v197_v18 = vld [vmem:[%s14669_s5 + $0xa0] sm:$0xff]  ;;  %v667_v20 = vpack.c.bf16 %v338_v58, %v631_v12  ;;  %v14916_v24 = vsel %vm321_vm0, %v337_v55, %v355_v16  ;;  %v14919_v25 = vsel %vm321_vm0, %v355_v16, %v373_v17  ;;  %v13421_v42 = vld [vmem:[%s14674_s9 + $0x154] ss:$8 sps:$4 sm:$0xff]   ;;  %v13425_v47 = vld [vmem:[%s14674_s9 + $0x170] ss:$8 sps:$4 sm:$0xff]  }
  0x50   :  { %1740 = vmatprep.subr.bf16.mxu0 %v13377_v21  ;;  %v206_v21 = vld [vmem:[%s14669_s5 + $0xe8] sm:$0xff]  ;;  %v353_v22 = vrot.slane %v197_v18, 7  ;;  %v13427_v46 = vld [vmem:[%s14674_s9 + $0x174] ss:$8 sps:$4 sm:$0xff]   ;;  %v13437_v55 = vld [vmem:[%s14674_s9 + $0x1b0] ss:$8 sps:$4 sm:$0xff]  }
  0x51   :  { %v13422_v45 = vld [vmem:[%s14674_s9 + $0x160] ss:$8 sps:$4 sm:$0xff]   ;;  %v13433_v50 = vld [vmem:[%s14674_s9 + $0x194] ss:$8 sps:$4 sm:$0xff]   ;;  %v13436_v52 = vld [vmem:[%s14674_s9 + $0x1a4] ss:$8 sps:$4 sm:$0xff]  }
  0x52   :  { %v13428_v49 = vld [vmem:[%s14674_s9 + $0x180] ss:$8 sps:$4 sm:$0xff]   ;;  %v13439_v54 = vld [vmem:[%s14674_s9 + $0x1b4] ss:$8 sps:$4 sm:$0xff]   ;;  %v13442_v56 = vld [vmem:[%s14674_s9 + $0x1c4] ss:$8 sps:$4 sm:$0xff]  }
  0x53   :  { %1741 = vmatpush1.bf16.msra.mxu0 %v13379_v26  ;;  %v371_v26 = vrot.slane %v206_v21, 7  ;;  %v13434_v53 = vld [vmem:[%s14674_s9 + $0x1a0] ss:$8 sps:$4 sm:$0xff]   ;;  %v13445_v58 = vld [vmem:[%s14674_s9 + $0x1d4] ss:$8 sps:$4 sm:$0xff]  }
  0x54   :  { %1742 = vmatprep.subr.bf16.mxu0 %v13380_v27  ;;  %v14922_v27 = vsel %vm321_vm0, %v335_v60, %v353_v22  ;;  %v13440_v57 = vld [vmem:[%s14674_s9 + $0x1c0] ss:$8 sps:$4 sm:$0xff]   ;;  %v13443_v59 = vld [vmem:[%s14674_s9 + $0x1d0] ss:$8 sps:$4 sm:$0xff]   ;;  %v13448_v60 = vld [vmem:[%s14674_s9 + $0x1e4] ss:$8 sps:$4 sm:$0xff]  }
  0x55   :  { %576 = vst [vmem:[#allocation2 + $0x130] sm:$0x1] %v371_v26  ;;  %v208_v4 = vld [vmem:[%s14669_s5 + $0xf8] sm:$0xff] }
  0x56   :  { %v13451_v12 = vld [vmem:[%s14674_s9 + $0x1f4] ss:$8 sps:$4 sm:$0xff]  }
  0x57   :  { %1743 = vmatpush1.bf16.msra.mxu0 %v13382_v28  ;;  %v182_v28 = vld [vmem:[%s14669_s5 + $0x28] sm:$0xff] }
  0x58   :  { %1744 = vmatprep.subr.bf16.mxu0 %v13383_v30  ;;  %v14930_v30 = vsel %vm321_vm0, %v353_v22, %v371_v26  ;;  %v327_v31 = vrot.slane %v182_v28, 7  ;;  %v13454_v22 = vld [vmem:[%s14674_s9 + $0x204] ss:$8 sps:$4 sm:$0xff]  }
  0x59   :  { %v193_v26 = vld [vmem:[%s14669_s5 + $0x80] sm:$0xff] }
  0x5a   :  { %543 = vst [vmem:[#allocation2 + $0x28] sm:$0xfe] %v327_v31  ;;  %v345_v28 = vrot.slane %v193_v26, 7  ;;  %v13491_v26 = vld [vmem:[%s14674_s9 + $0x2d0] ss:$8 sps:$4 sm:$0xff]  }
  0x5b   :  { %1745 = vmatpush1.bf16.msra.mxu0 %v13385_v32  ;;  %v341_v32 = vrot.slane %v14926_v29, 7  ;;  %v192_v29 = vld [vmem:[%s14669_s5 + $0x78] sm:$0xff] }
  0x5c   :  { %1746 = vmatprep.subr.bf16.mxu0 %v13386_v33  ;;  %v181_v33 = vld [vmem:[%s14669_s5 + $0x20] sm:$0xff] }
  0x5d   :  { %v14942_v38 = vsel %vm321_vm0, %v327_v31, %v341_v32 }
  0x5e   :  { %552 = vst [vmem:[#allocation2 + $0x70] sm:$0xff] %v14942_v38 }
  0x5f   :  { %1747 = vmatpush1.bf16.msra.mxu0 %v13388_v34  ;;  %v13413_v34 = vld [vmem:[%s14674_s9 + $0x130] ss:$8 sps:$4 sm:$0xff]  }
  0x60   :  { %1748 = vmatprep.subr.bf16.mxu0 %v13389_v35  ;;  %v14936_v35 = vld [vmem:[%s14669_s5 + $0x68] sm:$0xff] }
  0x63   :  { %1749 = vmatpush1.bf16.msra.mxu0 %v13391_v36  ;;  %v326_v36 = vrot.slane %v181_v33, 7  ;;  %v13452_v33 = vld [vmem:[%s14674_s9 + $0x200] ss:$8 sps:$4 sm:$0xff]  }
  0x64   :  { %1750 = vmatprep.subr.bf16.mxu0 %v13392_v39  ;;  %v339_v39 = vrot.slane %v14936_v35, 7 }
  0x65   :  { %542 = vst [vmem:[#allocation2 + $0x20] sm:$0xfe] %v326_v36 }
  0x66   :  { %v14949_v40 = vsel %vm321_vm0, %v326_v36, %v339_v39  ;;  %v13457_v36 = vld [vmem:[%s14674_s9 + $0x214] ss:$8 sps:$4 sm:$0xff]  }
  0x67   :  { %1751 = vmatpush1.bf16.msra.mxu0 %v13394_v48  ;;  %551 = vst [vmem:[#allocation2 + $0x68] sm:$0xff] %v14949_v40  ;;  %v13430_v48 = vld [vmem:[%s14674_s9 + $0x184] ss:$8 sps:$4 sm:$0xff]  }
  0x68   :  { %1752 = vmatprep.subr.bf16.mxu0 %v13395_v51  ;;  %v13431_v51 = vld [vmem:[%s14674_s9 + $0x190] ss:$8 sps:$4 sm:$0xff]  }
  0x6b   :  { %1753 = vmatpush1.bf16.msra.mxu0 %v13397_v61  ;;  %v200_v61 = vld [vmem:[%s14669_s5 + $0xb8] sm:$0xff] }
  0x6c   :  { %1754 = vmatprep.subr.bf16.mxu0 %v13398_v62  ;;  %v209_v62 = vld [vmem:[%s14669_s5 + $0x100] sm:$0xff] }
  0x6f   :  { %1755 = vmatpush1.bf16.msra.mxu0 %v13400_v0  ;;  %v359_v0 = vrot.slane %v200_v61, 7 }
  0x70   :  { %1756 = vmatprep.subr.bf16.mxu0 %v13401_v1  ;;  %v377_v1 = vrot.slane %v209_v62, 7 }
  0x71   :  { %v360_v13 = vsel %vm321_vm0, %v341_v32, %v359_v0  ;;  %v343_v32 = vrot.slane %v192_v29, 7  ;;  %v13494_v29 = vld [vmem:[%s14674_s9 + $0x2e0] ss:$8 sps:$4 sm:$0xff]  }
  0x72   :  { %v378_v14 = vsel %vm321_vm0, %v359_v0, %v377_v1  ;;  %579 = vst [vmem:[#allocation2 + $0x148] sm:$0x1] %v377_v1 }
  0x73   :  { %1757 = vmatpush1.bf16.msra.mxu0 %v13403_v3  ;;  %v199_v3 = vld [vmem:[%s14669_s5 + $0xb0] sm:$0xff]  ;;  %v14984_v17 = vpack.c.bf16 %v378_v14, %v360_v13  ;;  %v13484_v14 = vld [vmem:[%s14674_s9 + $0x2a4] ss:$8 sps:$4 sm:$0xff]  }
  0x74   :  { %1779 = vmatprep.subr.bf16.mxu0 %v13406_v5  ;;  %v184_v5 = vld [vmem:[%s14669_s5 + $0x38] sm:$0xff] }
  0x75   :  { %v13479_v13 = vld [vmem:[%s14674_s9 + $0x290] ss:$8 sps:$4 sm:$0xff]  }
  0x76   :  { %1759 = vmatmul.mubr.bf16.vlgmr.msra.gmra.mrb[0].mxu0 %v664_v6  ;;  %v357_v6 = vrot.slane %v199_v3, 7 }
  0x77   :  { %1780 = vmatpush1.bf16.msra.mxu0 %v13404_v7  ;;  %1768 = vmatprep.mubr.bf16.mxu0 %v14901_v8  ;;  %v375_v7 = vrot.slane %v208_v4, 7  ;;  %v13473_v4 = vld [vmem:[%s14674_s9 + $0x270] ss:$8 sps:$4 sm:$0xff]  }
  0x78   :  { %1781 = vmatprep.subr.bf16.mxu0 %v13409_v9  ;;  %v329_v9 = vrot.slane %v184_v5, 7  ;;  %v358_v18 = vsel %vm321_vm0, %v339_v39, %v357_v6  ;;  %v15016_v39 = vpack.c.bf16 %v14930_v30, %v14922_v27  ;;  %v13464_v27 = vld [vmem:[%s14674_s9 + $0x240] ss:$8 sps:$4 sm:$0xff]   ;;  %v13469_v30 = vld [vmem:[%s14674_s9 + $0x254] ss:$8 sps:$4 sm:$0xff]  }
  0x79   :  { %578 = vst [vmem:[#allocation2 + $0x140] sm:$0x1] %v375_v7  ;;  %v13478_v5 = vld [vmem:[%s14674_s9 + $0x284] ss:$8 sps:$4 sm:$0xff]  }
  0x7a   :  { %545 = vst [vmem:[#allocation2 + $0x38] sm:$0xfe] %v329_v9  ;;  %v15003_v35 = vsel %vm321_vm0, %v329_v9, %v345_v28  ;;  %v13476_v9 = vld [vmem:[%s14674_s9 + $0x280] ss:$8 sps:$4 sm:$0xff]  }
  0x7b   :  { %1782 = vmatpush1.bf16.msra.mxu0 %v13407_v10  ;;  %v183_v10 = vld [vmem:[%s14669_s5 + $0x30] sm:$0xff]  ;;  %554 = vst [vmem:[#allocation2 + $0x80] sm:$0xff] %v15003_v35 }
  0x7c   :  { %1783 = vmatprep.subr.bf16.mxu0 %v13412_v11  ;;  %v13446_v11 = vld [vmem:[%s14674_s9 + $0x1e0] ss:$8 sps:$4 sm:$0xff]   ;;  %v328_v16 = vrot.slane %v183_v10, 7  ;;  %v13481_v10 = vld [vmem:[%s14674_s9 + $0x294] ss:$8 sps:$4 sm:$0xff]  }
  0x7e   :  { %1769 = vmatmul.mubr.bf16.gmra.mrb[4].mxu0 %v14909_v15  ;;  %544 = vst [vmem:[#allocation2 + $0x30] sm:$0xfe] %v328_v16 }
  0x7f   :  { %1784 = vmatpush1.bf16.msra.mxu0 %v13410_v19  ;;  %1811 = vmatprep.mubr.bf16.mxu0 %v667_v20  ;;  %v376_v19 = vsel %vm321_vm0, %v357_v6, %v375_v7  ;;  %v13449_v20 = vld [vmem:[%s14674_s9 + $0x1f0] ss:$8 sps:$4 sm:$0xff]   ;;  %v15049_v6 = vld [vmem:[%s14669_s5 + $0x88] sm:$0xff] }
  0x80   :  { %1785 = vmatprep.subr.bf16.mxu0 %v13415_v23  ;;  %v14991_v21 = vpack.c.bf16 %v376_v19, %v358_v18  ;;  %v630_v23 = vld [vmem:[#allocation2 + $0x10] sm:$0xff]  ;;  %v347_v7 = vrot.slane %v15049_v6, 7 }
  0x81   :  { %v666_v31 = vpack.c.bf16 %v14892_v63, %v630_v23  ;;  %v13455_v63 = vld [vmem:[%s14674_s9 + $0x210] ss:$8 sps:$4 sm:$0xff]   ;;  %v13487_v18 = vld [vmem:[%s14674_s9 + $0x2b4] ss:$8 sps:$4 sm:$0xff]  }
  0x82   :  { %v13485_v19 = vld [vmem:[%s14674_s9 + $0x2b0] ss:$8 sps:$4 sm:$0xff]   ;;  %v13493_v23 = vld [vmem:[%s14674_s9 + $0x2d4] ss:$8 sps:$4 sm:$0xff]  }
  0x83   :  { %1786 = vmatpush1.bf16.msra.mxu0 %v13413_v34  ;;  %v15000_v34 = vpack.c.bf16 %v14919_v25, %v14916_v24  ;;  %v13460_v24 = vld [vmem:[%s14674_s9 + $0x224] ss:$8 sps:$4 sm:$0xff]   ;;  %v13533_v6 = vld [vmem:[%s14674_s9 + $0x3b0] ss:$8 sps:$4 sm:$0xff]  }
  0x84   :  { %1787 = vmatprep.subr.bf16.mxu0 %v13418_v37  ;;  %v15008_v37 = vsel %vm321_vm0, %v328_v16, %v343_v32  ;;  %v633_v25 = vld [vmem:[#allocation2 + $0x28] sm:$0xff] }
  0x85   :  { %553 = vst [vmem:[#allocation2 + $0x78] sm:$0xff] %v15008_v37  ;;  %v13482_v16 = vld [vmem:[%s14674_s9 + $0x2a0] ss:$8 sps:$4 sm:$0xff]  }
  0x87   :  { %1788 = vmatpush1.bf16.msra.mxu0 %v13416_v41  ;;  %v13458_v41 = vld [vmem:[%s14674_s9 + $0x220] ss:$8 sps:$4 sm:$0xff]  }
  0x88   :  { %1789 = vmatprep.subr.bf16.mxu0 %v13421_v42  ;;  %v13463_v42 = vld [vmem:[%s14674_s9 + $0x234] ss:$8 sps:$4 sm:$0xff]  }
  0x8b   :  { %1790 = vmatpush1.bf16.msra.mxu0 %v13419_v43  ;;  %v669_v43 = vpack.c.bf16 %v14942_v38, %v633_v25  ;;  %v13467_v38 = vld [vmem:[%s14674_s9 + $0x250] ss:$8 sps:$4 sm:$0xff]   ;;  %v13505_v25 = vld [vmem:[%s14674_s9 + $0x314] ss:$8 sps:$4 sm:$0xff]  }
  0x8c   :  { %1791 = vmatprep.subr.bf16.mxu0 %v13424_v44  ;;  %v13461_v44 = vld [vmem:[%s14674_s9 + $0x230] ss:$8 sps:$4 sm:$0xff]  }
  0x8f   :  { %1792 = vmatpush1.bf16.msra.mxu0 %v13422_v45  ;;  %v13466_v45 = vld [vmem:[%s14674_s9 + $0x244] ss:$8 sps:$4 sm:$0xff]  }
  0x90   :  { %1793 = vmatprep.subr.bf16.mxu0 %v13427_v46  ;;  %v13472_v46 = vld [vmem:[%s14674_s9 + $0x264] ss:$8 sps:$4 sm:$0xff]  }
  0x93   :  { %1794 = vmatpush1.bf16.msra.mxu0 %v13425_v47  ;;  %v202_v47 = vld [vmem:[%s14669_s5 + $0xc8] sm:$0xff] }
  0x94   :  { %1795 = vmatprep.subr.bf16.mxu0 %v13430_v48  ;;  %v211_v48 = vld [vmem:[%s14669_s5 + $0x110] sm:$0xff] }
  0x97   :  { %1796 = vmatpush1.bf16.msra.mxu0 %v13428_v49  ;;  %v363_v49 = vrot.slane %v202_v47, 7  ;;  %v13515_v47 = vld [vmem:[%s14674_s9 + $0x350] ss:$8 sps:$4 sm:$0xff]  }
  0x98   :  { %1797 = vmatprep.subr.bf16.mxu0 %v13433_v50  ;;  %v381_v50 = vrot.slane %v211_v48, 7  ;;  %v203_v48 = vld [vmem:[%s14669_s5 + $0xd0] sm:$0xff] }
  0x9a   :  { %581 = vst [vmem:[#allocation2 + $0x158] sm:$0x1] %v381_v50 }
  0x9b   :  { %1798 = vmatpush1.bf16.msra.mxu0 %v13431_v51  ;;  %v201_v51 = vld [vmem:[%s14669_s5 + $0xc0] sm:$0xff] }
  0x9c   :  { %1799 = vmatprep.subr.bf16.mxu0 %v13436_v52  ;;  %v210_v52 = vld [vmem:[%s14669_s5 + $0x108] sm:$0xff] }
  0x9f   :  { %1800 = vmatpush1.bf16.msra.mxu0 %v13434_v53  ;;  %v361_v53 = vrot.slane %v201_v51, 7 }
  0xa0   :  { %1801 = vmatprep.subr.bf16.mxu0 %v13439_v54  ;;  %v379_v54 = vrot.slane %v210_v52, 7  ;;  %v13518_v52 = vld [vmem:[%s14674_s9 + $0x360] ss:$8 sps:$4 sm:$0xff]  }
  0xa1   :  { %v362_v0 = vsel %vm321_vm0, %v343_v32, %v361_v53  ;;  %v13497_v32 = vld [vmem:[%s14674_s9 + $0x2f0] ss:$8 sps:$4 sm:$0xff]  }
  0xa2   :  { %v380_v1 = vsel %vm321_vm0, %v361_v53, %v379_v54  ;;  %580 = vst [vmem:[#allocation2 + $0x150] sm:$0x1] %v379_v54  ;;  %v13523_v53 = vld [vmem:[%s14674_s9 + $0x374] ss:$8 sps:$4 sm:$0xff]  }
  0xa3   :  { %1802 = vmatpush1.bf16.msra.mxu0 %v13437_v55  ;;  %v142_v55 = vlaneseq  ;;  %v15042_v3 = vpack.c.bf16 %v380_v1, %v362_v0  ;;  %v13527_v0 = vld [vmem:[%s14674_s9 + $0x390] ss:$8 sps:$4 sm:$0xff]   ;;  %v13532_v1 = vld [vmem:[%s14674_s9 + $0x3a4] ss:$8 sps:$4 sm:$0xff]  }
  0xa4   :  { %1803 = vmatprep.subr.bf16.mxu0 %v13442_v56  ;;  %v185_v56 = vld [vmem:[%s14669_s5 + $0x40] sm:$0xff] }
  0xa5   :  { %v330_v61 = vrot.slane %v185_v56, 7  ;;  %vm144_vm1 = vcmp.lt.s32.totalorder %v142_v55, 128 }
  0xa6   :  { %147 = vst.msk [vmem:[#allocation2 + $0x40] ss:$8 sm:$0x1] %vm144_vm1, %v14657_v2  ;;  %153 = vst.msk [vmem:[#allocation2 + $0x1a8] ss:$8 sm:$0x1] %vm144_vm1, %v14657_v2 }
  0xa7   :  { %1804 = vmatpush1.bf16.msra.mxu0 %v13440_v57  ;;  %v13470_v57 = vld [vmem:[%s14674_s9 + $0x260] ss:$8 sps:$4 sm:$0xff]   ;;  %546 = vst [vmem:[#allocation2 + $0x40] sm:$0xfe] %v330_v61 }
  0xa8   :  { %1805 = vmatprep.subr.bf16.mxu0 %v13445_v58  ;;  %v13475_v58 = vld [vmem:[%s14674_s9 + $0x274] ss:$8 sps:$4 sm:$0xff]  }
  0xab   :  { %1806 = vmatpush1.bf16.msra.mxu0 %v13443_v59  ;;  %v364_v59 = vsel %vm321_vm0, %v345_v28, %v363_v49  ;;  %v13496_v28 = vld [vmem:[%s14674_s9 + $0x2e4] ss:$8 sps:$4 sm:$0xff]  }
  0xac   :  { %1807 = vmatprep.subr.bf16.mxu0 %v13448_v60  ;;  %v382_v60 = vsel %vm321_vm0, %v363_v49, %v381_v50  ;;  %v212_v49 = vld [vmem:[%s14669_s5 + $0x118] sm:$0xff]  ;;  %v365_v50 = vrot.slane %v203_v48, 7 }
  0xad   :  { %v15037_v62 = vpack.c.bf16 %v382_v60, %v364_v59  ;;  %v383_v51 = vrot.slane %v212_v49, 7  ;;  %v13526_v59 = vld [vmem:[%s14674_s9 + $0x384] ss:$8 sps:$4 sm:$0xff]   ;;  %v13524_v60 = vld [vmem:[%s14674_s9 + $0x380] ss:$8 sps:$4 sm:$0xff]  }
  0xae   :  { %v366_v54 = vsel %vm321_vm0, %v347_v7, %v365_v50 }
  0xaf   :  { %1808 = vmatpush1.bf16.msra.mxu0 %v13446_v11  ;;  %v15057_v11 = vsel %vm321_vm0, %v330_v61, %v347_v7  ;;  %v384_v56 = vsel %vm321_vm0, %v365_v50, %v383_v51  ;;  %582 = vst [vmem:[#allocation2 + $0x160] sm:$0x1] %v383_v51  ;;  %v13529_v61 = vld [vmem:[%s14674_s9 + $0x394] ss:$8 sps:$4 sm:$0xff]   ;;  %v13538_v7 = vld [vmem:[%s14674_s9 + $0x3c4] ss:$8 sps:$4 sm:$0xff]  }
  0xb0   :  { %1809 = vmatprep.subr.bf16.mxu0 %v13451_v12  ;;  %v14658_v12 = vmov 0   ;;  %555 = vst [vmem:[#allocation2 + $0x88] sm:$0xff] %v15057_v11  ;;  %v14583_v50 = vld [vmem:[#allocation2 + $0x48] sm:$0xff] }
  0xb1   :  { %3392 = vmatprep.mubr.bf16.mxu1 %v14658_v12 }
  0xb3   :  { %1810 = vmatpush1.bf16.msra.mxu0 %v13449_v20  ;;  %v13490_v20 = vld [vmem:[%s14674_s9 + $0x2c4] ss:$8 sps:$4 sm:$0xff]  }
  0xb4   :  { %1832 = vmatprep.subr.bf16.mxu0 %v13454_v22  ;;  %v13488_v22 = vld [vmem:[%s14674_s9 + $0x2c0] ss:$8 sps:$4 sm:$0xff]  }
  0xb6   :  { %1812 = vmatmul.mubr.bf16.vlgmr.msra.gmra.mrb[0].mxu0 %v666_v31  ;;  %v13499_v31 = vld [vmem:[%s14674_s9 + $0x2f4] ss:$8 sps:$4 sm:$0xff]  }
  0xb7   :  { %1833 = vmatpush1.bf16.msra.mxu0 %v13452_v33  ;;  %1821 = vmatprep.mubr.bf16.mxu0 %v15000_v34  ;;  %v13502_v33 = vld [vmem:[%s14674_s9 + $0x304] ss:$8 sps:$4 sm:$0xff]  }
  0xb8   :  { %1834 = vmatprep.subr.bf16.mxu0 %v13457_v36  ;;  %v632_v36 = vld [vmem:[#allocation2 + $0x20] sm:$0xff] }
  0xbb   :  { %1835 = vmatpush1.bf16.msra.mxu0 %v13455_v63  ;;  %v668_v63 = vpack.c.bf16 %v14949_v40, %v632_v36  ;;  %v13511_v40 = vld [vmem:[%s14674_s9 + $0x334] ss:$8 sps:$4 sm:$0xff]   ;;  %v13562_v36 = vld [vmem:[%s14674_s9 + $0x444] ss:$8 sps:$4 sm:$0xff]  }
  0xbc   :  { %1836 = vmatprep.subr.bf16.mxu0 %v13460_v24  ;;  %v13500_v24 = vld [vmem:[%s14674_s9 + $0x300] ss:$8 sps:$4 sm:$0xff]  }
  0xbe   :  { %1822 = vmatmul.mubr.bf16.gmra.mrb[4].mxu0 %v15016_v39 }
  0xbf   :  { %1837 = vmatpush1.bf16.msra.mxu0 %v13458_v41  ;;  %1864 = vmatprep.mubr.bf16.mxu0 %v669_v43  ;;  %v13503_v41 = vld [vmem:[%s14674_s9 + $0x310] ss:$8 sps:$4 sm:$0xff]  }
  0xc0   :  { %1838 = vmatprep.subr.bf16.mxu0 %v13463_v42  ;;  %v13508_v42 = vld [vmem:[%s14674_s9 + $0x324] ss:$8 sps:$4 sm:$0xff]   ;;  %v635_v43 = vld [vmem:[#allocation2 + $0x38] sm:$0xff] }
  0xc3   :  { %1839 = vmatpush1.bf16.msra.mxu0 %v13461_v44  ;;  %v13506_v44 = vld [vmem:[%s14674_s9 + $0x320] ss:$8 sps:$4 sm:$0xff]  }
  0xc4   :  { %1840 = vmatprep.subr.bf16.mxu0 %v13466_v45  ;;  %v671_v45 = vpack.c.bf16 %v15003_v35, %v635_v43  ;;  %v13520_v35 = vld [vmem:[%s14674_s9 + $0x364] ss:$8 sps:$4 sm:$0xff]   ;;  %v14582_v43 = vld [vmem:[#allocation2 + $0x50] sm:$0xff] }
  0xc7   :  { %1841 = vmatpush1.bf16.msra.mxu0 %v13464_v27  ;;  %v13509_v27 = vld [vmem:[%s14674_s9 + $0x330] ss:$8 sps:$4 sm:$0xff]  }
  0xc8   :  { %1842 = vmatprep.subr.bf16.mxu0 %v13469_v30  ;;  %v13514_v30 = vld [vmem:[%s14674_s9 + $0x344] ss:$8 sps:$4 sm:$0xff]  }
  0xcb   :  { %1843 = vmatpush1.bf16.msra.mxu0 %v13467_v38  ;;  %v13512_v38 = vld [vmem:[%s14674_s9 + $0x340] ss:$8 sps:$4 sm:$0xff]  }
  0xcc   :  { %1844 = vmatprep.subr.bf16.mxu0 %v13472_v46  ;;  %v13517_v46 = vld [vmem:[%s14674_s9 + $0x354] ss:$8 sps:$4 sm:$0xff]  }
  0xcf   :  { %1845 = vmatpush1.bf16.msra.mxu0 %v13470_v57  ;;  %v15099_v57 = vpack.c.bf16 %v384_v56, %v366_v54  ;;  %v2012_v54 = vshll.u32 %v14901_v8, 16  ;;  %v13575_v56 = vld [vmem:[%s14679_s13 + $0x10] ss:$8 sps:$4 sm:$0xff]  }
  0xd0   :  { %1846 = vmatprep.subr.bf16.mxu0 %v13475_v58  ;;  %v13521_v58 = vld [vmem:[%s14674_s9 + $0x370] ss:$8 sps:$4 sm:$0xff]  }
  0xd3   :  { %1847 = vmatpush1.bf16.msra.mxu0 %v13473_v4  ;;  %v13530_v4 = vld [vmem:[%s14674_s9 + $0x3a0] ss:$8 sps:$4 sm:$0xff]  }
  0xd4   :  { %1848 = vmatprep.subr.bf16.mxu0 %v13478_v5  ;;  %v13535_v5 = vld [vmem:[%s14674_s9 + $0x3b4] ss:$8 sps:$4 sm:$0xff]  }
  0xd7   :  { %1849 = vmatpush1.bf16.msra.mxu0 %v13476_v9  ;;  %v13536_v9 = vld [vmem:[%s14674_s9 + $0x3c0] ss:$8 sps:$4 sm:$0xff]  }
  0xd8   :  { %1850 = vmatprep.subr.bf16.mxu0 %v13481_v10  ;;  %v13541_v10 = vld [vmem:[%s14674_s9 + $0x3d4] ss:$8 sps:$4 sm:$0xff]  }
  0xdb   :  { %1851 = vmatpush1.bf16.msra.mxu0 %v13479_v13  ;;  %v13539_v13 = vld [vmem:[%s14674_s9 + $0x3d0] ss:$8 sps:$4 sm:$0xff]  }
  0xdc   :  { %1852 = vmatprep.subr.bf16.mxu0 %v13484_v14  ;;  %v13544_v14 = vld [vmem:[%s14674_s9 + $0x3e4] ss:$8 sps:$4 sm:$0xff]  }
  0xdf   :  { %1853 = vmatpush1.bf16.msra.mxu0 %v13482_v16  ;;  %v13542_v16 = vld [vmem:[%s14674_s9 + $0x3e0] ss:$8 sps:$4 sm:$0xff]  }
  0xe0   :  { %1854 = vmatprep.subr.bf16.mxu0 %v13487_v18  ;;  %v13547_v18 = vld [vmem:[%s14674_s9 + $0x3f4] ss:$8 sps:$4 sm:$0xff]  }
  0xe3   :  { %1855 = vmatpush1.bf16.msra.mxu0 %v13485_v19  ;;  %v13545_v19 = vld [vmem:[%s14674_s9 + $0x3f0] ss:$8 sps:$4 sm:$0xff]  }
  0xe4   :  { %1856 = vmatprep.subr.bf16.mxu0 %v13490_v20  ;;  %v13550_v20 = vld [vmem:[%s14674_s9 + $0x404] ss:$8 sps:$4 sm:$0xff]  }
  0xe7   :  { %1857 = vmatpush1.bf16.msra.mxu0 %v13488_v22  ;;  %v634_v22 = vld [vmem:[#allocation2 + $0x30] sm:$0xff] }
  0xe8   :  { %1858 = vmatprep.subr.bf16.mxu0 %v13493_v23  ;;  %v670_v23 = vpack.c.bf16 %v15008_v37, %v634_v22  ;;  %v13559_v37 = vld [vmem:[%s14674_s9 + $0x434] ss:$8 sps:$4 sm:$0xff]   ;;  %v13599_v22 = vld [vmem:[%s14679_s13 + $0x90] ss:$8 sps:$4 sm:$0xff]  }
  0xeb   :  { %1859 = vmatpush1.bf16.msra.mxu0 %v13491_v26  ;;  %v13548_v26 = vld [vmem:[%s14674_s9 + $0x400] ss:$8 sps:$4 sm:$0xff]  }
  0xec   :  { %1860 = vmatprep.subr.bf16.mxu0 %v13496_v28  ;;  %v13553_v28 = vld [vmem:[%s14674_s9 + $0x414] ss:$8 sps:$4 sm:$0xff]  }
  0xef   :  { %1861 = vmatpush1.bf16.msra.mxu0 %v13494_v29  ;;  %v13551_v29 = vld [vmem:[%s14674_s9 + $0x410] ss:$8 sps:$4 sm:$0xff]  }
  0xf0   :  { %1862 = vmatprep.subr.bf16.mxu0 %v13499_v31  ;;  %v13556_v31 = vld [vmem:[%s14674_s9 + $0x424] ss:$8 sps:$4 sm:$0xff]  }
  0xf3   :  { %1863 = vmatpush1.bf16.msra.mxu0 %v13497_v32  ;;  %v13554_v32 = vld [vmem:[%s14674_s9 + $0x420] ss:$8 sps:$4 sm:$0xff]  }
  0xf4   :  { %1885 = vmatprep.subr.bf16.mxu0 %v13502_v33  ;;  %v13557_v33 = vld [vmem:[%s14674_s9 + $0x430] ss:$8 sps:$4 sm:$0xff]  }
  0xf6   :  { %1865 = vmatmul.mubr.bf16.vlgmr.msra.gmra.mrb[0].mxu0 %v668_v63  ;;  %v13560_v63 = vld [vmem:[%s14674_s9 + $0x440] ss:$8 sps:$4 sm:$0xff]  }
  0xf7   :  { %1886 = vmatpush1.bf16.msra.mxu0 %v13500_v24  ;;  %1874 = vmatprep.mubr.bf16.mxu0 %v14984_v17  ;;  %v13565_v24 = vld [vmem:[%s14674_s9 + $0x454] ss:$8 sps:$4 sm:$0xff]  }
  0xf8   :  { %1887 = vmatprep.subr.bf16.mxu0 %v13505_v25  ;;  %v683_v25 = vld [vmem:[#allocation2 + $0x8] sm:$0xfe] }
  0xfb   :  { %1888 = vmatpush1.bf16.msra.mxu0 %v13503_v41  ;;  %v13563_v41 = vld [vmem:[%s14674_s9 + $0x450] ss:$8 sps:$4 sm:$0xff]  }
  0xfc   :  { %1889 = vmatprep.subr.bf16.mxu0 %v13508_v42  ;;  %v13568_v42 = vld [vmem:[%s14674_s9 + $0x464] ss:$8 sps:$4 sm:$0xff]  }
  0xfe   :  { %1875 = vmatmul.mubr.bf16.gmra.mrb[4].mxu0 %v14991_v21 }
  0xff   :  { %1890 = vmatpush1.bf16.msra.mxu0 %v13506_v44  ;;  %1917 = vmatprep.mubr.bf16.mxu0 %v671_v45  ;;  %v701_v44 = vpack.c.bf16 %v14582_v43, %v683_v25  ;;  %v13571_v45 = vld [vmem:[%s14674_s9 + $0x474] ss:$8 sps:$4 sm:$0xff]  }
 0x100   :  { %1891 = vmatprep.subr.bf16.mxu0 %v13511_v40  ;;  %v13566_v40 = vld [vmem:[%s14674_s9 + $0x460] ss:$8 sps:$4 sm:$0xff]  }
 0x103   :  { %1892 = vmatpush1.bf16.msra.mxu0 %v13509_v27  ;;  %v682_v27 = vld [vmem:[#allocation2] sm:$0xfe] }
 0x104   :  { %1893 = vmatprep.subr.bf16.mxu0 %v13514_v30  ;;  %v2007_v30 = vshll.u32 %v701_v44, 16  ;;  %v15140_v51 = vpack.c.bf16 %v14583_v50, %v682_v27  ;;  %v13622_v50 = vld [vmem:[%s14679_s13 + $0x104] ss:$8 sps:$4 sm:$0xff]  }
 0x106   :  { %v2009_v49 = vrot.slane %v2007_v30, 1  ;;  %v13614_v30 = vld [vmem:[%s14679_s13 + $0xe0] ss:$8 sps:$4 sm:$0xff]  }
 0x107   :  { %1894 = vmatpush1.bf16.msra.mxu0 %v13512_v38  ;;  %v13569_v38 = vld [vmem:[%s14674_s9 + $0x470] ss:$8 sps:$4 sm:$0xff]  }
 0x108   :  { %1895 = vmatprep.subr.bf16.mxu0 %v13517_v46  ;;  %v636_v46 = vld [vmem:[#allocation2 + $0x40] sm:$0xff] }
 0x109   :  { %v672_v48 = vpack.c.bf16 %v15057_v11, %v636_v46  ;;  %v15149_v11 = vrot.slane %v2012_v54, 1  ;;  %v691_v46 = vld [vmem:[#allocation2 + $0x120] sm:$0x1] }
 0x10b   :  { %1896 = vmatpush1.bf16.msra.mxu0 %v13515_v47  ;;  %v13574_v47 = vld [vmem:[%s14679_s13 + $0x4] ss:$8 sps:$4 sm:$0xff]  }
 0x10c   :  { %1897 = vmatprep.subr.bf16.mxu0 %v13520_v35  ;;  %v2005_v35 = vshrl.u32 %v701_v44, 16  ;;  %v1993_v44 = vshrl.u32 %v15140_v51, 16 }
 0x10f   :  { %1898 = vmatpush1.bf16.msra.mxu0 %v13518_v52  ;;  %v13572_v52 = vld [vmem:[%s14679_s13] ss:$8 sps:$4 sm:$0xff]  }
 0x110   :  { %1899 = vmatprep.subr.bf16.mxu0 %v13523_v53  ;;  %v13577_v53 = vld [vmem:[%s14679_s13 + $0x14] ss:$8 sps:$4 sm:$0xff]  }
 0x113   :  { %1900 = vmatpush1.bf16.msra.mxu0 %v13521_v58  ;;  %v13580_v58 = vld [vmem:[%s14679_s13 + $0x24] ss:$8 sps:$4 sm:$0xff]  }
 0x114   :  { %1901 = vmatprep.subr.bf16.mxu0 %v13526_v59  ;;  %v1995_v59 = vshll.u32 %v15140_v51, 16 }
 0x117   :  { %1902 = vmatpush1.bf16.msra.mxu0 %v13524_v60  ;;  %v2010_v60 = vor.u32 %v2009_v49, %v2005_v35  ;;  %v13617_v49 = vld [vmem:[%s14679_s13 + $0xf0] ss:$8 sps:$4 sm:$0xff]  }
 0x118   :  { %1903 = vmatprep.subr.bf16.mxu0 %v13529_v61  ;;  %v13578_v61 = vld [vmem:[%s14679_s13 + $0x20] ss:$8 sps:$4 sm:$0xff]  }
 0x11b   :  { %1904 = vmatpush1.bf16.msra.mxu0 %v13527_v0  ;;  %v13583_v0 = vld [vmem:[%s14679_s13 + $0x34] ss:$8 sps:$4 sm:$0xff]  }
 0x11c   :  { %1905 = vmatprep.subr.bf16.mxu0 %v13532_v1  ;;  %v2015_v1 = vsel %vm1991_vm2, %v2010_v60, %v15149_v11  ;;  %v2100_v60 = vshrl.u32 %v14909_v15, 16 }
 0x11f   :  { %1906 = vmatpush1.bf16.msra.mxu0 %v13530_v4  ;;  %v13581_v4 = vld [vmem:[%s14679_s13 + $0x30] ss:$8 sps:$4 sm:$0xff]  }
 0x120   :  { %1907 = vmatprep.subr.bf16.mxu0 %v13535_v5  ;;  %v13586_v5 = vld [vmem:[%s14679_s13 + $0x44] ss:$8 sps:$4 sm:$0xff]  }
 0x123   :  { %1908 = vmatpush1.bf16.msra.mxu0 %v13533_v6  ;;  %v13584_v6 = vld [vmem:[%s14679_s13 + $0x40] ss:$8 sps:$4 sm:$0xff]  }
 0x124   :  { %1909 = vmatprep.subr.bf16.mxu0 %v13538_v7  ;;  %v13589_v7 = vld [vmem:[%s14679_s13 + $0x54] ss:$8 sps:$4 sm:$0xff]  }
 0x127   :  { %1910 = vmatpush1.bf16.msra.mxu0 %v13536_v9  ;;  %v13587_v9 = vld [vmem:[%s14679_s13 + $0x50] ss:$8 sps:$4 sm:$0xff]  }
 0x128   :  { %1911 = vmatprep.subr.bf16.mxu0 %v13541_v10  ;;  %v13592_v10 = vld [vmem:[%s14679_s13 + $0x64] ss:$8 sps:$4 sm:$0xff]  }
 0x12b   :  { %1912 = vmatpush1.bf16.msra.mxu0 %v13539_v13  ;;  %v13590_v13 = vld [vmem:[%s14679_s13 + $0x60] ss:$8 sps:$4 sm:$0xff]  }
 0x12c   :  { %1913 = vmatprep.subr.bf16.mxu0 %v13544_v14  ;;  %v13595_v14 = vld [vmem:[%s14679_s13 + $0x74] ss:$8 sps:$4 sm:$0xff]  }
 0x12f   :  { %1914 = vmatpush1.bf16.msra.mxu0 %v13542_v16  ;;  %v13593_v16 = vld [vmem:[%s14679_s13 + $0x70] ss:$8 sps:$4 sm:$0xff]  }
 0x130   :  { %1915 = vmatprep.subr.bf16.mxu0 %v13547_v18  ;;  %v13598_v18 = vld [vmem:[%s14679_s13 + $0x84] ss:$8 sps:$4 sm:$0xff]  }
 0x133   :  { %1916 = vmatpush1.bf16.msra.mxu0 %v13545_v19  ;;  %v13596_v19 = vld [vmem:[%s14679_s13 + $0x80] ss:$8 sps:$4 sm:$0xff]  }
 0x134   :  { %1938 = vmatprep.subr.bf16.mxu0 %v13550_v20  ;;  %v13601_v20 = vld [vmem:[%s14679_s13 + $0x94] ss:$8 sps:$4 sm:$0xff]  }
 0x136   :  { %1918 = vmatmul.mubr.bf16.vlgmr.msra.gmra.mrb[0].mxu0 %v670_v23  ;;  %v13604_v23 = vld [vmem:[%s14679_s13 + $0xa4] ss:$8 sps:$4 sm:$0xff]  }
 0x137   :  { %1939 = vmatpush1.bf16.msra.mxu0 %v13548_v26  ;;  %1927 = vmatprep.mubr.bf16.mxu0 %v15037_v62  ;;  %v13602_v26 = vld [vmem:[%s14679_s13 + $0xa0] ss:$8 sps:$4 sm:$0xff]  }
 0x138   :  { %1940 = vmatprep.subr.bf16.mxu0 %v13553_v28  ;;  %v13607_v28 = vld [vmem:[%s14679_s13 + $0xb4] ss:$8 sps:$4 sm:$0xff]  }
 0x13b   :  { %1941 = vmatpush1.bf16.msra.mxu0 %v13551_v29  ;;  %v13605_v29 = vld [vmem:[%s14679_s13 + $0xb0] ss:$8 sps:$4 sm:$0xff]  }
 0x13c   :  { %1942 = vmatprep.subr.bf16.mxu0 %v13556_v31  ;;  %v13610_v31 = vld [vmem:[%s14679_s13 + $0xc4] ss:$8 sps:$4 sm:$0xff]  }
 0x13e   :  { %1928 = vmatmul.mubr.bf16.gmra.mrb[4].mxu0 %v15042_v3 }
 0x13f   :  { %1943 = vmatpush1.bf16.msra.mxu0 %v13554_v32  ;;  %1970 = vmatprep.mubr.bf16.mxu0 %v14658_v12  ;;  %v685_v32 = vld [vmem:[#allocation2 + $0x18] sm:$0xfe] }
 0x140   :  { %1944 = vmatprep.subr.bf16.mxu0 %v13559_v37  ;;  %v13608_v37 = vld [vmem:[%s14679_s13 + $0xc0] ss:$8 sps:$4 sm:$0xff]  }
 0x143   :  { %1945 = vmatpush1.bf16.msra.mxu0 %v13557_v33  ;;  %v13613_v33 = vld [vmem:[%s14679_s13 + $0xd4] ss:$8 sps:$4 sm:$0xff]  }
 0x144   :  { %1946 = vmatprep.subr.bf16.mxu0 %v13562_v36  ;;  %v692_v36 = vld [vmem:[#allocation2 + $0x128] sm:$0x1] }
 0x145   :  { %v710_v43 = vpack.c.bf16 %v692_v36, %v692_v36  ;;  %v13647_v36 = vld [vmem:[%s14679_s13 + $0x190] ss:$8 sps:$4 sm:$0xff]  }
 0x147   :  { %1947 = vmatpush1.bf16.msra.mxu0 %v13560_v63  ;;  %v2000_v63 = vshll.u32 %v14909_v15, 16  ;;  %v2112_v35 = vshll.u32 %v710_v43, 16  ;;  %v13658_v43 = vld [vmem:[%s14679_s13 + $0x1c4] ss:$8 sps:$4 sm:$0xff]  }
 0x148   :  { %1948 = vmatprep.subr.bf16.mxu0 %v13565_v24  ;;  %v14584_v24 = vld [vmem:[#allocation2 + $0x60] sm:$0xff] }
 0x149   :  { %v703_v25 = vpack.c.bf16 %v14584_v24, %v685_v32  ;;  %v13646_v32 = vld [vmem:[%s14679_s13 + $0x184] ss:$8 sps:$4 sm:$0xff]   ;;  %v13650_v24 = vld [vmem:[%s14679_s13 + $0x1a0] ss:$8 sps:$4 sm:$0xff]  }
 0x14b   :  { %1949 = vmatpush1.bf16.msra.mxu0 %v13563_v41  ;;  %v13611_v41 = vld [vmem:[%s14679_s13 + $0xd0] ss:$8 sps:$4 sm:$0xff]   ;;  %v2031_v27 = vshll.u32 %v703_v25, 16  ;;  %v2029_v54 = vshrl.u32 %v703_v25, 16  ;;  %v13655_v25 = vld [vmem:[%s14679_s13 + $0x1b4] ss:$8 sps:$4 sm:$0xff]  }
 0x14c   :  { %1950 = vmatprep.subr.bf16.mxu0 %v13568_v42  ;;  %v13616_v42 = vld [vmem:[%s14679_s13 + $0xe4] ss:$8 sps:$4 sm:$0xff]  }
 0x14f   :  { %1951 = vmatpush1.bf16.msra.mxu0 %v13566_v40  ;;  %v1997_v40 = vrot.slane %v1995_v59, 1 }
 0x150   :  { %1952 = vmatprep.subr.bf16.mxu0 %v13571_v45  ;;  %v2002_v45 = vrot.slane %v2000_v63, 1  ;;  %v13652_v63 = vld [vmem:[%s14679_s13 + $0x1a4] ss:$8 sps:$4 sm:$0xff]  }
 0x153   :  { %1953 = vmatpush1.bf16.msra.mxu0 %v13569_v38  ;;  %v13619_v38 = vld [vmem:[%s14679_s13 + $0xf4] ss:$8 sps:$4 sm:$0xff]  }
 0x154   :  { %2910 = vmatprep.subr.bf16.mxu0 %v13574_v47  ;;  %v2108_v47 = vshrl.u32 %v14901_v8, 16  ;;  %v13625_v8 = vld [vmem:[%s14679_s13 + $0x114] ss:$8 sps:$4 sm:$0xff]  }
 0x156   :  { %1971 = vmatmul.mubr.bf16.vlgmr.msra.gmra.mrb[0].mxu0 %v672_v48  ;;  %v1998_v48 = vor.u32 %v1997_v40, %v1993_v44  ;;  %v2110_v51 = vor.u32 %v2108_v47, %v15149_v11  ;;  %v687_v44 = vld [vmem:[#allocation2 + $0x28] sm:$0xfe] }
 0x157   :  { %2911 = vmatpush1.bf16.msra.mxu0 %v13572_v52  ;;  %1980 = vmatprep.mubr.bf16.mxu0 %v14658_v12  ;;  %v709_v52 = vpack.c.bf16 %v691_v46, %v691_v46  ;;  %v13656_v40 = vld [vmem:[%s14679_s13 + $0x1c0] ss:$8 sps:$4 sm:$0xff]   ;;  %v14586_v46 = vld [vmem:[#allocation2 + $0x70] sm:$0xff] }
 0x158   :  { %2912 = vmatprep.subr.bf16.mxu0 %v13577_v53  ;;  %v2114_v53 = vrot.slane %v2112_v35, 1  ;;  %v2003_v59 = vsel %vm1991_vm2, %v1998_v48, %v2002_v45  ;;  %v705_v47 = vpack.c.bf16 %v14586_v46, %v687_v44  ;;  %v13659_v48 = vld [vmem:[%s14679_s13 + $0x1d0] ss:$8 sps:$4 sm:$0xff]   ;;  %v13688_v46 = vld [vmem:[%s14679_s13 + $0x264] ss:$8 sps:$4 sm:$0xff]  }
 0x15a   :  { %v2115_v11 = vsel %vm1991_vm2, %v2110_v51, %v2114_v53  ;;  %v2055_v51 = vshll.u32 %v705_v47, 16 }
 0x15b   :  { %2913 = vmatpush1.bf16.msra.mxu0 %v13575_v56  ;;  %v2024_v56 = vshll.u32 %v15016_v39, 16 }
 0x15c   :  { %2914 = vmatprep.subr.bf16.mxu0 %v13580_v58  ;;  %v13620_v58 = vld [vmem:[%s14679_s13 + $0x100] ss:$8 sps:$4 sm:$0xff]  }
 0x15e   :  { %1981 = vmatmul.mubr.bf16.gmra.mrb[4].mxu0 %v15099_v57 }
 0x15f   :  { %2915 = vmatpush1.bf16.msra.mxu0 %v13578_v61  ;;  %2942 = vmatprep.mubr.bf16.mxu0 %v2015_v1  ;;  %v2104_v61 = vshll.u32 %v709_v52, 16  ;;  %v2036_v1 = vshll.u32 %v15000_v34, 16  ;;  %v2026_v52 = vrot.slane %v2024_v56, 1 }
 0x160   :  { %2916 = vmatprep.subr.bf16.mxu0 %v13583_v0  ;;  %v2033_v0 = vrot.slane %v2031_v27, 1 }
 0x162   :  { %v2034_v15 = vor.u32 %v2033_v0, %v2029_v54 }
 0x163   :  { %2917 = vmatpush1.bf16.msra.mxu0 %v13581_v4  ;;  %v13623_v4 = vld [vmem:[%s14679_s13 + $0x110] ss:$8 sps:$4 sm:$0xff]  }
 0x164   :  { %2918 = vmatprep.subr.bf16.mxu0 %v13586_v5  ;;  %v13628_v5 = vld [vmem:[%s14679_s13 + $0x124] ss:$8 sps:$4 sm:$0xff]  }
 0x167   :  { %2919 = vmatpush1.bf16.msra.mxu0 %v13584_v6  ;;  %v2102_v6 = vor.u32 %v2100_v60, %v2002_v45  ;;  %v14585_v45 = vld [vmem:[#allocation2 + $0x58] sm:$0xff]  ;;  %v2124_v60 = vshrl.u32 %v15000_v34, 16 }
 0x168   :  { %2920 = vmatprep.subr.bf16.mxu0 %v13589_v7  ;;  %v2106_v7 = vrot.slane %v2104_v61, 1  ;;  %v13673_v34 = vld [vmem:[%s14679_s13 + $0x214] ss:$8 sps:$4 sm:$0xff]  }
 0x16b   :  { %2921 = vmatpush1.bf16.msra.mxu0 %v13587_v9  ;;  %v15197_v9 = vrot.slane %v2036_v1, 1  ;;  %v13665_v1 = vld [vmem:[%s14679_s13 + $0x1f0] ss:$8 sps:$4 sm:$0xff]  }
 0x16c   :  { %2922 = vmatprep.subr.bf16.mxu0 %v13592_v10  ;;  %v13626_v10 = vld [vmem:[%s14679_s13 + $0x120] ss:$8 sps:$4 sm:$0xff]  }
 0x16d   :  { %v2126_v56 = vor.u32 %v2124_v60, %v15197_v9  ;;  %v14589_v60 = vld [vmem:[#allocation2 + $0x78] sm:$0xff] }
 0x16f   :  { %2923 = vmatpush1.bf16.msra.mxu0 %v13590_v13  ;;  %v13631_v13 = vld [vmem:[%s14679_s13 + $0x134] ss:$8 sps:$4 sm:$0xff]  }
 0x170   :  { %2924 = vmatprep.subr.bf16.mxu0 %v13595_v14  ;;  %v2107_v14 = vsel %vm1991_vm2, %v2102_v6, %v2106_v7  ;;  %v2053_v6 = vshrl.u32 %v705_v47, 16  ;;  %v2048_v7 = vshll.u32 %v14991_v21, 16 }
 0x172   :  { %v15256_v44 = vrot.slane %v2048_v7, 1  ;;  %v13692_v7 = vld [vmem:[%s14679_s13 + $0x280] ss:$8 sps:$4 sm:$0xff]  }
 0x173   :  { %2925 = vmatpush1.bf16.msra.mxu0 %v13593_v16  ;;  %v2039_v16 = vsel %vm1991_vm2, %v2034_v15, %v15197_v9  ;;  %v13668_v15 = vld [vmem:[%s14679_s13 + $0x200] ss:$8 sps:$4 sm:$0xff]  }
 0x174   :  { %2926 = vmatprep.subr.bf16.mxu0 %v13598_v18  ;;  %v13629_v18 = vld [vmem:[%s14679_s13 + $0x130] ss:$8 sps:$4 sm:$0xff]  }
 0x177   :  { %2927 = vmatpush1.bf16.msra.mxu0 %v13596_v19  ;;  %v13634_v19 = vld [vmem:[%s14679_s13 + $0x144] ss:$8 sps:$4 sm:$0xff]  }
 0x178   :  { %2928 = vmatprep.subr.bf16.mxu0 %v13601_v20  ;;  %v13632_v20 = vld [vmem:[%s14679_s13 + $0x140] ss:$8 sps:$4 sm:$0xff]  }
 0x17b   :  { %2929 = vmatpush1.bf16.msra.mxu0 %v13599_v22  ;;  %v13637_v22 = vld [vmem:[%s14679_s13 + $0x154] ss:$8 sps:$4 sm:$0xff]  }
 0x17c   :  { %2930 = vmatprep.subr.bf16.mxu0 %v13604_v23  ;;  %v13635_v23 = vld [vmem:[%s14679_s13 + $0x150] ss:$8 sps:$4 sm:$0xff]  }
 0x17f   :  { %2931 = vmatpush1.bf16.msra.mxu0 %v13602_v26  ;;  %v13640_v26 = vld [vmem:[%s14679_s13 + $0x164] ss:$8 sps:$4 sm:$0xff]  }
 0x180   :  { %2932 = vmatprep.subr.bf16.mxu0 %v13607_v28  ;;  %v13638_v28 = vld [vmem:[%s14679_s13 + $0x160] ss:$8 sps:$4 sm:$0xff]  }
 0x183   :  { %2933 = vmatpush1.bf16.msra.mxu0 %v13605_v29  ;;  %v13643_v29 = vld [vmem:[%s14679_s13 + $0x174] ss:$8 sps:$4 sm:$0xff]  }
 0x184   :  { %2934 = vmatprep.subr.bf16.mxu0 %v13610_v31  ;;  %v13641_v31 = vld [vmem:[%s14679_s13 + $0x170] ss:$8 sps:$4 sm:$0xff]  }
 0x187   :  { %2935 = vmatpush1.bf16.msra.mxu0 %v13608_v37  ;;  %v13644_v37 = vld [vmem:[%s14679_s13 + $0x180] ss:$8 sps:$4 sm:$0xff]  }
 0x188   :  { %2936 = vmatprep.subr.bf16.mxu0 %v13613_v33  ;;  %v13649_v33 = vld [vmem:[%s14679_s13 + $0x194] ss:$8 sps:$4 sm:$0xff]  }
 0x18b   :  { %2937 = vmatpush1.bf16.msra.mxu0 %v13611_v41  ;;  %v684_v41 = vld [vmem:[#allocation2 + $0x10] sm:$0xfe] }
 0x18c   :  { %2938 = vmatprep.subr.bf16.mxu0 %v13616_v42  ;;  %v13653_v42 = vld [vmem:[%s14679_s13 + $0x1b0] ss:$8 sps:$4 sm:$0xff]   ;;  %v702_v27 = vpack.c.bf16 %v14585_v45, %v684_v41 }
 0x18e   :  { %v2019_v35 = vshll.u32 %v702_v27, 16  ;;  %v2017_v53 = vshrl.u32 %v702_v27, 16  ;;  %v2072_v27 = vshll.u32 %v15042_v3, 16 }
 0x18f   :  { %2939 = vmatpush1.bf16.msra.mxu0 %v13614_v30  ;;  %v13661_v30 = vld [vmem:[%s14679_s13 + $0x1d4] ss:$8 sps:$4 sm:$0xff]  }
 0x190   :  { %2940 = vmatprep.subr.bf16.mxu0 %v13619_v38  ;;  %v694_v38 = vld [vmem:[#allocation2 + $0x138] sm:$0x1]  ;;  %v2021_v54 = vrot.slane %v2019_v35, 1 }
 0x192   :  { %v2022_v0 = vor.u32 %v2021_v54, %v2017_v53  ;;  %v13691_v53 = vld [vmem:[%s14679_s13 + $0x274] ss:$8 sps:$4 sm:$0xff]  }
 0x193   :  { %2941 = vmatpush1.bf16.msra.mxu0 %v13617_v49  ;;  %v13664_v49 = vld [vmem:[%s14679_s13 + $0x1e4] ss:$8 sps:$4 sm:$0xff]  }
 0x194   :  { %2963 = vmatprep.subr.bf16.mxu0 %v13622_v50  ;;  %v712_v50 = vpack.c.bf16 %v694_v38, %v694_v38 }
 0x196   :  { %2943 = vmatmul.mubr.bf16.vlgmr.msra.gmra.mrb[0].mxu0 %v2003_v59  ;;  %v13667_v59 = vld [vmem:[%s14679_s13 + $0x1f4] ss:$8 sps:$4 sm:$0xff]   ;;  %v2128_v61 = vshll.u32 %v712_v50, 16 }
 0x197   :  { %2964 = vmatpush1.bf16.msra.mxu0 %v13620_v58  ;;  %2952 = vmatprep.mubr.bf16.mxu0 %v2115_v11  ;;  %v13662_v58 = vld [vmem:[%s14679_s13 + $0x1e0] ss:$8 sps:$4 sm:$0xff]   ;;  %v13670_v11 = vld [vmem:[%s14679_s13 + $0x204] ss:$8 sps:$4 sm:$0xff]  }
 0x198   :  { %2965 = vmatprep.subr.bf16.mxu0 %v13625_v8  ;;  %v693_v8 = vld [vmem:[#allocation2 + $0x130] sm:$0x1] }
 0x19b   :  { %2966 = vmatpush1.bf16.msra.mxu0 %v13623_v4  ;;  %v711_v4 = vpack.c.bf16 %v693_v8, %v693_v8 }
 0x19c   :  { %2967 = vmatprep.subr.bf16.mxu0 %v13628_v5  ;;  %v2130_v5 = vrot.slane %v2128_v61, 1 }
 0x19e   :  { %2953 = vmatmul.mubr.bf16.gmra.mrb[4].mxu0 %v2107_v14  ;;  %v2120_v14 = vshll.u32 %v711_v4, 16  ;;  %v2131_v9 = vsel %vm1991_vm2, %v2126_v56, %v2130_v5  ;;  %v2132_v56 = vshrl.u32 %v14991_v21, 16 }
 0x19f   :  { %2968 = vmatpush1.bf16.msra.mxu0 %v13626_v10  ;;  %2995 = vmatprep.mubr.bf16.mxu0 %v2039_v16  ;;  %v2027_v10 = vsel %vm1991_vm2, %v2022_v0, %v2026_v52  ;;  %v2057_v16 = vrot.slane %v2055_v51, 1  ;;  %v13686_v51 = vld [vmem:[%s14679_s13 + $0x260] ss:$8 sps:$4 sm:$0xff]   ;;  %v13689_v0 = vld [vmem:[%s14679_s13 + $0x270] ss:$8 sps:$4 sm:$0xff]  }
 0x1a0   :  { %2969 = vmatprep.subr.bf16.mxu0 %v13631_v13  ;;  %v2116_v13 = vshrl.u32 %v15016_v39, 16 }
 0x1a1   :  { %v2058_v39 = vor.u32 %v2057_v16, %v2053_v6  ;;  %v698_v6 = vld [vmem:[#allocation2 + $0x158] sm:$0x1] }
 0x1a3   :  { %2970 = vmatpush1.bf16.msra.mxu0 %v13629_v18  ;;  %v2060_v18 = vshll.u32 %v14984_v17, 16 }
 0x1a4   :  { %2971 = vmatprep.subr.bf16.mxu0 %v13634_v19  ;;  %v13671_v19 = vld [vmem:[%s14679_s13 + $0x210] ss:$8 sps:$4 sm:$0xff]  }
 0x1a7   :  { %2972 = vmatpush1.bf16.msra.mxu0 %v13632_v20  ;;  %v13676_v20 = vld [vmem:[%s14679_s13 + $0x224] ss:$8 sps:$4 sm:$0xff]  }
 0x1a8   :  { %2973 = vmatprep.subr.bf16.mxu0 %v13637_v22  ;;  %v2118_v22 = vor.u32 %v2116_v13, %v2026_v52  ;;  %v15266_v52 = vrot.slane %v2072_v27, 1  ;;  %v716_v13 = vpack.c.bf16 %v698_v6, %v698_v6  ;;  %v13721_v27 = vld [vmem:[%s14679_s13 + $0x314] ss:$8 sps:$4 sm:$0xff]   ;;  %v13746_v6 = vld [vmem:[%s14679_s13 + $0x3a0] ss:$8 sps:$4 sm:$0xff]  }
 0x1ab   :  { %2974 = vmatpush1.bf16.msra.mxu0 %v13635_v23  ;;  %v2122_v23 = vrot.slane %v2120_v14, 1  ;;  %v13700_v14 = vld [vmem:[%s14679_s13 + $0x2a4] ss:$8 sps:$4 sm:$0xff]  }
 0x1ac   :  { %2975 = vmatprep.subr.bf16.mxu0 %v13640_v26  ;;  %v15243_v26 = vrot.slane %v2060_v18, 1 }
 0x1af   :  { %2976 = vmatpush1.bf16.msra.mxu0 %v13638_v28  ;;  %v13674_v28 = vld [vmem:[%s14679_s13 + $0x220] ss:$8 sps:$4 sm:$0xff]  }
 0x1b0   :  { %2977 = vmatprep.subr.bf16.mxu0 %v13643_v29  ;;  %v13679_v29 = vld [vmem:[%s14679_s13 + $0x234] ss:$8 sps:$4 sm:$0xff]  }
 0x1b3   :  { %2978 = vmatpush1.bf16.msra.mxu0 %v13641_v31  ;;  %v2123_v31 = vsel %vm1991_vm2, %v2118_v22, %v2122_v23  ;;  %v13703_v23 = vld [vmem:[%s14679_s13 + $0x2b4] ss:$8 sps:$4 sm:$0xff]  }
 0x1b4   :  { %2979 = vmatprep.subr.bf16.mxu0 %v13646_v32  ;;  %v2063_v32 = vsel %vm1991_vm2, %v2058_v39, %v15243_v26  ;;  %v2156_v39 = vshrl.u32 %v15037_v62, 16 }
 0x1b7   :  { %2980 = vmatpush1.bf16.msra.mxu0 %v13644_v37  ;;  %v686_v37 = vld [vmem:[#allocation2 + $0x20] sm:$0xfe] }
 0x1b8   :  { %2981 = vmatprep.subr.bf16.mxu0 %v13649_v33  ;;  %v13677_v33 = vld [vmem:[%s14679_s13 + $0x230] ss:$8 sps:$4 sm:$0xff]  }
 0x1bb   :  { %2982 = vmatpush1.bf16.msra.mxu0 %v13647_v36  ;;  %v13682_v36 = vld [vmem:[%s14679_s13 + $0x244] ss:$8 sps:$4 sm:$0xff]  }
 0x1bc   :  { %2983 = vmatprep.subr.bf16.mxu0 %v13652_v63  ;;  %v689_v63 = vld [vmem:[#allocation2 + $0x38] sm:$0xfe] }
 0x1bf   :  { %2984 = vmatpush1.bf16.msra.mxu0 %v13650_v24  ;;  %v13680_v24 = vld [vmem:[%s14679_s13 + $0x240] ss:$8 sps:$4 sm:$0xff]  }
 0x1c0   :  { %2985 = vmatprep.subr.bf16.mxu0 %v13655_v25  ;;  %v14587_v25 = vld [vmem:[#allocation2 + $0x68] sm:$0xff] }
 0x1c1   :  { %v15253_v41 = vpack.c.bf16 %v14587_v25, %v686_v37  ;;  %v13709_v37 = vld [vmem:[%s14679_s13 + $0x2d4] ss:$8 sps:$4 sm:$0xff]   ;;  %v13713_v25 = vld [vmem:[%s14679_s13 + $0x2f0] ss:$8 sps:$4 sm:$0xff]  }
 0x1c3   :  { %2986 = vmatpush1.bf16.msra.mxu0 %v13653_v42  ;;  %v13685_v42 = vld [vmem:[%s14679_s13 + $0x254] ss:$8 sps:$4 sm:$0xff]   ;;  %v2043_v47 = vshll.u32 %v15253_v41, 16  ;;  %v2041_v54 = vshrl.u32 %v15253_v41, 16  ;;  %v13718_v41 = vld [vmem:[%s14679_s13 + $0x304] ss:$8 sps:$4 sm:$0xff]  }
 0x1c4   :  { %2987 = vmatprep.subr.bf16.mxu0 %v13658_v43  ;;  %v696_v43 = vld [vmem:[#allocation2 + $0x148] sm:$0x1] }
 0x1c5   :  { %v714_v35 = vpack.c.bf16 %v696_v43, %v696_v43 }
 0x1c7   :  { %2988 = vmatpush1.bf16.msra.mxu0 %v13656_v40  ;;  %v14588_v40 = vld [vmem:[#allocation2 + $0x80] sm:$0xff] }
 0x1c8   :  { %2989 = vmatprep.subr.bf16.mxu0 %v13661_v30  ;;  %v15258_v45 = vpack.c.bf16 %v14588_v40, %v689_v63  ;;  %v13683_v30 = vld [vmem:[%s14679_s13 + $0x250] ss:$8 sps:$4 sm:$0xff]   ;;  %v13710_v63 = vld [vmem:[%s14679_s13 + $0x2e0] ss:$8 sps:$4 sm:$0xff]  }
 0x1c9   :  { %v13716_v40 = vld [vmem:[%s14679_s13 + $0x300] ss:$8 sps:$4 sm:$0xff]  }
 0x1ca   :  { %v2077_v38 = vshrl.u32 %v15258_v45, 16  ;;  %v2079_v50 = vshll.u32 %v15258_v45, 16  ;;  %v13728_v45 = vld [vmem:[%s14679_s13 + $0x340] ss:$8 sps:$4 sm:$0xff]  }
 0x1cb   :  { %2990 = vmatpush1.bf16.msra.mxu0 %v13659_v48  ;;  %v688_v48 = vld [vmem:[#allocation2 + $0x30] sm:$0xfe] }
 0x1cc   :  { %2991 = vmatprep.subr.bf16.mxu0 %v13664_v49  ;;  %v695_v49 = vld [vmem:[#allocation2 + $0x140] sm:$0x1]  ;;  %v15273_v61 = vpack.c.bf16 %v14589_v60, %v688_v48  ;;  %v2081_v16 = vrot.slane %v2079_v50, 1  ;;  %v13727_v50 = vld [vmem:[%s14679_s13 + $0x334] ss:$8 sps:$4 sm:$0xff]  }
 0x1cd   :  { %v713_v8 = vpack.c.bf16 %v695_v49, %v695_v49  ;;  %v13722_v49 = vld [vmem:[%s14679_s13 + $0x320] ss:$8 sps:$4 sm:$0xff]   ;;  %v13739_v60 = vld [vmem:[%s14679_s13 + $0x374] ss:$8 sps:$4 sm:$0xff]  }
 0x1ce   :  { %v2065_v18 = vshrl.u32 %v15273_v61, 16  ;;  %v2082_v48 = vor.u32 %v2081_v16, %v2077_v38  ;;  %v13733_v38 = vld [vmem:[%s14679_s13 + $0x354] ss:$8 sps:$4 sm:$0xff]  }
 0x1cf   :  { %2992 = vmatpush1.bf16.msra.mxu0 %v13662_v58  ;;  %v2045_v58 = vrot.slane %v2043_v47, 1  ;;  %v15280_v5 = vshll.u32 %v713_v8, 16  ;;  %v13719_v47 = vld [vmem:[%s14679_s13 + $0x310] ss:$8 sps:$4 sm:$0xff]   ;;  %v13734_v8 = vld [vmem:[%s14679_s13 + $0x360] ss:$8 sps:$4 sm:$0xff]  }
 0x1d0   :  { %2993 = vmatprep.subr.bf16.mxu0 %v13667_v59  ;;  %v15271_v59 = vshll.u32 %v714_v35, 16  ;;  %v13724_v35 = vld [vmem:[%s14679_s13 + $0x324] ss:$8 sps:$4 sm:$0xff]   ;;  %v13763_v16 = vld [vmem:[%s14679_s13 + $0x3f4] ss:$8 sps:$4 sm:$0xff]  }
 0x1d1   :  { %v2138_v21 = vrot.slane %v15280_v5, 1  ;;  %v13748_v5 = vld [vmem:[%s14679_s13 + $0x3a4] ss:$8 sps:$4 sm:$0xff]  }
 0x1d2   :  { %v2146_v4 = vrot.slane %v15271_v59, 1  ;;  %v13736_v59 = vld [vmem:[%s14679_s13 + $0x364] ss:$8 sps:$4 sm:$0xff]  }
 0x1d3   :  { %2994 = vmatpush1.bf16.msra.mxu0 %v13665_v1  ;;  %v13694_v1 = vld [vmem:[%s14679_s13 + $0x284] ss:$8 sps:$4 sm:$0xff]  }
 0x1d4   :  { %3016 = vmatprep.subr.bf16.mxu0 %v13670_v11  ;;  %v2140_v11 = vshrl.u32 %v14984_v17, 16  ;;  %v13695_v17 = vld [vmem:[%s14679_s13 + $0x290] ss:$8 sps:$4 sm:$0xff]  }
 0x1d6   :  { %2996 = vmatmul.mubr.bf16.vlgmr.msra.gmra.mrb[0].mxu0 %v2027_v10  ;;  %v2067_v10 = vshll.u32 %v15273_v61, 16  ;;  %v2142_v43 = vor.u32 %v2140_v11, %v15243_v26  ;;  %v2134_v26 = vor.u32 %v2132_v56, %v15256_v44  ;;  %v13740_v11 = vld [vmem:[%s14679_s13 + $0x380] ss:$8 sps:$4 sm:$0xff]   ;;  %v13743_v56 = vld [vmem:[%s14679_s13 + $0x390] ss:$8 sps:$4 sm:$0xff]  }
 0x1d7   :  { %3017 = vmatpush1.bf16.msra.mxu0 %v13668_v15  ;;  %3005 = vmatprep.mubr.bf16.mxu0 %v2131_v9  ;;  %v2084_v15 = vshll.u32 %v15037_v62, 16  ;;  %v15290_v9 = vshll.u32 %v716_v13, 16  ;;  %v13757_v13 = vld [vmem:[%s14679_s13 + $0x3d4] ss:$8 sps:$4 sm:$0xff]  }
 0x1d8   :  { %3018 = vmatprep.subr.bf16.mxu0 %v13673_v34  ;;  %v13697_v34 = vld [vmem:[%s14679_s13 + $0x294] ss:$8 sps:$4 sm:$0xff]   ;;  %v15295_v22 = vrot.slane %v2067_v10, 1  ;;  %v13754_v10 = vld [vmem:[%s14679_s13 + $0x3c4] ss:$8 sps:$4 sm:$0xff]  }
 0x1db   :  { %3019 = vmatpush1.bf16.msra.mxu0 %v13671_v19  ;;  %v13698_v19 = vld [vmem:[%s14679_s13 + $0x2a0] ss:$8 sps:$4 sm:$0xff]  }
 0x1dc   :  { %3020 = vmatprep.subr.bf16.mxu0 %v13676_v20  ;;  %v15293_v20 = vrot.slane %v2084_v15, 1  ;;  %v13749_v15 = vld [vmem:[%s14679_s13 + $0x3b0] ss:$8 sps:$4 sm:$0xff]  }
 0x1de   :  { %3006 = vmatmul.mubr.bf16.gmra.mrb[4].mxu0 %v2123_v31  ;;  %v13706_v31 = vld [vmem:[%s14679_s13 + $0x2c4] ss:$8 sps:$4 sm:$0xff]  }
 0x1df   :  { %3021 = vmatpush1.bf16.msra.mxu0 %v13674_v28  ;;  %3048 = vmatprep.mubr.bf16.mxu0 %v2063_v32  ;;  %v2162_v28 = vrot.slane %v15290_v9, 1  ;;  %v13704_v32 = vld [vmem:[%s14679_s13 + $0x2c0] ss:$8 sps:$4 sm:$0xff]  }
 0x1e0   :  { %3022 = vmatprep.subr.bf16.mxu0 %v13679_v29  ;;  %v13701_v29 = vld [vmem:[%s14679_s13 + $0x2b0] ss:$8 sps:$4 sm:$0xff]  }
 0x1e3   :  { %3023 = vmatpush1.bf16.msra.mxu0 %v13677_v33  ;;  %v13707_v33 = vld [vmem:[%s14679_s13 + $0x2d0] ss:$8 sps:$4 sm:$0xff]  }
 0x1e4   :  { %3024 = vmatprep.subr.bf16.mxu0 %v13682_v36  ;;  %v13712_v36 = vld [vmem:[%s14679_s13 + $0x2e4] ss:$8 sps:$4 sm:$0xff]  }
 0x1e7   :  { %3025 = vmatpush1.bf16.msra.mxu0 %v13680_v24  ;;  %v13715_v24 = vld [vmem:[%s14679_s13 + $0x2f4] ss:$8 sps:$4 sm:$0xff]  }
 0x1e8   :  { %3026 = vmatprep.subr.bf16.mxu0 %v13685_v42  ;;  %v2046_v42 = vor.u32 %v2045_v58, %v2041_v54  ;;  %v13725_v54 = vld [vmem:[%s14679_s13 + $0x330] ss:$8 sps:$4 sm:$0xff]  }
 0x1e9   :  { %v13731_v58 = vld [vmem:[%s14679_s13 + $0x350] ss:$8 sps:$4 sm:$0xff]  }
 0x1eb   :  { %3027 = vmatpush1.bf16.msra.mxu0 %v13683_v30  ;;  %v2051_v30 = vsel %vm1991_vm2, %v2046_v42, %v15256_v44  ;;  %v13730_v44 = vld [vmem:[%s14679_s13 + $0x344] ss:$8 sps:$4 sm:$0xff]  }
 0x1ec   :  { %3028 = vmatprep.subr.bf16.mxu0 %v13688_v46  ;;  %v2147_v46 = vsel %vm1991_vm2, %v2142_v43, %v2146_v4  ;;  %v13745_v4 = vld [vmem:[%s14679_s13 + $0x394] ss:$8 sps:$4 sm:$0xff]  }
 0x1ef   :  { %3029 = vmatpush1.bf16.msra.mxu0 %v13686_v51  ;;  %v2139_v51 = vsel %vm1991_vm2, %v2134_v26, %v2138_v21  ;;  %v13758_v21 = vld [vmem:[%s14679_s13 + $0x3e0] ss:$8 sps:$4 sm:$0xff]  }
 0x1f0   :  { %3030 = vmatprep.subr.bf16.mxu0 %v13691_v53  ;;  %v2087_v53 = vsel %vm1991_vm2, %v2082_v48, %v15293_v20 }
 0x1f3   :  { %3031 = vmatpush1.bf16.msra.mxu0 %v13689_v0  ;;  %v13737_v0 = vld [vmem:[%s14679_s13 + $0x370] ss:$8 sps:$4 sm:$0xff]  }
 0x1f4   :  { %3032 = vmatprep.subr.bf16.mxu0 %v13694_v1  ;;  %v13742_v1 = vld [vmem:[%s14679_s13 + $0x384] ss:$8 sps:$4 sm:$0xff]  }
 0x1f7   :  { %3033 = vmatpush1.bf16.msra.mxu0 %v13692_v7  ;;  %v13751_v7 = vld [vmem:[%s14679_s13 + $0x3b4] ss:$8 sps:$4 sm:$0xff]  }
 0x1f8   :  { %3034 = vmatprep.subr.bf16.mxu0 %v13697_v34  ;;  %v13752_v34 = vld [vmem:[%s14679_s13 + $0x3c0] ss:$8 sps:$4 sm:$0xff]  }
 0x1fb   :  { %3035 = vmatpush1.bf16.msra.mxu0 %v13695_v17  ;;  %v13755_v17 = vld [vmem:[%s14679_s13 + $0x3d0] ss:$8 sps:$4 sm:$0xff]  }
 0x1fc   :  { %3036 = vmatprep.subr.bf16.mxu0 %v13700_v14  ;;  %v13760_v14 = vld [vmem:[%s14679_s13 + $0x3e4] ss:$8 sps:$4 sm:$0xff]  }
 0x1ff   :  { %3037 = vmatpush1.bf16.msra.mxu0 %v13698_v19  ;;  %v697_v19 = vld [vmem:[#allocation2 + $0x150] sm:$0x1] }
 0x200   :  { %3038 = vmatprep.subr.bf16.mxu0 %v13703_v23  ;;  %v13761_v23 = vld [vmem:[%s14679_s13 + $0x3f0] ss:$8 sps:$4 sm:$0xff]  }
 0x203   :  { %3039 = vmatpush1.bf16.msra.mxu0 %v13701_v29  ;;  %v13766_v29 = vld [vmem:[%s14679_s13 + $0x404] ss:$8 sps:$4 sm:$0xff]  }
 0x204   :  { %3040 = vmatprep.subr.bf16.mxu0 %v13706_v31  ;;  %v2070_v31 = vor.u32 %v15295_v22, %v2065_v18 }
 0x207   :  { %3041 = vmatpush1.bf16.msra.mxu0 %v13704_v32  ;;  %v715_v32 = vpack.c.bf16 %v697_v19, %v697_v19 }
 0x208   :  { %3042 = vmatprep.subr.bf16.mxu0 %v13709_v37  ;;  %v2158_v37 = vor.u32 %v2156_v39, %v15293_v20 }
 0x20b   :  { %3043 = vmatpush1.bf16.msra.mxu0 %v13707_v33 }
 0x20c   :  { %3044 = vmatprep.subr.bf16.mxu0 %v13712_v36 }
 0x20f   :  { %3045 = vmatpush1.bf16.msra.mxu0 %v13710_v63 }
 0x210   :  { %3046 = vmatprep.subr.bf16.mxu0 %v13715_v24 }
 0x213   :  { %3047 = vmatpush1.bf16.msra.mxu0 %v13713_v25 }
 0x214   :  { %3069 = vmatprep.subr.bf16.mxu0 %v13718_v41 }
 0x216   :  { %3049 = vmatmul.mubr.bf16.vlgmr.msra.gmra.mrb[0].mxu0 %v2051_v30 }
 0x217   :  { %3070 = vmatpush1.bf16.msra.mxu0 %v13716_v40  ;;  %3058 = vmatprep.mubr.bf16.mxu0 %v2147_v46 }
 0x218   :  { %3071 = vmatprep.subr.bf16.mxu0 %v13721_v27 }
 0x21b   :  { %3072 = vmatpush1.bf16.msra.mxu0 %v13719_v47 }
 0x21c   :  { %3073 = vmatprep.subr.bf16.mxu0 %v13724_v35 }
 0x21e   :  { %3059 = vmatmul.mubr.bf16.gmra.mrb[4].mxu0 %v2139_v51 }
 0x21f   :  { %3074 = vmatpush1.bf16.msra.mxu0 %v13722_v49  ;;  %3101 = vmatprep.mubr.bf16.mxu0 %v2087_v53 }
 0x220   :  { %3075 = vmatprep.subr.bf16.mxu0 %v13727_v50 }
 0x223   :  { %3076 = vmatpush1.bf16.msra.mxu0 %v13725_v54 }
 0x224   :  { %3077 = vmatprep.subr.bf16.mxu0 %v13730_v44 }
 0x227   :  { %3078 = vmatpush1.bf16.msra.mxu0 %v13728_v45 }
 0x228   :  { %3079 = vmatprep.subr.bf16.mxu0 %v13733_v38 }
 0x22b   :  { %3080 = vmatpush1.bf16.msra.mxu0 %v13731_v58 }
 0x22c   :  { %3081 = vmatprep.subr.bf16.mxu0 %v13736_v59 }
 0x22f   :  { %3082 = vmatpush1.bf16.msra.mxu0 %v13734_v8 }
 0x230   :  { %3083 = vmatprep.subr.bf16.mxu0 %v13739_v60 }
 0x233   :  { %3084 = vmatpush1.bf16.msra.mxu0 %v13737_v0 }
 0x234   :  { %3085 = vmatprep.subr.bf16.mxu0 %v13742_v1 }
 0x237   :  { %3086 = vmatpush1.bf16.msra.mxu0 %v13740_v11 }
 0x238   :  { %3087 = vmatprep.subr.bf16.mxu0 %v13745_v4 }
 0x23b   :  { %3088 = vmatpush1.bf16.msra.mxu0 %v13743_v56 }
 0x23c   :  { %3089 = vmatprep.subr.bf16.mxu0 %v13748_v5 }
 0x23f   :  { %3090 = vmatpush1.bf16.msra.mxu0 %v13746_v6 }
 0x240   :  { %3091 = vmatprep.subr.bf16.mxu0 %v13751_v7 }
 0x243   :  { %3092 = vmatpush1.bf16.msra.mxu0 %v13749_v15 }
 0x244   :  { %3093 = vmatprep.subr.bf16.mxu0 %v13754_v10 }
 0x247   :  { %3094 = vmatpush1.bf16.msra.mxu0 %v13752_v34 }
 0x248   :  { %3095 = vmatprep.subr.bf16.mxu0 %v13757_v13 }
 0x24b   :  { %3096 = vmatpush1.bf16.msra.mxu0 %v13755_v17 }
 0x24c   :  { %3097 = vmatprep.subr.bf16.mxu0 %v13760_v14 }
 0x24f   :  { %3098 = vmatpush1.bf16.msra.mxu0 %v13758_v21 }
 0x250   :  { %3099 = vmatprep.subr.bf16.mxu0 %v13763_v16 }
 0x251   :  { %72 = vsyncpa [#allocation9], 0  ;;  %v13764_v33 = vld [vmem:[%s14679_s13 + $0x400] ss:$8 sps:$4 sm:$0xff]   ;;  %v2075_v36 = vsel %vm1991_vm2, %v2070_v31, %v15266_v52  ;;  %v2148_v61 = vshrl.u32 %v15042_v3, 16  ;;  %v2152_v18 = vshll.u32 %v715_v32, 16  ;;  %v2163_v62 = vsel %vm1991_vm2, %v2158_v37, %v2162_v28 }
 0x252   :  { %v13769_v22 = vld [vmem:[%s14679_s13 + $0x414] ss:$8 sps:$4 sm:$0xff]   ;;  %v13767_v20 = vld [vmem:[%s14679_s13 + $0x410] ss:$8 sps:$4 sm:$0xff]   ;;  %v13772_v24 = vld [vmem:[%s14679_s13 + $0x424] ss:$8 sps:$4 sm:$0xff]  }
 0x253   :  { %3100 = vmatpush1.bf16.msra.mxu0 %v13761_v23  ;;  %v2150_v39 = vor.u32 %v2148_v61, %v15266_v52  ;;  %v2154_v63 = vrot.slane %v2152_v18, 1  ;;  %v13770_v3 = vld [vmem:[%s14679_s13 + $0x420] ss:$8 sps:$4 sm:$0xff]   ;;  %v13775_v9 = vld [vmem:[%s14679_s13 + $0x434] ss:$8 sps:$4 sm:$0xff]   ;;  %v2096_v35 = vshll.u32 %v15099_v57, 16 }
 0x254   :  { %3122 = vmatprep.subr.bf16.mxu0 %v13766_v29  ;;  %v13773_v28 = vld [vmem:[%s14679_s13 + $0x430] ss:$8 sps:$4 sm:$0xff]   ;;  %v690_v41 = vld [vmem:[#allocation2 + $0x40] sm:$0xfe]  ;;  %v14590_v42 = vld [vmem:[#allocation2 + $0x88] sm:$0xff]  ;;  %v2164_v58 = vshrl.u32 %v15099_v57, 16 }
 0x255   :  { %v2155_v25 = vsel %vm1991_vm2, %v2150_v39, %v2154_v63  ;;  %v13778_v52 = vld [vmem:[%s14679_s13 + $0x444] ss:$8 sps:$4 sm:$0xff]   ;;  %v708_v43 = vpack.c.bf16 %v14590_v42, %v690_v41  ;;  %v13776_v40 = vld [vmem:[%s14679_s13 + $0x440] ss:$8 sps:$4 sm:$0xff]   ;;  %v13781_v27 = vld [vmem:[%s14679_s13 + $0x454] ss:$8 sps:$4 sm:$0xff]  }
 0x256   :  { %3102 = vmatmul.mubr.bf16.vlgmr.msra.gmra.mrb[0].mxu0 %v2075_v36  ;;  %v13779_v30 = vld [vmem:[%s14679_s13 + $0x450] ss:$8 sps:$4 sm:$0xff]   ;;  %v13784_v47 = vld [vmem:[%s14679_s13 + $0x464] ss:$8 sps:$4 sm:$0xff]   ;;  %v13782_v26 = vld [vmem:[%s14679_s13 + $0x460] ss:$8 sps:$4 sm:$0xff]  }
 0x257   :  { %3123 = vmatpush1.bf16.msra.mxu0 %v13764_v33  ;;  %3111 = vmatprep.mubr.bf16.mxu0 %v2163_v62  ;;  %v2091_v46 = vshll.u32 %v708_v43, 16  ;;  %v2089_v48 = vshrl.u32 %v708_v43, 16  ;;  %v13787_v50 = vld [vmem:[%s14679_s13 + $0x474] ss:$8 sps:$4 sm:$0xff]   ;;  %v699_v51 = vld [vmem:[#allocation2 + $0x160] sm:$0x1] }
 0x258   :  { %3124 = vmatprep.subr.bf16.mxu0 %v13769_v22  ;;  %v2098_v53 = vrot.slane %v2096_v35, 1  ;;  %v13785_v54 = vld [vmem:[%s14679_s13 + $0x470] ss:$8 sps:$4 sm:$0xff]   ;;  %v717_v45 = vpack.c.bf16 %v699_v51, %v699_v51  ;;  %vm3302_vm3 = vcmask 261120   ;;  %vm155_vm4 = vcmp.lt.s32.totalorder %v142_v55, 512 }
 0x259   :  { %v2093_v49 = vrot.slane %v2091_v46, 1  ;;  %157 = vst.msk [vmem:[#allocation3] ss:$8 sm:$0xf] %vm155_vm4, %v14657_v2  ;;  %vm14659_vm5 = vmmov 0   ;;  %vm7081_vm6 = vcmask 130048  }
 0x25a   :  { %v2168_v59 = vshll.u32 %v717_v45, 16  ;;  %v2166_v8 = vor.u32 %v2164_v58, %v2098_v53  ;;  %v214_v45 = vld [vmem:[%s14669_s5 + $0x128] sm:$0xff]  ;;  %v213_v58 = vld [vmem:[%s14669_s5 + $0x120] sm:$0xff]  ;;  %160 = vst.msk [vmem:[#allocation3 + $0x60] ss:$8 sm:$0xf] %vm155_vm4, %v14657_v2 }
 0x25b   :  { %3125 = vmatpush1.bf16.msra.mxu0 %v13767_v20  ;;  %v2094_v44 = vor.u32 %v2093_v49, %v2089_v48  ;;  %vm162_vm7 = vcmp.lt.s32.totalorder %v142_v55, 256  ;;  %vm8512_vm8 = vcmask 1043456   ;;  %vm8508_vm9 = vcmask 64512  }
 0x25c   :  { %3126 = vmatprep.subr.bf16.mxu0 %v13772_v24  ;;  %v2170_v60 = vrot.slane %v2168_v59, 1  ;;  %v385_v59 = vrot.slane %v213_v58, 7  ;;  %164 = vst.msk [vmem:[#allocation4] ss:$8 sm:$0x3] %vm162_vm7, %v14657_v2  ;;  %vm9540_vm10 = vcmask 1041408  }
 0x25d   :  { %v2099_v38 = vsel %vm1991_vm2, %v2094_v44, %v2098_v53  ;;  %167 = vst.msk [vmem:[#allocation4 + $0x20] ss:$8 sm:$0x3] %vm162_vm7, %v14657_v2  ;;  %169 = vst.msk [vmem:[#allocation5] ss:$8 sm:$0x3] %vm162_vm7, %v14657_v2 }
 0x25e   :  { %3112 = vmatmul.mubr.bf16.gmra.mrb[4].mxu0 %v2155_v25  ;;  %v2171_v0 = vsel %vm1991_vm2, %v2166_v8, %v2170_v60  ;;  %583 = vst [vmem:[#allocation2 + $0x168] sm:$0xfe] %v385_v59  ;;  %v15407_v60 = vld [vmem:[%s14669_s5 + $0x170] sm:$0xff]  ;;  %172 = vst.msk [vmem:[#allocation5 + $0x10] ss:$8 sm:$0x3] %vm162_vm7, %v14657_v2 }
 0x25f   :  { %3127 = vmatpush1.bf16.msra.mxu0 %v13770_v3  ;;  %3154 = vmatprep.mubr.bf16.mxu0 %v14658_v12  ;;  %174 = vst.msk [vmem:[#allocation6] ss:$4 sm:$0x3] %vm162_vm7, %v14657_v2  ;;  %176 = vst.msk [vmem:[#allocation6 + $0x8] ss:$4 sm:$0x3] %vm162_vm7, %v14657_v2 }
 0x260   :  { %3128 = vmatprep.subr.bf16.mxu0 %v13775_v9  ;;  %vm9536_vm11 = vcmask 31744   ;;  %vm11401_vm12 = vcmask 17408  }
 0x263   :  { %3129 = vmatpush1.bf16.msra.mxu0 %v13773_v28 }
 0x264   :  { %3130 = vmatprep.subr.bf16.mxu0 %v13778_v52 }
 0x267   :  { %3131 = vmatpush1.bf16.msra.mxu0 %v13776_v40 }
 0x268   :  { %3132 = vmatprep.subr.bf16.mxu0 %v13781_v27 }
 0x26b   :  { %3133 = vmatpush1.bf16.msra.mxu0 %v13779_v30 }
 0x26c   :  { %3134 = vmatprep.subr.bf16.mxu0 %v13784_v47 }
 0x26f   :  { %3135 = vmatpush1.bf16.msra.mxu0 %v13782_v26 }
 0x270   :  { %3136 = vmatprep.subr.bf16.mxu0 %v13787_v50 }
 0x273   :  { %3137 = vmatpush1.bf16.msra.mxu0 %v13785_v54 }
 0x276   :  { %3155 = vmatmul.mubr.bf16.vlgmr.msra.gmra.mrb[0].mxu0 %v2099_v38  ;;  %v386_v38 = vrot.slane %v214_v45, 7  ;;  %v215_v45 = vld [vmem:[%s14669_s5 + $0x130] sm:$0xff] }
 0x277   :  { %3164 = vmatprep.mubr.bf16.mxu0 %v14658_v12 }
 0x278   :  { %584 = vst [vmem:[#allocation2 + $0x170] sm:$0xfe] %v386_v38 }
 0x27e   :  { %3165 = vmatmul.mubr.bf16.gmra.mrb[4].mxu0 %v2171_v0  ;;  %v396_v0 = vrot.slane %v15407_v60, 7 }
 0x27f   :  { %3338 = vmatprep.mubr.bf16.mxu0 %v14658_v12 }
 0x349   :  { %v3156_v1 = vpop.f32.mrb[0].mxu0 }
 0x34a   :  { %v3158_v11 = vpop.f32.mrb[1].mxu0 }
 0x34b   :  { %v3175_v4 = vadd.f32 %v3158_v11, %v3156_v1  ;;  %v3160_v56 = vpop.f32.mrb[2].mxu0 }
 0x34c   :  { %v3162_v5 = vpop.f32.mrb[3].mxu0 }
 0x34d   :  { %v3176_v6 = vadd.f32 %v3175_v4, %v3160_v56  ;;  %v15417_v4 = vsel %vm321_vm0, %v386_v38, %v396_v0 }
 0x34e   :  { %593 = vst [vmem:[#allocation2 + $0x1b8] sm:$0xff] %v15417_v4 }
 0x34f   :  { %v3177_v7 = vadd.f32 %v3176_v6, %v3162_v5 }
 0x351   :  { %v3166_v15 = vpop.f32.mrb[4].mxu0 }
 0x352   :  { %v3178_v57 = vadd.f32 %v3177_v7, %v3166_v15  ;;  %v3168_v10 = vpop.f32.mrb[5].mxu0 }
 0x353   :  { %v3170_v34 = vpop.f32.mrb[6].mxu0 }
 0x354   :  { %v3179_v13 = vadd.f32 %v3178_v57, %v3168_v10  ;;  %v3172_v17 = vpop.f32.mrb[7].mxu0  ;;  %v3263_v57 = vld [vmem:[%s14689_s21] sm:$0x3] }
 0x356   :  { %v3180_v14 = vadd.f32 %v3179_v13, %v3170_v34 }
 0x358   :  { %v3181_v21 = vadd.f32 %v3180_v14, %v3172_v17 }
 0x35a   :  { %3182 = vadd.xlane.f32.xlu0 %v3181_v21 }
 0x3e7   :  { %v3183_v16 = vpop.xlane.xlu0 %3182 }
 0x3e8   :  { %v3184_v19 = vrot.slane %v3183_v16, 4 }
 0x3ea   :  { %v3185_v23 = vadd.f32 %v3184_v19, %v3183_v16 }
 0x3ec   :  { %v3186_v29 = vrot.slane %v3185_v23, 2 }
 0x3ee   :  { %v3187_v31 = vadd.f32 %v3186_v29, %v3185_v23 }
 0x3f0   :  { %v3188_v32 = vrot.slane %v3187_v31, 1 }
 0x3f2   :  { %v3189_v37 = vadd.f32 %v3188_v32, %v3187_v31 }
 0x3f4   :  { %13247 = vpush %v3189_v37 }
 0x425   :  { %s13248_s0 = spop %13247 }
 0x426   :  { %s3193_s7 = smul.f32 0.00012207031, %s13248_s0 }
 0x428   :  { %v3194_v33 = vstv %s3193_s7 }
 0x429   :  { %v15388_v36 = vsub.f32 %v3156_v1, %v3194_v33  ;;  %v15390_v61 = vsub.f32 %v3158_v11, %v3194_v33  ;;  %v15392_v18 = vsub.f32 %v3160_v56, %v3194_v33  ;;  %v3198_v22 = vsub.f32 %v3162_v5, %v3194_v33  ;;  %v15411_v1 = vld [vmem:[%s14669_s5 + $0x168] sm:$0xff] }
 0x42a   :  { %v15398_v39 = vsub.f32 %v3166_v15, %v3194_v33  ;;  %v3200_v3 = vsub.f32 %v3168_v10, %v3194_v33  ;;  %v3201_v28 = vsub.f32 %v3170_v34, %v3194_v33  ;;  %v3202_v42 = vsub.f32 %v3172_v17, %v3194_v33  ;;  %v3243_v15 = vld [vmem:[%s14684_s17] sm:$0x3] }
 0x42b   :  { %v3203_v62 = vmul.f32 %v15388_v36, %v15388_v36  ;;  %v3204_v20 = vmul.f32 %v15390_v61, %v15390_v61  ;;  %v3205_v63 = vmul.f32 %v15392_v18, %v15392_v18  ;;  %v3206_v25 = vmul.f32 %v3198_v22, %v3198_v22 }
 0x42c   :  { %v3207_v41 = vmul.f32 %v15398_v39, %v15398_v39  ;;  %v3208_v43 = vmul.f32 %v3200_v3, %v3200_v3  ;;  %v3209_v27 = vmul.f32 %v3201_v28, %v3201_v28  ;;  %v3210_v46 = vmul.f32 %v3202_v42, %v3202_v42 }
 0x42d   :  { %v3211_v24 = vadd.f32 %v3204_v20, %v3203_v62  ;;  %v394_v11 = vrot.slane %v15411_v1, 7  ;;  %v3246_v5 = vshrl.u32 %v142_v55, 7 }
 0x42f   :  { %v3212_v9 = vadd.f32 %v3211_v24, %v3205_v63  ;;  %v15423_v56 = vsel %vm321_vm0, %v385_v59, %v394_v11  ;;  %v15427_v6 = vsub.s32 0, %v3246_v5  ;;  %v15429_v7 = vsub.s32 1, %v3246_v5 }
 0x430   :  { %592 = vst [vmem:[#allocation2 + $0x1b0] sm:$0xff] %v15423_v56 }
 0x431   :  { %v3213_v52 = vadd.f32 %v3212_v9, %v3206_v25  ;;  %v3248_v10 = vrot.slane %v3243_v15, %v15427_v6  ;;  %v3252_v34 = vrot.slane %v3243_v15, %v15429_v7  ;;  %v3268_v17 = vrot.slane %v3263_v57, %v15427_v6 }
 0x432   :  { %v3272_v14 = vrot.slane %v3263_v57, %v15429_v7 }
 0x433   :  { %v3214_v40 = vadd.f32 %v3213_v52, %v3207_v41 }
 0x435   :  { %v3215_v30 = vadd.f32 %v3214_v40, %v3208_v43  ;;  %v241_v43 = vld [vmem:[%s14669_s5 + $0x200] sm:$0xff] }
 0x437   :  { %v3216_v47 = vadd.f32 %v3215_v30, %v3209_v27 }
 0x439   :  { %v3217_v35 = vadd.f32 %v3216_v47, %v3210_v46  ;;  %v231_v47 = vld [vmem:[%s14669_s5 + $0x1b0] sm:$0xff] }
 0x43a   :  { %v412_v59 = vrot.slane %v231_v47, 7  ;;  %v13825_v47 = vld [vmem:[%s14674_s9 + $0xc0] ss:$8 sps:$4 sm:$0xff]  }
 0x43b   :  { %3218 = vadd.xlane.f32.xlu0 %v3217_v35  ;;  %v240_v35 = vld [vmem:[%s14669_s5 + $0x1f8] sm:$0xff] }
 0x4c8   :  { %v3219_v26 = vpop.xlane.xlu0 %3218 }
 0x4c9   :  { %v3220_v48 = vrot.slane %v3219_v26, 4 }
 0x4cb   :  { %v3221_v49 = vadd.f32 %v3220_v48, %v3219_v26 }
 0x4cd   :  { %v3222_v50 = vrot.slane %v3221_v49, 2 }
 0x4cf   :  { %v3223_v51 = vadd.f32 %v3222_v50, %v3221_v49 }
 0x4d1   :  { %v3224_v53 = vrot.slane %v3223_v51, 1 }
 0x4d3   :  { %v3225_v54 = vadd.f32 %v3224_v53, %v3223_v51 }
 0x4d5   :  { %13249 = vpush %v3225_v54  ;;  %v432_v54 = vrot.slane %v241_v43, 7  ;;  %v13821_v43 = vld [vmem:[%s14674_s9 + $0xa4] ss:$8 sps:$4 sm:$0xff]  }
 0x4d7   :  { %620 = vst [vmem:[#allocation2 + $0x290] sm:$0x1] %v432_v54 }
 0x506   :  { %s13250_s10 = spop %13249 }
 0x507   :  { %s3229_s11 = smul.f32 0.00012207031, %s13250_s10  ;;  %s16648_s10 = sld [smem:[#allocation11_spill]] }
 0x509   :  { %s3230_s15 = sadd.f32 1e-05, %s3229_s11 }
 0x50b   :  { %v3231_v44 = vstv %s3230_s15 }
 0x50c   :  { %14558 = vrsqrt.f32 %v3231_v44  ;;  %v216_v44 = vld [vmem:[%s14669_s5 + $0x138] sm:$0xff] }
 0x50d   :  { %v388_v57 = vrot.slane %v216_v44, 7  ;;  %v242_v44 = vld [vmem:[%s14669_s5 + $0x208] sm:$0xff] }
 0x50f   :  { %586 = vst [vmem:[#allocation2 + $0x180] sm:$0xfe] %v388_v57 }
 0x516   :  { %v14559_v8 = vpop.eup %14558 }
 0x517   :  { %13251 = vpush %v14559_v8  ;;  %v430_v8 = vrot.slane %v240_v35, 7  ;;  %v13830_v35 = vld [vmem:[%s14674_s9 + $0xd4] ss:$8 sps:$4 sm:$0xff]  }
 0x519   :  { %v431_v60 = vsel %vm321_vm0, %v412_v59, %v430_v8  ;;  %619 = vst [vmem:[#allocation2 + $0x288] sm:$0x1] %v430_v8  ;;  %v13836_v8 = vld [vmem:[%s14674_s9 + $0xf4] ss:$8 sps:$4 sm:$0xff]  }
 0x548   :  { %s13252_s16 = spop %13251 }
 0x549   :  { %v3234_v13 = vstv %s13252_s16 }
 0x54a   :  { %v3236_v21 = vmul.f32 %v3234_v13, %v15390_v61  ;;  %v3238_v16 = vmul.f32 %v3234_v13, %v3198_v22  ;;  %v3235_v19 = vmul.f32 %v3234_v13, %v15388_v36  ;;  %v3237_v23 = vmul.f32 %v3234_v13, %v15392_v18 }
 0x54b   :  { %v3240_v29 = vmul.f32 %v3234_v13, %v3200_v3  ;;  %v3242_v31 = vmul.f32 %v3234_v13, %v3202_v42  ;;  %v3239_v32 = vmul.f32 %v3234_v13, %v15398_v39  ;;  %v3241_v37 = vmul.f32 %v3234_v13, %v3201_v28  ;;  %v232_v42 = vld [vmem:[%s14669_s5 + $0x1b8] sm:$0xff] }
 0x54c   :  { %v3256_v33 = vmul.f32 %v3252_v34, %v3236_v21  ;;  %v3258_v62 = vmul.f32 %v3252_v34, %v3238_v16  ;;  %v3255_v20 = vmul.f32 %v3248_v10, %v3235_v19  ;;  %v3257_v63 = vmul.f32 %v3248_v10, %v3237_v23  ;;  %v15461_v16 = vld [vmem:[%s14669_s5 + $0x180] sm:$0xff]  ;;  %v13788_v19 = vld [vmem:[%s14774_s4 + $0x8] sm:$0xff]  }
 0x54d   :  { %v3260_v24 = vmul.f32 %v3252_v34, %v3240_v29  ;;  %v3262_v25 = vmul.f32 %v3252_v34, %v3242_v31  ;;  %v3259_v9 = vmul.f32 %v3248_v10, %v3239_v32  ;;  %v3261_v61 = vmul.f32 %v3248_v10, %v3241_v37  ;;  %v13789_v23 = vld [vmem:[%s14674_s9] ss:$8 sps:$4 sm:$0xff]   ;;  %v13794_v32 = vld [vmem:[%s14674_s9 + $0x14] ss:$8 sps:$4 sm:$0xff]  }
 0x54e   :  { %v3276_v36 = vadd.f32 %v3272_v14, %v3256_v33  ;;  %v3278_v22 = vadd.f32 %v3272_v14, %v3258_v62  ;;  %v3275_v18 = vadd.f32 %v3268_v17, %v3255_v20  ;;  %v3277_v3 = vadd.f32 %v3268_v17, %v3257_v63  ;;  %v13797_v62 = vld [vmem:[%s14674_s9 + $0x24] ss:$8 sps:$4 sm:$0xff]   ;;  %v13795_v20 = vld [vmem:[%s14674_s9 + $0x20] ss:$8 sps:$4 sm:$0xff]   ;;  %v13800_v63 = vld [vmem:[%s14674_s9 + $0x34] ss:$8 sps:$4 sm:$0xff]  }
 0x54f   :  { %v3280_v41 = vadd.f32 %v3272_v14, %v3260_v24  ;;  %v3282_v52 = vadd.f32 %v3272_v14, %v3262_v25  ;;  %v3279_v39 = vadd.f32 %v3268_v17, %v3259_v9  ;;  %v3281_v28 = vadd.f32 %v3268_v17, %v3261_v61  ;;  %v3449_v17 = vld [vmem:[#allocation2 + $0x170] sm:$0xff]  ;;  %v13803_v25 = vld [vmem:[%s14674_s9 + $0x44] ss:$8 sps:$4 sm:$0xff]   ;;  %v13801_v9 = vld [vmem:[%s14674_s9 + $0x40] ss:$8 sps:$4 sm:$0xff]  }
 0x550   :  { %v3284_v40 = vmax.f32 %v3276_v36, 0.0  ;;  %v3286_v27 = vmax.f32 %v3278_v22, 0.0  ;;  %v3283_v30 = vmax.f32 %v3275_v18, 0.0  ;;  %v3285_v46 = vmax.f32 %v3277_v3, 0.0  ;;  %v13798_v24 = vld [vmem:[%s14674_s9 + $0x30] ss:$8 sps:$4 sm:$0xff]  }
 0x551   :  { %v3288_v26 = vmax.f32 %v3280_v41, 0.0  ;;  %v3290_v48 = vmax.f32 %v3282_v52, 0.0  ;;  %v3287_v49 = vmax.f32 %v3279_v39, 0.0  ;;  %v414_v53 = vrot.slane %v232_v42, 7  ;;  %v13806_v61 = vld [vmem:[%s14674_s9 + $0x54] ss:$8 sps:$4 sm:$0xff]  }
 0x552   :  { %v3292_v50 = vpack.c.bf16 %v3286_v27, %v3284_v40  ;;  %v3291_v51 = vpack.c.bf16 %v3285_v46, %v3283_v30  ;;  %v3289_v58 = vmax.f32 %v3281_v28, 0.0  ;;  %v387_v10 = vrot.slane %v215_v45, 7  ;;  %v13804_v36 = vld [vmem:[%s14674_s9 + $0x50] ss:$8 sps:$4 sm:$0xff]   ;;  %v13809_v22 = vld [vmem:[%s14674_s9 + $0x64] ss:$8 sps:$4 sm:$0xff]  }
 0x553   :  { %v3294_v38 = vpack.c.bf16 %v3290_v48, %v3288_v26  ;;  %v415_v5 = vsel %vm321_vm0, %v396_v0, %v414_v53  ;;  %v433_v15 = vsel %vm321_vm0, %v414_v53, %v432_v54  ;;  %v413_v13 = vsel %vm321_vm0, %v394_v11, %v412_v59  ;;  %v13791_v0 = vld [vmem:[%s14674_s9 + $0x4] ss:$8 sps:$4 sm:$0xff]   ;;  %v15466_v11 = vld [vmem:[%s14669_s5 + $0x178] sm:$0xff]  ;;  %v13807_v18 = vld [vmem:[%s14674_s9 + $0x60] ss:$8 sps:$4 sm:$0xff]  }
 0x554   :  { %3306 = vmatprep.subr.bf16.mxu0 %v3292_v50  ;;  %3360 = vmatprep.subr.bf16.mxu1 %v3292_v50  ;;  %v15451_v34 = vpack.c.bf16 %v433_v15, %v415_v5  ;;  %v15458_v14 = vpack.c.bf16 %v431_v60, %v413_v13  ;;  %585 = vst [vmem:[#allocation2 + $0x178] sm:$0xfe] %v387_v10  ;;  %v400_v1 = vrot.slane %v15461_v16, 7  ;;  %v398_v31 = vrot.slane %v15466_v11, 7  ;;  %v13812_v3 = vld [vmem:[%s14674_s9 + $0x74] ss:$8 sps:$4 sm:$0xff]  }
 0x555   :  { %3307 = vmatpush1.bf16.msra.mxu0 %v3291_v51  ;;  %3361 = vmatpush1.bf16.msra.mxu1 %v3291_v51  ;;  %v3293_v21 = vpack.c.bf16 %v3289_v58, %v3287_v49  ;;  %v3485_v29 = vpack.c.bf16 %v15417_v4, %v3449_v17  ;;  %v13792_v4 = vld [vmem:[%s14674_s9 + $0x10] ss:$8 sps:$4 sm:$0xff]   ;;  %v13815_v52 = vld [vmem:[%s14674_s9 + $0x84] ss:$8 sps:$4 sm:$0xff]   ;;  %v13813_v39 = vld [vmem:[%s14674_s9 + $0x80] ss:$8 sps:$4 sm:$0xff]  }
 0x556   :  { %3308 = vmatprep.subr.bf16.mxu0 %v3294_v38  ;;  %3362 = vmatprep.subr.bf16.mxu1 %v3294_v38  ;;  %v15475_v37 = vsel %vm321_vm0, %v388_v57, %v400_v1  ;;  %v15481_v33 = vsel %vm321_vm0, %v387_v10, %v398_v31  ;;  %v13810_v41 = vld [vmem:[%s14674_s9 + $0x70] ss:$8 sps:$4 sm:$0xff]   ;;  %v13818_v28 = vld [vmem:[%s14674_s9 + $0x94] ss:$8 sps:$4 sm:$0xff]   ;;  %v13819_v40 = vld [vmem:[%s14674_s9 + $0xa0] ss:$8 sps:$4 sm:$0xff]  }
 0x557   :  { %595 = vst [vmem:[#allocation2 + $0x1c8] sm:$0xff] %v15475_v37  ;;  %594 = vst [vmem:[#allocation2 + $0x1c0] sm:$0xff] %v15481_v33  ;;  %v13816_v42 = vld [vmem:[%s14674_s9 + $0x90] ss:$8 sps:$4 sm:$0xff]   ;;  %v13824_v27 = vld [vmem:[%s14674_s9 + $0xb4] ss:$8 sps:$4 sm:$0xff]  }
 0x558   :  { %v13822_v30 = vld [vmem:[%s14674_s9 + $0xb0] ss:$8 sps:$4 sm:$0xff]   ;;  %v13827_v46 = vld [vmem:[%s14674_s9 + $0xc4] ss:$8 sps:$4 sm:$0xff]   ;;  %v13831_v38 = vld [vmem:[%s14674_s9 + $0xe0] ss:$8 sps:$4 sm:$0xff]  }
 0x559   :  { %3309 = vmatpush1.bf16.msra.mxu0 %v3293_v21  ;;  %3363 = vmatpush1.bf16.msra.mxu1 %v3293_v21  ;;  %v13828_v26 = vld [vmem:[%s14674_s9 + $0xd0] ss:$8 sps:$4 sm:$0xff]   ;;  %v13833_v48 = vld [vmem:[%s14674_s9 + $0xe4] ss:$8 sps:$4 sm:$0xff]   ;;  %v434_v59 = vrot.slane %v242_v44, 7 }
 0x55a   :  { %4546 = vmatprep.subr.bf16.mxu1 %v13791_v0  ;;  %v234_v49 = vld [vmem:[%s14669_s5 + $0x1c8] sm:$0xff]  ;;  %v243_v50 = vld [vmem:[%s14669_s5 + $0x210] sm:$0xff]  ;;  %v233_v54 = vld [vmem:[%s14669_s5 + $0x1c0] sm:$0xff] }
 0x55b   :  { %v418_v51 = vrot.slane %v234_v49, 7  ;;  %v436_v53 = vrot.slane %v243_v50, 7  ;;  %v218_v45 = vld [vmem:[%s14669_s5 + $0x148] sm:$0xff]  ;;  %v416_v58 = vrot.slane %v233_v54, 7  ;;  %v217_v10 = vld [vmem:[%s14669_s5 + $0x140] sm:$0xff]  ;;  %v15534_v11 = vld [vmem:[%s14669_s5 + $0x190] sm:$0xff] }
 0x55c   :  { %11743 = vmatmul.mubr.msk.bf16.vlgmr.msra.gmra.mrb[0].mxu1 %vm3302_vm3, %v13788_v19  ;;  %v390_v57 = vrot.slane %v218_v45, 7  ;;  %621 = vst [vmem:[#allocation2 + $0x298] sm:$0x1] %v434_v59  ;;  %v389_v17 = vrot.slane %v217_v10, 7  ;;  %v13834_v16 = vld [vmem:[%s14674_s9 + $0xf0] ss:$8 sps:$4 sm:$0xff]  }
 0x55d   :  { %4547 = vmatpush1.bf16.msra.mxu1 %v13789_v23  ;;  %4578 = vmatprep.mubr.bf16.mxu1 %v3485_v29  ;;  %v419_v5 = vsel %vm321_vm0, %v400_v1, %v418_v51  ;;  %v437_v15 = vsel %vm321_vm0, %v418_v51, %v436_v53  ;;  %622 = vst [vmem:[#allocation2 + $0x2a0] sm:$0x1] %v436_v53  ;;  %v3448_v19 = vld [vmem:[#allocation2 + $0x168] sm:$0xff]  ;;  %v404_v29 = vrot.slane %v15534_v11, 7  ;;  %v13878_v50 = vld [vmem:[%s14674_s9 + $0x1d4] ss:$8 sps:$4 sm:$0xff]  }
 0x55e   :  { %4548 = vmatprep.subr.bf16.mxu1 %v13794_v32  ;;  %v15523_v13 = vpack.c.bf16 %v437_v15, %v419_v5  ;;  %v417_v60 = vsel %vm321_vm0, %v398_v31, %v416_v58  ;;  %v435_v0 = vsel %vm321_vm0, %v416_v58, %v434_v59  ;;  %588 = vst [vmem:[#allocation2 + $0x190] sm:$0xfe] %v390_v57  ;;  %587 = vst [vmem:[#allocation2 + $0x188] sm:$0xfe] %v389_v17  ;;  %v13839_v1 = vld [vmem:[%s14674_s9 + $0x104] ss:$8 sps:$4 sm:$0xff]  }
 0x55f   :  { %v15529_v21 = vpack.c.bf16 %v435_v0, %v417_v60  ;;  %v3484_v23 = vpack.c.bf16 %v15423_v56, %v3448_v19  ;;  %v15539_v31 = vld [vmem:[%s14669_s5 + $0x188] sm:$0xff]  ;;  %v13876_v51 = vld [vmem:[%s14674_s9 + $0x1d0] ss:$8 sps:$4 sm:$0xff]   ;;  %v245_v44 = vld [vmem:[%s14669_s5 + $0x220] sm:$0xff] }
 0x560   :  { %v13837_v32 = vld [vmem:[%s14674_s9 + $0x100] ss:$8 sps:$4 sm:$0xff]   ;;  %v13881_v53 = vld [vmem:[%s14674_s9 + $0x1e4] ss:$8 sps:$4 sm:$0xff]   ;;  %v236_v54 = vld [vmem:[%s14669_s5 + $0x1d8] sm:$0xff] }
 0x561   :  { %4549 = vmatpush1.bf16.msra.mxu1 %v13792_v4  ;;  %v402_v4 = vrot.slane %v15539_v31, 7  ;;  %v13873_v49 = vld [vmem:[%s14674_s9 + $0x1c0] ss:$8 sps:$4 sm:$0xff]   ;;  %v422_v45 = vrot.slane %v236_v54, 7  ;;  %v235_v58 = vld [vmem:[%s14669_s5 + $0x1d0] sm:$0xff]  ;;  %v244_v59 = vld [vmem:[%s14669_s5 + $0x218] sm:$0xff] }
 0x562   :  { %4550 = vmatprep.subr.bf16.mxu1 %v13797_v62  ;;  %v13842_v62 = vld [vmem:[%s14674_s9 + $0x114] ss:$8 sps:$4 sm:$0xff]   ;;  %v13879_v5 = vld [vmem:[%s14674_s9 + $0x1e0] ss:$8 sps:$4 sm:$0xff]   ;;  %v420_v15 = vrot.slane %v235_v58, 7 }
 0x563   :  { %v15553_v56 = vsel %vm321_vm0, %v389_v17, %v402_v4  ;;  %v13884_v10 = vld [vmem:[%s14674_s9 + $0x1f4] ss:$8 sps:$4 sm:$0xff]   ;;  %v423_v60 = vsel %vm321_vm0, %v404_v29, %v422_v45  ;;  %v229_v31 = vld [vmem:[%s14669_s5 + $0x1a0] sm:$0xff] }
 0x564   :  { %596 = vst [vmem:[#allocation2 + $0x1d0] sm:$0xff] %v15553_v56 }
 0x565   :  { %4551 = vmatpush1.bf16.msra.mxu1 %v13795_v20  ;;  %v15547_v20 = vsel %vm321_vm0, %v390_v57, %v404_v29  ;;  %v438_v57 = vrot.slane %v244_v59, 7 }
 0x566   :  { %4552 = vmatprep.subr.bf16.mxu1 %v13800_v63  ;;  %597 = vst [vmem:[#allocation2 + $0x1d8] sm:$0xff] %v15547_v20  ;;  %v13840_v63 = vld [vmem:[%s14674_s9 + $0x110] ss:$8 sps:$4 sm:$0xff]  }
 0x567   :  { %623 = vst [vmem:[#allocation2 + $0x2a8] sm:$0x1] %v438_v57 }
 0x569   :  { %4553 = vmatpush1.bf16.msra.mxu1 %v13798_v24  ;;  %v13845_v24 = vld [vmem:[%s14674_s9 + $0x124] ss:$8 sps:$4 sm:$0xff]  }
 0x56a   :  { %4554 = vmatprep.subr.bf16.mxu1 %v13803_v25  ;;  %v3451_v25 = vld [vmem:[#allocation2 + $0x180] sm:$0xff] }
 0x56d   :  { %4555 = vmatpush1.bf16.msra.mxu1 %v13801_v9  ;;  %v13843_v9 = vld [vmem:[%s14674_s9 + $0x120] ss:$8 sps:$4 sm:$0xff]  }
 0x56e   :  { %4556 = vmatprep.subr.bf16.mxu1 %v13806_v61  ;;  %v3487_v61 = vpack.c.bf16 %v15475_v37, %v3451_v25  ;;  %v13852_v37 = vld [vmem:[%s14674_s9 + $0x150] ss:$8 sps:$4 sm:$0xff]  }
 0x56f   :  { %v228_v25 = vld [vmem:[%s14669_s5 + $0x198] sm:$0xff] }
 0x571   :  { %4557 = vmatpush1.bf16.msra.mxu1 %v13804_v36  ;;  %v13848_v36 = vld [vmem:[%s14674_s9 + $0x134] ss:$8 sps:$4 sm:$0xff]  }
 0x572   :  { %4558 = vmatprep.subr.bf16.mxu1 %v13809_v22  ;;  %v13846_v22 = vld [vmem:[%s14674_s9 + $0x130] ss:$8 sps:$4 sm:$0xff]  }
 0x575   :  { %4559 = vmatpush1.bf16.msra.mxu1 %v13807_v18  ;;  %v13851_v18 = vld [vmem:[%s14674_s9 + $0x144] ss:$8 sps:$4 sm:$0xff]  }
 0x576   :  { %4560 = vmatprep.subr.bf16.mxu1 %v13812_v3  ;;  %v13849_v3 = vld [vmem:[%s14674_s9 + $0x140] ss:$8 sps:$4 sm:$0xff]  }
 0x579   :  { %4561 = vmatpush1.bf16.msra.mxu1 %v13810_v41  ;;  %v13854_v41 = vld [vmem:[%s14674_s9 + $0x154] ss:$8 sps:$4 sm:$0xff]  }
 0x57a   :  { %4562 = vmatprep.subr.bf16.mxu1 %v13815_v52  ;;  %v13857_v52 = vld [vmem:[%s14674_s9 + $0x164] ss:$8 sps:$4 sm:$0xff]  }
 0x57d   :  { %4563 = vmatpush1.bf16.msra.mxu1 %v13813_v39  ;;  %v13855_v39 = vld [vmem:[%s14674_s9 + $0x160] ss:$8 sps:$4 sm:$0xff]  }
 0x57e   :  { %4564 = vmatprep.subr.bf16.mxu1 %v13818_v28  ;;  %v13860_v28 = vld [vmem:[%s14674_s9 + $0x174] ss:$8 sps:$4 sm:$0xff]  }
 0x581   :  { %4565 = vmatpush1.bf16.msra.mxu1 %v13816_v42  ;;  %v13858_v42 = vld [vmem:[%s14674_s9 + $0x170] ss:$8 sps:$4 sm:$0xff]  }
 0x582   :  { %4566 = vmatprep.subr.bf16.mxu1 %v13821_v43  ;;  %v13863_v43 = vld [vmem:[%s14674_s9 + $0x184] ss:$8 sps:$4 sm:$0xff]  }
 0x585   :  { %4567 = vmatpush1.bf16.msra.mxu1 %v13819_v40  ;;  %v13861_v40 = vld [vmem:[%s14674_s9 + $0x180] ss:$8 sps:$4 sm:$0xff]  }
 0x586   :  { %4568 = vmatprep.subr.bf16.mxu1 %v13824_v27  ;;  %v13866_v27 = vld [vmem:[%s14674_s9 + $0x194] ss:$8 sps:$4 sm:$0xff]  }
 0x589   :  { %4569 = vmatpush1.bf16.msra.mxu1 %v13822_v30  ;;  %v13864_v30 = vld [vmem:[%s14674_s9 + $0x190] ss:$8 sps:$4 sm:$0xff]  }
 0x58a   :  { %4570 = vmatprep.subr.bf16.mxu1 %v13827_v46  ;;  %v13869_v46 = vld [vmem:[%s14674_s9 + $0x1a4] ss:$8 sps:$4 sm:$0xff]  }
 0x58d   :  { %4571 = vmatpush1.bf16.msra.mxu1 %v13825_v47  ;;  %v13867_v47 = vld [vmem:[%s14674_s9 + $0x1a0] ss:$8 sps:$4 sm:$0xff]  }
 0x58e   :  { %4572 = vmatprep.subr.bf16.mxu1 %v13830_v35  ;;  %v13872_v35 = vld [vmem:[%s14674_s9 + $0x1b4] ss:$8 sps:$4 sm:$0xff]  }
 0x591   :  { %4573 = vmatpush1.bf16.msra.mxu1 %v13828_v26  ;;  %v13870_v26 = vld [vmem:[%s14674_s9 + $0x1b0] ss:$8 sps:$4 sm:$0xff]  }
 0x592   :  { %4574 = vmatprep.subr.bf16.mxu1 %v13833_v48  ;;  %v13875_v48 = vld [vmem:[%s14674_s9 + $0x1c4] ss:$8 sps:$4 sm:$0xff]  }
 0x595   :  { %4575 = vmatpush1.bf16.msra.mxu1 %v13831_v38  ;;  %v440_v38 = vrot.slane %v245_v44, 7 }
 0x596   :  { %4576 = vmatprep.subr.bf16.mxu1 %v13836_v8  ;;  %v220_v8 = vld [vmem:[%s14669_s5 + $0x158] sm:$0xff] }
 0x597   :  { %v441_v0 = vsel %vm321_vm0, %v422_v45, %v440_v38  ;;  %624 = vst [vmem:[#allocation2 + $0x2b0] sm:$0x1] %v440_v38  ;;  %v392_v17 = vrot.slane %v220_v8, 7  ;;  %v221_v45 = vld [vmem:[%s14669_s5 + $0x160] sm:$0xff] }
 0x598   :  { %v15600_v19 = vpack.c.bf16 %v441_v0, %v423_v60  ;;  %v393_v8 = vrot.slane %v221_v45, 7  ;;  %v13909_v60 = vld [vmem:[%s14674_s9 + $0x280] ss:$8 sps:$4 sm:$0xff]  }
 0x599   :  { %4577 = vmatpush1.bf16.msra.mxu1 %v13834_v16  ;;  %v219_v16 = vld [vmem:[%s14669_s5 + $0x150] sm:$0xff]  ;;  %590 = vst [vmem:[#allocation2 + $0x1a0] sm:$0xfe] %v392_v17 }
 0x59a   :  { %4599 = vmatprep.subr.bf16.mxu1 %v13839_v1  ;;  %v421_v1 = vsel %vm321_vm0, %v402_v4, %v420_v15  ;;  %v391_v11 = vrot.slane %v219_v16, 7  ;;  %v408_v4 = vrot.slane %v229_v31, 7  ;;  %591 = vst [vmem:[#allocation2 + $0x1a8] sm:$0xfe] %v393_v8  ;;  %v13921_v31 = vld [vmem:[%s14674_s9 + $0x2c0] ss:$8 sps:$4 sm:$0xff]  }
 0x59c   :  { %4579 = vmatmul.mubr.bf16.vlgmr.msra.gmra.mrb[4].mxu1 %v3484_v23  ;;  %v439_v23 = vsel %vm321_vm0, %v420_v15, %v438_v57  ;;  %589 = vst [vmem:[#allocation2 + $0x198] sm:$0xfe] %v391_v11  ;;  %v13906_v15 = vld [vmem:[%s14674_s9 + $0x270] ss:$8 sps:$4 sm:$0xff]   ;;  %v13911_v57 = vld [vmem:[%s14674_s9 + $0x284] ss:$8 sps:$4 sm:$0xff]  }
 0x59d   :  { %4600 = vmatpush1.bf16.msra.mxu1 %v13837_v32  ;;  %4588 = vmatprep.mubr.bf16.mxu1 %v15451_v34  ;;  %v15606_v29 = vpack.c.bf16 %v439_v23, %v421_v1  ;;  %v13882_v32 = vld [vmem:[%s14674_s9 + $0x1f0] ss:$8 sps:$4 sm:$0xff]   ;;  %v13917_v23 = vld [vmem:[%s14674_s9 + $0x2a4] ss:$8 sps:$4 sm:$0xff]  }
 0x59e   :  { %4601 = vmatprep.subr.bf16.mxu1 %v13842_v62  ;;  %v3450_v62 = vld [vmem:[#allocation2 + $0x178] sm:$0xff] }
 0x59f   :  { %v13912_v1 = vld [vmem:[%s14674_s9 + $0x290] ss:$8 sps:$4 sm:$0xff]  }
 0x5a1   :  { %4602 = vmatpush1.bf16.msra.mxu1 %v13840_v63  ;;  %v13887_v63 = vld [vmem:[%s14674_s9 + $0x204] ss:$8 sps:$4 sm:$0xff]  }
 0x5a2   :  { %4603 = vmatprep.subr.bf16.mxu1 %v13845_v24  ;;  %v3486_v24 = vpack.c.bf16 %v15481_v33, %v3450_v62  ;;  %v13888_v33 = vld [vmem:[%s14674_s9 + $0x210] ss:$8 sps:$4 sm:$0xff]  }
 0x5a3   :  { %v13918_v62 = vld [vmem:[%s14674_s9 + $0x2b0] ss:$8 sps:$4 sm:$0xff]  }
 0x5a4   :  { %4589 = vmatmul.mubr.bf16.gmra.mrb[8].mxu1 %v15458_v14 }
 0x5a5   :  { %4604 = vmatpush1.bf16.msra.mxu1 %v13843_v9  ;;  %4631 = vmatprep.mubr.bf16.mxu1 %v3487_v61  ;;  %v13885_v9 = vld [vmem:[%s14674_s9 + $0x200] ss:$8 sps:$4 sm:$0xff]   ;;  %v406_v61 = vrot.slane %v228_v25, 7  ;;  %v13929_v25 = vld [vmem:[%s14674_s9 + $0x2e4] ss:$8 sps:$4 sm:$0xff]  }
 0x5a6   :  { %4605 = vmatprep.subr.bf16.mxu1 %v13848_v36  ;;  %v13890_v36 = vld [vmem:[%s14674_s9 + $0x214] ss:$8 sps:$4 sm:$0xff]  }
 0x5a9   :  { %4606 = vmatpush1.bf16.msra.mxu1 %v13846_v22  ;;  %v15616_v22 = vsel %vm321_vm0, %v392_v17, %v408_v4  ;;  %v13914_v17 = vld [vmem:[%s14674_s9 + $0x294] ss:$8 sps:$4 sm:$0xff]  }
 0x5aa   :  { %4607 = vmatprep.subr.bf16.mxu1 %v13851_v18  ;;  %599 = vst [vmem:[#allocation2 + $0x1e8] sm:$0xff] %v15616_v22  ;;  %v15620_v18 = vsel %vm321_vm0, %v391_v11, %v406_v61  ;;  %v13915_v11 = vld [vmem:[%s14674_s9 + $0x2a0] ss:$8 sps:$4 sm:$0xff]  }
 0x5ab   :  { %598 = vst [vmem:[#allocation2 + $0x1e0] sm:$0xff] %v15620_v18 }
 0x5ad   :  { %4608 = vmatpush1.bf16.msra.mxu1 %v13849_v3  ;;  %v13893_v3 = vld [vmem:[%s14674_s9 + $0x224] ss:$8 sps:$4 sm:$0xff]  }
 0x5ae   :  { %4609 = vmatprep.subr.bf16.mxu1 %v13854_v41  ;;  %v3453_v41 = vld [vmem:[#allocation2 + $0x190] sm:$0xff] }
 0x5b1   :  { %4610 = vmatpush1.bf16.msra.mxu1 %v13852_v37  ;;  %v13891_v37 = vld [vmem:[%s14674_s9 + $0x220] ss:$8 sps:$4 sm:$0xff]  }
 0x5b2   :  { %4611 = vmatprep.subr.bf16.mxu1 %v13857_v52  ;;  %v3489_v52 = vpack.c.bf16 %v15547_v20, %v3453_v41  ;;  %v13900_v20 = vld [vmem:[%s14674_s9 + $0x250] ss:$8 sps:$4 sm:$0xff]  }
 0x5b5   :  { %4612 = vmatpush1.bf16.msra.mxu1 %v13855_v39  ;;  %v13896_v39 = vld [vmem:[%s14674_s9 + $0x234] ss:$8 sps:$4 sm:$0xff]  }
 0x5b6   :  { %4613 = vmatprep.subr.bf16.mxu1 %v13860_v28  ;;  %v13894_v28 = vld [vmem:[%s14674_s9 + $0x230] ss:$8 sps:$4 sm:$0xff]  }
 0x5b9   :  { %4614 = vmatpush1.bf16.msra.mxu1 %v13858_v42  ;;  %v13899_v42 = vld [vmem:[%s14674_s9 + $0x244] ss:$8 sps:$4 sm:$0xff]  }
 0x5ba   :  { %4615 = vmatprep.subr.bf16.mxu1 %v13863_v43  ;;  %v13897_v43 = vld [vmem:[%s14674_s9 + $0x240] ss:$8 sps:$4 sm:$0xff]  }
 0x5bd   :  { %4616 = vmatpush1.bf16.msra.mxu1 %v13861_v40  ;;  %v13902_v40 = vld [vmem:[%s14674_s9 + $0x254] ss:$8 sps:$4 sm:$0xff]  }
 0x5be   :  { %4617 = vmatprep.subr.bf16.mxu1 %v13866_v27  ;;  %v13905_v27 = vld [vmem:[%s14674_s9 + $0x264] ss:$8 sps:$4 sm:$0xff]  }
 0x5c1   :  { %4618 = vmatpush1.bf16.msra.mxu1 %v13864_v30  ;;  %v238_v30 = vld [vmem:[%s14669_s5 + $0x1e8] sm:$0xff] }
 0x5c2   :  { %4619 = vmatprep.subr.bf16.mxu1 %v13869_v46  ;;  %v247_v46 = vld [vmem:[%s14669_s5 + $0x230] sm:$0xff] }
 0x5c5   :  { %4620 = vmatpush1.bf16.msra.mxu1 %v13867_v47  ;;  %v426_v47 = vrot.slane %v238_v30, 7  ;;  %v13945_v30 = vld [vmem:[%s14674_s9 + $0x340] ss:$8 sps:$4 sm:$0xff]  }
 0x5c6   :  { %4621 = vmatprep.subr.bf16.mxu1 %v13872_v35  ;;  %v444_v35 = vrot.slane %v247_v46, 7  ;;  %v13950_v46 = vld [vmem:[%s14674_s9 + $0x354] ss:$8 sps:$4 sm:$0xff]  }
 0x5c7   :  { %v427_v54 = vsel %vm321_vm0, %v408_v4, %v426_v47  ;;  %v13924_v4 = vld [vmem:[%s14674_s9 + $0x2d0] ss:$8 sps:$4 sm:$0xff]  }
 0x5c8   :  { %v445_v44 = vsel %vm321_vm0, %v426_v47, %v444_v35  ;;  %626 = vst [vmem:[#allocation2 + $0x2c0] sm:$0x1] %v444_v35  ;;  %v13948_v47 = vld [vmem:[%s14674_s9 + $0x350] ss:$8 sps:$4 sm:$0xff]  }
 0x5c9   :  { %4622 = vmatpush1.bf16.msra.mxu1 %v13870_v26  ;;  %v237_v26 = vld [vmem:[%s14669_s5 + $0x1e0] sm:$0xff]  ;;  %v15645_v38 = vpack.c.bf16 %v445_v44, %v427_v54 }
 0x5ca   :  { %4623 = vmatprep.subr.bf16.mxu1 %v13875_v48  ;;  %v246_v48 = vld [vmem:[%s14669_s5 + $0x228] sm:$0xff] }
 0x5cb   :  { %v13951_v54 = vld [vmem:[%s14674_s9 + $0x360] ss:$8 sps:$4 sm:$0xff]  }
 0x5cd   :  { %4624 = vmatpush1.bf16.msra.mxu1 %v13873_v49  ;;  %v13903_v49 = vld [vmem:[%s14674_s9 + $0x260] ss:$8 sps:$4 sm:$0xff]  }
 0x5ce   :  { %4625 = vmatprep.subr.bf16.mxu1 %v13878_v50  ;;  %v424_v50 = vrot.slane %v237_v26, 7 }
 0x5d0   :  { %v425_v58 = vsel %vm321_vm0, %v406_v61, %v424_v50  ;;  %v13932_v61 = vld [vmem:[%s14674_s9 + $0x2f4] ss:$8 sps:$4 sm:$0xff]  }
 0x5d1   :  { %4626 = vmatpush1.bf16.msra.mxu1 %v13876_v51  ;;  %v442_v51 = vrot.slane %v246_v48, 7 }
 0x5d2   :  { %4627 = vmatprep.subr.bf16.mxu1 %v13881_v53  ;;  %v13908_v53 = vld [vmem:[%s14674_s9 + $0x274] ss:$8 sps:$4 sm:$0xff]  }
 0x5d3   :  { %v443_v59 = vsel %vm321_vm0, %v424_v50, %v442_v51  ;;  %625 = vst [vmem:[#allocation2 + $0x2b8] sm:$0x1] %v442_v51  ;;  %v248_v50 = vld [vmem:[%s14669_s5 + $0x238] sm:$0xff] }
 0x5d5   :  { %4628 = vmatpush1.bf16.msra.mxu1 %v13879_v5  ;;  %v15649_v5 = vpack.c.bf16 %v443_v59, %v425_v58  ;;  %v13956_v58 = vld [vmem:[%s14674_s9 + $0x374] ss:$8 sps:$4 sm:$0xff]  }
 0x5d6   :  { %4629 = vmatprep.subr.bf16.mxu1 %v13884_v10  ;;  %v15654_v10 = vld [vmem:[%s14669_s5 + $0x1a8] sm:$0xff] }
 0x5d7   :  { %v410_v0 = vrot.slane %v15654_v10, 7  ;;  %v13959_v10 = vld [vmem:[%s14674_s9 + $0x384] ss:$8 sps:$4 sm:$0xff]  }
 0x5d9   :  { %4630 = vmatpush1.bf16.msra.mxu1 %v13882_v32  ;;  %v15662_v16 = vsel %vm321_vm0, %v393_v8, %v410_v0  ;;  %v13920_v32 = vld [vmem:[%s14674_s9 + $0x2b4] ss:$8 sps:$4 sm:$0xff]   ;;  %v446_v8 = vrot.slane %v248_v50, 7 }
 0x5da   :  { %4652 = vmatprep.subr.bf16.mxu1 %v13887_v63  ;;  %600 = vst [vmem:[#allocation2 + $0x1f0] sm:$0xff] %v15662_v16  ;;  %v13923_v63 = vld [vmem:[%s14674_s9 + $0x2c4] ss:$8 sps:$4 sm:$0xff]  }
 0x5db   :  { %627 = vst [vmem:[#allocation2 + $0x2c8] sm:$0x1] %v446_v8 }
 0x5dc   :  { %4632 = vmatmul.mubr.bf16.vlgmr.msra.gmra.mrb[4].mxu1 %v3486_v24  ;;  %v13926_v24 = vld [vmem:[%s14674_s9 + $0x2d4] ss:$8 sps:$4 sm:$0xff]  }
 0x5dd   :  { %4653 = vmatpush1.bf16.msra.mxu1 %v13885_v9  ;;  %4641 = vmatprep.mubr.bf16.mxu1 %v15523_v13  ;;  %v13927_v9 = vld [vmem:[%s14674_s9 + $0x2e0] ss:$8 sps:$4 sm:$0xff]  }
 0x5de   :  { %4654 = vmatprep.subr.bf16.mxu1 %v13890_v36  ;;  %v13930_v36 = vld [vmem:[%s14674_s9 + $0x2f0] ss:$8 sps:$4 sm:$0xff]  }
 0x5e1   :  { %4655 = vmatpush1.bf16.msra.mxu1 %v13888_v33  ;;  %v3452_v33 = vld [vmem:[#allocation2 + $0x188] sm:$0xff] }
 0x5e2   :  { %4656 = vmatprep.subr.bf16.mxu1 %v13893_v3  ;;  %v13935_v3 = vld [vmem:[%s14674_s9 + $0x304] ss:$8 sps:$4 sm:$0xff]   ;;  %v3488_v41 = vpack.c.bf16 %v15553_v56, %v3452_v33  ;;  %v13939_v56 = vld [vmem:[%s14674_s9 + $0x320] ss:$8 sps:$4 sm:$0xff]  }
 0x5e3   :  { %v13977_v33 = vld [vmem:[%s14674_s9 + $0x3e4] ss:$8 sps:$4 sm:$0xff]  }
 0x5e4   :  { %4642 = vmatmul.mubr.bf16.gmra.mrb[8].mxu1 %v15529_v21 }
 0x5e5   :  { %4657 = vmatpush1.bf16.msra.mxu1 %v13891_v37  ;;  %4684 = vmatprep.mubr.bf16.mxu1 %v3489_v52  ;;  %v13933_v37 = vld [vmem:[%s14674_s9 + $0x300] ss:$8 sps:$4 sm:$0xff]   ;;  %v13938_v52 = vld [vmem:[%s14674_s9 + $0x314] ss:$8 sps:$4 sm:$0xff]  }
 0x5e6   :  { %4658 = vmatprep.subr.bf16.mxu1 %v13896_v39  ;;  %v13936_v39 = vld [vmem:[%s14674_s9 + $0x310] ss:$8 sps:$4 sm:$0xff]  }
 0x5e9   :  { %4659 = vmatpush1.bf16.msra.mxu1 %v13894_v28  ;;  %v13941_v28 = vld [vmem:[%s14674_s9 + $0x324] ss:$8 sps:$4 sm:$0xff]  }
 0x5ea   :  { %4660 = vmatprep.subr.bf16.mxu1 %v13899_v42  ;;  %v3455_v42 = vld [vmem:[#allocation2 + $0x1a0] sm:$0xff] }
 0x5ed   :  { %4661 = vmatpush1.bf16.msra.mxu1 %v13897_v43  ;;  %v3491_v43 = vpack.c.bf16 %v15616_v22, %v3455_v42  ;;  %v13953_v22 = vld [vmem:[%s14674_s9 + $0x364] ss:$8 sps:$4 sm:$0xff]   ;;  %v13981_v42 = vld [vmem:[%s14674_s9 + $0x400] ss:$8 sps:$4 sm:$0xff]  }
 0x5ee   :  { %4662 = vmatprep.subr.bf16.mxu1 %v13902_v40  ;;  %v13944_v40 = vld [vmem:[%s14674_s9 + $0x334] ss:$8 sps:$4 sm:$0xff]  }
 0x5f1   :  { %4663 = vmatpush1.bf16.msra.mxu1 %v13900_v20  ;;  %v13942_v20 = vld [vmem:[%s14674_s9 + $0x330] ss:$8 sps:$4 sm:$0xff]  }
 0x5f2   :  { %4664 = vmatprep.subr.bf16.mxu1 %v13905_v27  ;;  %v13947_v27 = vld [vmem:[%s14674_s9 + $0x344] ss:$8 sps:$4 sm:$0xff]  }
 0x5f5   :  { %4665 = vmatpush1.bf16.msra.mxu1 %v13903_v49  ;;  %v239_v49 = vld [vmem:[%s14669_s5 + $0x1f0] sm:$0xff] }
 0x5f6   :  { %4666 = vmatprep.subr.bf16.mxu1 %v13908_v53  ;;  %v428_v59 = vrot.slane %v239_v49, 7  ;;  %v14591_v49 = vld [vmem:[#allocation2 + $0x1b8] sm:$0xff] }
 0x5f9   :  { %4667 = vmatpush1.bf16.msra.mxu1 %v13906_v15 }
 0x5fa   :  { %4668 = vmatprep.subr.bf16.mxu1 %v13911_v57 }
 0x5fd   :  { %4669 = vmatpush1.bf16.msra.mxu1 %v13909_v60  ;;  %v429_v60 = vsel %vm321_vm0, %v410_v0, %v428_v59  ;;  %v13957_v0 = vld [vmem:[%s14674_s9 + $0x380] ss:$8 sps:$4 sm:$0xff]  }
 0x5fe   :  { %4670 = vmatprep.subr.bf16.mxu1 %v13914_v17  ;;  %v447_v17 = vsel %vm321_vm0, %v428_v59, %v446_v8  ;;  %v14005_v59 = vld [vmem:[%s14679_s13] ss:$8 sps:$4 sm:$0xff]  }
 0x601   :  { %4671 = vmatpush1.bf16.msra.mxu1 %v13912_v1 }
 0x602   :  { %4672 = vmatprep.subr.bf16.mxu1 %v13917_v23  ;;  %v13954_v23 = vld [vmem:[%s14674_s9 + $0x370] ss:$8 sps:$4 sm:$0xff]  }
 0x605   :  { %4673 = vmatpush1.bf16.msra.mxu1 %v13915_v11  ;;  %v15706_v11 = vpack.c.bf16 %v447_v17, %v429_v60  ;;  %v4831_v60 = vshll.u32 %v15451_v34, 16  ;;  %v14008_v17 = vld [vmem:[%s14679_s13 + $0x10] ss:$8 sps:$4 sm:$0xff]  }
 0x606   :  { %4674 = vmatprep.subr.bf16.mxu1 %v13920_v32  ;;  %v13962_v32 = vld [vmem:[%s14674_s9 + $0x394] ss:$8 sps:$4 sm:$0xff]  }
 0x609   :  { %4675 = vmatpush1.bf16.msra.mxu1 %v13918_v62  ;;  %v13960_v62 = vld [vmem:[%s14674_s9 + $0x390] ss:$8 sps:$4 sm:$0xff]  }
 0x60a   :  { %4676 = vmatprep.subr.bf16.mxu1 %v13923_v63  ;;  %v13965_v63 = vld [vmem:[%s14674_s9 + $0x3a4] ss:$8 sps:$4 sm:$0xff]  }
 0x60d   :  { %4677 = vmatpush1.bf16.msra.mxu1 %v13921_v31  ;;  %v13963_v31 = vld [vmem:[%s14674_s9 + $0x3a0] ss:$8 sps:$4 sm:$0xff]  }
 0x60e   :  { %4678 = vmatprep.subr.bf16.mxu1 %v13926_v24  ;;  %v13968_v24 = vld [vmem:[%s14674_s9 + $0x3b4] ss:$8 sps:$4 sm:$0xff]  }
 0x611   :  { %4679 = vmatpush1.bf16.msra.mxu1 %v13924_v4  ;;  %v13966_v4 = vld [vmem:[%s14674_s9 + $0x3b0] ss:$8 sps:$4 sm:$0xff]  }
 0x612   :  { %4680 = vmatprep.subr.bf16.mxu1 %v13929_v25  ;;  %v13971_v25 = vld [vmem:[%s14674_s9 + $0x3c4] ss:$8 sps:$4 sm:$0xff]  }
 0x615   :  { %4681 = vmatpush1.bf16.msra.mxu1 %v13927_v9  ;;  %v13969_v9 = vld [vmem:[%s14674_s9 + $0x3c0] ss:$8 sps:$4 sm:$0xff]  }
 0x616   :  { %4682 = vmatprep.subr.bf16.mxu1 %v13932_v61  ;;  %v13974_v61 = vld [vmem:[%s14674_s9 + $0x3d4] ss:$8 sps:$4 sm:$0xff]  }
 0x619   :  { %4683 = vmatpush1.bf16.msra.mxu1 %v13930_v36  ;;  %v13972_v36 = vld [vmem:[%s14674_s9 + $0x3d0] ss:$8 sps:$4 sm:$0xff]  }
 0x61a   :  { %4705 = vmatprep.subr.bf16.mxu1 %v13935_v3  ;;  %v13975_v3 = vld [vmem:[%s14674_s9 + $0x3e0] ss:$8 sps:$4 sm:$0xff]  }
 0x61c   :  { %4685 = vmatmul.mubr.bf16.vlgmr.msra.gmra.mrb[4].mxu1 %v3488_v41  ;;  %v13980_v41 = vld [vmem:[%s14674_s9 + $0x3f4] ss:$8 sps:$4 sm:$0xff]  }
 0x61d   :  { %4706 = vmatpush1.bf16.msra.mxu1 %v13933_v37  ;;  %4694 = vmatprep.mubr.bf16.mxu1 %v15600_v19  ;;  %v13978_v37 = vld [vmem:[%s14674_s9 + $0x3f0] ss:$8 sps:$4 sm:$0xff]  }
 0x61e   :  { %4707 = vmatprep.subr.bf16.mxu1 %v13938_v52  ;;  %v3454_v52 = vld [vmem:[#allocation2 + $0x198] sm:$0xff] }
 0x621   :  { %4708 = vmatpush1.bf16.msra.mxu1 %v13936_v39  ;;  %v13983_v39 = vld [vmem:[%s14674_s9 + $0x404] ss:$8 sps:$4 sm:$0xff]  }
 0x622   :  { %4709 = vmatprep.subr.bf16.mxu1 %v13941_v28  ;;  %v3490_v28 = vpack.c.bf16 %v15620_v18, %v3454_v52  ;;  %v13992_v18 = vld [vmem:[%s14674_s9 + $0x434] ss:$8 sps:$4 sm:$0xff]   ;;  %v14037_v52 = vld [vmem:[%s14679_s13 + $0xa4] ss:$8 sps:$4 sm:$0xff]  }
 0x624   :  { %4695 = vmatmul.mubr.bf16.gmra.mrb[8].mxu1 %v15606_v29 }
 0x625   :  { %4710 = vmatpush1.bf16.msra.mxu1 %v13939_v56  ;;  %4737 = vmatprep.mubr.bf16.mxu1 %v3491_v43  ;;  %v13986_v56 = vld [vmem:[%s14674_s9 + $0x414] ss:$8 sps:$4 sm:$0xff]   ;;  %v13984_v43 = vld [vmem:[%s14674_s9 + $0x410] ss:$8 sps:$4 sm:$0xff]  }
 0x626   :  { %4711 = vmatprep.subr.bf16.mxu1 %v13944_v40  ;;  %v13989_v40 = vld [vmem:[%s14674_s9 + $0x424] ss:$8 sps:$4 sm:$0xff]  }
 0x629   :  { %4712 = vmatpush1.bf16.msra.mxu1 %v13942_v20  ;;  %v13987_v20 = vld [vmem:[%s14674_s9 + $0x420] ss:$8 sps:$4 sm:$0xff]  }
 0x62a   :  { %4713 = vmatprep.subr.bf16.mxu1 %v13947_v27  ;;  %v13990_v27 = vld [vmem:[%s14674_s9 + $0x430] ss:$8 sps:$4 sm:$0xff]  }
 0x62d   :  { %4714 = vmatpush1.bf16.msra.mxu1 %v13945_v30  ;;  %v13995_v30 = vld [vmem:[%s14674_s9 + $0x444] ss:$8 sps:$4 sm:$0xff]  }
 0x62e   :  { %4715 = vmatprep.subr.bf16.mxu1 %v13950_v46  ;;  %v13993_v46 = vld [vmem:[%s14674_s9 + $0x440] ss:$8 sps:$4 sm:$0xff]  }
 0x62f   :  { %v3394_v35 = vpop.f32.mrb[0].mxu1 }
 0x630   :  { %v3429_v26 = vrot.slane %v3394_v35, 7  ;;  %v3396_v48 = vpop.f32.mrb[1].mxu1  ;;  %v14001_v35 = vld [vmem:[%s14674_s9 + $0x464] ss:$8 sps:$4 sm:$0xff]  }
 0x631   :  { %v3430_v51 = vrot.slane %v3396_v48, 7  ;;  %v3398_v53 = vpop.f32.mrb[2].mxu1  ;;  %4716 = vmatpush1.bf16.msra.mxu1 %v13948_v47  ;;  %v13998_v47 = vld [vmem:[%s14674_s9 + $0x454] ss:$8 sps:$4 sm:$0xff]   ;;  %v13999_v48 = vld [vmem:[%s14674_s9 + $0x460] ss:$8 sps:$4 sm:$0xff]  }
 0x632   :  { %3441 = vst [vmem:[#allocation3 + $0x10] sm:$0xfe] %v3429_v26  ;;  %v3431_v44 = vrot.slane %v3398_v53, 7  ;;  %v3400_v45 = vpop.f32.mrb[3].mxu1  ;;  %4717 = vmatprep.subr.bf16.mxu1 %v13953_v22  ;;  %v13996_v22 = vld [vmem:[%s14674_s9 + $0x450] ss:$8 sps:$4 sm:$0xff]  }
 0x633   :  { %3442 = vst [vmem:[#allocation3 + $0x18] sm:$0xfe] %v3430_v51  ;;  %v3433_v15 = vrot.slane %v3400_v45, 7  ;;  %v14002_v53 = vld [vmem:[%s14674_s9 + $0x470] ss:$8 sps:$4 sm:$0xff]  }
 0x634   :  { %v3432_v57 = vsel %vm321_vm0, %v3429_v26, %v3431_v44  ;;  %3445 = vst [vmem:[#allocation3 + $0x50] sm:$0x1] %v3431_v44  ;;  %v3503_v26 = vld [vmem:[#allocation2 + $0x170] sm:$0xfe]  ;;  %v14007_v45 = vld [vmem:[%s14679_s13 + $0x4] ss:$8 sps:$4 sm:$0xff]  }
 0x635   :  { %3443 = vst [vmem:[#allocation3 + $0x30] sm:$0xff] %v3432_v57  ;;  %v3434_v1 = vsel %vm321_vm0, %v3430_v51, %v3433_v15  ;;  %3446 = vst [vmem:[#allocation3 + $0x58] sm:$0x1] %v3433_v15  ;;  %4718 = vmatpush1.bf16.msra.mxu1 %v13951_v54  ;;  %v3521_v50 = vpack.c.bf16 %v14591_v49, %v3503_v26  ;;  %v14004_v51 = vld [vmem:[%s14674_s9 + $0x474] ss:$8 sps:$4 sm:$0xff]   ;;  %v3456_v54 = vld [vmem:[#allocation2 + $0x1a8] sm:$0xff] }
 0x636   :  { %3444 = vst [vmem:[#allocation3 + $0x38] sm:$0xff] %v3434_v1  ;;  %4719 = vmatprep.subr.bf16.mxu1 %v13956_v58  ;;  %v3492_v58 = vpack.c.bf16 %v15662_v16, %v3456_v54  ;;  %v14010_v15 = vld [vmem:[%s14679_s13 + $0x14] ss:$8 sps:$4 sm:$0xff]   ;;  %v14013_v16 = vld [vmem:[%s14679_s13 + $0x24] ss:$8 sps:$4 sm:$0xff]  }
 0x637   :  { %v4826_v44 = vshll.u32 %v3521_v50, 16  ;;  %v4824_v8 = vshrl.u32 %v3521_v50, 16  ;;  %v3505_v26 = vld [vmem:[#allocation2 + $0x180] sm:$0xfe]  ;;  %v4819_v50 = vshll.u32 %v15458_v14, 16 }
 0x639   :  { %4720 = vmatpush1.bf16.msra.mxu1 %v13954_v23  ;;  %v4828_v57 = vrot.slane %v4826_v44, 1  ;;  %v15752_v23 = vrot.slane %v4831_v60, 1  ;;  %v14052_v44 = vld [vmem:[%s14679_s13 + $0xf4] ss:$8 sps:$4 sm:$0xff]  }
 0x63a   :  { %4721 = vmatprep.subr.bf16.mxu1 %v13959_v10  ;;  %v14011_v10 = vld [vmem:[%s14679_s13 + $0x20] ss:$8 sps:$4 sm:$0xff]  }
 0x63b   :  { %v4829_v1 = vor.u32 %v4828_v57, %v4824_v8  ;;  %v4821_v8 = vrot.slane %v4819_v50, 1  ;;  %v3504_v50 = vld [vmem:[#allocation2 + $0x178] sm:$0xfe] }
 0x63d   :  { %4722 = vmatpush1.bf16.msra.mxu1 %v13957_v0  ;;  %v14016_v0 = vld [vmem:[%s14679_s13 + $0x34] ss:$8 sps:$4 sm:$0xff]  }
 0x63e   :  { %4723 = vmatprep.subr.bf16.mxu1 %v13962_v32  ;;  %v4834_v32 = vsel %vm1991_vm2, %v4829_v1, %v15752_v23 }
 0x641   :  { %4724 = vmatpush1.bf16.msra.mxu1 %v13960_v62  ;;  %v14014_v62 = vld [vmem:[%s14679_s13 + $0x30] ss:$8 sps:$4 sm:$0xff]  }
 0x642   :  { %4725 = vmatprep.subr.bf16.mxu1 %v13965_v63  ;;  %v14019_v63 = vld [vmem:[%s14679_s13 + $0x44] ss:$8 sps:$4 sm:$0xff]  }
 0x645   :  { %4726 = vmatpush1.bf16.msra.mxu1 %v13963_v31  ;;  %v14017_v31 = vld [vmem:[%s14679_s13 + $0x40] ss:$8 sps:$4 sm:$0xff]  }
 0x646   :  { %4727 = vmatprep.subr.bf16.mxu1 %v13968_v24  ;;  %v14022_v24 = vld [vmem:[%s14679_s13 + $0x54] ss:$8 sps:$4 sm:$0xff]  }
 0x649   :  { %4728 = vmatpush1.bf16.msra.mxu1 %v13966_v4  ;;  %v14020_v4 = vld [vmem:[%s14679_s13 + $0x50] ss:$8 sps:$4 sm:$0xff]  }
 0x64a   :  { %4729 = vmatprep.subr.bf16.mxu1 %v13971_v25  ;;  %v14025_v25 = vld [vmem:[%s14679_s13 + $0x64] ss:$8 sps:$4 sm:$0xff]  }
 0x64d   :  { %4730 = vmatpush1.bf16.msra.mxu1 %v13969_v9  ;;  %v14023_v9 = vld [vmem:[%s14679_s13 + $0x60] ss:$8 sps:$4 sm:$0xff]  }
 0x64e   :  { %4731 = vmatprep.subr.bf16.mxu1 %v13974_v61  ;;  %v14028_v61 = vld [vmem:[%s14679_s13 + $0x74] ss:$8 sps:$4 sm:$0xff]  }
 0x651   :  { %4732 = vmatpush1.bf16.msra.mxu1 %v13972_v36  ;;  %v14026_v36 = vld [vmem:[%s14679_s13 + $0x70] ss:$8 sps:$4 sm:$0xff]  }
 0x652   :  { %4733 = vmatprep.subr.bf16.mxu1 %v13977_v33  ;;  %v14031_v33 = vld [vmem:[%s14679_s13 + $0x84] ss:$8 sps:$4 sm:$0xff]  }
 0x655   :  { %4734 = vmatpush1.bf16.msra.mxu1 %v13975_v3  ;;  %v14029_v3 = vld [vmem:[%s14679_s13 + $0x80] ss:$8 sps:$4 sm:$0xff]  }
 0x656   :  { %4735 = vmatprep.subr.bf16.mxu1 %v13980_v41  ;;  %v14034_v41 = vld [vmem:[%s14679_s13 + $0x94] ss:$8 sps:$4 sm:$0xff]  }
 0x659   :  { %4736 = vmatpush1.bf16.msra.mxu1 %v13978_v37  ;;  %v14032_v37 = vld [vmem:[%s14679_s13 + $0x90] ss:$8 sps:$4 sm:$0xff]  }
 0x65a   :  { %4758 = vmatprep.subr.bf16.mxu1 %v13983_v39  ;;  %v14035_v39 = vld [vmem:[%s14679_s13 + $0xa0] ss:$8 sps:$4 sm:$0xff]  }
 0x65c   :  { %4738 = vmatmul.mubr.bf16.vlgmr.msra.gmra.mrb[4].mxu1 %v3490_v28  ;;  %v14040_v28 = vld [vmem:[%s14679_s13 + $0xb4] ss:$8 sps:$4 sm:$0xff]  }
 0x65d   :  { %4759 = vmatpush1.bf16.msra.mxu1 %v13981_v42  ;;  %4747 = vmatprep.mubr.bf16.mxu1 %v15645_v38  ;;  %v14038_v42 = vld [vmem:[%s14679_s13 + $0xb0] ss:$8 sps:$4 sm:$0xff]  }
 0x65e   :  { %4760 = vmatprep.subr.bf16.mxu1 %v13986_v56  ;;  %v3502_v56 = vld [vmem:[#allocation2 + $0x168] sm:$0xfe] }
 0x661   :  { %4761 = vmatpush1.bf16.msra.mxu1 %v13984_v43  ;;  %v14043_v43 = vld [vmem:[%s14679_s13 + $0xc4] ss:$8 sps:$4 sm:$0xff]  }
 0x662   :  { %4762 = vmatprep.subr.bf16.mxu1 %v13989_v40  ;;  %v14592_v40 = vld [vmem:[#allocation2 + $0x1b0] sm:$0xff] }
 0x664   :  { %4748 = vmatmul.mubr.bf16.gmra.mrb[8].mxu1 %v15649_v5 }
 0x665   :  { %4763 = vmatpush1.bf16.msra.mxu1 %v13987_v20  ;;  %4790 = vmatprep.mubr.bf16.mxu1 %v14658_v12  ;;  %v3520_v20 = vpack.c.bf16 %v14592_v40, %v3502_v56  ;;  %v14070_v56 = vld [vmem:[%s14679_s13 + $0x154] ss:$8 sps:$4 sm:$0xff]   ;;  %v14073_v40 = vld [vmem:[%s14679_s13 + $0x164] ss:$8 sps:$4 sm:$0xff]  }
 0x666   :  { %4764 = vmatprep.subr.bf16.mxu1 %v13992_v18  ;;  %v14041_v18 = vld [vmem:[%s14679_s13 + $0xc0] ss:$8 sps:$4 sm:$0xff]  }
 0x669   :  { %4765 = vmatpush1.bf16.msra.mxu1 %v13990_v27  ;;  %v14046_v27 = vld [vmem:[%s14679_s13 + $0xd4] ss:$8 sps:$4 sm:$0xff]  }
 0x66a   :  { %4766 = vmatprep.subr.bf16.mxu1 %v13995_v30  ;;  %v3512_v30 = vld [vmem:[#allocation2 + $0x290] sm:$0x1] }
 0x66d   :  { %4767 = vmatpush1.bf16.msra.mxu1 %v13993_v46  ;;  %v4814_v46 = vshll.u32 %v3520_v20, 16 }
 0x66e   :  { %4768 = vmatprep.subr.bf16.mxu1 %v13998_v47  ;;  %v14044_v47 = vld [vmem:[%s14679_s13 + $0xd0] ss:$8 sps:$4 sm:$0xff]  }
 0x66f   :  { %v4816_v49 = vrot.slane %v4814_v46, 1  ;;  %v14077_v46 = vld [vmem:[%s14679_s13 + $0x180] ss:$8 sps:$4 sm:$0xff]  }
 0x671   :  { %4769 = vmatpush1.bf16.msra.mxu1 %v13996_v22  ;;  %v14049_v22 = vld [vmem:[%s14679_s13 + $0xe4] ss:$8 sps:$4 sm:$0xff]  }
 0x672   :  { %4770 = vmatprep.subr.bf16.mxu1 %v14001_v35  ;;  %v3530_v35 = vpack.c.bf16 %v3512_v30, %v3512_v30  ;;  %v14079_v30 = vld [vmem:[%s14679_s13 + $0x184] ss:$8 sps:$4 sm:$0xff]  }
 0x675   :  { %4771 = vmatpush1.bf16.msra.mxu1 %v13999_v48  ;;  %v4812_v48 = vshrl.u32 %v3520_v20, 16  ;;  %v14071_v20 = vld [vmem:[%s14679_s13 + $0x160] ss:$8 sps:$4 sm:$0xff]  }
 0x676   :  { %4772 = vmatprep.subr.bf16.mxu1 %v14004_v51  ;;  %v14047_v51 = vld [vmem:[%s14679_s13 + $0xe0] ss:$8 sps:$4 sm:$0xff]  }
 0x677   :  { %v4817_v57 = vor.u32 %v4816_v49, %v4812_v48  ;;  %v14088_v48 = vld [vmem:[%s14679_s13 + $0x1b4] ss:$8 sps:$4 sm:$0xff]   ;;  %v14086_v49 = vld [vmem:[%s14679_s13 + $0x1b0] ss:$8 sps:$4 sm:$0xff]  }
 0x679   :  { %4773 = vmatpush1.bf16.msra.mxu1 %v14002_v53  ;;  %v14593_v53 = vld [vmem:[#allocation2 + $0x1c8] sm:$0xff] }
 0x67a   :  { %5729 = vmatprep.subr.bf16.mxu1 %v14007_v45  ;;  %v3523_v54 = vpack.c.bf16 %v14593_v53, %v3505_v26  ;;  %v4927_v45 = vshrl.u32 %v15451_v34, 16  ;;  %v4919_v34 = vshrl.u32 %v15458_v14, 16  ;;  %v14061_v14 = vld [vmem:[%s14679_s13 + $0x124] ss:$8 sps:$4 sm:$0xff]   ;;  %v14083_v26 = vld [vmem:[%s14679_s13 + $0x1a0] ss:$8 sps:$4 sm:$0xff]  }
 0x67b   :  { %v14594_v53 = vld [vmem:[#allocation2 + $0x1c0] sm:$0xff] }
 0x67c   :  { %4791 = vmatmul.mubr.bf16.vlgmr.msra.gmra.mrb[4].mxu1 %v3492_v58  ;;  %v4931_v58 = vshll.u32 %v3530_v35, 16  ;;  %v4929_v1 = vor.u32 %v4927_v45, %v15752_v23  ;;  %v14056_v23 = vld [vmem:[%s14679_s13 + $0x110] ss:$8 sps:$4 sm:$0xff]   ;;  %v14085_v35 = vld [vmem:[%s14679_s13 + $0x1a4] ss:$8 sps:$4 sm:$0xff]  }
 0x67d   :  { %5730 = vmatpush1.bf16.msra.mxu1 %v14005_v59  ;;  %4800 = vmatprep.mubr.bf16.mxu1 %v14658_v12  ;;  %v3511_v59 = vld [vmem:[#allocation2 + $0x288] sm:$0x1]  ;;  %v14094_v45 = vld [vmem:[%s14679_s13 + $0x1d4] ss:$8 sps:$4 sm:$0xff]  }
 0x67e   :  { %5731 = vmatprep.subr.bf16.mxu1 %v14010_v15  ;;  %v14050_v15 = vld [vmem:[%s14679_s13 + $0xf0] ss:$8 sps:$4 sm:$0xff]   ;;  %v3529_v60 = vpack.c.bf16 %v3511_v59, %v3511_v59 }
 0x67f   :  { %v14092_v59 = vld [vmem:[%s14679_s13 + $0x1d0] ss:$8 sps:$4 sm:$0xff]  }
 0x681   :  { %5732 = vmatpush1.bf16.msra.mxu1 %v14008_v17  ;;  %v4850_v17 = vshll.u32 %v3523_v54, 16 }
 0x682   :  { %5733 = vmatprep.subr.bf16.mxu1 %v14013_v16  ;;  %v14055_v16 = vld [vmem:[%s14679_s13 + $0x104] ss:$8 sps:$4 sm:$0xff]  }
 0x684   :  { %4801 = vmatmul.mubr.bf16.gmra.mrb[8].mxu1 %v15706_v11 }
 0x685   :  { %5734 = vmatpush1.bf16.msra.mxu1 %v14011_v10  ;;  %5761 = vmatprep.mubr.bf16.mxu1 %v4834_v32  ;;  %v4933_v10 = vrot.slane %v4931_v58, 1  ;;  %v4822_v32 = vsel %vm1991_vm2, %v4817_v57, %v4821_v8  ;;  %v3514_v58 = vld [vmem:[#allocation2 + $0x2a0] sm:$0x1] }
 0x686   :  { %5735 = vmatprep.subr.bf16.mxu1 %v14016_v0  ;;  %v14053_v0 = vld [vmem:[%s14679_s13 + $0x100] ss:$8 sps:$4 sm:$0xff]   ;;  %v3532_v57 = vpack.c.bf16 %v3514_v58, %v3514_v58  ;;  %v14130_v58 = vld [vmem:[%s14679_s13 + $0x294] ss:$8 sps:$4 sm:$0xff]  }
 0x689   :  { %5736 = vmatpush1.bf16.msra.mxu1 %v14014_v62  ;;  %v4923_v62 = vshll.u32 %v3529_v60, 16  ;;  %v3507_v60 = vld [vmem:[#allocation2 + $0x190] sm:$0xfe] }
 0x68a   :  { %5737 = vmatprep.subr.bf16.mxu1 %v14019_v63  ;;  %v4848_v63 = vshrl.u32 %v3523_v54, 16  ;;  %v3522_v54 = vpack.c.bf16 %v14594_v53, %v3504_v50  ;;  %v14121_v50 = vld [vmem:[%s14679_s13 + $0x264] ss:$8 sps:$4 sm:$0xff]   ;;  %v14124_v53 = vld [vmem:[%s14679_s13 + $0x274] ss:$8 sps:$4 sm:$0xff]  }
 0x68d   :  { %5738 = vmatpush1.bf16.msra.mxu1 %v14017_v31  ;;  %v14058_v31 = vld [vmem:[%s14679_s13 + $0x114] ss:$8 sps:$4 sm:$0xff]  }
 0x68e   :  { %5739 = vmatprep.subr.bf16.mxu1 %v14022_v24  ;;  %v4934_v24 = vsel %vm1991_vm2, %v4929_v1, %v4933_v10  ;;  %v4836_v1 = vshrl.u32 %v3522_v54, 16 }
 0x691   :  { %5740 = vmatpush1.bf16.msra.mxu1 %v14020_v4  ;;  %v4852_v4 = vrot.slane %v4850_v17, 1  ;;  %v4843_v17 = vshll.u32 %v15529_v21, 16 }
 0x692   :  { %5741 = vmatprep.subr.bf16.mxu1 %v14025_v25  ;;  %v4855_v25 = vshll.u32 %v15523_v13, 16 }
 0x695   :  { %5742 = vmatpush1.bf16.msra.mxu1 %v14023_v9  ;;  %v4921_v9 = vor.u32 %v4919_v34, %v4821_v8  ;;  %v4838_v8 = vshll.u32 %v3522_v54, 16  ;;  %v14100_v34 = vld [vmem:[%s14679_s13 + $0x1f4] ss:$8 sps:$4 sm:$0xff]   ;;  %v14122_v54 = vld [vmem:[%s14679_s13 + $0x270] ss:$8 sps:$4 sm:$0xff]  }
 0x696   :  { %5743 = vmatprep.subr.bf16.mxu1 %v14028_v61  ;;  %v4925_v61 = vrot.slane %v4923_v62, 1  ;;  %v4943_v62 = vshrl.u32 %v15523_v13, 16  ;;  %v4935_v13 = vshrl.u32 %v15529_v21, 16  ;;  %v14109_v21 = vld [vmem:[%s14679_s13 + $0x224] ss:$8 sps:$4 sm:$0xff]  }
 0x697   :  { %v4840_v10 = vrot.slane %v4838_v8, 1  ;;  %v14133_v8 = vld [vmem:[%s14679_s13 + $0x2a4] ss:$8 sps:$4 sm:$0xff]  }
 0x699   :  { %5744 = vmatpush1.bf16.msra.mxu1 %v14026_v36  ;;  %v4853_v36 = vor.u32 %v4852_v4, %v4848_v63  ;;  %v4947_v63 = vshll.u32 %v3532_v57, 16  ;;  %v14098_v4 = vld [vmem:[%s14679_s13 + $0x1f0] ss:$8 sps:$4 sm:$0xff]   ;;  %v14136_v57 = vld [vmem:[%s14679_s13 + $0x2b4] ss:$8 sps:$4 sm:$0xff]  }
 0x69a   :  { %5745 = vmatprep.subr.bf16.mxu1 %v14031_v33  ;;  %v15796_v33 = vrot.slane %v4855_v25, 1  ;;  %v4841_v25 = vor.u32 %v4840_v10, %v4836_v1  ;;  %v14596_v1 = vld [vmem:[#allocation2 + $0x1d0] sm:$0xff] }
 0x69d   :  { %5746 = vmatpush1.bf16.msra.mxu1 %v14029_v3  ;;  %v14059_v3 = vld [vmem:[%s14679_s13 + $0x120] ss:$8 sps:$4 sm:$0xff]  }
 0x69e   :  { %5747 = vmatprep.subr.bf16.mxu1 %v14034_v41  ;;  %v4926_v41 = vsel %vm1991_vm2, %v4921_v9, %v4925_v61  ;;  %v14103_v61 = vld [vmem:[%s14679_s13 + $0x204] ss:$8 sps:$4 sm:$0xff]  }
 0x6a1   :  { %5748 = vmatpush1.bf16.msra.mxu1 %v14032_v37  ;;  %v14064_v37 = vld [vmem:[%s14679_s13 + $0x134] ss:$8 sps:$4 sm:$0xff]  }
 0x6a2   :  { %5749 = vmatprep.subr.bf16.mxu1 %v14037_v52  ;;  %v4858_v52 = vsel %vm1991_vm2, %v4853_v36, %v15796_v33  ;;  %v4949_v36 = vrot.slane %v4947_v63, 1 }
 0x6a5   :  { %5750 = vmatpush1.bf16.msra.mxu1 %v14035_v39  ;;  %v14062_v39 = vld [vmem:[%s14679_s13 + $0x130] ss:$8 sps:$4 sm:$0xff]  }
 0x6a6   :  { %5751 = vmatprep.subr.bf16.mxu1 %v14040_v28  ;;  %v14067_v28 = vld [vmem:[%s14679_s13 + $0x144] ss:$8 sps:$4 sm:$0xff]  }
 0x6a9   :  { %5752 = vmatpush1.bf16.msra.mxu1 %v14038_v42  ;;  %v14065_v42 = vld [vmem:[%s14679_s13 + $0x140] ss:$8 sps:$4 sm:$0xff]  }
 0x6aa   :  { %5753 = vmatprep.subr.bf16.mxu1 %v14043_v43  ;;  %v14068_v43 = vld [vmem:[%s14679_s13 + $0x150] ss:$8 sps:$4 sm:$0xff]  }
 0x6ad   :  { %5754 = vmatpush1.bf16.msra.mxu1 %v14041_v18  ;;  %v14076_v18 = vld [vmem:[%s14679_s13 + $0x174] ss:$8 sps:$4 sm:$0xff]  }
 0x6ae   :  { %5755 = vmatprep.subr.bf16.mxu1 %v14046_v27  ;;  %v14074_v27 = vld [vmem:[%s14679_s13 + $0x170] ss:$8 sps:$4 sm:$0xff]  }
 0x6b1   :  { %5756 = vmatpush1.bf16.msra.mxu1 %v14044_v47  ;;  %v14082_v47 = vld [vmem:[%s14679_s13 + $0x194] ss:$8 sps:$4 sm:$0xff]  }
 0x6b2   :  { %5757 = vmatprep.subr.bf16.mxu1 %v14049_v22  ;;  %v14080_v22 = vld [vmem:[%s14679_s13 + $0x190] ss:$8 sps:$4 sm:$0xff]  }
 0x6b5   :  { %5758 = vmatpush1.bf16.msra.mxu1 %v14047_v51  ;;  %v14091_v51 = vld [vmem:[%s14679_s13 + $0x1c4] ss:$8 sps:$4 sm:$0xff]  }
 0x6b6   :  { %5759 = vmatprep.subr.bf16.mxu1 %v14052_v44  ;;  %v14089_v44 = vld [vmem:[%s14679_s13 + $0x1c0] ss:$8 sps:$4 sm:$0xff]  }
 0x6b9   :  { %5760 = vmatpush1.bf16.msra.mxu1 %v14050_v15  ;;  %v14097_v15 = vld [vmem:[%s14679_s13 + $0x1e4] ss:$8 sps:$4 sm:$0xff]  }
 0x6ba   :  { %5782 = vmatprep.subr.bf16.mxu1 %v14055_v16  ;;  %v14095_v16 = vld [vmem:[%s14679_s13 + $0x1e0] ss:$8 sps:$4 sm:$0xff]  }
 0x6bc   :  { %5762 = vmatmul.mubr.bf16.vlgmr.msra.gmra.mrb[4].mxu1 %v4822_v32 }
 0x6bd   :  { %5783 = vmatpush1.bf16.msra.mxu1 %v14053_v0  ;;  %5771 = vmatprep.mubr.bf16.mxu1 %v4934_v24  ;;  %v14595_v0 = vld [vmem:[#allocation2 + $0x1d8] sm:$0xff]  ;;  %v4845_v24 = vrot.slane %v4843_v17, 1  ;;  %v3506_v17 = vld [vmem:[#allocation2 + $0x188] sm:$0xfe] }
 0x6be   :  { %5784 = vmatprep.subr.bf16.mxu1 %v14058_v31  ;;  %v3525_v32 = vpack.c.bf16 %v14595_v0, %v3507_v60  ;;  %v3513_v31 = vld [vmem:[#allocation2 + $0x298] sm:$0x1]  ;;  %v3524_v10 = vpack.c.bf16 %v14596_v1, %v3506_v17  ;;  %v14137_v0 = vld [vmem:[%s14679_s13 + $0x2c0] ss:$8 sps:$4 sm:$0xff]   ;;  %v14172_v17 = vld [vmem:[%s14679_s13 + $0x374] ss:$8 sps:$4 sm:$0xff]  }
 0x6bf   :  { %v14134_v60 = vld [vmem:[%s14679_s13 + $0x2b0] ss:$8 sps:$4 sm:$0xff]   ;;  %v14175_v1 = vld [vmem:[%s14679_s13 + $0x384] ss:$8 sps:$4 sm:$0xff]  }
 0x6c0   :  { %v4874_v9 = vshll.u32 %v3525_v32, 16  ;;  %v4862_v63 = vshll.u32 %v3524_v10, 16 }
 0x6c1   :  { %5785 = vmatpush1.bf16.msra.mxu1 %v14056_v23  ;;  %v3531_v23 = vpack.c.bf16 %v3513_v31, %v3513_v31  ;;  %v14145_v31 = vld [vmem:[%s14679_s13 + $0x2e4] ss:$8 sps:$4 sm:$0xff]  }
 0x6c2   :  { %5786 = vmatprep.subr.bf16.mxu1 %v14061_v14  ;;  %v4945_v14 = vor.u32 %v4943_v62, %v15796_v33  ;;  %v14104_v33 = vld [vmem:[%s14679_s13 + $0x210] ss:$8 sps:$4 sm:$0xff]  }
 0x6c3   :  { %v14140_v62 = vld [vmem:[%s14679_s13 + $0x2d0] ss:$8 sps:$4 sm:$0xff]  }
 0x6c4   :  { %5772 = vmatmul.mubr.bf16.gmra.mrb[8].mxu1 %v4926_v41  ;;  %v4846_v41 = vsel %vm1991_vm2, %v4841_v25, %v4845_v24  ;;  %v4867_v25 = vshll.u32 %v15606_v29, 16 }
 0x6c5   :  { %5787 = vmatpush1.bf16.msra.mxu1 %v14059_v3  ;;  %5814 = vmatprep.mubr.bf16.mxu1 %v4858_v52  ;;  %v14101_v3 = vld [vmem:[%s14679_s13 + $0x200] ss:$8 sps:$4 sm:$0xff]   ;;  %v4872_v52 = vshrl.u32 %v3525_v32, 16  ;;  %v14142_v32 = vld [vmem:[%s14679_s13 + $0x2d4] ss:$8 sps:$4 sm:$0xff]  }
 0x6c6   :  { %5788 = vmatprep.subr.bf16.mxu1 %v14064_v37  ;;  %v4939_v37 = vshll.u32 %v3531_v23, 16  ;;  %v14143_v23 = vld [vmem:[%s14679_s13 + $0x2e0] ss:$8 sps:$4 sm:$0xff]  }
 0x6c9   :  { %5789 = vmatpush1.bf16.msra.mxu1 %v14062_v39  ;;  %v14106_v39 = vld [vmem:[%s14679_s13 + $0x214] ss:$8 sps:$4 sm:$0xff]  }
 0x6ca   :  { %5790 = vmatprep.subr.bf16.mxu1 %v14067_v28  ;;  %v4950_v28 = vsel %vm1991_vm2, %v4945_v14, %v4949_v36  ;;  %v14597_v14 = vld [vmem:[#allocation2 + $0x1e8] sm:$0xff] }
 0x6cd   :  { %5791 = vmatpush1.bf16.msra.mxu1 %v14065_v42  ;;  %v4876_v42 = vrot.slane %v4874_v9, 1  ;;  %v4860_v9 = vshrl.u32 %v3524_v10, 16  ;;  %v14173_v10 = vld [vmem:[%s14679_s13 + $0x380] ss:$8 sps:$4 sm:$0xff]  }
 0x6ce   :  { %5792 = vmatprep.subr.bf16.mxu1 %v14070_v56  ;;  %v4879_v56 = vshll.u32 %v15600_v19, 16 }
 0x6d1   :  { %5793 = vmatpush1.bf16.msra.mxu1 %v14068_v43  ;;  %v4937_v43 = vor.u32 %v4935_v13, %v4845_v24 }
 0x6d2   :  { %5794 = vmatprep.subr.bf16.mxu1 %v14073_v40  ;;  %v4941_v40 = vrot.slane %v4939_v37, 1  ;;  %v3515_v37 = vld [vmem:[#allocation2 + $0x2a8] sm:$0x1] }
 0x6d5   :  { %5795 = vmatpush1.bf16.msra.mxu1 %v14071_v20  ;;  %v4877_v20 = vor.u32 %v4876_v42, %v4872_v52  ;;  %v4869_v52 = vrot.slane %v4867_v25, 1  ;;  %v3533_v42 = vpack.c.bf16 %v3515_v37, %v3515_v37  ;;  %v14598_v25 = vld [vmem:[#allocation2 + $0x1e0] sm:$0xff]  ;;  %v4891_v37 = vshll.u32 %v15649_v5, 16 }
 0x6d6   :  { %5796 = vmatprep.subr.bf16.mxu1 %v14076_v18  ;;  %v15840_v18 = vrot.slane %v4879_v56, 1 }
 0x6d9   :  { %5797 = vmatpush1.bf16.msra.mxu1 %v14074_v27  ;;  %v14107_v27 = vld [vmem:[%s14679_s13 + $0x220] ss:$8 sps:$4 sm:$0xff]  }
 0x6da   :  { %5798 = vmatprep.subr.bf16.mxu1 %v14079_v30  ;;  %v4942_v30 = vsel %vm1991_vm2, %v4937_v43, %v4941_v40 }
 0x6dd   :  { %5799 = vmatpush1.bf16.msra.mxu1 %v14077_v46  ;;  %v14112_v46 = vld [vmem:[%s14679_s13 + $0x234] ss:$8 sps:$4 sm:$0xff]  }
 0x6de   :  { %5800 = vmatprep.subr.bf16.mxu1 %v14082_v47  ;;  %v4882_v47 = vsel %vm1991_vm2, %v4877_v20, %v15840_v18 }
 0x6e1   :  { %5801 = vmatpush1.bf16.msra.mxu1 %v14080_v22  ;;  %v14110_v22 = vld [vmem:[%s14679_s13 + $0x230] ss:$8 sps:$4 sm:$0xff]  }
 0x6e2   :  { %5802 = vmatprep.subr.bf16.mxu1 %v14085_v35  ;;  %v14115_v35 = vld [vmem:[%s14679_s13 + $0x244] ss:$8 sps:$4 sm:$0xff]  }
 0x6e5   :  { %5803 = vmatpush1.bf16.msra.mxu1 %v14083_v26  ;;  %v14113_v26 = vld [vmem:[%s14679_s13 + $0x240] ss:$8 sps:$4 sm:$0xff]  }
 0x6e6   :  { %5804 = vmatprep.subr.bf16.mxu1 %v14088_v48  ;;  %v14118_v48 = vld [vmem:[%s14679_s13 + $0x254] ss:$8 sps:$4 sm:$0xff]  }
 0x6e9   :  { %5805 = vmatpush1.bf16.msra.mxu1 %v14086_v49  ;;  %v14116_v49 = vld [vmem:[%s14679_s13 + $0x250] ss:$8 sps:$4 sm:$0xff]  }
 0x6ea   :  { %5806 = vmatprep.subr.bf16.mxu1 %v14091_v51  ;;  %v14119_v51 = vld [vmem:[%s14679_s13 + $0x260] ss:$8 sps:$4 sm:$0xff]  }
 0x6ed   :  { %5807 = vmatpush1.bf16.msra.mxu1 %v14089_v44  ;;  %v14127_v44 = vld [vmem:[%s14679_s13 + $0x284] ss:$8 sps:$4 sm:$0xff]  }
 0x6ee   :  { %5808 = vmatprep.subr.bf16.mxu1 %v14094_v45  ;;  %v14125_v45 = vld [vmem:[%s14679_s13 + $0x280] ss:$8 sps:$4 sm:$0xff]  }
 0x6f1   :  { %5809 = vmatpush1.bf16.msra.mxu1 %v14092_v59  ;;  %v14128_v59 = vld [vmem:[%s14679_s13 + $0x290] ss:$8 sps:$4 sm:$0xff]  }
 0x6f2   :  { %5810 = vmatprep.subr.bf16.mxu1 %v14097_v15  ;;  %v14131_v15 = vld [vmem:[%s14679_s13 + $0x2a0] ss:$8 sps:$4 sm:$0xff]  }
 0x6f5   :  { %5811 = vmatpush1.bf16.msra.mxu1 %v14095_v16  ;;  %v14139_v16 = vld [vmem:[%s14679_s13 + $0x2c4] ss:$8 sps:$4 sm:$0xff]  }
 0x6f6   :  { %5812 = vmatprep.subr.bf16.mxu1 %v14100_v34  ;;  %v3516_v34 = vld [vmem:[#allocation2 + $0x2b0] sm:$0x1] }
 0x6f7   :  { %v3534_v24 = vpack.c.bf16 %v3516_v34, %v3516_v34  ;;  %v14181_v34 = vld [vmem:[%s14679_s13 + $0x3a4] ss:$8 sps:$4 sm:$0xff]  }
 0x6f9   :  { %5813 = vmatpush1.bf16.msra.mxu1 %v14098_v4  ;;  %v3509_v4 = vld [vmem:[#allocation2 + $0x1a0] sm:$0xfe]  ;;  %v4963_v13 = vshll.u32 %v3534_v24, 16  ;;  %v3508_v24 = vld [vmem:[#allocation2 + $0x198] sm:$0xfe] }
 0x6fa   :  { %5835 = vmatprep.subr.bf16.mxu1 %v14103_v61  ;;  %v4864_v61 = vrot.slane %v4862_v63, 1  ;;  %v3527_v36 = vpack.c.bf16 %v14597_v14, %v3509_v4  ;;  %v14184_v63 = vld [vmem:[%s14679_s13 + $0x3b4] ss:$8 sps:$4 sm:$0xff]   ;;  %v14187_v4 = vld [vmem:[%s14679_s13 + $0x3c4] ss:$8 sps:$4 sm:$0xff]  }
 0x6fb   :  { %v4965_v40 = vrot.slane %v4963_v13, 1  ;;  %v3518_v14 = vld [vmem:[#allocation2 + $0x2c0] sm:$0x1] }
 0x6fc   :  { %5815 = vmatmul.mubr.bf16.vlgmr.msra.gmra.mrb[4].mxu1 %v4846_v41  ;;  %v4959_v41 = vshrl.u32 %v15600_v19, 16  ;;  %v4898_v56 = vshll.u32 %v3527_v36, 16  ;;  %v4951_v19 = vshrl.u32 %v15606_v29, 16  ;;  %v14157_v29 = vld [vmem:[%s14679_s13 + $0x324] ss:$8 sps:$4 sm:$0xff]   ;;  %v3536_v13 = vpack.c.bf16 %v3518_v14, %v3518_v14 }
 0x6fd   :  { %5836 = vmatpush1.bf16.msra.mxu1 %v14101_v3  ;;  %5824 = vmatprep.mubr.bf16.mxu1 %v4950_v28  ;;  %v14148_v3 = vld [vmem:[%s14679_s13 + $0x2f4] ss:$8 sps:$4 sm:$0xff]   ;;  %v4865_v28 = vor.u32 %v4864_v61, %v4860_v9  ;;  %v14185_v9 = vld [vmem:[%s14679_s13 + $0x3c0] ss:$8 sps:$4 sm:$0xff]  }
 0x6fe   :  { %5837 = vmatprep.subr.bf16.mxu1 %v14106_v39  ;;  %v14146_v39 = vld [vmem:[%s14679_s13 + $0x2f0] ss:$8 sps:$4 sm:$0xff]   ;;  %v4961_v43 = vor.u32 %v4959_v41, %v15840_v18  ;;  %v14190_v61 = vld [vmem:[%s14679_s13 + $0x3d4] ss:$8 sps:$4 sm:$0xff]   ;;  %v14193_v41 = vld [vmem:[%s14679_s13 + $0x3e4] ss:$8 sps:$4 sm:$0xff]  }
 0x6ff   :  { %v4870_v20 = vsel %vm1991_vm2, %v4865_v28, %v4869_v52  ;;  %v14152_v18 = vld [vmem:[%s14679_s13 + $0x310] ss:$8 sps:$4 sm:$0xff]  }
 0x701   :  { %5838 = vmatpush1.bf16.msra.mxu1 %v14104_v33  ;;  %v14151_v33 = vld [vmem:[%s14679_s13 + $0x304] ss:$8 sps:$4 sm:$0xff]  }
 0x702   :  { %5839 = vmatprep.subr.bf16.mxu1 %v14109_v21  ;;  %v14149_v21 = vld [vmem:[%s14679_s13 + $0x300] ss:$8 sps:$4 sm:$0xff]  }
 0x704   :  { %5825 = vmatmul.mubr.bf16.gmra.mrb[8].mxu1 %v4942_v30  ;;  %v4896_v30 = vshrl.u32 %v3527_v36, 16  ;;  %v14188_v36 = vld [vmem:[%s14679_s13 + $0x3d0] ss:$8 sps:$4 sm:$0xff]  }
 0x705   :  { %5840 = vmatpush1.bf16.msra.mxu1 %v14107_v27  ;;  %5867 = vmatprep.mubr.bf16.mxu1 %v4882_v47  ;;  %v4955_v27 = vshll.u32 %v3533_v42, 16  ;;  %v4966_v47 = vsel %vm1991_vm2, %v4961_v43, %v4965_v40  ;;  %v14196_v42 = vld [vmem:[%s14679_s13 + $0x3f4] ss:$8 sps:$4 sm:$0xff]   ;;  %v3517_v43 = vld [vmem:[#allocation2 + $0x2b8] sm:$0x1]  ;;  %v4893_v40 = vrot.slane %v4891_v37, 1 }
 0x706   :  { %5841 = vmatprep.subr.bf16.mxu1 %v14112_v46  ;;  %v14154_v46 = vld [vmem:[%s14679_s13 + $0x314] ss:$8 sps:$4 sm:$0xff]  }
 0x709   :  { %5842 = vmatpush1.bf16.msra.mxu1 %v14110_v22  ;;  %v4900_v22 = vrot.slane %v4898_v56, 1  ;;  %v4975_v56 = vshrl.u32 %v15645_v38, 16 }
 0x70a   :  { %5843 = vmatprep.subr.bf16.mxu1 %v14115_v35  ;;  %v4903_v35 = vshll.u32 %v15645_v38, 16 }
 0x70d   :  { %5844 = vmatpush1.bf16.msra.mxu1 %v14113_v26  ;;  %v4953_v26 = vor.u32 %v4951_v19, %v4869_v52  ;;  %v14191_v52 = vld [vmem:[%s14679_s13 + $0x3e0] ss:$8 sps:$4 sm:$0xff]   ;;  %v3535_v19 = vpack.c.bf16 %v3517_v43, %v3517_v43 }
 0x70e   :  { %5845 = vmatprep.subr.bf16.mxu1 %v14118_v48  ;;  %v4957_v48 = vrot.slane %v4955_v27, 1  ;;  %v14199_v27 = vld [vmem:[%s14679_s13 + $0x404] ss:$8 sps:$4 sm:$0xff]  }
 0x711   :  { %5846 = vmatpush1.bf16.msra.mxu1 %v14116_v49  ;;  %v4901_v49 = vor.u32 %v4900_v22, %v4896_v30  ;;  %v4967_v22 = vshrl.u32 %v15649_v5, 16 }
 0x712   :  { %5847 = vmatprep.subr.bf16.mxu1 %v14121_v50  ;;  %v15884_v50 = vrot.slane %v4903_v35, 1  ;;  %v4971_v35 = vshll.u32 %v3535_v19, 16 }
 0x714   :  { %v4977_v30 = vor.u32 %v4975_v56, %v15884_v50 }
 0x715   :  { %5848 = vmatpush1.bf16.msra.mxu1 %v14119_v51  ;;  %v14155_v51 = vld [vmem:[%s14679_s13 + $0x320] ss:$8 sps:$4 sm:$0xff]  }
 0x716   :  { %5849 = vmatprep.subr.bf16.mxu1 %v14124_v53  ;;  %v4958_v53 = vsel %vm1991_vm2, %v4953_v26, %v4957_v48  ;;  %v14200_v48 = vld [vmem:[%s14679_s13 + $0x410] ss:$8 sps:$4 sm:$0xff]  }
 0x719   :  { %5850 = vmatpush1.bf16.msra.mxu1 %v14122_v54  ;;  %v14160_v54 = vld [vmem:[%s14679_s13 + $0x334] ss:$8 sps:$4 sm:$0xff]  }
 0x71a   :  { %5851 = vmatprep.subr.bf16.mxu1 %v14127_v44  ;;  %v4906_v44 = vsel %vm1991_vm2, %v4901_v49, %v15884_v50  ;;  %v4973_v49 = vrot.slane %v4971_v35, 1  ;;  %v14205_v50 = vld [vmem:[%s14679_s13 + $0x424] ss:$8 sps:$4 sm:$0xff]  }
 0x71d   :  { %5852 = vmatpush1.bf16.msra.mxu1 %v14125_v45  ;;  %v14158_v45 = vld [vmem:[%s14679_s13 + $0x330] ss:$8 sps:$4 sm:$0xff]  }
 0x71e   :  { %5853 = vmatprep.subr.bf16.mxu1 %v14130_v58  ;;  %v14163_v58 = vld [vmem:[%s14679_s13 + $0x344] ss:$8 sps:$4 sm:$0xff]  }
 0x721   :  { %5854 = vmatpush1.bf16.msra.mxu1 %v14128_v59  ;;  %v14161_v59 = vld [vmem:[%s14679_s13 + $0x340] ss:$8 sps:$4 sm:$0xff]  }
 0x722   :  { %5855 = vmatprep.subr.bf16.mxu1 %v14133_v8  ;;  %v14166_v8 = vld [vmem:[%s14679_s13 + $0x354] ss:$8 sps:$4 sm:$0xff]  }
 0x725   :  { %5856 = vmatpush1.bf16.msra.mxu1 %v14131_v15  ;;  %v14164_v15 = vld [vmem:[%s14679_s13 + $0x350] ss:$8 sps:$4 sm:$0xff]  }
 0x726   :  { %5857 = vmatprep.subr.bf16.mxu1 %v14136_v57  ;;  %v14169_v57 = vld [vmem:[%s14679_s13 + $0x364] ss:$8 sps:$4 sm:$0xff]  }
 0x729   :  { %5858 = vmatpush1.bf16.msra.mxu1 %v14134_v60  ;;  %v14167_v60 = vld [vmem:[%s14679_s13 + $0x360] ss:$8 sps:$4 sm:$0xff]  }
 0x72a   :  { %5859 = vmatprep.subr.bf16.mxu1 %v14139_v16  ;;  %v14170_v16 = vld [vmem:[%s14679_s13 + $0x370] ss:$8 sps:$4 sm:$0xff]  }
 0x72d   :  { %5860 = vmatpush1.bf16.msra.mxu1 %v14137_v0  ;;  %v14178_v0 = vld [vmem:[%s14679_s13 + $0x394] ss:$8 sps:$4 sm:$0xff]  }
 0x72e   :  { %5861 = vmatprep.subr.bf16.mxu1 %v14142_v32  ;;  %v14176_v32 = vld [vmem:[%s14679_s13 + $0x390] ss:$8 sps:$4 sm:$0xff]  }
 0x731   :  { %5862 = vmatpush1.bf16.msra.mxu1 %v14140_v62  ;;  %v14179_v62 = vld [vmem:[%s14679_s13 + $0x3a0] ss:$8 sps:$4 sm:$0xff]  }
 0x732   :  { %5863 = vmatprep.subr.bf16.mxu1 %v14145_v31  ;;  %v14182_v31 = vld [vmem:[%s14679_s13 + $0x3b0] ss:$8 sps:$4 sm:$0xff]  }
 0x735   :  { %5864 = vmatpush1.bf16.msra.mxu1 %v14143_v23  ;;  %v3526_v23 = vpack.c.bf16 %v14598_v25, %v3508_v24  ;;  %v4983_v25 = vshrl.u32 %v15706_v11, 16 }
 0x736   :  { %5865 = vmatprep.subr.bf16.mxu1 %v14148_v3 }
 0x737   :  { %v4886_v3 = vshll.u32 %v3526_v23, 16 }
 0x739   :  { %5866 = vmatpush1.bf16.msra.mxu1 %v14146_v39  ;;  %v4884_v39 = vshrl.u32 %v3526_v23, 16  ;;  %v4888_v28 = vrot.slane %v4886_v3, 1 }
 0x73a   :  { %5888 = vmatprep.subr.bf16.mxu1 %v14151_v33  ;;  %v4979_v33 = vshll.u32 %v3536_v13, 16 }
 0x73c   :  { %5868 = vmatmul.mubr.bf16.vlgmr.msra.gmra.mrb[4].mxu1 %v4870_v20  ;;  %v4889_v20 = vor.u32 %v4888_v28, %v4884_v39 }
 0x73d   :  { %5889 = vmatpush1.bf16.msra.mxu1 %v14149_v21  ;;  %5877 = vmatprep.mubr.bf16.mxu1 %v4966_v47  ;;  %v14194_v21 = vld [vmem:[%s14679_s13 + $0x3f0] ss:$8 sps:$4 sm:$0xff]   ;;  %v14197_v47 = vld [vmem:[%s14679_s13 + $0x400] ss:$8 sps:$4 sm:$0xff]  }
 0x73e   :  { %5890 = vmatprep.subr.bf16.mxu1 %v14154_v46  ;;  %v4981_v46 = vrot.slane %v4979_v33, 1  ;;  %v4894_v38 = vsel %vm1991_vm2, %v4889_v20, %v4893_v40  ;;  %v14221_v20 = vld [vmem:[%s14774_s4] sm:$0xff]  }
 0x73f   :  { %11739 = vmatmul.mubr.msk.bf16.vlgmr.msra.gmra.mrb[8].mxu0 %vm3302_vm3, %v14221_v20 }
 0x740   :  { %v4982_v26 = vsel %vm1991_vm2, %v4977_v30, %v4981_v46  ;;  %6156 = vmatprep.mubr.bf16.mxu0 %v14658_v12 }
 0x741   :  { %5891 = vmatpush1.bf16.msra.mxu1 %v14152_v18  ;;  %v14202_v18 = vld [vmem:[%s14679_s13 + $0x414] ss:$8 sps:$4 sm:$0xff]  }
 0x742   :  { %5892 = vmatprep.subr.bf16.mxu1 %v14157_v29  ;;  %v4969_v29 = vor.u32 %v4967_v22, %v4893_v40 }
 0x744   :  { %5878 = vmatmul.mubr.bf16.gmra.mrb[8].mxu1 %v4958_v53  ;;  %v4974_v5 = vsel %vm1991_vm2, %v4969_v29, %v4973_v49  ;;  %v14208_v53 = vld [vmem:[%s14679_s13 + $0x434] ss:$8 sps:$4 sm:$0xff]  }
 0x745   :  { %5893 = vmatpush1.bf16.msra.mxu1 %v14155_v51  ;;  %5920 = vmatprep.mubr.bf16.mxu1 %v4906_v44  ;;  %v14203_v51 = vld [vmem:[%s14679_s13 + $0x420] ss:$8 sps:$4 sm:$0xff]  }
 0x746   :  { %5894 = vmatprep.subr.bf16.mxu1 %v14160_v54  ;;  %v14206_v54 = vld [vmem:[%s14679_s13 + $0x430] ss:$8 sps:$4 sm:$0xff]   ;;  %v3510_v44 = vld [vmem:[#allocation2 + $0x1a8] sm:$0xfe] }
 0x749   :  { %5895 = vmatpush1.bf16.msra.mxu1 %v14158_v45  ;;  %v14211_v45 = vld [vmem:[%s14679_s13 + $0x444] ss:$8 sps:$4 sm:$0xff]  }
 0x74a   :  { %5896 = vmatprep.subr.bf16.mxu1 %v14163_v58  ;;  %v14599_v58 = vld [vmem:[#allocation2 + $0x1f0] sm:$0xff] }
 0x74d   :  { %5897 = vmatpush1.bf16.msra.mxu1 %v14161_v59  ;;  %v3528_v59 = vpack.c.bf16 %v14599_v58, %v3510_v44 }
 0x74e   :  { %5898 = vmatprep.subr.bf16.mxu1 %v14166_v8  ;;  %v14209_v8 = vld [vmem:[%s14679_s13 + $0x440] ss:$8 sps:$4 sm:$0xff]  }
 0x751   :  { %5899 = vmatpush1.bf16.msra.mxu1 %v14164_v15  ;;  %v14214_v15 = vld [vmem:[%s14679_s13 + $0x454] ss:$8 sps:$4 sm:$0xff]  }
 0x752   :  { %5900 = vmatprep.subr.bf16.mxu1 %v14169_v57  ;;  %v14212_v57 = vld [vmem:[%s14679_s13 + $0x450] ss:$8 sps:$4 sm:$0xff]  }
 0x755   :  { %5901 = vmatpush1.bf16.msra.mxu1 %v14167_v60  ;;  %v4910_v60 = vshll.u32 %v3528_v59, 16 }
 0x756   :  { %5902 = vmatprep.subr.bf16.mxu1 %v14172_v17  ;;  %v14217_v17 = vld [vmem:[%s14679_s13 + $0x464] ss:$8 sps:$4 sm:$0xff]  }
 0x759   :  { %5903 = vmatpush1.bf16.msra.mxu1 %v14170_v16  ;;  %v4915_v16 = vshll.u32 %v15706_v11, 16 }
 0x75a   :  { %5904 = vmatprep.subr.bf16.mxu1 %v14175_v1  ;;  %v14215_v1 = vld [vmem:[%s14679_s13 + $0x460] ss:$8 sps:$4 sm:$0xff]  }
 0x75d   :  { %5905 = vmatpush1.bf16.msra.mxu1 %v14173_v10  ;;  %v4908_v10 = vshrl.u32 %v3528_v59, 16 }
 0x75e   :  { %5906 = vmatprep.subr.bf16.mxu1 %v14178_v0  ;;  %v4912_v0 = vrot.slane %v4910_v60, 1 }
 0x761   :  { %5907 = vmatpush1.bf16.msra.mxu1 %v14176_v32  ;;  %v14220_v32 = vld [vmem:[%s14679_s13 + $0x474] ss:$8 sps:$4 sm:$0xff]  }
 0x762   :  { %5908 = vmatprep.subr.bf16.mxu1 %v14181_v34  ;;  %v3519_v34 = vld [vmem:[#allocation2 + $0x2c8] sm:$0x1] }
 0x763   :  { %v3537_v24 = vpack.c.bf16 %v3519_v34, %v3519_v34  ;;  %v14223_v34 = vld [vmem:[%s14694_s25] sm:$0xff]  }
 0x765   :  { %5909 = vmatpush1.bf16.msra.mxu1 %v14179_v62  ;;  %v4917_v62 = vrot.slane %v4915_v16, 1  ;;  %v4987_v23 = vshll.u32 %v3537_v24, 16  ;;  %v14227_v24 = vld [vmem:[%s14694_s25 + $0x10] sm:$0xff]  }
 0x766   :  { %5910 = vmatprep.subr.bf16.mxu1 %v14184_v63  ;;  %v14218_v63 = vld [vmem:[%s14679_s13 + $0x470] ss:$8 sps:$4 sm:$0xff]  }
 0x769   :  { %5911 = vmatpush1.bf16.msra.mxu1 %v14182_v31  ;;  %v4913_v31 = vor.u32 %v4912_v0, %v4908_v10 }
 0x76a   :  { %5912 = vmatprep.subr.bf16.mxu1 %v14187_v4 }
 0x76b   :  { %v4918_v4 = vsel %vm1991_vm2, %v4913_v31, %v4917_v62  ;;  %v14226_v31 = vld [vmem:[%s14694_s25 + $0x50] sm:$0xff]  }
 0x76d   :  { %5913 = vmatpush1.bf16.msra.mxu1 %v14185_v9  ;;  %v4985_v9 = vor.u32 %v4983_v25, %v4917_v62  ;;  %v14224_v62 = vld [vmem:[%s14694_s25 + $0x48] sm:$0xff]  }
 0x76e   :  { %5914 = vmatprep.subr.bf16.mxu1 %v14190_v61  ;;  %v4989_v61 = vrot.slane %v4987_v23, 1  ;;  %v14229_v23 = vld [vmem:[%s14694_s25 + $0x18] sm:$0xff]  }
 0x770   :  { %v4990_v14 = vsel %vm1991_vm2, %v4985_v9, %v4989_v61 }
 0x771   :  { %5915 = vmatpush1.bf16.msra.mxu1 %v14188_v36 }
 0x772   :  { %5916 = vmatprep.subr.bf16.mxu1 %v14193_v41 }
 0x775   :  { %5917 = vmatpush1.bf16.msra.mxu1 %v14191_v52 }
 0x776   :  { %5918 = vmatprep.subr.bf16.mxu1 %v14196_v42 }
 0x779   :  { %5919 = vmatpush1.bf16.msra.mxu1 %v14194_v21 }
 0x77a   :  { %5941 = vmatprep.subr.bf16.mxu1 %v14199_v27 }
 0x77c   :  { %5921 = vmatmul.mubr.bf16.vlgmr.msra.gmra.mrb[4].mxu1 %v4894_v38 }
 0x77d   :  { %5942 = vmatpush1.bf16.msra.mxu1 %v14197_v47  ;;  %5930 = vmatprep.mubr.bf16.mxu1 %v4982_v26 }
 0x77e   :  { %5943 = vmatprep.subr.bf16.mxu1 %v14202_v18 }
 0x781   :  { %5944 = vmatpush1.bf16.msra.mxu1 %v14200_v48 }
 0x782   :  { %5945 = vmatprep.subr.bf16.mxu1 %v14205_v50 }
 0x784   :  { %5931 = vmatmul.mubr.bf16.gmra.mrb[8].mxu1 %v4974_v5 }
 0x785   :  { %5946 = vmatpush1.bf16.msra.mxu1 %v14203_v51  ;;  %5973 = vmatprep.mubr.bf16.mxu1 %v14658_v12 }
 0x786   :  { %5947 = vmatprep.subr.bf16.mxu1 %v14208_v53 }
 0x789   :  { %5948 = vmatpush1.bf16.msra.mxu1 %v14206_v54 }
 0x78a   :  { %5949 = vmatprep.subr.bf16.mxu1 %v14211_v45 }
 0x78d   :  { %5950 = vmatpush1.bf16.msra.mxu1 %v14209_v8 }
 0x78e   :  { %5951 = vmatprep.subr.bf16.mxu1 %v14214_v15 }
 0x791   :  { %5952 = vmatpush1.bf16.msra.mxu1 %v14212_v57 }
 0x792   :  { %5953 = vmatprep.subr.bf16.mxu1 %v14217_v17 }
 0x795   :  { %5954 = vmatpush1.bf16.msra.mxu1 %v14215_v1 }
 0x796   :  { %5955 = vmatprep.subr.bf16.mxu1 %v14220_v32  ;;  %v14222_v32 = vld [vmem:[%s14694_s25 + $0x40] sm:$0xff]  }
 0x799   :  { %5956 = vmatpush1.bf16.msra.mxu1 %v14218_v63  ;;  %v14225_v63 = vld [vmem:[%s14694_s25 + $0x8] sm:$0xff]  }
 0x79a   :  { %12403 = vmatprep.subr.bf16.mxu1 %v14222_v32 }
 0x79c   :  { %5974 = vmatmul.mubr.bf16.vlgmr.msra.gmra.mrb[4].mxu1 %v4918_v4  ;;  %v14228_v4 = vld [vmem:[%s14694_s25 + $0x58] sm:$0xff]  }
 0x79d   :  { %5983 = vmatprep.mubr.bf16.mxu1 %v14658_v12  ;;  %12404 = vmatpush3.bf16.msra.mxu1 %v14223_v34  ;;  %v14263_v34 = vld [vmem:[%s14699_s29 + $0x70] sm:$0xff]  }
 0x79e   :  { %12405 = vmatprep.subr.bf16.mxu1 %v14224_v62 }
 0x7a1   :  { %12406 = vmatpush3.bf16.msra.mxu1 %v14225_v63  ;;  %v14265_v63 = vld [vmem:[%s14699_s29 + $0x30] sm:$0xff]  }
 0x7a2   :  { %12407 = vmatprep.subr.bf16.mxu1 %v14226_v31 }
 0x7a4   :  { %5984 = vmatmul.mubr.bf16.gmra.mrb[8].mxu1 %v4990_v14  ;;  %v14230_v14 = vld [vmem:[%s14694_s25 + $0x60] sm:$0xff]  }
 0x7a5   :  { %12408 = vmatpush3.bf16.msra.mxu1 %v14227_v24 }
 0x7a6   :  { %12409 = vmatprep.subr.bf16.mxu1 %v14228_v4 }
 0x7a9   :  { %12410 = vmatpush3.bf16.msra.mxu1 %v14229_v23 }
 0x7aa   :  { %12411 = vmatprep.subr.bf16.mxu1 %v14230_v14  ;;  %v14267_v14 = vld [vmem:[%s14699_s29 + $0x78] sm:$0xff]  }
 0x812   :  { %v3340_v61 = vpop.f32.mrb[8].mxu0 }
 0x86f   :  { %v5975_v36 = vpop.f32.mrb[4].mxu1 }
 0x870   :  { %v5977_v3 = vpop.f32.mrb[5].mxu1 }
 0x871   :  { %v5994_v41 = vadd.f32 %v5977_v3, %v5975_v36  ;;  %v5979_v13 = vpop.f32.mrb[6].mxu1 }
 0x872   :  { %v5981_v37 = vpop.f32.mrb[7].mxu1 }
 0x873   :  { %v5995_v52 = vadd.f32 %v5994_v41, %v5979_v13  ;;  %v14231_v41 = vld [vmem:[%s14694_s25 + $0x20] sm:$0xff]  }
 0x874   :  { %12412 = vmatpush3.bf16.msra.mxu1 %v14231_v41  ;;  %v14269_v41 = vld [vmem:[%s14699_s29 + $0x38] sm:$0xff]  }
 0x875   :  { %v5996_v39 = vadd.f32 %v5995_v52, %v5981_v37 }
 0x877   :  { %v5985_v28 = vpop.f32.mrb[8].mxu1 }
 0x878   :  { %v5997_v42 = vadd.f32 %v5996_v39, %v5985_v28  ;;  %v5987_v11 = vpop.f32.mrb[9].mxu1 }
 0x879   :  { %v5989_v56 = vpop.f32.mrb[10].mxu1 }
 0x87a   :  { %v5998_v33 = vadd.f32 %v5997_v42, %v5987_v11  ;;  %v5991_v43 = vpop.f32.mrb[11].mxu1 }
 0x87c   :  { %v5999_v40 = vadd.f32 %v5998_v33, %v5989_v56 }
 0x87e   :  { %v6000_v21 = vadd.f32 %v5999_v40, %v5991_v43  ;;  %v14232_v40 = vld [vmem:[%s14694_s25 + $0x68] sm:$0xff]  }
 0x87f   :  { %12413 = vmatprep.subr.bf16.mxu1 %v14232_v40 }
 0x880   :  { %6001 = vadd.xlane.f32.xlu1 %v6000_v21  ;;  %v14233_v21 = vld [vmem:[%s14694_s25 + $0x28] sm:$0xff]  }
 0x881   :  { %12414 = vmatpush3.bf16.msra.mxu1 %v14233_v21  ;;  %v6062_v21 = vld [vmem:[%s14684_s17] sm:$0x3] }
 0x90d   :  { %v6002_v19 = vpop.xlane.xlu1 %6001 }
 0x90e   :  { %v6003_v27 = vrot.slane %v6002_v19, 4 }
 0x910   :  { %v6004_v30 = vadd.f32 %v6003_v27, %v6002_v19  ;;  %v14234_v27 = vld [vmem:[%s14694_s25 + $0x70] sm:$0xff]  }
 0x911   :  { %12415 = vmatprep.subr.bf16.mxu1 %v14234_v27  ;;  %v6071_v27 = vrot.slane %v6062_v21, %v15429_v7 }
 0x912   :  { %v6005_v46 = vrot.slane %v6004_v30, 2 }
 0x914   :  { %v6006_v47 = vadd.f32 %v6005_v46, %v6004_v30  ;;  %v14235_v30 = vld [vmem:[%s14694_s25 + $0x30] sm:$0xff]   ;;  %v14237_v46 = vld [vmem:[%s14694_s25 + $0x78] sm:$0xff]  }
 0x915   :  { %12416 = vmatpush3.bf16.msra.mxu1 %v14235_v30 }
 0x916   :  { %v6007_v38 = vrot.slane %v6006_v47, 1  ;;  %12417 = vmatprep.subr.bf16.mxu1 %v14237_v46 }
 0x918   :  { %v6008_v22 = vadd.f32 %v6007_v38, %v6006_v47  ;;  %v14238_v47 = vld [vmem:[%s14694_s25 + $0x38] sm:$0xff]  }
 0x919   :  { %12418 = vmatpush3.bf16.msra.mxu1 %v14238_v47 }
 0x91a   :  { %13253 = vpush %v6008_v22 }
 0x94b   :  { %s13254_s5 = spop %13253 }
 0x94c   :  { %s6012_s9 = smul.f32 0.00012207031, %s13254_s5 }
 0x94e   :  { %v6013_v35 = vstv %s6012_s9  ;;  %s16649_s9 = sld [smem:[#allocation20_spill]] }
 0x94f   :  { %v15948_v18 = vsub.f32 %v5975_v36, %v6013_v35  ;;  %v15950_v26 = vsub.f32 %v5977_v3, %v6013_v35  ;;  %v15952_v48 = vsub.f32 %v5979_v13, %v6013_v35  ;;  %v15954_v29 = vsub.f32 %v5981_v37, %v6013_v35  ;;  %v3342_v3 = vpop.f32.mrb[9].mxu0 }
 0x950   :  { %v15960_v51 = vsub.f32 %v5985_v28, %v6013_v35  ;;  %v15964_v54 = vsub.f32 %v5987_v11, %v6013_v35  ;;  %v15968_v58 = vsub.f32 %v5989_v56, %v6013_v35  ;;  %v15972_v15 = vsub.f32 %v5991_v43, %v6013_v35  ;;  %v3344_v52 = vpop.f32.mrb[10].mxu0  ;;  %v14239_v35 = vld [vmem:[%s14699_s29 + $0x40] sm:$0xff]  }
 0x951   :  { %v6022_v49 = vmul.f32 %v15948_v18, %v15948_v18  ;;  %v6023_v50 = vmul.f32 %v15950_v26, %v15950_v26  ;;  %v6024_v5 = vmul.f32 %v15952_v48, %v15952_v48  ;;  %v6025_v44 = vmul.f32 %v15954_v29, %v15954_v29  ;;  %v3346_v28 = vpop.f32.mrb[11].mxu0  ;;  %12447 = vmatprep.subr.bf16.mxu1 %v14239_v35 }
 0x952   :  { %v6026_v59 = vmul.f32 %v15960_v51, %v15960_v51  ;;  %v6027_v57 = vmul.f32 %v15964_v54, %v15964_v54  ;;  %v6028_v17 = vmul.f32 %v15968_v58, %v15968_v58  ;;  %v6029_v1 = vmul.f32 %v15972_v15, %v15972_v15 }
 0x953   :  { %v6030_v53 = vadd.f32 %v6023_v50, %v6022_v49  ;;  %v3407_v36 = vrot.slane %v3340_v61, 7  ;;  %v3408_v37 = vrot.slane %v3342_v3, 7  ;;  %v3409_v39 = vrot.slane %v3344_v52, 7 }
 0x954   :  { %v3411_v11 = vrot.slane %v3346_v28, 7 }
 0x955   :  { %v6031_v45 = vadd.f32 %v6030_v53, %v6024_v5  ;;  %3419 = vst [vmem:[#allocation3] sm:$0xfe] %v3407_v36  ;;  %3420 = vst [vmem:[#allocation3 + $0x8] sm:$0xfe] %v3408_v37  ;;  %v3410_v56 = vsel %vm321_vm0, %v3407_v36, %v3409_v39  ;;  %v14240_v5 = vld [vmem:[%s14699_s29] sm:$0xff]   ;;  %v14243_v53 = vld [vmem:[%s14699_s29 + $0x48] sm:$0xff]  }
 0x956   :  { %3423 = vst [vmem:[#allocation3 + $0x40] sm:$0x1] %v3409_v39  ;;  %v3412_v43 = vsel %vm321_vm0, %v3408_v37, %v3411_v11  ;;  %3424 = vst [vmem:[#allocation3 + $0x48] sm:$0x1] %v3411_v11 }
 0x957   :  { %v6032_v8 = vadd.f32 %v6031_v45, %v6025_v44  ;;  %v14245_v44 = vld [vmem:[%s14699_s29 + $0x8] sm:$0xff]   ;;  %v14247_v45 = vld [vmem:[%s14699_s29 + $0x50] sm:$0xff]  }
 0x959   :  { %v6033_v60 = vadd.f32 %v6032_v8, %v6026_v59  ;;  %v14249_v59 = vld [vmem:[%s14699_s29 + $0x10] sm:$0xff]   ;;  %v14251_v8 = vld [vmem:[%s14699_s29 + $0x58] sm:$0xff]  }
 0x95b   :  { %v6034_v16 = vadd.f32 %v6033_v60, %v6027_v57  ;;  %v14253_v57 = vld [vmem:[%s14699_s29 + $0x18] sm:$0xff]   ;;  %v14255_v60 = vld [vmem:[%s14699_s29 + $0x60] sm:$0xff]  }
 0x95c   :  { %v6266_v38 = vld [vmem:[#allocation3 + $0x8] sm:$0xff]  ;;  %v6265_v49 = vld [vmem:[#allocation3] sm:$0xff] }
 0x95d   :  { %v6035_v10 = vadd.f32 %v6034_v16, %v6028_v17  ;;  %v6274_v22 = vpack.c.bf16 %v3412_v43, %v6266_v38  ;;  %v6273_v50 = vpack.c.bf16 %v3410_v56, %v6265_v49  ;;  %v6278_v17 = vld [vmem:[#allocation3 + $0x8] sm:$0xfe]  ;;  %v14257_v16 = vld [vmem:[%s14699_s29 + $0x20] sm:$0xff]   ;;  %v6277_v62 = vld [vmem:[#allocation3] sm:$0xfe] }
 0x95e   :  { %v6282_v31 = vld [vmem:[#allocation3 + $0x48] sm:$0x1]  ;;  %v6285_v24 = vpack.c.bf16 %v3410_v56, %v6277_v62  ;;  %v6281_v23 = vld [vmem:[#allocation3 + $0x40] sm:$0x1] }
 0x95f   :  { %v6036_v0 = vadd.f32 %v6035_v10, %v6029_v1  ;;  %6645 = vmatprep.mubr.bf16.mxu1 %v6274_v22  ;;  %v6286_v1 = vpack.c.bf16 %v3412_v43, %v6278_v17  ;;  %v14259_v10 = vld [vmem:[%s14699_s29 + $0x68] sm:$0xff]  }
 0x960   :  { %6646 = vmatmul.mubr.bf16.vlgmr.msra.gmra.mrb[12].mxu1 %v6273_v50  ;;  %v6698_v61 = vshll.u32 %v6285_v24, 16 }
 0x961   :  { %6037 = vadd.xlane.f32.xlu1 %v6036_v0  ;;  %12448 = vmatpush3.bf16.msra.mxu1 %v14240_v5  ;;  %v14261_v0 = vld [vmem:[%s14699_s29 + $0x28] sm:$0xff]   ;;  %v6710_v32 = vshll.u32 %v6286_v1, 16  ;;  %v6708_v4 = vshrl.u32 %v6286_v1, 16 }
 0x962   :  { %12449 = vmatprep.subr.bf16.mxu1 %v14243_v53  ;;  %v6700_v37 = vrot.slane %v6698_v61, 1  ;;  %v14241_v61 = vld [vmem:[%s14774_s4 + $0x8] sm:$0xff]  }
 0x963   :  { %v6712_v36 = vrot.slane %v6710_v32, 1 }
 0x965   :  { %12450 = vmatpush3.bf16.msra.mxu1 %v14245_v44  ;;  %v6713_v39 = vor.u32 %v6712_v36, %v6708_v4  ;;  %v14244_v36 = vld [vmem:[%s14694_s25 + $0x80] sm:$0xff]  }
 0x966   :  { %12451 = vmatprep.subr.bf16.mxu1 %v14247_v45 }
 0x969   :  { %12452 = vmatpush3.bf16.msra.mxu1 %v14249_v59 }
 0x96a   :  { %12453 = vmatprep.subr.bf16.mxu1 %v14251_v8 }
 0x96d   :  { %12454 = vmatpush3.bf16.msra.mxu1 %v14253_v57 }
 0x96e   :  { %12455 = vmatprep.subr.bf16.mxu1 %v14255_v60 }
 0x971   :  { %12456 = vmatpush3.bf16.msra.mxu1 %v14257_v16 }
 0x972   :  { %12457 = vmatprep.subr.bf16.mxu1 %v14259_v10 }
 0x975   :  { %12458 = vmatpush3.bf16.msra.mxu1 %v14261_v0 }
 0x976   :  { %12459 = vmatprep.subr.bf16.mxu1 %v14263_v34 }
 0x979   :  { %12460 = vmatpush3.bf16.msra.mxu1 %v14265_v63 }
 0x97a   :  { %12461 = vmatprep.subr.bf16.mxu1 %v14267_v14  ;;  %v6272_v14 = vld [vmem:[#allocation3 + $0x38] sm:$0xff] }
 0x97d   :  { %12462 = vmatpush3.bf16.msra.mxu1 %v14269_v41  ;;  %v14246_v41 = vld [vmem:[%s14694_s25 + $0xc8] sm:$0xff]  }
 0x97e   :  { %12915 = vmatprep.subr.bf16.mxu1 %v14657_v2 }
 0x9ee   :  { %v6038_v25 = vpop.xlane.xlu1 %6037 }
 0x9ef   :  { %v6039_v9 = vrot.slane %v6038_v25, 4 }
 0x9f1   :  { %v6040_v13 = vadd.f32 %v6039_v9, %v6038_v25  ;;  %v6290_v25 = vpack.c.bf16 %v6282_v31, %v6282_v31  ;;  %v6289_v9 = vpack.c.bf16 %v6281_v23, %v6281_v23  ;;  %v14236_v23 = vld [vmem:[%s14774_s4] sm:$0xff]  }
 0x9f3   :  { %v6041_v42 = vrot.slane %v6040_v13, 2  ;;  %v6715_v3 = vshll.u32 %v6290_v25, 16  ;;  %v6703_v52 = vshll.u32 %v6289_v9, 16  ;;  %v14242_v9 = vld [vmem:[%s14694_s25 + $0xc0] sm:$0xff]  }
 0x9f5   :  { %v6042_v33 = vadd.f32 %v6041_v42, %v6040_v13  ;;  %v6696_v13 = vshrl.u32 %v6285_v24, 16  ;;  %v6717_v28 = vrot.slane %v6715_v3, 1  ;;  %v6705_v11 = vrot.slane %v6703_v52, 1  ;;  %v6268_v3 = vld [vmem:[#allocation3 + $0x18] sm:$0xff]  ;;  %v14252_v52 = vld [vmem:[%s14694_s25 + $0x90] sm:$0xff]  }
 0x9f7   :  { %v6043_v20 = vrot.slane %v6042_v33, 1  ;;  %v6701_v42 = vor.u32 %v6700_v37, %v6696_v13  ;;  %v6718_v56 = vsel %vm1991_vm2, %v6713_v39, %v6717_v28  ;;  %v6276_v13 = vpack.c.bf16 %v6272_v14, %v6268_v3  ;;  %v14250_v37 = vld [vmem:[%s14694_s25 + $0xd0] sm:$0xff]   ;;  %v14254_v39 = vld [vmem:[%s14694_s25 + $0xd8] sm:$0xff]  }
 0x9f8   :  { %6971 = vmatprep.mubr.bf16.mxu1 %v6718_v56  ;;  %v14256_v28 = vld [vmem:[%s14694_s25 + $0x98] sm:$0xff]   ;;  %v14262_v56 = vld [vmem:[%s14694_s25 + $0xe8] sm:$0xff]  }
 0x9f9   :  { %v6044_v19 = vadd.f32 %v6043_v20, %v6042_v33  ;;  %v6706_v33 = vsel %vm1991_vm2, %v6701_v42, %v6705_v11  ;;  %v6082_v20 = vld [vmem:[%s14689_s21] sm:$0x3] }
 0x9fa   :  { %6972 = vmatmul.mubr.bf16.vlgmr.msra.gmra.mrb[16].mxu1 %v6706_v33  ;;  %v6087_v46 = vrot.slane %v6082_v20, %v15427_v6  ;;  %v6091_v47 = vrot.slane %v6082_v20, %v15429_v7  ;;  %v14258_v42 = vld [vmem:[%s14694_s25 + $0xe0] sm:$0xff]   ;;  %v6280_v33 = vld [vmem:[#allocation3 + $0x18] sm:$0xfe]  ;;  %v6284_v20 = vld [vmem:[#allocation3 + $0x58] sm:$0x1] }
 0x9fb   :  { %13255 = vpush %v6044_v19  ;;  %v6067_v19 = vrot.slane %v6062_v21, %v15427_v6  ;;  %v14260_v11 = vld [vmem:[%s14694_s25 + $0xa0] sm:$0xff]   ;;  %v14266_v21 = vld [vmem:[%s14694_s25 + $0xf0] sm:$0xff]   ;;  %12917 = vmatprep.mubr.msk.bf16.mxu1 %vm14659_vm5, %v14657_v2 }
 0xa2c   :  { %s13256_s13 = spop %13255 }
 0xa2d   :  { %s6048_s18 = smul.f32 0.00012207031, %s13256_s13 }
 0xa2f   :  { %s6049_s22 = sadd.f32 1e-05, %s6048_s18  ;;  %s16650_s18 = sld [smem:[#allocation12_spill]] }
 0xa31   :  { %v6050_v43 = vstv %s6049_s22 }
 0xa32   :  { %14560 = vrsqrt.f32 %v6050_v43  ;;  %v6288_v43 = vpack.c.bf16 %v6272_v14, %v6280_v33 }
 0xa3c   :  { %v14561_v40 = vpop.eup %14560 }
 0xa3d   :  { %13257 = vpush %v14561_v40  ;;  %v14264_v40 = vld [vmem:[%s14694_s25 + $0xa8] sm:$0xff]  }
 0xa6e   :  { %s13258_s23 = spop %13257 }
 0xa6f   :  { %v6053_v30 = vstv %s13258_s23  ;;  %s16651_s23 = sld [smem:[#allocation13_spill]] }
 0xa70   :  { %v6055_v38 = vmul.f32 %v6053_v30, %v15950_v26  ;;  %v6057_v22 = vmul.f32 %v6053_v30, %v15954_v29  ;;  %v6054_v35 = vmul.f32 %v6053_v30, %v15948_v18  ;;  %v6056_v49 = vmul.f32 %v6053_v30, %v15952_v48 }
 0xa71   :  { %v6059_v50 = vmul.f32 %v6053_v30, %v15964_v54  ;;  %v6061_v5 = vmul.f32 %v6053_v30, %v15972_v15  ;;  %v6058_v53 = vmul.f32 %v6053_v30, %v15960_v51  ;;  %v6060_v44 = vmul.f32 %v6053_v30, %v15968_v58  ;;  %v14270_v30 = vld [vmem:[%s14694_s25 + $0xf8] sm:$0xff]  }
 0xa72   :  { %v6075_v45 = vmul.f32 %v6071_v27, %v6055_v38  ;;  %v6077_v6 = vmul.f32 %v6071_v27, %v6057_v22  ;;  %v6074_v59 = vmul.f32 %v6067_v19, %v6054_v35  ;;  %v6076_v7 = vmul.f32 %v6067_v19, %v6056_v49  ;;  %v14271_v38 = vld [vmem:[%s14694_s25 + $0xb8] sm:$0xff]   ;;  %v14272_v35 = vld [vmem:[%s14699_s29 + $0xc0] sm:$0xff]  }
 0xa73   :  { %v6079_v8 = vmul.f32 %v6071_v27, %v6059_v50  ;;  %v6081_v26 = vmul.f32 %v6071_v27, %v6061_v5  ;;  %v6078_v57 = vmul.f32 %v6067_v19, %v6058_v53  ;;  %v6080_v29 = vmul.f32 %v6067_v19, %v6060_v44  ;;  %v14268_v27 = vld [vmem:[%s14694_s25 + $0xb0] sm:$0xff]   ;;  %v6271_v50 = vld [vmem:[#allocation3 + $0x30] sm:$0xff] }
 0xa74   :  { %v6095_v60 = vadd.f32 %v6091_v47, %v6075_v45  ;;  %v6097_v18 = vadd.f32 %v6091_v47, %v6077_v6  ;;  %v6094_v17 = vadd.f32 %v6087_v46, %v6074_v59  ;;  %v6096_v48 = vadd.f32 %v6087_v46, %v6076_v7  ;;  %v6267_v53 = vld [vmem:[#allocation3 + $0x10] sm:$0xff]  ;;  %v14274_v59 = vld [vmem:[%s14699_s29 + $0xc8] sm:$0xff]  }
 0xa75   :  { %v6099_v16 = vadd.f32 %v6091_v47, %v6079_v8  ;;  %v6101_v54 = vadd.f32 %v6091_v47, %v6081_v26  ;;  %v6098_v1 = vadd.f32 %v6087_v46, %v6078_v57  ;;  %v6100_v15 = vadd.f32 %v6087_v46, %v6080_v29  ;;  %v14273_v44 = vld [vmem:[%s14699_s29 + $0x80] sm:$0xff]   ;;  %v14275_v8 = vld [vmem:[%s14699_s29 + $0x88] sm:$0xff]   ;;  %v14276_v26 = vld [vmem:[%s14699_s29 + $0xd0] sm:$0xff]  }
 0xa76   :  { %v6103_v51 = vmax.f32 %v6095_v60, 0.0  ;;  %v6105_v10 = vmax.f32 %v6097_v18, 0.0  ;;  %v6102_v58 = vmax.f32 %v6094_v17, 0.0  ;;  %v6104_v0 = vmax.f32 %v6096_v48, 0.0  ;;  %v14277_v57 = vld [vmem:[%s14699_s29 + $0x90] sm:$0xff]   ;;  %v14278_v29 = vld [vmem:[%s14699_s29 + $0xd8] sm:$0xff]  }
 0xa77   :  { %v6107_v32 = vmax.f32 %v6099_v16, 0.0  ;;  %v6109_v34 = vmax.f32 %v6101_v54, 0.0  ;;  %v6106_v31 = vmax.f32 %v6098_v1, 0.0  ;;  %v6108_v24 = vmax.f32 %v6100_v15, 0.0  ;;  %v14279_v60 = vld [vmem:[%s14699_s29 + $0x98] sm:$0xff]   ;;  %v14280_v18 = vld [vmem:[%s14699_s29 + $0xe0] sm:$0xff]  }
 0xa78   :  { %v6111_v62 = vpack.c.bf16 %v6105_v10, %v6103_v51  ;;  %v6110_v63 = vpack.c.bf16 %v6104_v0, %v6102_v58  ;;  %v6734_v19 = vshll.u32 %v6288_v43, 16  ;;  %v6292_v46 = vpack.c.bf16 %v6284_v20, %v6284_v20  ;;  %v14281_v17 = vld [vmem:[%s14699_s29 + $0xa0] sm:$0xff]   ;;  %v14282_v16 = vld [vmem:[%s14699_s29 + $0xe8] sm:$0xff]   ;;  %v14284_v15 = vld [vmem:[%s14699_s29 + $0xf0] sm:$0xff]  }
 0xa79   :  { %v6113_v4 = vpack.c.bf16 %v6109_v34, %v6107_v32  ;;  %v6112_v25 = vpack.c.bf16 %v6108_v24, %v6106_v31  ;;  %v6732_v22 = vshrl.u32 %v6288_v43, 16  ;;  %v6275_v45 = vpack.c.bf16 %v6271_v50, %v6267_v53  ;;  %v6279_v48 = vld [vmem:[#allocation3 + $0x10] sm:$0xfe]  ;;  %v14283_v1 = vld [vmem:[%s14699_s29 + $0xa8] sm:$0xff]   ;;  %v6283_v51 = vld [vmem:[#allocation3 + $0x50] sm:$0x1] }
 0xa7a   :  { %6124 = vmatprep.subr.bf16.mxu0 %v6111_v62  ;;  %v6736_v47 = vrot.slane %v6734_v19, 1  ;;  %v6739_v49 = vshll.u32 %v6292_v46, 16  ;;  %v6287_v54 = vpack.c.bf16 %v6271_v50, %v6279_v48  ;;  %v14285_v58 = vld [vmem:[%s14699_s29 + $0xb0] sm:$0xff]   ;;  %v6291_v0 = vpack.c.bf16 %v6283_v51, %v6283_v51  ;;  %v14286_v32 = vld [vmem:[%s14699_s29 + $0xf8] sm:$0xff]  }
 0xa7b   :  { %6125 = vmatpush1.bf16.msra.mxu0 %v6110_v63 }
 0xa7c   :  { %6126 = vmatprep.subr.bf16.mxu0 %v6113_v4  ;;  %v6737_v5 = vor.u32 %v6736_v47, %v6732_v22  ;;  %v6741_v6 = vrot.slane %v6739_v49, 1  ;;  %v6722_v10 = vshll.u32 %v6287_v54, 16  ;;  %v6727_v31 = vshll.u32 %v6291_v0, 16 }
 0xa7e   :  { %v6742_v7 = vsel %vm1991_vm2, %v6737_v5, %v6741_v6  ;;  %v6724_v34 = vrot.slane %v6722_v10, 1 }
 0xa7f   :  { %6127 = vmatpush1.bf16.msra.mxu0 %v6112_v25 }
 0xa80   :  { %6177 = vmatprep.subr.bf16.mxu0 %v6111_v62  ;;  %v14287_v62 = vld [vmem:[%s14699_s29 + $0xb8] sm:$0xff]  }
 0xa82   :  { %12033 = vmatmul.mubr.msk.bf16.vlgmr.msra.gmra.mrb[12].mxu0 %vm3302_vm3, %v14236_v23  ;;  %v12419_v23 = vpop.f32.mrb[12].mxu1 }
 0xa83   :  { %6178 = vmatpush1.bf16.msra.mxu0 %v6110_v63  ;;  %6209 = vmatprep.mubr.bf16.mxu0 %v14658_v12  ;;  %v14248_v12 = vld [vmem:[%s14694_s25 + $0x88] sm:$0xff]   ;;  %v6720_v63 = vshrl.u32 %v6287_v54, 16 }
 0xa84   :  { %6179 = vmatprep.subr.bf16.mxu0 %v6113_v4  ;;  %v6729_v4 = vrot.slane %v6727_v31, 1 }
 0xa85   :  { %v6725_v24 = vor.u32 %v6724_v34, %v6720_v63 }
 0xa87   :  { %6180 = vmatpush1.bf16.msra.mxu0 %v6112_v25  ;;  %v6730_v25 = vsel %vm1991_vm2, %v6725_v24, %v6729_v4 }
 0xa88   :  { %12425 = vmatprep.subr.bf16.mxu0 %v14242_v9  ;;  %v12420_v9 = vpop.f32.mrb[13].mxu1 }
 0xa89   :  { %v12422_v14 = vpop.f32.mrb[14].mxu1 }
 0xa8a   :  { %12037 = vmatmul.mubr.msk.bf16.vlgmr.msra.gmra.mrb[16].mxu0 %vm3302_vm3, %v14241_v61  ;;  %v12421_v61 = vadd.f32 %v12420_v9, %v12419_v23 }
 0xa8b   :  { %12426 = vmatpush3.bf16.msra.mxu0 %v14244_v36  ;;  %6686 = vmatprep.mubr.bf16.mxu0 %v6276_v13  ;;  %v12423_v36 = vpop.f32.mrb[15].mxu1 }
 0xa8c   :  { %12427 = vmatprep.subr.bf16.mxu0 %v14246_v41  ;;  %v12424_v3 = vadd.f32 %v12423_v36, %v12422_v14 }
 0xa8f   :  { %12428 = vmatpush3.bf16.msra.mxu0 %v14248_v12 }
 0xa90   :  { %12429 = vmatprep.subr.bf16.mxu0 %v14250_v37 }
 0xa93   :  { %12430 = vmatpush3.bf16.msra.mxu0 %v14252_v52 }
 0xa94   :  { %12431 = vmatprep.subr.bf16.mxu0 %v14254_v39 }
 0xa97   :  { %12432 = vmatpush3.bf16.msra.mxu0 %v14256_v28 }
 0xa98   :  { %12433 = vmatprep.subr.bf16.mxu0 %v14258_v42 }
 0xa9b   :  { %12434 = vmatpush3.bf16.msra.mxu0 %v14260_v11 }
 0xa9c   :  { %12435 = vmatprep.subr.bf16.mxu0 %v14262_v56 }
 0xa9f   :  { %12436 = vmatpush3.bf16.msra.mxu0 %v14264_v40 }
 0xaa0   :  { %12437 = vmatprep.subr.bf16.mxu0 %v14266_v21 }
 0xaa3   :  { %12438 = vmatpush3.bf16.msra.mxu0 %v14268_v27 }
 0xaa4   :  { %12439 = vmatprep.subr.bf16.mxu0 %v14270_v30 }
 0xaa7   :  { %12440 = vmatpush3.bf16.msra.mxu0 %v14271_v38 }
 0xaa8   :  { %12469 = vmatprep.subr.bf16.mxu0 %v14272_v35 }
 0xaaa   :  { %6687 = vmatmul.mubr.bf16.vlgmr.msra.gmra.mrb[20].mxu0 %v6275_v45 }
 0xaab   :  { %12470 = vmatpush3.bf16.msra.mxu0 %v14273_v44  ;;  %7012 = vmatprep.mubr.bf16.mxu0 %v6742_v7 }
 0xaac   :  { %12471 = vmatprep.subr.bf16.mxu0 %v14274_v59 }
 0xaaf   :  { %12472 = vmatpush3.bf16.msra.mxu0 %v14275_v8 }
 0xab0   :  { %12473 = vmatprep.subr.bf16.mxu0 %v14276_v26 }
 0xab3   :  { %12474 = vmatpush3.bf16.msra.mxu0 %v14277_v57 }
 0xab4   :  { %12475 = vmatprep.subr.bf16.mxu0 %v14278_v29 }
 0xab7   :  { %12476 = vmatpush3.bf16.msra.mxu0 %v14279_v60 }
 0xab8   :  { %12477 = vmatprep.subr.bf16.mxu0 %v14280_v18 }
 0xabb   :  { %12478 = vmatpush3.bf16.msra.mxu0 %v14281_v17 }
 0xabc   :  { %12479 = vmatprep.subr.bf16.mxu0 %v14282_v16 }
 0xabf   :  { %12480 = vmatpush3.bf16.msra.mxu0 %v14283_v1 }
 0xac0   :  { %12481 = vmatprep.subr.bf16.mxu0 %v14284_v15 }
 0xac3   :  { %12482 = vmatpush3.bf16.msra.mxu0 %v14285_v58 }
 0xac4   :  { %12483 = vmatprep.subr.bf16.mxu0 %v14286_v32 }
 0xac7   :  { %12484 = vmatpush3.bf16.msra.mxu0 %v14287_v62 }
 0xac8   :  { %12921 = vmatprep.subr.bf16.mxu0 %v14657_v2 }
 0xaca   :  { %7013 = vmatmul.mubr.bf16.vlgmr.msra.gmra.mrb[24].mxu0 %v6730_v25 }
 0xacb   :  { %12923 = vmatprep.mubr.msk.bf16.mxu0 %vm14659_vm5, %v14657_v2 }
 0xacd   :  { %v12463_v41 = vpop.f32.mrb[16].mxu1 }
 0xace   :  { %v12464_v13 = vpop.f32.mrb[17].mxu1 }
 0xacf   :  { %v12465_v12 = vadd.f32 %v12464_v13, %v12463_v41  ;;  %v12466_v37 = vpop.f32.mrb[18].mxu1 }
 0xad0   :  { %v12467_v52 = vpop.f32.mrb[19].mxu1 }
 0xad1   :  { %v12468_v39 = vadd.f32 %v12467_v52, %v12466_v37 }
 0xb55   :  { %v6158_v28 = vpop.f32.mrb[12].mxu0 }
 0xb56   :  { %v6224_v42 = vrot.slane %v6158_v28, 7  ;;  %v6160_v11 = vpop.f32.mrb[13].mxu0  ;;  %v16088_v28 = vld [vmem:[%s14704_s3] ss:$0 sm:$0xff] }
 0xb57   :  { %v6225_v56 = vrot.slane %v6160_v11, 7  ;;  %v6162_v33 = vpop.f32.mrb[14].mxu0 }
 0xb58   :  { %6237 = vst [vmem:[#allocation3 + $0x60] sm:$0xfe] %v6224_v42  ;;  %v6226_v43 = vrot.slane %v6162_v33, 7  ;;  %v6164_v40 = vpop.f32.mrb[15].mxu0 }
 0xb59   :  { %6238 = vst [vmem:[#allocation3 + $0x68] sm:$0xfe] %v6225_v56  ;;  %v6228_v21 = vrot.slane %v6164_v40, 7 }
 0xb5a   :  { %v16072_v20 = vsel %vm321_vm0, %v6224_v42, %v6226_v43  ;;  %6241 = vst [vmem:[#allocation3 + $0xa0] sm:$0x1] %v6226_v43 }
 0xb5b   :  { %v16075_v19 = vsel %vm321_vm0, %v6225_v56, %v6228_v21  ;;  %6242 = vst [vmem:[#allocation3 + $0xa8] sm:$0x1] %v6228_v21  ;;  %v16091_v56 = vld [vmem:[%s14709_s8] ss:$0 sm:$0xff] }
 0xb5d   :  { %v6211_v27 = vpop.f32.mrb[16].mxu0 }
 0xb5e   :  { %v6247_v30 = vrot.slane %v6211_v27, 7  ;;  %v6213_v46 = vpop.f32.mrb[17].mxu0 }
 0xb5f   :  { %v6248_v47 = vrot.slane %v6213_v46, 7  ;;  %v6215_v38 = vpop.f32.mrb[18].mxu0  ;;  %v14288_v46 = vld [vmem:[%s14694_s25 + $0x40] sm:$0xff]  }
 0xb60   :  { %6259 = vst [vmem:[#allocation3 + $0x70] sm:$0xfe] %v6247_v30  ;;  %v6249_v22 = vrot.slane %v6215_v38, 7  ;;  %v6217_v35 = vpop.f32.mrb[19].mxu0 }
 0xb61   :  { %6260 = vst [vmem:[#allocation3 + $0x78] sm:$0xfe] %v6248_v47  ;;  %v6251_v49 = vrot.slane %v6217_v35, 7 }
 0xb62   :  { %v16078_v50 = vsel %vm321_vm0, %v6247_v30, %v6249_v22  ;;  %6263 = vst [vmem:[#allocation3 + $0xb0] sm:$0x1] %v6249_v22  ;;  %v7181_v22 = vld [vmem:[#allocation3 + $0x68] sm:$0xff] }
 0xb63   :  { %v16081_v5 = vsel %vm321_vm0, %v6248_v47, %v6251_v49  ;;  %6264 = vst [vmem:[#allocation3 + $0xb8] sm:$0x1] %v6251_v49  ;;  %v14289_v47 = vld [vmem:[%s14694_s25 + $0xc0] sm:$0xff]  }
 0xb64   :  { %v7080_v49 = vld [vmem:[%s14779_s12] sm:$0xf] }
 0xb68   :  { %v7183_v35 = vld [vmem:[#allocation3 + $0x78] sm:$0xff] }
 0xb7d   :  { %v12441_v53 = vpop.f32.mrb[20].mxu0 }
 0xb7e   :  { %v12442_v44 = vpop.f32.mrb[21].mxu0 }
 0xb7f   :  { %v12443_v45 = vadd.f32 %v12442_v44, %v12441_v53  ;;  %v12444_v6 = vpop.f32.mrb[22].mxu0  ;;  %v12105_v53 = vld [vmem:[%s14779_s12 + $0x4] sm:$0xf] }
 0xb80   :  { %v12445_v59 = vpop.f32.mrb[23].mxu0  ;;  %v14290_v44 = vld [vmem:[%s14694_s25] sm:$0xff]  }
 0xb81   :  { %v6689_v7 = vadd.f32 %v12443_v45, %v12421_v61  ;;  %v12446_v8 = vadd.f32 %v12445_v59, %v12444_v6  ;;  %v14291_v45 = vld [vmem:[%s14694_s25 + $0x80] sm:$0xff]   ;;  %v7189_v6 = vpack.c.bf16 %v16075_v19, %v7181_v22  ;;  %v14292_v59 = vld [vmem:[%s14694_s25 + $0x48] sm:$0xff]  }
 0xb83   :  { %v6692_v26 = vadd.f32 %v12446_v8, %v12424_v3  ;;  %v6974_v57 = vadd.f32 %v12465_v12, %v6689_v7  ;;  %v14293_v7 = vld [vmem:[%s14694_s25 + $0xc8] sm:$0xff]   ;;  %v7191_v8 = vpack.c.bf16 %v16081_v5, %v7183_v35 }
 0xb85   :  { %v6977_v29 = vadd.f32 %v12468_v39, %v6692_v26  ;;  %v14294_v26 = vld [vmem:[%s14694_s25 + $0x8] sm:$0xff]  }
 0xb9d   :  { %v12485_v60 = vpop.f32.mrb[24].mxu0 }
 0xb9e   :  { %v12486_v18 = vpop.f32.mrb[25].mxu0 }
 0xb9f   :  { %v12487_v17 = vadd.f32 %v12486_v18, %v12485_v60  ;;  %v12488_v48 = vpop.f32.mrb[26].mxu0  ;;  %v14297_v60 = vld [vmem:[%s14694_s25 + $0xd0] sm:$0xff]  }
 0xba0   :  { %v12489_v16 = vpop.f32.mrb[27].mxu0  ;;  %v14298_v18 = vld [vmem:[%s14694_s25 + $0x10] sm:$0xff]  }
 0xba1   :  { %v7015_v54 = vadd.f32 %v12487_v17, %v6974_v57  ;;  %v12490_v1 = vadd.f32 %v12489_v16, %v12488_v48  ;;  %v14295_v57 = vld [vmem:[%s14694_s25 + $0x88] sm:$0xff]   ;;  %v14299_v17 = vld [vmem:[%s14694_s25 + $0x90] sm:$0xff]   ;;  %v14300_v48 = vld [vmem:[%s14694_s25 + $0x58] sm:$0xff]  }
 0xba2   :  { %v14301_v16 = vld [vmem:[%s14694_s25 + $0xd8] sm:$0xff]  }
 0xba3   :  { %v7018_v15 = vadd.f32 %v12490_v1, %v6977_v29  ;;  %v14296_v29 = vld [vmem:[%s14694_s25 + $0x50] sm:$0xff]   ;;  %v14303_v1 = vld [vmem:[%s14694_s25 + $0x98] sm:$0xff]  }
 0xba5   :  { %v7021_v51 = vadd.f32 %v7018_v15, %v7015_v54 }
 0xba7   :  { %7022 = vadd.xlane.f32.xlu0 %v7021_v51  ;;  %v14305_v51 = vld [vmem:[%s14694_s25 + $0xe0] sm:$0xff]  }
 0xc34   :  { %v7023_v10 = vpop.xlane.xlu0 %7022 }
 0xc35   :  { %v7024_v58 = vrot.slane %v7023_v10, 4 }
 0xc37   :  { %v7025_v0 = vadd.f32 %v7024_v58, %v7023_v10  ;;  %v14306_v10 = vld [vmem:[%s14694_s25 + $0x20] sm:$0xff]   ;;  %v7193_v58 = vld [vmem:[#allocation3 + $0x68] sm:$0xfe] }
 0xc39   :  { %v7026_v32 = vrot.slane %v7025_v0, 2 }
 0xc3b   :  { %v7027_v34 = vadd.f32 %v7026_v32, %v7025_v0  ;;  %v14307_v0 = vld [vmem:[%s14694_s25 + $0xa0] sm:$0xff]   ;;  %v14308_v32 = vld [vmem:[%s14694_s25 + $0x68] sm:$0xff]  }
 0xc3d   :  { %v7028_v62 = vrot.slane %v7027_v34, 1 }
 0xc3f   :  { %v7029_v63 = vadd.f32 %v7028_v62, %v7027_v34  ;;  %v7195_v34 = vld [vmem:[#allocation3 + $0x78] sm:$0xfe] }
 0xc40   :  { %v14309_v62 = vld [vmem:[%s14694_s25 + $0xe8] sm:$0xff]  }
 0xc41   :  { %13259 = vpush %v7029_v63  ;;  %v7201_v63 = vpack.c.bf16 %v16075_v19, %v7193_v58  ;;  %v7194_v58 = vld [vmem:[#allocation3 + $0x70] sm:$0xfe] }
 0xc72   :  { %s13260_s17 = spop %13259 }
 0xc73   :  { %s7033_s21 = smul.f32 0.00048828125, %s13260_s17 }
 0xc75   :  { %v7034_v31 = vstv %s7033_s21 }
 0xc76   :  { %v7035_v24 = vsub.f32 %v7015_v54, %v7034_v31  ;;  %v7036_v4 = vsub.f32 %v7018_v15, %v7034_v31  ;;  %v14302_v54 = vld [vmem:[%s14694_s25 + $0x18] sm:$0xff]   ;;  %v14304_v15 = vld [vmem:[%s14694_s25 + $0x60] sm:$0xff]   ;;  %v14310_v31 = vld [vmem:[%s14694_s25 + $0x28] sm:$0xff]  }
 0xc78   :  { %v7037_v25 = vmul.f32 %v7035_v24, %v7035_v24  ;;  %v7038_v23 = vmul.f32 %v7036_v4, %v7036_v4 }
 0xc7a   :  { %v7039_v9 = vadd.f32 %v7038_v23, %v7037_v25  ;;  %v14312_v25 = vld [vmem:[%s14694_s25 + $0x70] sm:$0xff]   ;;  %v7197_v23 = vld [vmem:[#allocation3 + $0xa8] sm:$0x1] }
 0xc7b   :  { %v7205_v19 = vpack.c.bf16 %v7197_v23, %v7197_v23  ;;  %v14343_v23 = vld [vmem:[%s14699_s29 + $0xa8] sm:$0xff]  }
 0xc7c   :  { %7040 = vadd.xlane.f32.xlu1 %v7039_v9  ;;  %v14313_v9 = vld [vmem:[%s14694_s25 + $0xf0] sm:$0xff]  }
 0xd09   :  { %v7041_v61 = vpop.xlane.xlu1 %7040 }
 0xd0a   :  { %v7042_v14 = vrot.slane %v7041_v61, 4 }
 0xd0c   :  { %v7043_v36 = vadd.f32 %v7042_v14, %v7041_v61  ;;  %v7199_v61 = vld [vmem:[#allocation3 + $0xb8] sm:$0x1]  ;;  %v7625_v14 = vshll.u32 %v7201_v63, 16 }
 0xd0e   :  { %v7044_v3 = vrot.slane %v7043_v36, 2 }
 0xd10   :  { %v7045_v41 = vadd.f32 %v7044_v3, %v7043_v36  ;;  %v14314_v36 = vld [vmem:[%s14694_s25 + $0x30] sm:$0xff]  }
 0xd12   :  { %v7046_v13 = vrot.slane %v7045_v41, 1 }
 0xd14   :  { %v7047_v12 = vadd.f32 %v7046_v13, %v7045_v41  ;;  %v14316_v41 = vld [vmem:[%s14694_s25 + $0x78] sm:$0xff]   ;;  %v7207_v13 = vpack.c.bf16 %v7199_v61, %v7199_v61  ;;  %v14345_v61 = vld [vmem:[%s14699_s29 + $0xf0] sm:$0xff]  }
 0xd16   :  { %13261 = vpush %v7047_v12  ;;  %v14317_v12 = vld [vmem:[%s14694_s25 + $0xf8] sm:$0xff]  }
 0xd47   :  { %s13262_s4 = spop %13261 }
 0xd48   :  { %s7051_s26 = smul.f32 0.00048828125, %s13262_s4 }
 0xd4a   :  { %s7052_s28 = sadd.f32 1e-05, %s7051_s26  ;;  %s16652_s26 = sld [smem:[#allocation14_spill]] }
 0xd4c   :  { %v7053_v37 = vstv %s7052_s28  ;;  %s16653_s28 = sld [smem:[#allocation15_spill]] }
 0xd4d   :  { %14562 = vrsqrt.f32 %v7053_v37  ;;  %v14318_v37 = vld [vmem:[%s14694_s25 + $0x38] sm:$0xff]  }
 0xd57   :  { %v14563_v52 = vpop.eup %14562 }
 0xd58   :  { %13263 = vpush %v14563_v52  ;;  %v7627_v52 = vrot.slane %v7625_v14, 1 }
 0xd89   :  { %s13264_s1 = spop %13263 }
 0xd8a   :  { %v7056_v39 = vstv %s13264_s1 }
 0xd8b   :  { %v7057_v42 = vmul.f32 %v7056_v39, %v7035_v24  ;;  %v7058_v11 = vmul.f32 %v7056_v39, %v7036_v4  ;;  %v7203_v24 = vpack.c.bf16 %v16081_v5, %v7195_v34  ;;  %v14311_v4 = vld [vmem:[%s14694_s25 + $0xa8] sm:$0xff]   ;;  %v14315_v5 = vld [vmem:[%s14694_s25 + $0xb0] sm:$0xff]   ;;  %v7630_v39 = vshll.u32 %v7205_v19, 16 }
 0xd8c   :  { %v14340_v34 = vld [vmem:[%s14699_s29 + $0x68] sm:$0xff]  }
 0xd8d   :  { %v7066_v33 = vmul.f32 %v16088_v28, %v7057_v42  ;;  %v7067_v43 = vmul.f32 %v16088_v28, %v7058_v11  ;;  %v7649_v3 = vshll.u32 %v7203_v24, 16  ;;  %v14319_v42 = vld [vmem:[%s14694_s25 + $0xb8] sm:$0xff]   ;;  %v14320_v11 = vld [vmem:[%s14699_s29 + $0x40] sm:$0xff]   ;;  %v7632_v22 = vrot.slane %v7630_v39, 1 }
 0xd8e   :  { %v14350_v39 = vld [vmem:[%s14699_s29 + $0x38] sm:$0xff]  }
 0xd8f   :  { %v7075_v40 = vadd.f32 %v16091_v56, %v7066_v33  ;;  %v7076_v21 = vadd.f32 %v16091_v56, %v7067_v43  ;;  %v7651_v33 = vrot.slane %v7649_v3, 1  ;;  %v7654_v43 = vshll.u32 %v7207_v13, 16  ;;  %v14347_v3 = vld [vmem:[%s14699_s29 + $0xb0] sm:$0xff]  }
 0xd91   :  { %v7077_v27 = vmax.f32 %v7075_v40, 0.0  ;;  %v7078_v30 = vmax.f32 %v7076_v21, 0.0  ;;  %v7623_v40 = vshrl.u32 %v7201_v63, 16  ;;  %v7180_v21 = vld [vmem:[#allocation3 + $0x60] sm:$0xff]  ;;  %v14341_v63 = vld [vmem:[%s14699_s29 + $0xe8] sm:$0xff]  }
 0xd92   :  { %v7188_v35 = vpack.c.bf16 %v16072_v20, %v7180_v21 }
 0xd93   :  { %v7079_v38 = vpack.c.bf16 %v7078_v30, %v7077_v27  ;;  %v14321_v27 = vld [vmem:[%s14699_s29 + $0xc0] sm:$0xff]   ;;  %v7647_v30 = vshrl.u32 %v7203_v24, 16  ;;  %v7196_v24 = vld [vmem:[#allocation3 + $0xa0] sm:$0x1] }
 0xd94   :  { %v7204_v14 = vpack.c.bf16 %v7196_v24, %v7196_v24 }
 0xd95   :  { %12916 = vmatpush3.bf16.msra.mxu1 %v7079_v38  ;;  %12922 = vmatpush3.bf16.msra.mxu0 %v7079_v38  ;;  %v7628_v38 = vor.u32 %v7627_v52, %v7623_v40 }
 0xd96   :  { %12495 = vmatprep.subr.bf16.mxu1 %v14288_v46  ;;  %12517 = vmatprep.subr.bf16.mxu0 %v14289_v47  ;;  %v7182_v46 = vld [vmem:[#allocation3 + $0x70] sm:$0xff] }
 0xd97   :  { %v14322_v47 = vld [vmem:[%s14699_s29] sm:$0xff]  }
 0xd98   :  { %12918 = vmatmul.mubr.msk.bf16.vlgmr.msra.gmra.mrb[20].mxu1 %vm7081_vm6, %v7080_v49  ;;  %12924 = vmatmul.mubr.msk.bf16.vlgmr.msra.gmra.mrb[28].mxu0 %vm7081_vm6, %v12105_v53  ;;  %v14323_v49 = vld [vmem:[%s14699_s29 + $0x80] sm:$0xff]   ;;  %v7652_v53 = vor.u32 %v7651_v33, %v7647_v30 }
 0xd99   :  { %12496 = vmatpush3.bf16.msra.mxu1 %v14290_v44  ;;  %7560 = vmatprep.mubr.bf16.mxu1 %v7189_v6  ;;  %v7656_v44 = vrot.slane %v7654_v43, 1  ;;  %v14324_v6 = vld [vmem:[%s14699_s29 + $0x48] sm:$0xff]  }
 0xd9a   :  { %12518 = vmatpush3.bf16.msra.mxu0 %v14291_v45  ;;  %7601 = vmatprep.mubr.bf16.mxu0 %v7191_v8  ;;  %v7190_v45 = vpack.c.bf16 %v16078_v50, %v7182_v46  ;;  %v14326_v8 = vld [vmem:[%s14699_s29 + $0x8] sm:$0xff]  }
 0xd9b   :  { %12497 = vmatprep.subr.bf16.mxu1 %v14292_v59  ;;  %12519 = vmatprep.subr.bf16.mxu0 %v14293_v7  ;;  %v14325_v59 = vld [vmem:[%s14699_s29 + $0xc8] sm:$0xff]   ;;  %v7633_v7 = vsel %vm1991_vm2, %v7628_v38, %v7632_v22 }
 0xd9d   :  { %12498 = vmatpush3.bf16.msra.mxu1 %v14294_v26  ;;  %v7657_v26 = vsel %vm1991_vm2, %v7652_v53, %v7656_v44 }
 0xd9e   :  { %12520 = vmatpush3.bf16.msra.mxu0 %v14295_v57  ;;  %12499 = vmatprep.subr.bf16.mxu1 %v14296_v29  ;;  %v14327_v57 = vld [vmem:[%s14699_s29 + $0x88] sm:$0xff]   ;;  %v14328_v29 = vld [vmem:[%s14699_s29 + $0x50] sm:$0xff]  }
 0xd9f   :  { %12521 = vmatprep.subr.bf16.mxu0 %v14297_v60  ;;  %v14329_v60 = vld [vmem:[%s14699_s29 + $0xd0] sm:$0xff]  }
 0xda1   :  { %12500 = vmatpush3.bf16.msra.mxu1 %v14298_v18  ;;  %v14330_v18 = vld [vmem:[%s14699_s29 + $0x10] sm:$0xff]  }
 0xda2   :  { %12522 = vmatpush3.bf16.msra.mxu0 %v14299_v17  ;;  %12501 = vmatprep.subr.bf16.mxu1 %v14300_v48  ;;  %v14331_v17 = vld [vmem:[%s14699_s29 + $0x90] sm:$0xff]   ;;  %v14332_v48 = vld [vmem:[%s14699_s29 + $0x58] sm:$0xff]  }
 0xda3   :  { %12523 = vmatprep.subr.bf16.mxu0 %v14301_v16  ;;  %v14333_v16 = vld [vmem:[%s14699_s29 + $0xd8] sm:$0xff]  }
 0xda5   :  { %12502 = vmatpush3.bf16.msra.mxu1 %v14302_v54  ;;  %v14334_v54 = vld [vmem:[%s14699_s29 + $0x18] sm:$0xff]  }
 0xda6   :  { %12524 = vmatpush3.bf16.msra.mxu0 %v14303_v1  ;;  %12503 = vmatprep.subr.bf16.mxu1 %v14304_v15  ;;  %v14335_v1 = vld [vmem:[%s14699_s29 + $0x98] sm:$0xff]   ;;  %v14336_v15 = vld [vmem:[%s14699_s29 + $0x60] sm:$0xff]  }
 0xda7   :  { %12525 = vmatprep.subr.bf16.mxu0 %v14305_v51  ;;  %v14337_v51 = vld [vmem:[%s14699_s29 + $0xe0] sm:$0xff]  }
 0xda9   :  { %12504 = vmatpush3.bf16.msra.mxu1 %v14306_v10  ;;  %v7192_v10 = vld [vmem:[#allocation3 + $0x60] sm:$0xfe] }
 0xdaa   :  { %12526 = vmatpush3.bf16.msra.mxu0 %v14307_v0  ;;  %12505 = vmatprep.subr.bf16.mxu1 %v14308_v32  ;;  %v14338_v0 = vld [vmem:[%s14699_s29 + $0x20] sm:$0xff]  }
 0xdab   :  { %12527 = vmatprep.subr.bf16.mxu0 %v14309_v62  ;;  %v14339_v32 = vld [vmem:[%s14699_s29 + $0xa0] sm:$0xff]   ;;  %v7200_v62 = vpack.c.bf16 %v16072_v20, %v7192_v10 }
 0xdad   :  { %12506 = vmatpush3.bf16.msra.mxu1 %v14310_v31  ;;  %v7202_v31 = vpack.c.bf16 %v16078_v50, %v7194_v58  ;;  %v7613_v20 = vshll.u32 %v7200_v62, 16  ;;  %v14346_v50 = vld [vmem:[%s14699_s29 + $0x30] sm:$0xff]  }
 0xdae   :  { %12528 = vmatpush3.bf16.msra.mxu0 %v14311_v4  ;;  %12507 = vmatprep.subr.bf16.mxu1 %v14312_v25  ;;  %v14342_v4 = vld [vmem:[%s14699_s29 + $0x28] sm:$0xff]   ;;  %v7198_v25 = vld [vmem:[#allocation3 + $0xb0] sm:$0x1] }
 0xdaf   :  { %12529 = vmatprep.subr.bf16.mxu0 %v14313_v9  ;;  %v14344_v9 = vld [vmem:[%s14699_s29 + $0x70] sm:$0xff]   ;;  %v7637_v19 = vshll.u32 %v7202_v31, 16  ;;  %v7615_v13 = vrot.slane %v7613_v20, 1  ;;  %v7635_v33 = vshrl.u32 %v7202_v31, 16 }
 0xdb1   :  { %12508 = vmatpush3.bf16.msra.mxu1 %v14314_v36  ;;  %v7206_v36 = vpack.c.bf16 %v7198_v25, %v7198_v25 }
 0xdb2   :  { %12530 = vmatpush3.bf16.msra.mxu0 %v14315_v5  ;;  %12509 = vmatprep.subr.bf16.mxu1 %v14316_v41  ;;  %v14348_v5 = vld [vmem:[%s14699_s29 + $0x78] sm:$0xff]  }
 0xdb3   :  { %12531 = vmatprep.subr.bf16.mxu0 %v14317_v12  ;;  %v14349_v41 = vld [vmem:[%s14699_s29 + $0xf8] sm:$0xff]   ;;  %v7618_v12 = vshll.u32 %v7204_v14, 16  ;;  %v7642_v52 = vshll.u32 %v7206_v36, 16 }
 0xdb5   :  { %12510 = vmatpush3.bf16.msra.mxu1 %v14318_v37  ;;  %v7639_v37 = vrot.slane %v7637_v19, 1  ;;  %v7620_v40 = vrot.slane %v7618_v12, 1 }
 0xdb6   :  { %12532 = vmatpush3.bf16.msra.mxu0 %v14319_v42  ;;  %12539 = vmatprep.subr.bf16.mxu1 %v14320_v11  ;;  %v7611_v42 = vshrl.u32 %v7200_v62, 16  ;;  %v14351_v11 = vld [vmem:[%s14699_s29 + $0xb8] sm:$0xff]  }
 0xdb7   :  { %12561 = vmatprep.subr.bf16.mxu0 %v14321_v27  ;;  %v7640_v21 = vor.u32 %v7639_v37, %v7635_v33  ;;  %v7644_v27 = vrot.slane %v7642_v52, 1 }
 0xdb8   :  { %7561 = vmatmul.mubr.bf16.vlgmr.msra.gmra.mrb[24].mxu1 %v7188_v35  ;;  %v7616_v43 = vor.u32 %v7615_v13, %v7611_v42 }
 0xdb9   :  { %7602 = vmatmul.mubr.bf16.vlgmr.msra.gmra.mrb[32].mxu0 %v7190_v45  ;;  %12540 = vmatpush3.bf16.msra.mxu1 %v14322_v47  ;;  %v7645_v46 = vsel %vm1991_vm2, %v7640_v21, %v7644_v27 }
 0xdba   :  { %7886 = vmatprep.mubr.bf16.mxu1 %v7633_v7  ;;  %12562 = vmatpush3.bf16.msra.mxu0 %v14323_v49  ;;  %v7621_v30 = vsel %vm1991_vm2, %v7616_v43, %v7620_v40 }
 0xdbb   :  { %7927 = vmatprep.mubr.bf16.mxu0 %v7657_v26  ;;  %12541 = vmatprep.subr.bf16.mxu1 %v14324_v6 }
 0xdbc   :  { %12563 = vmatprep.subr.bf16.mxu0 %v14325_v59 }
 0xdbd   :  { %12542 = vmatpush3.bf16.msra.mxu1 %v14326_v8 }
 0xdbe   :  { %12564 = vmatpush3.bf16.msra.mxu0 %v14327_v57  ;;  %12543 = vmatprep.subr.bf16.mxu1 %v14328_v29 }
 0xdbf   :  { %12565 = vmatprep.subr.bf16.mxu0 %v14329_v60 }
 0xdc1   :  { %12544 = vmatpush3.bf16.msra.mxu1 %v14330_v18 }
 0xdc2   :  { %12566 = vmatpush3.bf16.msra.mxu0 %v14331_v17  ;;  %12545 = vmatprep.subr.bf16.mxu1 %v14332_v48 }
 0xdc3   :  { %12567 = vmatprep.subr.bf16.mxu0 %v14333_v16 }
 0xdc5   :  { %12546 = vmatpush3.bf16.msra.mxu1 %v14334_v54 }
 0xdc6   :  { %12568 = vmatpush3.bf16.msra.mxu0 %v14335_v1  ;;  %12547 = vmatprep.subr.bf16.mxu1 %v14336_v15 }
 0xdc7   :  { %12569 = vmatprep.subr.bf16.mxu0 %v14337_v51 }
 0xdc9   :  { %12548 = vmatpush3.bf16.msra.mxu1 %v14338_v0 }
 0xdca   :  { %12570 = vmatpush3.bf16.msra.mxu0 %v14339_v32  ;;  %12549 = vmatprep.subr.bf16.mxu1 %v14340_v34 }
 0xdcb   :  { %12571 = vmatprep.subr.bf16.mxu0 %v14341_v63 }
 0xdcd   :  { %12550 = vmatpush3.bf16.msra.mxu1 %v14342_v4 }
 0xdce   :  { %12572 = vmatpush3.bf16.msra.mxu0 %v14343_v23  ;;  %12551 = vmatprep.subr.bf16.mxu1 %v14344_v9 }
 0xdcf   :  { %12573 = vmatprep.subr.bf16.mxu0 %v14345_v61 }
 0xdd1   :  { %12552 = vmatpush3.bf16.msra.mxu1 %v14346_v50 }
 0xdd2   :  { %12574 = vmatpush3.bf16.msra.mxu0 %v14347_v3  ;;  %12553 = vmatprep.subr.bf16.mxu1 %v14348_v5 }
 0xdd3   :  { %12575 = vmatprep.subr.bf16.mxu0 %v14349_v41 }
 0xdd5   :  { %12554 = vmatpush3.bf16.msra.mxu1 %v14350_v39 }
 0xdd6   :  { %12576 = vmatpush3.bf16.msra.mxu0 %v14351_v11  ;;  %12927 = vmatprep.subr.bf16.mxu1 %v14657_v2 }
 0xdd7   :  { %12933 = vmatprep.subr.bf16.mxu0 %v14657_v2 }
 0xdd8   :  { %7887 = vmatmul.mubr.bf16.vlgmr.msra.gmra.mrb[28].mxu1 %v7621_v30 }
 0xdd9   :  { %7928 = vmatmul.mubr.bf16.vlgmr.msra.gmra.mrb[36].mxu0 %v7645_v46  ;;  %12929 = vmatprep.mubr.msk.bf16.mxu1 %vm14659_vm5, %v14657_v2 }
 0xdda   :  { %12935 = vmatprep.mubr.msk.bf16.mxu0 %vm14659_vm5, %v14657_v2 }
 0xe6b   :  { %v7119_v47 = vpop.f32.mrb[20].mxu1  ;;  %v7164_v38 = vpop.f32.mrb[28].mxu0 }
 0xe6c   :  { %v7171_v22 = vrot.slane %v7119_v47, 7  ;;  %v7176_v35 = vrot.slane %v7164_v38, 7  ;;  %v12919_v49 = vpop.f32.mrb[21].mxu1  ;;  %v12925_v53 = vpop.f32.mrb[29].mxu0 }
 0xe6d   :  { %v7122_v44 = vpop.f32.mrb[22].mxu1  ;;  %v7167_v55 = vpop.f32.mrb[30].mxu0 }
 0xe6e   :  { %7173 = vst [vmem:[#allocation4] sm:$0xfe] %v7171_v22  ;;  %7174 = vst [vmem:[#allocation4 + $0x10] sm:$0x1] %v7171_v22  ;;  %v12920_v45 = vpop.f32.mrb[23].mxu1  ;;  %v12926_v6 = vpop.f32.mrb[31].mxu0 }
 0xe6f   :  { %7178 = vst [vmem:[#allocation4 + $0x8] sm:$0xfe] %v7176_v35  ;;  %7179 = vst [vmem:[#allocation4 + $0x18] sm:$0x1] %v7176_v35 }
 0xe76   :  { %v8099_v22 = vld [vmem:[#allocation4 + $0x8] sm:$0xfe]  ;;  %v8101_v35 = vld [vmem:[#allocation4 + $0x18] sm:$0x1] }
 0xe77   :  { %v8103_v55 = vpack.c.bf16 %v8101_v35, %v8099_v22 }
 0xe8b   :  { %v12511_v59 = vpop.f32.mrb[24].mxu1 }
 0xe8c   :  { %v12533_v7 = vpop.f32.mrb[32].mxu0  ;;  %v12512_v8 = vpop.f32.mrb[25].mxu1 }
 0xe8d   :  { %v12513_v26 = vadd.f32 %v12512_v8, %v12511_v59  ;;  %v12534_v57 = vpop.f32.mrb[33].mxu0  ;;  %v12514_v29 = vpop.f32.mrb[26].mxu1  ;;  %v8314_v8 = vshll.u32 %v8103_v55, 16 }
 0xe8e   :  { %v12535_v60 = vadd.f32 %v12534_v57, %v12533_v7  ;;  %v12536_v18 = vpop.f32.mrb[34].mxu0  ;;  %v12515_v17 = vpop.f32.mrb[27].mxu1 }
 0xe8f   :  { %v12516_v48 = vadd.f32 %v12515_v17, %v12514_v29  ;;  %v12537_v16 = vpop.f32.mrb[35].mxu0  ;;  %v14352_v29 = vld [vmem:[%s14714_s14 + $0x40] sm:$0xff]   ;;  %v8095_v17 = vld [vmem:[#allocation4 + $0x8] sm:$0xff] }
 0xe90   :  { %v7604_v54 = vadd.f32 %v12535_v60, %v12513_v26  ;;  %v12538_v1 = vadd.f32 %v12537_v16, %v12536_v18  ;;  %v14353_v60 = vld [vmem:[%s14719_s19 + $0x40] sm:$0xff]   ;;  %v8316_v16 = vrot.slane %v8314_v8, 1 }
 0xe92   :  { %v7607_v15 = vadd.f32 %v12538_v1, %v12516_v48  ;;  %v8312_v48 = vshrl.u32 %v8103_v55, 16  ;;  %v14354_v1 = vld [vmem:[%s14714_s14] sm:$0xff]  }
 0xeab   :  { %v12555_v51 = vpop.f32.mrb[28].mxu1 }
 0xeac   :  { %v12577_v10 = vpop.f32.mrb[36].mxu0  ;;  %v12556_v58 = vpop.f32.mrb[29].mxu1 }
 0xead   :  { %v12557_v0 = vadd.f32 %v12556_v58, %v12555_v51  ;;  %v12578_v32 = vpop.f32.mrb[37].mxu0  ;;  %v12558_v34 = vpop.f32.mrb[30].mxu1  ;;  %v14356_v51 = vld [vmem:[%s14714_s14 + $0x48] sm:$0xff]   ;;  %v8317_v58 = vor.u32 %v8316_v16, %v8312_v48 }
 0xeae   :  { %v12579_v62 = vadd.f32 %v12578_v32, %v12577_v10  ;;  %v12580_v63 = vpop.f32.mrb[38].mxu0  ;;  %v12559_v31 = vpop.f32.mrb[31].mxu1  ;;  %v14357_v10 = vld [vmem:[%s14719_s19 + $0x48] sm:$0xff]  }
 0xeaf   :  { %v7889_v24 = vadd.f32 %v12557_v0, %v7604_v54  ;;  %v12560_v4 = vadd.f32 %v12559_v31, %v12558_v34  ;;  %v12581_v25 = vpop.f32.mrb[39].mxu0  ;;  %v12174_v54 = vld [vmem:[%s14779_s12 + $0x4] sm:$0xf]  ;;  %v14358_v0 = vld [vmem:[%s14714_s14 + $0x8] sm:$0xff]   ;;  %v14360_v34 = vld [vmem:[%s14714_s14 + $0x50] sm:$0xff]  }
 0xeb0   :  { %v12582_v23 = vadd.f32 %v12581_v25, %v12580_v63  ;;  %v14359_v32 = vld [vmem:[%s14719_s19 + $0x8] sm:$0xff]   ;;  %v14362_v63 = vld [vmem:[%s14714_s14 + $0x10] sm:$0xff]   ;;  %v14366_v25 = vld [vmem:[%s14714_s14 + $0x18] sm:$0xff]  }
 0xeb1   :  { %v7930_v9 = vadd.f32 %v12579_v62, %v7889_v24  ;;  %v7892_v61 = vadd.f32 %v12560_v4, %v7607_v15  ;;  %v8097_v15 = vpack.c.bf16 %v8095_v17, %v8095_v17  ;;  %v14361_v62 = vld [vmem:[%s14719_s19 + $0x50] sm:$0xff]   ;;  %v14364_v24 = vld [vmem:[%s14714_s14 + $0x58] sm:$0xff]  }
 0xeb2   :  { %v14363_v31 = vld [vmem:[%s14719_s19 + $0x10] sm:$0xff]   ;;  %v14365_v4 = vld [vmem:[%s14719_s19 + $0x58] sm:$0xff]  }
 0xeb3   :  { %v7933_v14 = vadd.f32 %v12582_v23, %v7892_v61  ;;  %v14367_v23 = vld [vmem:[%s14719_s19 + $0x18] sm:$0xff]   ;;  %v14369_v61 = vld [vmem:[%s14719_s19 + $0x60] sm:$0xff]  }
 0xeb5   :  { %v7936_v20 = vadd.f32 %v7933_v14, %v7930_v9 }
 0xeb7   :  { %7937 = vadd.xlane.f32.xlu0 %v7936_v20  ;;  %v14371_v20 = vld [vmem:[%s14719_s19 + $0x20] sm:$0xff]  }
 0xf44   :  { %v7938_v36 = vpop.xlane.xlu0 %7937 }
 0xf45   :  { %v7939_v19 = vrot.slane %v7938_v36, 4 }
 0xf47   :  { %v7940_v50 = vadd.f32 %v7939_v19, %v7938_v36  ;;  %v14372_v36 = vld [vmem:[%s14714_s14 + $0x68] sm:$0xff]  }
 0xf48   :  { %v14373_v19 = vld [vmem:[%s14719_s19 + $0x68] sm:$0xff]  }
 0xf49   :  { %v7941_v3 = vrot.slane %v7940_v50, 2 }
 0xf4b   :  { %v7942_v5 = vadd.f32 %v7941_v3, %v7940_v50  ;;  %v8098_v50 = vld [vmem:[#allocation4] sm:$0xfe]  ;;  %v8100_v3 = vld [vmem:[#allocation4 + $0x10] sm:$0x1] }
 0xf4d   :  { %v7943_v41 = vrot.slane %v7942_v5, 1 }
 0xf4f   :  { %v7944_v13 = vadd.f32 %v7943_v41, %v7942_v5  ;;  %v14374_v5 = vld [vmem:[%s14714_s14 + $0x28] sm:$0xff]  }
 0xf50   :  { %v14375_v41 = vld [vmem:[%s14719_s19 + $0x28] sm:$0xff]  }
 0xf51   :  { %13265 = vpush %v7944_v13  ;;  %v14376_v13 = vld [vmem:[%s14714_s14 + $0x70] sm:$0xff]  }
 0xf82   :  { %s13266_s25 = spop %13265 }
 0xf83   :  { %s7948_s29 = smul.f32 0.00048828125, %s13266_s25 }
 0xf85   :  { %v7949_v12 = vstv %s7948_s29 }
 0xf86   :  { %v7950_v37 = vsub.f32 %v7930_v9, %v7949_v12  ;;  %v7951_v52 = vsub.f32 %v7933_v14, %v7949_v12  ;;  %v14368_v9 = vld [vmem:[%s14714_s14 + $0x60] sm:$0xff]   ;;  %v14377_v12 = vld [vmem:[%s14719_s19 + $0x70] sm:$0xff]  }
 0xf87   :  { %v14370_v14 = vld [vmem:[%s14714_s14 + $0x20] sm:$0xff]  }
 0xf88   :  { %v7952_v39 = vmul.f32 %v7950_v37, %v7950_v37  ;;  %v7953_v42 = vmul.f32 %v7951_v52, %v7951_v52 }
 0xf8a   :  { %v7954_v11 = vadd.f32 %v7953_v42, %v7952_v39  ;;  %v14379_v39 = vld [vmem:[%s14719_s19 + $0x30] sm:$0xff]   ;;  %v14380_v42 = vld [vmem:[%s14714_s14 + $0x78] sm:$0xff]  }
 0xf8c   :  { %7955 = vadd.xlane.f32.xlu1 %v7954_v11  ;;  %v14381_v11 = vld [vmem:[%s14719_s19 + $0x78] sm:$0xff]  }
0x1019   :  { %v7956_v33 = vpop.xlane.xlu1 %7955 }
0x101a   :  { %v7957_v43 = vrot.slane %v7956_v33, 4 }
0x101c   :  { %v7958_v40 = vadd.f32 %v7957_v43, %v7956_v33  ;;  %v14382_v43 = vld [vmem:[%s14714_s14 + $0x38] sm:$0xff]  }
0x101e   :  { %v7959_v21 = vrot.slane %v7958_v40, 2 }
0x1020   :  { %v7960_v27 = vadd.f32 %v7959_v21, %v7958_v40  ;;  %v14383_v40 = vld [vmem:[%s14719_s19 + $0x38] sm:$0xff]   ;;  %v8094_v21 = vld [vmem:[#allocation4] sm:$0xff] }
0x1022   :  { %v7961_v30 = vrot.slane %v7960_v27, 1 }
0x1024   :  { %v7962_v46 = vadd.f32 %v7961_v30, %v7960_v27 }
0x1026   :  { %13267 = vpush %v7962_v46  ;;  %v8096_v46 = vpack.c.bf16 %v8094_v21, %v8094_v21  ;;  %v8507_v21 = vld [vmem:[%s16649_s9] sm:$0x3] }
0x1057   :  { %s13268_s3 = spop %13267 }
0x1058   :  { %s7966_s8 = smul.f32 0.00048828125, %s13268_s3 }
0x105a   :  { %s7967_s2 = sadd.f32 1e-05, %s7966_s8  ;;  %s16654_s8 = sld [smem:[#allocation21_spill]] }
0x105c   :  { %v7968_v47 = vstv %s7967_s2 }
0x105d   :  { %14564 = vrsqrt.f32 %v7968_v47 }
0x1067   :  { %v14565_v38 = vpop.eup %14564 }
0x1068   :  { %13269 = vpush %v14565_v38 }
0x1099   :  { %s13270_s0 = spop %13269 }
0x109a   :  { %v7971_v49 = vstv %s13270_s0 }
0x109b   :  { %v7972_v53 = vmul.f32 %v7971_v49, %v7950_v37  ;;  %v7973_v44 = vmul.f32 %v7971_v49, %v7951_v52  ;;  %v8102_v37 = vpack.c.bf16 %v8100_v3, %v8098_v50  ;;  %v14378_v52 = vld [vmem:[%s14714_s14 + $0x30] sm:$0xff]   ;;  %v16240_v3 = vld [vmem:[%s16648_s10] ss:$0 sm:$0xff] }
0x109d   :  { %v7981_v45 = vmul.f32 %v16088_v28, %v7972_v53  ;;  %v7982_v6 = vmul.f32 %v16088_v28, %v7973_v44  ;;  %v7995_v28 = vld [vmem:[%s14779_s12] sm:$0xf]  ;;  %v8307_v33 = vshll.u32 %v8102_v37, 16  ;;  %v8305_v27 = vshrl.u32 %v8102_v37, 16 }
0x109f   :  { %v7990_v59 = vadd.f32 %v16091_v56, %v7981_v45  ;;  %v7991_v7 = vadd.f32 %v16091_v56, %v7982_v6  ;;  %v14355_v56 = vld [vmem:[%s14719_s19] sm:$0xff]   ;;  %v8309_v30 = vrot.slane %v8307_v33, 1 }
0x10a1   :  { %v7992_v26 = vmax.f32 %v7990_v59, 0.0  ;;  %v7993_v57 = vmax.f32 %v7991_v7, 0.0  ;;  %v8310_v47 = vor.u32 %v8309_v30, %v8305_v27  ;;  %v12211_v27 = vld [vmem:[%s16649_s9 + $0x2] sm:$0x3] }
0x10a2   :  { %v14386_v30 = vld [vmem:[%s14714_s14] sm:$0xff]  }
0x10a3   :  { %v7994_v18 = vpack.c.bf16 %v7993_v57, %v7992_v26 }
0x10a5   :  { %12928 = vmatpush3.bf16.msra.mxu1 %v7994_v18  ;;  %12934 = vmatpush3.bf16.msra.mxu0 %v7994_v18 }
0x10a6   :  { %12587 = vmatprep.subr.bf16.mxu1 %v14352_v29  ;;  %12609 = vmatprep.subr.bf16.mxu0 %v14353_v60 }
0x10a8   :  { %12930 = vmatmul.mubr.msk.bf16.vlgmr.msra.gmra.mrb[32].mxu1 %vm7081_vm6, %v7995_v28  ;;  %12936 = vmatmul.mubr.msk.bf16.vlgmr.msra.gmra.mrb[40].mxu0 %vm7081_vm6, %v12174_v54 }
0x10a9   :  { %12588 = vmatpush3.bf16.msra.mxu1 %v14354_v1  ;;  %8296 = vmatprep.mubr.bf16.mxu1 %v8097_v15 }
0x10aa   :  { %12610 = vmatpush3.bf16.msra.mxu0 %v14355_v56  ;;  %8448 = vmatprep.mubr.bf16.mxu0 %v8317_v58 }
0x10ab   :  { %12589 = vmatprep.subr.bf16.mxu1 %v14356_v51  ;;  %12611 = vmatprep.subr.bf16.mxu0 %v14357_v10 }
0x10ad   :  { %12590 = vmatpush3.bf16.msra.mxu1 %v14358_v0 }
0x10ae   :  { %12612 = vmatpush3.bf16.msra.mxu0 %v14359_v32  ;;  %12591 = vmatprep.subr.bf16.mxu1 %v14360_v34 }
0x10af   :  { %12613 = vmatprep.subr.bf16.mxu0 %v14361_v62 }
0x10b1   :  { %12592 = vmatpush3.bf16.msra.mxu1 %v14362_v63 }
0x10b2   :  { %12614 = vmatpush3.bf16.msra.mxu0 %v14363_v31  ;;  %12593 = vmatprep.subr.bf16.mxu1 %v14364_v24 }
0x10b3   :  { %12615 = vmatprep.subr.bf16.mxu0 %v14365_v4 }
0x10b5   :  { %12594 = vmatpush3.bf16.msra.mxu1 %v14366_v25 }
0x10b6   :  { %12616 = vmatpush3.bf16.msra.mxu0 %v14367_v23  ;;  %12595 = vmatprep.subr.bf16.mxu1 %v14368_v9 }
0x10b7   :  { %12617 = vmatprep.subr.bf16.mxu0 %v14369_v61 }
0x10b9   :  { %12596 = vmatpush3.bf16.msra.mxu1 %v14370_v14 }
0x10ba   :  { %12618 = vmatpush3.bf16.msra.mxu0 %v14371_v20  ;;  %12597 = vmatprep.subr.bf16.mxu1 %v14372_v36  ;;  %v16237_v20 = vld [vmem:[%s14724_s24] ss:$0 sm:$0xff] }
0x10bb   :  { %12619 = vmatprep.subr.bf16.mxu0 %v14373_v19 }
0x10bd   :  { %12598 = vmatpush3.bf16.msra.mxu1 %v14374_v5 }
0x10be   :  { %12620 = vmatpush3.bf16.msra.mxu0 %v14375_v41  ;;  %12599 = vmatprep.subr.bf16.mxu1 %v14376_v13 }
0x10bf   :  { %12621 = vmatprep.subr.bf16.mxu0 %v14377_v12 }
0x10c1   :  { %12600 = vmatpush3.bf16.msra.mxu1 %v14378_v52 }
0x10c2   :  { %12622 = vmatpush3.bf16.msra.mxu0 %v14379_v39  ;;  %12601 = vmatprep.subr.bf16.mxu1 %v14380_v42  ;;  %v14384_v39 = vld [vmem:[%s14714_s14 + $0x40] sm:$0xff]  }
0x10c3   :  { %12623 = vmatprep.subr.bf16.mxu0 %v14381_v11  ;;  %v14385_v42 = vld [vmem:[%s14719_s19 + $0x40] sm:$0xff]  }
0x10c5   :  { %12602 = vmatpush3.bf16.msra.mxu1 %v14382_v43 }
0x10c6   :  { %12624 = vmatpush3.bf16.msra.mxu0 %v14383_v40  ;;  %12939 = vmatprep.subr.bf16.mxu1 %v14657_v2 }
0x10c7   :  { %12945 = vmatprep.subr.bf16.mxu0 %v14657_v2 }
0x10c8   :  { %8297 = vmatmul.mubr.bf16.vlgmr.msra.gmra.mrb[36].mxu1 %v8096_v46  ;;  %v14387_v46 = vld [vmem:[%s14719_s19] sm:$0xff]  }
0x10c9   :  { %8449 = vmatmul.mubr.bf16.vlgmr.msra.gmra.mrb[44].mxu0 %v8310_v47  ;;  %12941 = vmatprep.mubr.msk.bf16.mxu1 %vm14659_vm5, %v14657_v2 }
0x10ca   :  { %12947 = vmatprep.mubr.msk.bf16.mxu0 %vm14659_vm5, %v14657_v2 }
0x117b   :  { %v8033_v38 = vpop.f32.mrb[32].mxu1  ;;  %v8077_v22 = vpop.f32.mrb[40].mxu0 }
0x117c   :  { %v8084_v35 = vrot.slane %v8033_v38, 7  ;;  %v8090_v49 = vrot.slane %v8077_v22, 7  ;;  %v12931_v53 = vpop.f32.mrb[33].mxu1  ;;  %v12937_v44 = vpop.f32.mrb[41].mxu0  ;;  %v14388_v38 = vld [vmem:[%s14714_s14 + $0x48] sm:$0xff]  }
0x117d   :  { %v8036_v55 = vpop.f32.mrb[34].mxu1  ;;  %v8080_v45 = vpop.f32.mrb[42].mxu0  ;;  %v14389_v22 = vld [vmem:[%s14719_s19 + $0x48] sm:$0xff]   ;;  %v14392_v44 = vld [vmem:[%s14714_s14 + $0x50] sm:$0xff]  }
0x117e   :  { %8087 = vst [vmem:[#allocation4 + $0x20] sm:$0xfe] %v8084_v35  ;;  %8088 = vst [vmem:[#allocation4 + $0x30] sm:$0x1] %v8084_v35  ;;  %v12932_v6 = vpop.f32.mrb[35].mxu1  ;;  %v12938_v59 = vpop.f32.mrb[43].mxu0 }
0x117f   :  { %8092 = vst [vmem:[#allocation4 + $0x28] sm:$0xfe] %v8090_v49  ;;  %8093 = vst [vmem:[#allocation4 + $0x38] sm:$0x1] %v8090_v49  ;;  %v14390_v49 = vld [vmem:[%s14714_s14 + $0x8] sm:$0xff]   ;;  %v14393_v55 = vld [vmem:[%s14719_s19 + $0x50] sm:$0xff]  }
0x1180   :  { %v14391_v53 = vld [vmem:[%s14719_s19 + $0x8] sm:$0xff]   ;;  %v14394_v45 = vld [vmem:[%s14714_s14 + $0x10] sm:$0xff]   ;;  %v14396_v59 = vld [vmem:[%s14714_s14 + $0x58] sm:$0xff]  }
0x1181   :  { %v14395_v6 = vld [vmem:[%s14719_s19 + $0x10] sm:$0xff]  }
0x1186   :  { %v8614_v36 = vld [vmem:[#allocation4 + $0x28] sm:$0xfe]  ;;  %v8616_v19 = vld [vmem:[#allocation4 + $0x38] sm:$0x1] }
0x1187   :  { %v8618_v41 = vpack.c.bf16 %v8616_v19, %v8614_v36  ;;  %v8610_v33 = vld [vmem:[#allocation4 + $0x28] sm:$0xff] }
0x1188   :  { %v8612_v47 = vpack.c.bf16 %v8610_v33, %v8610_v33 }
0x1189   :  { %v8829_v37 = vshll.u32 %v8618_v41, 16  ;;  %v8827_v43 = vshrl.u32 %v8618_v41, 16 }
0x118b   :  { %v8831_v40 = vrot.slane %v8829_v37, 1 }
0x118d   :  { %v8832_v35 = vor.u32 %v8831_v40, %v8827_v43 }
0x119b   :  { %v12603_v7 = vpop.f32.mrb[36].mxu1 }
0x119c   :  { %v12625_v8 = vpop.f32.mrb[44].mxu0  ;;  %v12604_v26 = vpop.f32.mrb[37].mxu1 }
0x119d   :  { %v12605_v57 = vadd.f32 %v12604_v26, %v12603_v7  ;;  %v12626_v29 = vpop.f32.mrb[45].mxu0  ;;  %v12606_v60 = vpop.f32.mrb[38].mxu1  ;;  %v14397_v7 = vld [vmem:[%s14719_s19 + $0x58] sm:$0xff]  }
0x119e   :  { %v12627_v18 = vadd.f32 %v12626_v29, %v12625_v8  ;;  %v12628_v17 = vpop.f32.mrb[46].mxu0  ;;  %v12607_v48 = vpop.f32.mrb[39].mxu1  ;;  %v14398_v8 = vld [vmem:[%s14714_s14 + $0x18] sm:$0xff]   ;;  %v14401_v29 = vld [vmem:[%s14719_s19 + $0x60] sm:$0xff]  }
0x119f   :  { %v12629_v16 = vpop.f32.mrb[47].mxu0  ;;  %v14399_v26 = vld [vmem:[%s14719_s19 + $0x18] sm:$0xff]   ;;  %v14402_v60 = vld [vmem:[%s14714_s14 + $0x20] sm:$0xff]   ;;  %v14404_v17 = vld [vmem:[%s14714_s14 + $0x68] sm:$0xff]  }
0x11a0   :  { %v8451_v28 = vadd.f32 %v12627_v18, %v12605_v57  ;;  %v14400_v57 = vld [vmem:[%s14714_s14 + $0x60] sm:$0xff]   ;;  %v14405_v48 = vld [vmem:[%s14719_s19 + $0x68] sm:$0xff]   ;;  %v8613_v16 = vld [vmem:[#allocation4 + $0x20] sm:$0xfe] }
0x11a1   :  { %v14403_v18 = vld [vmem:[%s14719_s19 + $0x20] sm:$0xff]  }
0x11a2   :  { %8456 = vadd.xlane.f32.xlu0 %v8451_v28 }
0x122f   :  { %v8457_v54 = vpop.xlane.xlu0 %8456 }
0x1230   :  { %v8458_v1 = vrot.slane %v8457_v54, 4 }
0x1232   :  { %v8459_v56 = vadd.f32 %v8458_v1, %v8457_v54  ;;  %v14406_v54 = vld [vmem:[%s14714_s14 + $0x28] sm:$0xff]  }
0x1233   :  { %v14407_v1 = vld [vmem:[%s14719_s19 + $0x28] sm:$0xff]  }
0x1234   :  { %v8460_v15 = vrot.slane %v8459_v56, 2 }
0x1236   :  { %v8461_v51 = vadd.f32 %v8460_v15, %v8459_v56  ;;  %v14408_v56 = vld [vmem:[%s14714_s14 + $0x70] sm:$0xff]  }
0x1237   :  { %v14409_v15 = vld [vmem:[%s14719_s19 + $0x70] sm:$0xff]  }
0x1238   :  { %v8462_v10 = vrot.slane %v8461_v51, 1 }
0x123a   :  { %v8463_v58 = vadd.f32 %v8462_v10, %v8461_v51  ;;  %v14410_v10 = vld [vmem:[%s14714_s14 + $0x30] sm:$0xff]  }
0x123c   :  { %13271 = vpush %v8463_v58  ;;  %v14411_v58 = vld [vmem:[%s14719_s19 + $0x30] sm:$0xff]  }
0x126d   :  { %s13272_s12 = spop %13271 }
0x126e   :  { %s8467_s7 = smul.f32 0.0009765625, %s13272_s12 }
0x1270   :  { %v8468_v0 = vstv %s8467_s7 }
0x1271   :  { %v8469_v32 = vsub.f32 %v8451_v28, %v8468_v0  ;;  %v8615_v28 = vld [vmem:[#allocation4 + $0x30] sm:$0x1]  ;;  %v14412_v0 = vld [vmem:[%s14714_s14 + $0x78] sm:$0xff]  }
0x1272   :  { %v8617_v51 = vpack.c.bf16 %v8615_v28, %v8613_v16 }
0x1273   :  { %v8470_v34 = vmul.f32 %v8469_v32, %v8469_v32 }
0x1275   :  { %8471 = vadd.xlane.f32.xlu1 %v8470_v34  ;;  %v8822_v34 = vshll.u32 %v8617_v51, 16 }
0x1302   :  { %v8472_v62 = vpop.xlane.xlu1 %8471 }
0x1303   :  { %v8473_v63 = vrot.slane %v8472_v62, 4 }
0x1305   :  { %v8474_v31 = vadd.f32 %v8473_v63, %v8472_v62  ;;  %v14414_v62 = vld [vmem:[%s14714_s14 + $0x38] sm:$0xff]  }
0x1306   :  { %v14415_v63 = vld [vmem:[%s14719_s19 + $0x38] sm:$0xff]  }
0x1307   :  { %v8475_v24 = vrot.slane %v8474_v31, 2 }
0x1309   :  { %v8476_v4 = vadd.f32 %v8475_v24, %v8474_v31  ;;  %v8609_v31 = vld [vmem:[#allocation4 + $0x20] sm:$0xff]  ;;  %v8820_v24 = vshrl.u32 %v8617_v51, 16 }
0x130b   :  { %v8477_v25 = vrot.slane %v8476_v4, 1 }
0x130d   :  { %v8478_v23 = vadd.f32 %v8477_v25, %v8476_v4  ;;  %v8824_v4 = vrot.slane %v8822_v34, 1  ;;  %v8611_v25 = vpack.c.bf16 %v8609_v31, %v8609_v31  ;;  %v14419_v31 = vld [vmem:[%s16651_s23] sm:$0xff]  }
0x130f   :  { %13273 = vpush %v8478_v23  ;;  %v8825_v23 = vor.u32 %v8824_v4, %v8820_v24  ;;  %v14420_v4 = vld [vmem:[%s16650_s18 + $0x48] sm:$0xff]  }
0x1340   :  { %s13274_s11 = spop %13273 }
0x1341   :  { %s8482_s15 = smul.f32 0.0009765625, %s13274_s11  ;;  %s16655_s11 = sld [smem:[#allocation16_spill]] }
0x1343   :  { %s8483_s16 = sadd.f32 1e-05, %s8482_s15  ;;  %s16656_s15 = sld [smem:[#allocation17_spill]] }
0x1345   :  { %v8484_v9 = vstv %s8483_s16 }
0x1346   :  { %14566 = vrsqrt.f32 %v8484_v9 }
0x1350   :  { %v14567_v61 = vpop.eup %14566 }
0x1351   :  { %13275 = vpush %v14567_v61 }
0x1382   :  { %s13276_s5 = spop %13275 }
0x1383   :  { %v8487_v14 = vstv %s13276_s5  ;;  %s16657_s5 = sld [smem:[#allocation23_spill]] }
0x1384   :  { %v8488_v50 = vmul.f32 %v8487_v14, %v8469_v32  ;;  %v14413_v32 = vld [vmem:[%s14719_s19 + $0x78] sm:$0xff]  }
0x1386   :  { %v8496_v5 = vmul.f32 %v16237_v20, %v8488_v50 }
0x1388   :  { %v8504_v13 = vadd.f32 %v16240_v3, %v8496_v5 }
0x138a   :  { %v8505_v12 = vmax.f32 %v8504_v13, 0.0 }
0x138c   :  { %v8506_v52 = vpack.c.bf16 %v8505_v12, %v8505_v12 }
0x138e   :  { %v8514_v11 = vsel %vm8512_vm8, %v8506_v52, 0 }
0x138f   :  { %12940 = vmatpush3.bf16.msra.mxu1 %v8514_v11  ;;  %12946 = vmatpush3.bf16.msra.mxu0 %v8514_v11 }
0x1390   :  { %12635 = vmatprep.subr.bf16.mxu1 %v14384_v39  ;;  %12657 = vmatprep.subr.bf16.mxu0 %v14385_v42 }
0x1392   :  { %12942 = vmatmul.mubr.msk.bf16.vlgmr.msra.gmra.mrb[40].mxu1 %vm8508_vm9, %v8507_v21  ;;  %12948 = vmatmul.mubr.msk.bf16.vlgmr.msra.gmra.mrb[48].mxu0 %vm8508_vm9, %v12211_v27 }
0x1393   :  { %12636 = vmatpush3.bf16.msra.mxu1 %v14386_v30  ;;  %8811 = vmatprep.mubr.bf16.mxu1 %v8612_v47 }
0x1394   :  { %12658 = vmatpush3.bf16.msra.mxu0 %v14387_v46  ;;  %8963 = vmatprep.mubr.bf16.mxu0 %v8832_v35 }
0x1395   :  { %12637 = vmatprep.subr.bf16.mxu1 %v14388_v38  ;;  %12659 = vmatprep.subr.bf16.mxu0 %v14389_v22 }
0x1397   :  { %12638 = vmatpush3.bf16.msra.mxu1 %v14390_v49 }
0x1398   :  { %12660 = vmatpush3.bf16.msra.mxu0 %v14391_v53  ;;  %12639 = vmatprep.subr.bf16.mxu1 %v14392_v44 }
0x1399   :  { %12661 = vmatprep.subr.bf16.mxu0 %v14393_v55 }
0x139b   :  { %12640 = vmatpush3.bf16.msra.mxu1 %v14394_v45 }
0x139c   :  { %12662 = vmatpush3.bf16.msra.mxu0 %v14395_v6  ;;  %12641 = vmatprep.subr.bf16.mxu1 %v14396_v59 }
0x139d   :  { %12663 = vmatprep.subr.bf16.mxu0 %v14397_v7 }
0x139f   :  { %12642 = vmatpush3.bf16.msra.mxu1 %v14398_v8 }
0x13a0   :  { %12664 = vmatpush3.bf16.msra.mxu0 %v14399_v26  ;;  %12643 = vmatprep.subr.bf16.mxu1 %v14400_v57 }
0x13a1   :  { %12665 = vmatprep.subr.bf16.mxu0 %v14401_v29 }
0x13a3   :  { %12644 = vmatpush3.bf16.msra.mxu1 %v14402_v60 }
0x13a4   :  { %12666 = vmatpush3.bf16.msra.mxu0 %v14403_v18  ;;  %12645 = vmatprep.subr.bf16.mxu1 %v14404_v17 }
0x13a5   :  { %12667 = vmatprep.subr.bf16.mxu0 %v14405_v48 }
0x13a7   :  { %12646 = vmatpush3.bf16.msra.mxu1 %v14406_v54 }
0x13a8   :  { %12668 = vmatpush3.bf16.msra.mxu0 %v14407_v1  ;;  %12647 = vmatprep.subr.bf16.mxu1 %v14408_v56 }
0x13a9   :  { %12669 = vmatprep.subr.bf16.mxu0 %v14409_v15 }
0x13ab   :  { %12648 = vmatpush3.bf16.msra.mxu1 %v14410_v10  ;;  %v14416_v10 = vld [vmem:[%s16650_s18 + $0x40] sm:$0xff]  }
0x13ac   :  { %12670 = vmatpush3.bf16.msra.mxu0 %v14411_v58  ;;  %12649 = vmatprep.subr.bf16.mxu1 %v14412_v0  ;;  %v14417_v58 = vld [vmem:[%s16651_s23 + $0x40] sm:$0xff]  }
0x13ad   :  { %12671 = vmatprep.subr.bf16.mxu0 %v14413_v32 }
0x13af   :  { %12650 = vmatpush3.bf16.msra.mxu1 %v14414_v62 }
0x13b0   :  { %12672 = vmatpush3.bf16.msra.mxu0 %v14415_v63  ;;  %12951 = vmatprep.subr.bf16.mxu1 %v14657_v2  ;;  %v12248_v63 = vld [vmem:[%s16649_s9 + $0x2] sm:$0x3] }
0x13b1   :  { %12957 = vmatprep.subr.bf16.mxu0 %v14657_v2 }
0x13b2   :  { %8812 = vmatmul.mubr.bf16.vlgmr.msra.gmra.mrb[44].mxu1 %v8611_v25  ;;  %v14421_v25 = vld [vmem:[%s16651_s23 + $0x48] sm:$0xff]  }
0x13b3   :  { %8964 = vmatmul.mubr.bf16.vlgmr.msra.gmra.mrb[52].mxu0 %v8825_v23  ;;  %12953 = vmatprep.mubr.msk.bf16.mxu1 %vm14659_vm5, %v14657_v2 }
0x13b4   :  { %12959 = vmatprep.mubr.msk.bf16.mxu0 %vm14659_vm5, %v14657_v2 }
0x1465   :  { %v8550_v9 = vpop.f32.mrb[40].mxu1  ;;  %v8595_v61 = vpop.f32.mrb[48].mxu0 }
0x1466   :  { %v8602_v14 = vrot.slane %v8550_v9, 7  ;;  %v8606_v36 = vrot.slane %v8595_v61, 7  ;;  %v12943_v19 = vpop.f32.mrb[41].mxu1  ;;  %v12949_v50 = vpop.f32.mrb[49].mxu0  ;;  %v14422_v9 = vld [vmem:[%s16650_s18 + $0x8] sm:$0xff]  }
0x1467   :  { %v8553_v5 = vpop.f32.mrb[42].mxu1  ;;  %v8598_v41 = vpop.f32.mrb[50].mxu0  ;;  %v14423_v61 = vld [vmem:[%s16651_s23 + $0x8] sm:$0xff]   ;;  %v14426_v19 = vld [vmem:[%s16650_s18 + $0x10] sm:$0xff]  }
0x1468   :  { %8604 = vst [vmem:[#allocation5] sm:$0x1e] %v8602_v14  ;;  %8608 = vst [vmem:[#allocation5 + $0x8] sm:$0x1e] %v8606_v36  ;;  %v12944_v13 = vpop.f32.mrb[43].mxu1  ;;  %v12950_v12 = vpop.f32.mrb[51].mxu0 }
0x1469   :  { %v14424_v14 = vld [vmem:[%s16650_s18 + $0x50] sm:$0xff]   ;;  %v14428_v5 = vld [vmem:[%s16650_s18 + $0x58] sm:$0xff]  }
0x146a   :  { %v14425_v36 = vld [vmem:[%s16651_s23 + $0x50] sm:$0xff]   ;;  %v14429_v41 = vld [vmem:[%s16651_s23 + $0x58] sm:$0xff]  }
0x146b   :  { %v14427_v50 = vld [vmem:[%s16651_s23 + $0x10] sm:$0xff]   ;;  %v14430_v13 = vld [vmem:[%s16650_s18 + $0x18] sm:$0xff]  }
0x146c   :  { %v14431_v12 = vld [vmem:[%s16651_s23 + $0x18] sm:$0xff]  }
0x146f   :  { %v9127_v48 = vld [vmem:[#allocation5 + $0x8] sm:$0x1e] }
0x1470   :  { %v9129_v54 = vpack.c.bf16 %v9127_v48, %v9127_v48  ;;  %v9123_v32 = vld [vmem:[#allocation5 + $0x8] sm:$0xf] }
0x1471   :  { %v9125_v24 = vpack.c.bf16 %v9123_v32, %v9123_v32 }
0x1472   :  { %v9340_v15 = vshll.u32 %v9129_v54, 16  ;;  %v9338_v34 = vshrl.u32 %v9129_v54, 16 }
0x1474   :  { %v9342_v62 = vrot.slane %v9340_v15, 1 }
0x1476   :  { %v9343_v23 = vor.u32 %v9342_v62, %v9338_v34 }
0x1485   :  { %v12651_v37 = vpop.f32.mrb[44].mxu1 }
0x1486   :  { %v12673_v52 = vpop.f32.mrb[52].mxu0  ;;  %v12652_v39 = vpop.f32.mrb[45].mxu1 }
0x1487   :  { %v12653_v42 = vadd.f32 %v12652_v39, %v12651_v37  ;;  %v12674_v11 = vpop.f32.mrb[53].mxu0  ;;  %v12654_v33 = vpop.f32.mrb[46].mxu1  ;;  %v14432_v37 = vld [vmem:[%s16650_s18 + $0x60] sm:$0xff]  }
0x1488   :  { %v12675_v43 = vadd.f32 %v12674_v11, %v12673_v52  ;;  %v12676_v40 = vpop.f32.mrb[54].mxu0  ;;  %v12655_v21 = vpop.f32.mrb[47].mxu1  ;;  %v14433_v52 = vld [vmem:[%s16651_s23 + $0x60] sm:$0xff]   ;;  %v14436_v11 = vld [vmem:[%s16650_s18 + $0x68] sm:$0xff]  }
0x1489   :  { %v12677_v27 = vpop.f32.mrb[55].mxu0  ;;  %v14434_v39 = vld [vmem:[%s16650_s18 + $0x20] sm:$0xff]   ;;  %v14437_v33 = vld [vmem:[%s16651_s23 + $0x68] sm:$0xff]  }
0x148a   :  { %v8966_v30 = vadd.f32 %v12675_v43, %v12653_v42  ;;  %v14435_v42 = vld [vmem:[%s16651_s23 + $0x20] sm:$0xff]   ;;  %v9126_v43 = vld [vmem:[#allocation5] sm:$0x1e]  ;;  %v14438_v40 = vld [vmem:[%s16650_s18 + $0x28] sm:$0xff]  }
0x148b   :  { %v14439_v21 = vld [vmem:[%s16651_s23 + $0x28] sm:$0xff]   ;;  %v14440_v27 = vld [vmem:[%s16650_s18 + $0x70] sm:$0xff]  }
0x148c   :  { %8971 = vadd.xlane.f32.xlu0 %v8966_v30 }
0x1519   :  { %v8972_v46 = vpop.xlane.xlu0 %8971 }
0x151a   :  { %v8973_v47 = vrot.slane %v8972_v46, 4 }
0x151c   :  { %v8974_v38 = vadd.f32 %v8973_v47, %v8972_v46  ;;  %v9128_v46 = vpack.c.bf16 %v9126_v43, %v9126_v43  ;;  %v14442_v47 = vld [vmem:[%s16650_s18 + $0x30] sm:$0xff]  }
0x151e   :  { %v8975_v22 = vrot.slane %v8974_v38, 2 }
0x1520   :  { %v8976_v35 = vadd.f32 %v8975_v22, %v8974_v38  ;;  %v14443_v38 = vld [vmem:[%s16651_s23 + $0x30] sm:$0xff]   ;;  %v14444_v22 = vld [vmem:[%s16650_s18 + $0x78] sm:$0xff]  }
0x1522   :  { %v8977_v49 = vrot.slane %v8976_v35, 1 }
0x1524   :  { %v8978_v53 = vadd.f32 %v8977_v49, %v8976_v35  ;;  %v14445_v35 = vld [vmem:[%s16651_s23 + $0x78] sm:$0xff]   ;;  %v9333_v49 = vshll.u32 %v9128_v46, 16 }
0x1526   :  { %13277 = vpush %v8978_v53  ;;  %v14446_v53 = vld [vmem:[%s16650_s18 + $0x38] sm:$0xff]  }
0x1557   :  { %s13278_s14 = spop %13277 }
0x1558   :  { %s8982_s19 = smul.f32 0.0009765625, %s13278_s14 }
0x155a   :  { %v8983_v44 = vstv %s8982_s19  ;;  %s16658_s19 = sld [smem:[#allocation18_spill]] }
0x155b   :  { %v8984_v55 = vsub.f32 %v8966_v30, %v8983_v44  ;;  %v14441_v30 = vld [vmem:[%s16651_s23 + $0x70] sm:$0xff]   ;;  %v14447_v44 = vld [vmem:[%s16651_s23 + $0x38] sm:$0xff]  }
0x155d   :  { %v8985_v45 = vmul.f32 %v8984_v55, %v8984_v55 }
0x155f   :  { %8986 = vadd.xlane.f32.xlu1 %v8985_v45  ;;  %v9331_v45 = vshrl.u32 %v9128_v46, 16 }
0x15ec   :  { %v8987_v6 = vpop.xlane.xlu1 %8986 }
0x15ed   :  { %v8988_v59 = vrot.slane %v8987_v6, 4 }
0x15ef   :  { %v8989_v7 = vadd.f32 %v8988_v59, %v8987_v6  ;;  %v9335_v6 = vrot.slane %v9333_v49, 1 }
0x15f1   :  { %v8990_v8 = vrot.slane %v8989_v7, 2 }
0x15f3   :  { %v8991_v26 = vadd.f32 %v8990_v8, %v8989_v7  ;;  %v9336_v7 = vor.u32 %v9335_v6, %v9331_v45  ;;  %v9535_v45 = vld [vmem:[%s16654_s8] sm:$0x1]  ;;  %v12285_v6 = vld [vmem:[%s16654_s8 + $0x1] sm:$0x1] }
0x15f5   :  { %v8992_v57 = vrot.slane %v8991_v26, 1 }
0x15f7   :  { %v8993_v29 = vadd.f32 %v8992_v57, %v8991_v26 }
0x15f9   :  { %13279 = vpush %v8993_v29 }
0x162a   :  { %s13280_s24 = spop %13279 }
0x162b   :  { %s8997_s13 = smul.f32 0.0009765625, %s13280_s24 }
0x162d   :  { %s8998_s22 = sadd.f32 1e-05, %s8997_s13 }
0x162f   :  { %v8999_v60 = vstv %s8998_s22  ;;  %s16659_s22 = sld [smem:[#allocation19_spill]] }
0x1630   :  { %14568 = vrsqrt.f32 %v8999_v60 }
0x163a   :  { %v14569_v18 = vpop.eup %14568 }
0x163b   :  { %13281 = vpush %v14569_v18 }
0x166c   :  { %s13282_s17 = spop %13281 }
0x166d   :  { %v9002_v17 = vstv %s13282_s17  ;;  %s16660_s17 = sld [smem:[#allocation22_spill]] }
0x166e   :  { %v9003_v16 = vmul.f32 %v9002_v17, %v8984_v55  ;;  %v9122_v55 = vld [vmem:[#allocation5] sm:$0xf] }
0x166f   :  { %v9124_v59 = vpack.c.bf16 %v9122_v55, %v9122_v55 }
0x1670   :  { %v9011_v28 = vmul.f32 %v16237_v20, %v9003_v16  ;;  %v9022_v20 = vld [vmem:[%s16649_s9] sm:$0x3] }
0x1672   :  { %v9019_v1 = vadd.f32 %v16240_v3, %v9011_v28  ;;  %v14418_v3 = vld [vmem:[%s16650_s18] sm:$0xff]  }
0x1674   :  { %v9020_v56 = vmax.f32 %v9019_v1, 0.0 }
0x1676   :  { %v9021_v51 = vpack.c.bf16 %v9020_v56, %v9020_v56 }
0x1678   :  { %v9027_v0 = vsel %vm8512_vm8, %v9021_v51, 0 }
0x1679   :  { %12952 = vmatpush3.bf16.msra.mxu1 %v9027_v0  ;;  %12958 = vmatpush3.bf16.msra.mxu0 %v9027_v0 }
0x167a   :  { %12683 = vmatprep.subr.bf16.mxu1 %v14416_v10  ;;  %12705 = vmatprep.subr.bf16.mxu0 %v14417_v58 }
0x167c   :  { %12954 = vmatmul.mubr.msk.bf16.vlgmr.msra.gmra.mrb[48].mxu1 %vm8508_vm9, %v9022_v20  ;;  %12960 = vmatmul.mubr.msk.bf16.vlgmr.msra.gmra.mrb[56].mxu0 %vm8508_vm9, %v12248_v63 }
0x167d   :  { %12684 = vmatpush3.bf16.msra.mxu1 %v14418_v3  ;;  %9322 = vmatprep.mubr.bf16.mxu1 %v9125_v24 }
0x167e   :  { %12706 = vmatpush3.bf16.msra.mxu0 %v14419_v31  ;;  %9474 = vmatprep.mubr.bf16.mxu0 %v9343_v23 }
0x167f   :  { %12685 = vmatprep.subr.bf16.mxu1 %v14420_v4  ;;  %12707 = vmatprep.subr.bf16.mxu0 %v14421_v25 }
0x1681   :  { %12686 = vmatpush3.bf16.msra.mxu1 %v14422_v9 }
0x1682   :  { %12708 = vmatpush3.bf16.msra.mxu0 %v14423_v61  ;;  %12687 = vmatprep.subr.bf16.mxu1 %v14424_v14 }
0x1683   :  { %12709 = vmatprep.subr.bf16.mxu0 %v14425_v36 }
0x1685   :  { %12688 = vmatpush3.bf16.msra.mxu1 %v14426_v19 }
0x1686   :  { %12710 = vmatpush3.bf16.msra.mxu0 %v14427_v50  ;;  %12689 = vmatprep.subr.bf16.mxu1 %v14428_v5 }
0x1687   :  { %12711 = vmatprep.subr.bf16.mxu0 %v14429_v41 }
0x1689   :  { %12690 = vmatpush3.bf16.msra.mxu1 %v14430_v13 }
0x168a   :  { %12712 = vmatpush3.bf16.msra.mxu0 %v14431_v12  ;;  %12691 = vmatprep.subr.bf16.mxu1 %v14432_v37 }
0x168b   :  { %12713 = vmatprep.subr.bf16.mxu0 %v14433_v52 }
0x168d   :  { %12692 = vmatpush3.bf16.msra.mxu1 %v14434_v39 }
0x168e   :  { %12714 = vmatpush3.bf16.msra.mxu0 %v14435_v42  ;;  %12693 = vmatprep.subr.bf16.mxu1 %v14436_v11  ;;  %v16335_v11 = vld [vmem:[%s16652_s26] ss:$0 sm:$0xff] }
0x168f   :  { %12715 = vmatprep.subr.bf16.mxu0 %v14437_v33 }
0x1691   :  { %12694 = vmatpush3.bf16.msra.mxu1 %v14438_v40  ;;  %v16338_v40 = vld [vmem:[%s16653_s28] ss:$0 sm:$0xff] }
0x1692   :  { %12716 = vmatpush3.bf16.msra.mxu0 %v14439_v21  ;;  %12695 = vmatprep.subr.bf16.mxu1 %v14440_v27 }
0x1693   :  { %12717 = vmatprep.subr.bf16.mxu0 %v14441_v30 }
0x1695   :  { %12696 = vmatpush3.bf16.msra.mxu1 %v14442_v47 }
0x1696   :  { %12718 = vmatpush3.bf16.msra.mxu0 %v14443_v38  ;;  %12697 = vmatprep.subr.bf16.mxu1 %v14444_v22  ;;  %v14448_v22 = vld [vmem:[%s16650_s18 + $0x40] sm:$0xff]  }
0x1697   :  { %12719 = vmatprep.subr.bf16.mxu0 %v14445_v35  ;;  %v14449_v35 = vld [vmem:[%s16651_s23 + $0x40] sm:$0xff]  }
0x1699   :  { %12698 = vmatpush3.bf16.msra.mxu1 %v14446_v53 }
0x169a   :  { %12720 = vmatpush3.bf16.msra.mxu0 %v14447_v44  ;;  %12963 = vmatprep.subr.bf16.mxu1 %v14657_v2 }
0x169b   :  { %12969 = vmatprep.subr.bf16.mxu0 %v14657_v2 }
0x169c   :  { %9323 = vmatmul.mubr.bf16.vlgmr.msra.gmra.mrb[52].mxu1 %v9124_v59  ;;  %v14450_v59 = vld [vmem:[%s16650_s18] sm:$0xff]  }
0x169d   :  { %9475 = vmatmul.mubr.bf16.vlgmr.msra.gmra.mrb[60].mxu0 %v9336_v7  ;;  %12965 = vmatprep.mubr.msk.bf16.mxu1 %vm14659_vm5, %v14657_v2  ;;  %v14451_v7 = vld [vmem:[%s16651_s23] sm:$0xff]  }
0x169e   :  { %12971 = vmatprep.mubr.msk.bf16.mxu0 %vm14659_vm5, %v14657_v2 }
0x174f   :  { %v9063_v8 = vpop.f32.mrb[48].mxu1  ;;  %v9107_v26 = vpop.f32.mrb[56].mxu0 }
0x1750   :  { %v9114_v57 = vrot.slane %v9063_v8, 7  ;;  %v9119_v29 = vrot.slane %v9107_v26, 7  ;;  %v12955_v60 = vpop.f32.mrb[49].mxu1  ;;  %v12961_v18 = vpop.f32.mrb[57].mxu0  ;;  %v14452_v26 = vld [vmem:[%s16650_s18 + $0x48] sm:$0xff]  }
0x1751   :  { %v9066_v17 = vpop.f32.mrb[50].mxu1  ;;  %v9110_v48 = vpop.f32.mrb[58].mxu0  ;;  %v14454_v60 = vld [vmem:[%s16650_s18 + $0x8] sm:$0xff]  }
0x1752   :  { %9117 = vst [vmem:[#allocation5 + $0x10] sm:$0x1e] %v9114_v57  ;;  %9121 = vst [vmem:[#allocation5 + $0x18] sm:$0x1e] %v9119_v29  ;;  %v12956_v16 = vpop.f32.mrb[51].mxu1  ;;  %v12962_v28 = vpop.f32.mrb[59].mxu0 }
0x1753   :  { %v14453_v57 = vld [vmem:[%s16651_s23 + $0x48] sm:$0xff]   ;;  %v14456_v17 = vld [vmem:[%s16650_s18 + $0x50] sm:$0xff]  }
0x1754   :  { %v14455_v18 = vld [vmem:[%s16651_s23 + $0x8] sm:$0xff]   ;;  %v14457_v48 = vld [vmem:[%s16651_s23 + $0x50] sm:$0xff]  }
0x1755   :  { %v14458_v16 = vld [vmem:[%s16650_s18 + $0x10] sm:$0xff]  }
0x1756   :  { %v14459_v28 = vld [vmem:[%s16651_s23 + $0x10] sm:$0xff]  }
0x1759   :  { %v9642_v33 = vld [vmem:[#allocation5 + $0x18] sm:$0x1e] }
0x175a   :  { %v9644_v27 = vpack.c.bf16 %v9642_v33, %v9642_v33  ;;  %v9638_v53 = vld [vmem:[#allocation5 + $0x18] sm:$0xf] }
0x175b   :  { %v9640_v8 = vpack.c.bf16 %v9638_v53, %v9638_v53 }
0x175c   :  { %v9855_v47 = vshll.u32 %v9644_v27, 16  ;;  %v9853_v44 = vshrl.u32 %v9644_v27, 16 }
0x175e   :  { %v9857_v55 = vrot.slane %v9855_v47, 1 }
0x1760   :  { %v9858_v29 = vor.u32 %v9857_v55, %v9853_v44 }
0x176f   :  { %v12699_v54 = vpop.f32.mrb[52].mxu1 }
0x1770   :  { %v12721_v1 = vpop.f32.mrb[60].mxu0  ;;  %v12700_v56 = vpop.f32.mrb[53].mxu1 }
0x1771   :  { %v12701_v15 = vadd.f32 %v12700_v56, %v12699_v54  ;;  %v12722_v51 = vpop.f32.mrb[61].mxu0  ;;  %v12702_v10 = vpop.f32.mrb[54].mxu1  ;;  %v14460_v54 = vld [vmem:[%s16650_s18 + $0x58] sm:$0xff]  }
0x1772   :  { %v12723_v58 = vadd.f32 %v12722_v51, %v12721_v1  ;;  %v12724_v0 = vpop.f32.mrb[62].mxu0  ;;  %v12703_v32 = vpop.f32.mrb[55].mxu1  ;;  %v14461_v1 = vld [vmem:[%s16651_s23 + $0x58] sm:$0xff]   ;;  %v14464_v51 = vld [vmem:[%s16650_s18 + $0x60] sm:$0xff]  }
0x1773   :  { %v12725_v34 = vpop.f32.mrb[63].mxu0  ;;  %v14462_v56 = vld [vmem:[%s16650_s18 + $0x18] sm:$0xff]   ;;  %v14465_v10 = vld [vmem:[%s16651_s23 + $0x60] sm:$0xff]   ;;  %v14468_v32 = vld [vmem:[%s16650_s18 + $0x68] sm:$0xff]  }
0x1774   :  { %v9477_v62 = vadd.f32 %v12723_v58, %v12701_v15  ;;  %v14463_v15 = vld [vmem:[%s16651_s23 + $0x18] sm:$0xff]   ;;  %v14466_v58 = vld [vmem:[%s16650_s18 + $0x20] sm:$0xff]   ;;  %v14469_v34 = vld [vmem:[%s16651_s23 + $0x68] sm:$0xff]  }
0x1775   :  { %v14467_v0 = vld [vmem:[%s16651_s23 + $0x20] sm:$0xff]  }
0x1776   :  { %v9482_v20 = vsel %vm8512_vm8, %v9477_v62, 0.0 }
0x1777   :  { %9483 = vadd.xlane.f32.xlu0 %v9482_v20  ;;  %v14470_v20 = vld [vmem:[%s16650_s18 + $0x28] sm:$0xff]  }
0x1804   :  { %v9484_v63 = vpop.xlane.xlu0 %9483 }
0x1805   :  { %v9485_v3 = vrot.slane %v9484_v63, 4 }
0x1807   :  { %v9486_v31 = vadd.f32 %v9485_v3, %v9484_v63  ;;  %v14471_v63 = vld [vmem:[%s16651_s23 + $0x28] sm:$0xff]   ;;  %v14472_v3 = vld [vmem:[%s16650_s18 + $0x70] sm:$0xff]  }
0x1809   :  { %v9487_v24 = vrot.slane %v9486_v31, 2 }
0x180b   :  { %v9488_v4 = vadd.f32 %v9487_v24, %v9486_v31  ;;  %v14473_v31 = vld [vmem:[%s16651_s23 + $0x70] sm:$0xff]  }
0x180d   :  { %v9489_v25 = vrot.slane %v9488_v4, 1 }
0x180f   :  { %v9490_v23 = vadd.f32 %v9489_v25, %v9488_v4  ;;  %v14474_v4 = vld [vmem:[%s16650_s18 + $0x30] sm:$0xff]  }
0x1810   :  { %v14475_v25 = vld [vmem:[%s16651_s23 + $0x30] sm:$0xff]  }
0x1811   :  { %13283 = vpush %v9490_v23  ;;  %v14476_v23 = vld [vmem:[%s16650_s18 + $0x78] sm:$0xff]  }
0x1842   :  { %s13284_s21 = spop %13283 }
0x1843   :  { %s9494_s4 = smul.f32 0.001953125, %s13284_s21 }
0x1845   :  { %v9495_v9 = vstv %s9494_s4 }
0x1846   :  { %v9496_v61 = vsub.f32 %v9477_v62, %v9495_v9  ;;  %v9641_v62 = vld [vmem:[#allocation5 + $0x10] sm:$0x1e]  ;;  %v14477_v9 = vld [vmem:[%s16651_s23 + $0x78] sm:$0xff]  }
0x1847   :  { %v9643_v24 = vpack.c.bf16 %v9641_v62, %v9641_v62 }
0x1848   :  { %v9497_v14 = vmul.f32 %v9496_v61, %v9496_v61 }
0x184a   :  { %v9498_v36 = vsel %vm8512_vm8, %v9497_v14, 0.0  ;;  %v14478_v14 = vld [vmem:[%s16650_s18 + $0x38] sm:$0xff]  }
0x184b   :  { %9499 = vadd.xlane.f32.xlu1 %v9498_v36  ;;  %v14479_v36 = vld [vmem:[%s16651_s23 + $0x38] sm:$0xff]  }
0x18d8   :  { %v9500_v19 = vpop.xlane.xlu1 %9499 }
0x18d9   :  { %v9501_v50 = vrot.slane %v9500_v19, 4 }
0x18db   :  { %v9502_v5 = vadd.f32 %v9501_v50, %v9500_v19  ;;  %v9637_v19 = vld [vmem:[#allocation5 + $0x10] sm:$0xf]  ;;  %v9846_v50 = vshrl.u32 %v9643_v24, 16 }
0x18dd   :  { %v9503_v41 = vrot.slane %v9502_v5, 2 }
0x18df   :  { %v9504_v13 = vadd.f32 %v9503_v41, %v9502_v5  ;;  %v9639_v41 = vpack.c.bf16 %v9637_v19, %v9637_v19 }
0x18e1   :  { %v9505_v12 = vrot.slane %v9504_v13, 1 }
0x18e3   :  { %v9506_v37 = vadd.f32 %v9505_v12, %v9504_v13 }
0x18e5   :  { %13285 = vpush %v9506_v37 }
0x1916   :  { %s13286_s1 = spop %13285 }
0x1917   :  { %s9510_s25 = smul.f32 0.001953125, %s13286_s1 }
0x1919   :  { %s9511_s29 = sadd.f32 1e-05, %s9510_s25 }
0x191b   :  { %v9512_v52 = vstv %s9511_s29 }
0x191c   :  { %14570 = vrsqrt.f32 %v9512_v52 }
0x1926   :  { %v14571_v39 = vpop.eup %14570 }
0x1927   :  { %13287 = vpush %v14571_v39 }
0x1958   :  { %s13288_s3 = spop %13287 }
0x1959   :  { %v9515_v42 = vstv %s13288_s3 }
0x195a   :  { %v9516_v43 = vmul.f32 %v9515_v42, %v9496_v61  ;;  %v9848_v61 = vshll.u32 %v9643_v24, 16 }
0x195c   :  { %v9524_v21 = vmul.f32 %v16335_v11, %v9516_v43  ;;  %v9850_v5 = vrot.slane %v9848_v61, 1  ;;  %v16396_v61 = vld [vmem:[%s16655_s11 + $0x40] sm:$0xff]  }
0x195e   :  { %v9532_v30 = vadd.f32 %v16338_v40, %v9524_v21  ;;  %v9851_v13 = vor.u32 %v9850_v5, %v9846_v50  ;;  %v12322_v5 = vld [vmem:[%s16654_s8 + $0x1] sm:$0x1] }
0x1960   :  { %v9533_v46 = vmax.f32 %v9532_v30, 0.0 }
0x1962   :  { %v9534_v38 = vpack.c.bf16 %v9533_v46, %v9533_v46 }
0x1964   :  { %v9542_v49 = vsel %vm9540_vm10, %v9534_v38, 0 }
0x1965   :  { %12964 = vmatpush3.bf16.msra.mxu1 %v9542_v49  ;;  %12970 = vmatpush3.bf16.msra.mxu0 %v9542_v49 }
0x1966   :  { %12731 = vmatprep.subr.bf16.mxu1 %v14448_v22  ;;  %12753 = vmatprep.subr.bf16.mxu0 %v14449_v35 }
0x1968   :  { %12966 = vmatmul.mubr.msk.bf16.vlgmr.msra.gmra.mrb[56].mxu1 %vm9536_vm11, %v9535_v45  ;;  %12972 = vmatmul.mubr.msk.bf16.vlgmr.msra.gmra.mrb[64].mxu0 %vm9536_vm11, %v12285_v6 }
0x1969   :  { %12732 = vmatpush3.bf16.msra.mxu1 %v14450_v59  ;;  %9837 = vmatprep.mubr.bf16.mxu1 %v9640_v8 }
0x196a   :  { %12754 = vmatpush3.bf16.msra.mxu0 %v14451_v7  ;;  %9989 = vmatprep.mubr.bf16.mxu0 %v9858_v29 }
0x196b   :  { %12733 = vmatprep.subr.bf16.mxu1 %v14452_v26  ;;  %12755 = vmatprep.subr.bf16.mxu0 %v14453_v57 }
0x196d   :  { %12734 = vmatpush3.bf16.msra.mxu1 %v14454_v60 }
0x196e   :  { %12756 = vmatpush3.bf16.msra.mxu0 %v14455_v18  ;;  %12735 = vmatprep.subr.bf16.mxu1 %v14456_v17 }
0x196f   :  { %12757 = vmatprep.subr.bf16.mxu0 %v14457_v48 }
0x1971   :  { %12736 = vmatpush3.bf16.msra.mxu1 %v14458_v16 }
0x1972   :  { %12758 = vmatpush3.bf16.msra.mxu0 %v14459_v28  ;;  %12737 = vmatprep.subr.bf16.mxu1 %v14460_v54 }
0x1973   :  { %12759 = vmatprep.subr.bf16.mxu0 %v14461_v1 }
0x1975   :  { %12738 = vmatpush3.bf16.msra.mxu1 %v14462_v56 }
0x1976   :  { %12760 = vmatpush3.bf16.msra.mxu0 %v14463_v15  ;;  %12739 = vmatprep.subr.bf16.mxu1 %v14464_v51 }
0x1977   :  { %12761 = vmatprep.subr.bf16.mxu0 %v14465_v10 }
0x1979   :  { %12740 = vmatpush3.bf16.msra.mxu1 %v14466_v58 }
0x197a   :  { %12762 = vmatpush3.bf16.msra.mxu0 %v14467_v0  ;;  %12741 = vmatprep.subr.bf16.mxu1 %v14468_v32 }
0x197b   :  { %12763 = vmatprep.subr.bf16.mxu0 %v14469_v34 }
0x197d   :  { %12742 = vmatpush3.bf16.msra.mxu1 %v14470_v20 }
0x197e   :  { %12764 = vmatpush3.bf16.msra.mxu0 %v14471_v63  ;;  %12743 = vmatprep.subr.bf16.mxu1 %v14472_v3 }
0x197f   :  { %12765 = vmatprep.subr.bf16.mxu0 %v14473_v31 }
0x1981   :  { %12744 = vmatpush3.bf16.msra.mxu1 %v14474_v4 }
0x1982   :  { %12766 = vmatpush3.bf16.msra.mxu0 %v14475_v25  ;;  %12745 = vmatprep.subr.bf16.mxu1 %v14476_v23 }
0x1983   :  { %12767 = vmatprep.subr.bf16.mxu0 %v14477_v9 }
0x1985   :  { %12746 = vmatpush3.bf16.msra.mxu1 %v14478_v14  ;;  %v16399_v14 = vld [vmem:[%s16656_s15 + $0x40] sm:$0xff]  }
0x1986   :  { %12768 = vmatpush3.bf16.msra.mxu0 %v14479_v36  ;;  %12975 = vmatprep.subr.bf16.mxu1 %v14657_v2 }
0x1987   :  { %12981 = vmatprep.subr.bf16.mxu0 %v14657_v2 }
0x1988   :  { %9838 = vmatmul.mubr.bf16.vlgmr.msra.gmra.mrb[60].mxu1 %v9639_v41  ;;  %v16407_v41 = vld [vmem:[%s16655_s11] sm:$0xff]  }
0x1989   :  { %9990 = vmatmul.mubr.bf16.vlgmr.msra.gmra.mrb[68].mxu0 %v9851_v13  ;;  %12977 = vmatprep.mubr.msk.bf16.mxu1 %vm14659_vm5, %v14657_v2  ;;  %v16412_v13 = vld [vmem:[%s16656_s15] sm:$0xff]  }
0x198a   :  { %12983 = vmatprep.mubr.msk.bf16.mxu0 %vm14659_vm5, %v14657_v2 }
0x1a3b   :  { %v9578_v12 = vpop.f32.mrb[56].mxu1  ;;  %v9623_v37 = vpop.f32.mrb[64].mxu0 }
0x1a3c   :  { %v9630_v52 = vrot.slane %v9578_v12, 7  ;;  %v9634_v39 = vrot.slane %v9623_v37, 7  ;;  %v12967_v42 = vpop.f32.mrb[57].mxu1  ;;  %v12973_v33 = vpop.f32.mrb[65].mxu0  ;;  %v16415_v37 = vld [vmem:[%s16655_s11 + $0x48] sm:$0xff]  }
0x1a3d   :  { %v9581_v43 = vpop.f32.mrb[58].mxu1  ;;  %v9626_v21 = vpop.f32.mrb[66].mxu0  ;;  %v16424_v42 = vld [vmem:[%s16655_s11 + $0x8] sm:$0xff]  }
0x1a3e   :  { %9632 = vst [vmem:[#allocation6] sm:$0x6] %v9630_v52  ;;  %9636 = vst [vmem:[#allocation6 + $0x4] sm:$0x6] %v9634_v39  ;;  %v12968_v27 = vpop.f32.mrb[59].mxu1  ;;  %v12974_v30 = vpop.f32.mrb[67].mxu0 }
0x1a3f   :  { %v16418_v52 = vld [vmem:[%s16656_s15 + $0x48] sm:$0xff]   ;;  %v16431_v43 = vld [vmem:[%s16655_s11 + $0x50] sm:$0xff]  }
0x1a40   :  { %v16428_v33 = vld [vmem:[%s16656_s15 + $0x8] sm:$0xff]   ;;  %v16436_v21 = vld [vmem:[%s16656_s15 + $0x50] sm:$0xff]  }
0x1a41   :  { %v16440_v27 = vld [vmem:[%s16655_s11 + $0x10] sm:$0xff]  }
0x1a42   :  { %v16445_v30 = vld [vmem:[%s16656_s15 + $0x10] sm:$0xff]  }
0x1a45   :  { %v16387_v34 = vld [vmem:[#allocation6] sm:$0x66] }
0x1a46   :  { %v10158_v62 = vcombine.high %v16387_v34, %v16387_v34  ;;  %v16393_v25 = vld [vmem:[#allocation6] sm:$0x33] }
0x1a48   :  { %v10161_v31 = vpack.c.bf16 %v10158_v62, %v10158_v62 }
0x1a4a   :  { %v10372_v23 = vshll.u32 %v10161_v31, 16  ;;  %v10370_v19 = vshrl.u32 %v10161_v31, 16 }
0x1a4c   :  { %v10374_v50 = vrot.slane %v10372_v23, 1 }
0x1a4e   :  { %v10375_v39 = vor.u32 %v10374_v50, %v10370_v19 }
0x1a5b   :  { %v12747_v46 = vpop.f32.mrb[60].mxu1 }
0x1a5c   :  { %v12769_v47 = vpop.f32.mrb[68].mxu0  ;;  %v12748_v38 = vpop.f32.mrb[61].mxu1 }
0x1a5d   :  { %v12749_v22 = vadd.f32 %v12748_v38, %v12747_v46  ;;  %v12770_v35 = vpop.f32.mrb[69].mxu0  ;;  %v12750_v49 = vpop.f32.mrb[62].mxu1  ;;  %v14494_v46 = vld [vmem:[%s16655_s11 + $0x58] sm:$0xff]  }
0x1a5e   :  { %v12771_v53 = vadd.f32 %v12770_v35, %v12769_v47  ;;  %v12772_v44 = vpop.f32.mrb[70].mxu0  ;;  %v12751_v55 = vpop.f32.mrb[63].mxu1  ;;  %v14495_v47 = vld [vmem:[%s16656_s15 + $0x58] sm:$0xff]   ;;  %v14498_v35 = vld [vmem:[%s16655_s11 + $0x60] sm:$0xff]  }
0x1a5f   :  { %v12773_v45 = vpop.f32.mrb[71].mxu0  ;;  %v14496_v38 = vld [vmem:[%s16655_s11 + $0x18] sm:$0xff]   ;;  %v14499_v49 = vld [vmem:[%s16656_s15 + $0x60] sm:$0xff]   ;;  %v14502_v55 = vld [vmem:[%s16655_s11 + $0x68] sm:$0xff]  }
0x1a60   :  { %v9992_v6 = vadd.f32 %v12771_v53, %v12749_v22  ;;  %v14497_v22 = vld [vmem:[%s16656_s15 + $0x18] sm:$0xff]   ;;  %v14500_v53 = vld [vmem:[%s16655_s11 + $0x20] sm:$0xff]   ;;  %v14503_v45 = vld [vmem:[%s16656_s15 + $0x68] sm:$0xff]  }
0x1a61   :  { %v14501_v44 = vld [vmem:[%s16656_s15 + $0x20] sm:$0xff]  }
0x1a62   :  { %v9997_v59 = vsel %vm8512_vm8, %v9992_v6, 0.0 }
0x1a63   :  { %9998 = vadd.xlane.f32.xlu0 %v9997_v59  ;;  %v14505_v59 = vld [vmem:[%s16656_s15 + $0x28] sm:$0xff]  }
0x1af0   :  { %v9999_v7 = vpop.xlane.xlu0 %9998 }
0x1af1   :  { %v10000_v8 = vrot.slane %v9999_v7, 4 }
0x1af3   :  { %v10001_v26 = vadd.f32 %v10000_v8, %v9999_v7  ;;  %v14506_v7 = vld [vmem:[%s16655_s11 + $0x70] sm:$0xff]   ;;  %v10160_v8 = vpack.c.bf16 %v16387_v34, %v16387_v34 }
0x1af5   :  { %v10002_v57 = vrot.slane %v10001_v26, 2 }
0x1af7   :  { %v10003_v29 = vadd.f32 %v10002_v57, %v10001_v26  ;;  %v14507_v26 = vld [vmem:[%s16656_s15 + $0x70] sm:$0xff]  }
0x1af8   :  { %v14508_v57 = vld [vmem:[%s16655_s11 + $0x30] sm:$0xff]  }
0x1af9   :  { %v10004_v60 = vrot.slane %v10003_v29, 1 }
0x1afb   :  { %v10005_v18 = vadd.f32 %v10004_v60, %v10003_v29  ;;  %v14509_v29 = vld [vmem:[%s16656_s15 + $0x30] sm:$0xff]   ;;  %v14510_v60 = vld [vmem:[%s16655_s11 + $0x78] sm:$0xff]  }
0x1afd   :  { %13289 = vpush %v10005_v18  ;;  %v14511_v18 = vld [vmem:[%s16656_s15 + $0x78] sm:$0xff]  }
0x1b2e   :  { %s13290_s2 = spop %13289 }
0x1b2f   :  { %s10009_s0 = smul.f32 0.001953125, %s13290_s2 }
0x1b31   :  { %v10010_v17 = vstv %s10009_s0  ;;  %s16661_s0 = sld [smem:[#allocation24_spill]] }
0x1b32   :  { %v10011_v48 = vsub.f32 %v9992_v6, %v10010_v17  ;;  %v14504_v6 = vld [vmem:[%s16655_s11 + $0x28] sm:$0xff]   ;;  %v10365_v17 = vshll.u32 %v10160_v8, 16 }
0x1b34   :  { %v10012_v16 = vmul.f32 %v10011_v48, %v10011_v48 }
0x1b36   :  { %v10013_v28 = vsel %vm8512_vm8, %v10012_v16, 0.0  ;;  %v14513_v16 = vld [vmem:[%s16656_s15 + $0x38] sm:$0xff]  }
0x1b37   :  { %10014 = vadd.xlane.f32.xlu1 %v10013_v28  ;;  %v10363_v28 = vshrl.u32 %v10160_v8, 16 }
0x1bc4   :  { %v10015_v54 = vpop.xlane.xlu1 %10014 }
0x1bc5   :  { %v10016_v1 = vrot.slane %v10015_v54, 4 }
0x1bc7   :  { %v10017_v56 = vadd.f32 %v10016_v1, %v10015_v54  ;;  %v10367_v54 = vrot.slane %v10365_v17, 1  ;;  %v10154_v1 = vpack.c.bf16 %v16393_v25, %v16393_v25 }
0x1bc9   :  { %v10018_v15 = vrot.slane %v10017_v56, 2 }
0x1bcb   :  { %v10019_v51 = vadd.f32 %v10018_v15, %v10017_v56  ;;  %v10368_v56 = vor.u32 %v10367_v54, %v10363_v28 }
0x1bcd   :  { %v10020_v10 = vrot.slane %v10019_v51, 1 }
0x1bcf   :  { %v10021_v58 = vadd.f32 %v10020_v10, %v10019_v51 }
0x1bd1   :  { %13291 = vpush %v10021_v58 }
0x1c02   :  { %s13292_s12 = spop %13291 }
0x1c03   :  { %s10025_s7 = smul.f32 0.001953125, %s13292_s12 }
0x1c05   :  { %s10026_s10 = sadd.f32 1e-05, %s10025_s7  ;;  %s16662_s7 = sld [smem:[#allocation25_spill]] }
0x1c07   :  { %v10027_v0 = vstv %s10026_s10 }
0x1c08   :  { %14572 = vrsqrt.f32 %v10027_v0 }
0x1c12   :  { %v14573_v32 = vpop.eup %14572 }
0x1c13   :  { %13293 = vpush %v14573_v32 }
0x1c44   :  { %s13294_s16 = spop %13293 }
0x1c45   :  { %v10030_v20 = vstv %s13294_s16 }
0x1c46   :  { %v10031_v63 = vmul.f32 %v10030_v20, %v10011_v48  ;;  %v14512_v48 = vld [vmem:[%s16655_s11 + $0x38] sm:$0xff]   ;;  %s16663_s11 = sld [smem:[#allocation26_spill]] }
0x1c48   :  { %v10039_v3 = vmul.f32 %v16335_v11, %v10031_v63  ;;  %v10152_v11 = vcombine.high %v16393_v25, %v16393_v25 }
0x1c4a   :  { %v10047_v24 = vadd.f32 %v16338_v40, %v10039_v3  ;;  %v10050_v40 = vld [vmem:[%s16654_s8] sm:$0x1]  ;;  %v10155_v12 = vpack.c.bf16 %v10152_v11, %v10152_v11 }
0x1c4c   :  { %v10048_v4 = vmax.f32 %v10047_v24, 0.0 }
0x1c4e   :  { %v10049_v9 = vpack.c.bf16 %v10048_v4, %v10048_v4 }
0x1c50   :  { %v10055_v36 = vsel %vm9540_vm10, %v10049_v9, 0 }
0x1c51   :  { %12976 = vmatpush3.bf16.msra.mxu1 %v10055_v36  ;;  %12982 = vmatpush3.bf16.msra.mxu0 %v10055_v36 }
0x1c52   :  { %12779 = vmatprep.subr.bf16.mxu1 %v16396_v61  ;;  %12801 = vmatprep.subr.bf16.mxu0 %v16399_v14 }
0x1c54   :  { %12978 = vmatmul.mubr.msk.bf16.vlgmr.msra.gmra.mrb[64].mxu1 %vm9536_vm11, %v10050_v40  ;;  %12984 = vmatmul.mubr.msk.bf16.vlgmr.msra.gmra.mrb[72].mxu0 %vm9536_vm11, %v12322_v5 }
0x1c55   :  { %12780 = vmatpush3.bf16.msra.mxu1 %v16407_v41  ;;  %10354 = vmatprep.mubr.bf16.mxu1 %v10155_v12 }
0x1c56   :  { %12802 = vmatpush3.bf16.msra.mxu0 %v16412_v13  ;;  %10506 = vmatprep.mubr.bf16.mxu0 %v10375_v39 }
0x1c57   :  { %12781 = vmatprep.subr.bf16.mxu1 %v16415_v37  ;;  %12803 = vmatprep.subr.bf16.mxu0 %v16418_v52 }
0x1c59   :  { %12782 = vmatpush3.bf16.msra.mxu1 %v16424_v42 }
0x1c5a   :  { %12804 = vmatpush3.bf16.msra.mxu0 %v16428_v33  ;;  %12783 = vmatprep.subr.bf16.mxu1 %v16431_v43 }
0x1c5b   :  { %12805 = vmatprep.subr.bf16.mxu0 %v16436_v21 }
0x1c5d   :  { %12784 = vmatpush3.bf16.msra.mxu1 %v16440_v27 }
0x1c5e   :  { %12806 = vmatpush3.bf16.msra.mxu0 %v16445_v30  ;;  %12785 = vmatprep.subr.bf16.mxu1 %v14494_v46 }
0x1c5f   :  { %12807 = vmatprep.subr.bf16.mxu0 %v14495_v47 }
0x1c61   :  { %12786 = vmatpush3.bf16.msra.mxu1 %v14496_v38 }
0x1c62   :  { %12808 = vmatpush3.bf16.msra.mxu0 %v14497_v22  ;;  %12787 = vmatprep.subr.bf16.mxu1 %v14498_v35 }
0x1c63   :  { %12809 = vmatprep.subr.bf16.mxu0 %v14499_v49 }
0x1c65   :  { %12788 = vmatpush3.bf16.msra.mxu1 %v14500_v53 }
0x1c66   :  { %12810 = vmatpush3.bf16.msra.mxu0 %v14501_v44  ;;  %12789 = vmatprep.subr.bf16.mxu1 %v14502_v55 }
0x1c67   :  { %12811 = vmatprep.subr.bf16.mxu0 %v14503_v45 }
0x1c69   :  { %12790 = vmatpush3.bf16.msra.mxu1 %v14504_v6 }
0x1c6a   :  { %12812 = vmatpush3.bf16.msra.mxu0 %v14505_v59  ;;  %12791 = vmatprep.subr.bf16.mxu1 %v14506_v7 }
0x1c6b   :  { %12813 = vmatprep.subr.bf16.mxu0 %v14507_v26 }
0x1c6d   :  { %12792 = vmatpush3.bf16.msra.mxu1 %v14508_v57 }
0x1c6e   :  { %12814 = vmatpush3.bf16.msra.mxu0 %v14509_v29  ;;  %12793 = vmatprep.subr.bf16.mxu1 %v14510_v60 }
0x1c6f   :  { %12815 = vmatprep.subr.bf16.mxu0 %v14511_v18 }
0x1c71   :  { %12794 = vmatpush3.bf16.msra.mxu1 %v14512_v48 }
0x1c72   :  { %12816 = vmatpush3.bf16.msra.mxu0 %v14513_v16  ;;  %12823 = vmatprep.subr.bf16.mxu1 %v16396_v61 }
0x1c73   :  { %12845 = vmatprep.subr.bf16.mxu0 %v16399_v14 }
0x1c74   :  { %10355 = vmatmul.mubr.bf16.vlgmr.msra.gmra.mrb[68].mxu1 %v10154_v1  ;;  %v14516_v1 = vld [vmem:[%s16657_s5] sm:$0xff]  }
0x1c75   :  { %10507 = vmatmul.mubr.bf16.vlgmr.msra.gmra.mrb[76].mxu0 %v10368_v56  ;;  %12824 = vmatpush3.bf16.msra.mxu1 %v16407_v41  ;;  %v14517_v56 = vld [vmem:[%s16657_s5 + $0x8] sm:$0xff]  }
0x1c76   :  { %12825 = vmatprep.subr.bf16.mxu1 %v16415_v37  ;;  %12846 = vmatpush3.bf16.msra.mxu0 %v16412_v13 }
0x1c77   :  { %12847 = vmatprep.subr.bf16.mxu0 %v16418_v52 }
0x1c79   :  { %12826 = vmatpush3.bf16.msra.mxu1 %v16424_v42 }
0x1c7a   :  { %12827 = vmatprep.subr.bf16.mxu1 %v16431_v43  ;;  %12848 = vmatpush3.bf16.msra.mxu0 %v16428_v33 }
0x1c7b   :  { %12849 = vmatprep.subr.bf16.mxu0 %v16436_v21 }
0x1c7d   :  { %12828 = vmatpush3.bf16.msra.mxu1 %v16440_v27 }
0x1c7e   :  { %12829 = vmatprep.subr.bf16.mxu1 %v14494_v46  ;;  %12850 = vmatpush3.bf16.msra.mxu0 %v16445_v30 }
0x1c7f   :  { %12851 = vmatprep.subr.bf16.mxu0 %v14495_v47 }
0x1c81   :  { %12830 = vmatpush3.bf16.msra.mxu1 %v14496_v38 }
0x1c82   :  { %12831 = vmatprep.subr.bf16.mxu1 %v14498_v35  ;;  %12852 = vmatpush3.bf16.msra.mxu0 %v14497_v22 }
0x1c83   :  { %12853 = vmatprep.subr.bf16.mxu0 %v14499_v49 }
0x1c85   :  { %12832 = vmatpush3.bf16.msra.mxu1 %v14500_v53 }
0x1c86   :  { %12833 = vmatprep.subr.bf16.mxu1 %v14502_v55  ;;  %12854 = vmatpush3.bf16.msra.mxu0 %v14501_v44 }
0x1c87   :  { %12855 = vmatprep.subr.bf16.mxu0 %v14503_v45 }
0x1c89   :  { %12834 = vmatpush3.bf16.msra.mxu1 %v14504_v6 }
0x1c8a   :  { %12835 = vmatprep.subr.bf16.mxu1 %v14506_v7  ;;  %12856 = vmatpush3.bf16.msra.mxu0 %v14505_v59 }
0x1c8b   :  { %12857 = vmatprep.subr.bf16.mxu0 %v14507_v26 }
0x1c8d   :  { %12836 = vmatpush3.bf16.msra.mxu1 %v14508_v57 }
0x1c8e   :  { %12837 = vmatprep.subr.bf16.mxu1 %v14510_v60  ;;  %12858 = vmatpush3.bf16.msra.mxu0 %v14509_v29 }
0x1c8f   :  { %12859 = vmatprep.subr.bf16.mxu0 %v14511_v18 }
0x1c91   :  { %12838 = vmatpush3.bf16.msra.mxu1 %v14512_v48 }
0x1c92   :  { %12860 = vmatpush3.bf16.msra.mxu0 %v14513_v16  ;;  %12987 = vmatprep.subr.bf16.mxu1 %v14657_v2 }
0x1c93   :  { %13027 = vmatprep.subr.bf16.mxu0 %v14657_v2 }
0x1d27   :  { %v10091_v15 = vpop.f32.mrb[64].mxu1  ;;  %v10135_v51 = vpop.f32.mrb[72].mxu0 }
0x1d28   :  { %v10142_v10 = vrot.slane %v10091_v15, 7  ;;  %v10147_v58 = vrot.slane %v10135_v51, 7  ;;  %v12979_v0 = vpop.f32.mrb[65].mxu1  ;;  %v12985_v32 = vpop.f32.mrb[73].mxu0  ;;  %v14518_v15 = vld [vmem:[%s16657_s5 + $0x10] sm:$0xff]   ;;  %v14519_v51 = vld [vmem:[%s16657_s5 + $0x18] sm:$0xff]  }
0x1d29   :  { %v10094_v34 = vpop.f32.mrb[66].mxu1  ;;  %v10138_v62 = vpop.f32.mrb[74].mxu0  ;;  %v14521_v32 = vld [vmem:[%s16657_s5 + $0x28] sm:$0xff]  }
0x1d2a   :  { %10145 = vst [vmem:[#allocation6 + $0x8] sm:$0x6] %v10142_v10  ;;  %10149 = vst [vmem:[#allocation6 + $0xc] sm:$0x6] %v10147_v58  ;;  %v12980_v20 = vpop.f32.mrb[67].mxu1  ;;  %v12986_v63 = vpop.f32.mrb[75].mxu0 }
0x1d2b   :  { %v14520_v10 = vld [vmem:[%s16657_s5 + $0x20] sm:$0xff]   ;;  %v14522_v20 = vld [vmem:[%s16657_s5 + $0x30] sm:$0xff]  }
0x1d31   :  { %v10566_v3 = vld [vmem:[#allocation6 + $0x8] sm:$0x33] }
0x1d32   :  { %v10572_v31 = vld [vmem:[#allocation6 + $0x8] sm:$0x66]  ;;  %v10568_v24 = vcombine.high %v10566_v3, %v10566_v3  ;;  %v10570_v14 = vpack.c.bf16 %v10566_v3, %v10566_v3 }
0x1d33   :  { %v10574_v4 = vcombine.high %v10572_v31, %v10572_v31  ;;  %v10576_v25 = vpack.c.bf16 %v10572_v31, %v10572_v31  ;;  %v14523_v31 = vld [vmem:[%s16657_s5 + $0x38] sm:$0xff]  }
0x1d34   :  { %v10571_v23 = vpack.c.bf16 %v10568_v24, %v10568_v24 }
0x1d35   :  { %v10577_v9 = vpack.c.bf16 %v10574_v4, %v10574_v4  ;;  %v10621_v61 = vshll.u32 %v10576_v25, 16  ;;  %v10619_v19 = vshrl.u32 %v10576_v25, 16 }
0x1d36   :  { %10610 = vmatprep.mubr.bf16.mxu1 %v10571_v23 }
0x1d37   :  { %v10626_v11 = vshrl.u32 %v10577_v9, 16  ;;  %v10628_v36 = vshll.u32 %v10577_v9, 16  ;;  %10611 = vmatmul.mubr.bf16.vlgmr.msra.gmra.mrb[72].mxu1 %v10570_v14  ;;  %v10623_v50 = vrot.slane %v10621_v61, 1 }
0x1d38   :  { %13003 = vmatprep.mubr.msk.bf16.mxu1 %vm14659_vm5, %v14657_v2  ;;  %12988 = vmatpush3.bf16.msra.mxu1 %v14516_v1 }
0x1d39   :  { %v10630_v40 = vrot.slane %v10628_v36, 1  ;;  %v10624_v41 = vor.u32 %v10623_v50, %v10619_v19  ;;  %12989 = vmatprep.subr.bf16.mxu1 %v14657_v2 }
0x1d3b   :  { %v10631_v5 = vor.u32 %v10630_v40, %v10626_v11  ;;  %v16515_v40 = vld [vmem:[%s16658_s19] ss:$0 sm:$0xff] }
0x1d3c   :  { %12990 = vmatpush3.bf16.msra.mxu1 %v14517_v56 }
0x1d3d   :  { %10666 = vmatprep.mubr.bf16.mxu0 %v10631_v5  ;;  %12991 = vmatprep.subr.bf16.mxu1 %v14657_v2 }
0x1d3e   :  { %10667 = vmatmul.mubr.bf16.vlgmr.msra.gmra.mrb[80].mxu0 %v10624_v41  ;;  %v16518_v41 = vld [vmem:[%s16659_s22] ss:$0 sm:$0xff] }
0x1d3f   :  { %13043 = vmatprep.mubr.msk.bf16.mxu0 %vm14659_vm5, %v14657_v2 }
0x1d40   :  { %12992 = vmatpush3.bf16.msra.mxu1 %v14518_v15 }
0x1d41   :  { %12993 = vmatprep.subr.bf16.mxu1 %v14657_v2 }
0x1d44   :  { %12994 = vmatpush3.bf16.msra.mxu1 %v14519_v51 }
0x1d45   :  { %12995 = vmatprep.subr.bf16.mxu1 %v14657_v2 }
0x1d47   :  { %v12795_v13 = vpop.f32.mrb[68].mxu1 }
0x1d48   :  { %v12817_v12 = vpop.f32.mrb[76].mxu0  ;;  %v12796_v37 = vpop.f32.mrb[69].mxu1  ;;  %12996 = vmatpush3.bf16.msra.mxu1 %v14520_v10 }
0x1d49   :  { %v12797_v52 = vadd.f32 %v12796_v37, %v12795_v13  ;;  %v12818_v39 = vpop.f32.mrb[77].mxu0  ;;  %v12798_v42 = vpop.f32.mrb[70].mxu1  ;;  %12997 = vmatprep.subr.bf16.mxu1 %v14657_v2 }
0x1d4a   :  { %v12819_v33 = vadd.f32 %v12818_v39, %v12817_v12  ;;  %v12820_v43 = vpop.f32.mrb[78].mxu0  ;;  %v12799_v21 = vpop.f32.mrb[71].mxu1 }
0x1d4b   :  { %v12821_v27 = vpop.f32.mrb[79].mxu0  ;;  %v14524_v21 = vld [vmem:[%s16660_s17] sm:$0xff]  }
0x1d4c   :  { %v10509_v30 = vadd.f32 %v12819_v33, %v12797_v52  ;;  %12998 = vmatpush3.bf16.msra.mxu1 %v14521_v32 }
0x1d4d   :  { %12999 = vmatprep.subr.bf16.mxu1 %v14657_v2 }
0x1d4e   :  { %v10514_v46 = vsel %vm9540_vm10, %v10509_v30, 0.0 }
0x1d4f   :  { %10515 = vadd.xlane.f32.xlu0 %v10514_v46  ;;  %v14526_v46 = vld [vmem:[%s16660_s17 + $0x10] sm:$0xff]  }
0x1d50   :  { %13000 = vmatpush3.bf16.msra.mxu1 %v14522_v20  ;;  %v14540_v20 = vld [vmem:[%s16660_s17] sm:$0xff]  }
0x1d51   :  { %13001 = vmatprep.subr.bf16.mxu1 %v14657_v2 }
0x1d54   :  { %13002 = vmatpush3.bf16.msra.mxu1 %v14523_v31  ;;  %v14542_v31 = vld [vmem:[%s16660_s17 + $0x10] sm:$0xff]  }
0x1d55   :  { %13007 = vmatprep.subr.bf16.mxu1 %v14657_v2 }
0x1ddc   :  { %v10516_v47 = vpop.xlane.xlu0 %10515 }
0x1ddd   :  { %v10517_v38 = vrot.slane %v10516_v47, 4 }
0x1ddf   :  { %v10518_v22 = vadd.f32 %v10517_v38, %v10516_v47  ;;  %v14527_v47 = vld [vmem:[%s16660_s17 + $0x18] sm:$0xff]   ;;  %v14528_v38 = vld [vmem:[%s16660_s17 + $0x20] sm:$0xff]  }
0x1de1   :  { %v10519_v35 = vrot.slane %v10518_v22, 2 }
0x1de3   :  { %v10520_v49 = vadd.f32 %v10519_v35, %v10518_v22  ;;  %v14529_v22 = vld [vmem:[%s16660_s17 + $0x28] sm:$0xff]   ;;  %v14530_v35 = vld [vmem:[%s16660_s17 + $0x30] sm:$0xff]  }
0x1de5   :  { %v10521_v53 = vrot.slane %v10520_v49, 1 }
0x1de7   :  { %v10522_v44 = vadd.f32 %v10521_v53, %v10520_v49  ;;  %v14531_v49 = vld [vmem:[%s16660_s17 + $0x38] sm:$0xff]   ;;  %v14532_v53 = vld [vmem:[%s16657_s5] sm:$0xff]  }
0x1de8   :  { %13028 = vmatpush3.bf16.msra.mxu0 %v14532_v53 }
0x1de9   :  { %13295 = vpush %v10522_v44  ;;  %v14533_v44 = vld [vmem:[%s16657_s5 + $0x8] sm:$0xff]   ;;  %13029 = vmatprep.subr.bf16.mxu0 %v14657_v2 }
0x1dec   :  { %13030 = vmatpush3.bf16.msra.mxu0 %v14533_v44 }
0x1ded   :  { %13031 = vmatprep.subr.bf16.mxu0 %v14657_v2 }
0x1e0a   :  { %v12839_v55 = vpop.f32.mrb[72].mxu1 }
0x1e0b   :  { %v12840_v45 = vpop.f32.mrb[73].mxu1 }
0x1e0c   :  { %v12841_v6 = vadd.f32 %v12840_v45, %v12839_v55  ;;  %v12842_v59 = vpop.f32.mrb[74].mxu1  ;;  %v14534_v55 = vld [vmem:[%s16657_s5 + $0x10] sm:$0xff]   ;;  %v14535_v45 = vld [vmem:[%s16657_s5 + $0x18] sm:$0xff]  }
0x1e0d   :  { %v12843_v7 = vpop.f32.mrb[75].mxu1  ;;  %13032 = vmatpush3.bf16.msra.mxu0 %v14534_v55 }
0x1e0e   :  { %13033 = vmatprep.subr.bf16.mxu0 %v14657_v2  ;;  %v14537_v7 = vld [vmem:[%s16657_s5 + $0x28] sm:$0xff]  }
0x1e11   :  { %v12861_v8 = vpop.f32.mrb[80].mxu0  ;;  %13034 = vmatpush3.bf16.msra.mxu0 %v14535_v45 }
0x1e12   :  { %v12862_v26 = vpop.f32.mrb[81].mxu0  ;;  %13035 = vmatprep.subr.bf16.mxu0 %v14657_v2 }
0x1e13   :  { %v12863_v57 = vadd.f32 %v12862_v26, %v12861_v8  ;;  %v12864_v29 = vpop.f32.mrb[82].mxu0 }
0x1e14   :  { %v12865_v60 = vpop.f32.mrb[83].mxu0 }
0x1e15   :  { %v16493_v18 = vadd.f32 %v12863_v57, %v12841_v6  ;;  %v14536_v6 = vld [vmem:[%s16657_s5 + $0x20] sm:$0xff]   ;;  %v14538_v57 = vld [vmem:[%s16657_s5 + $0x30] sm:$0xff]  }
0x1e16   :  { %13036 = vmatpush3.bf16.msra.mxu0 %v14536_v6 }
0x1e17   :  { %v10674_v17 = vsel %vm9540_vm10, %v16493_v18, 0.0  ;;  %13037 = vmatprep.subr.bf16.mxu0 %v14657_v2 }
0x1e18   :  { %10675 = vadd.xlane.f32.xlu0 %v10674_v17 }
0x1e1a   :  { %s13296_s9 = spop %13295  ;;  %13038 = vmatpush3.bf16.msra.mxu0 %v14537_v7 }
0x1e1b   :  { %s10526_s14 = smul.f32 0.00390625, %s13296_s9  ;;  %13039 = vmatprep.subr.bf16.mxu0 %v14657_v2 }
0x1e1d   :  { %v10527_v48 = vstv %s10526_s14 }
0x1e1e   :  { %v10528_v16 = vsub.f32 %v10509_v30, %v10527_v48  ;;  %v14525_v30 = vld [vmem:[%s16660_s17 + $0x8] sm:$0xff]   ;;  %13040 = vmatpush3.bf16.msra.mxu0 %v14538_v57  ;;  %v10962_v57 = vld [vmem:[%s16662_s7] sm:$0x1] }
0x1e1f   :  { %13041 = vmatprep.subr.bf16.mxu0 %v14657_v2 }
0x1e20   :  { %v10529_v28 = vmul.f32 %v10528_v16, %v10528_v16 }
0x1e22   :  { %v10530_v54 = vsel %vm9540_vm10, %v10529_v28, 0.0 }
0x1e23   :  { %10531 = vadd.xlane.f32.xlu1 %v10530_v54 }
0x1ea5   :  { %v10676_v4 = vpop.xlane.xlu0 %10675 }
0x1ea6   :  { %v10677_v25 = vrot.slane %v10676_v4, 4 }
0x1ea8   :  { %v10678_v23 = vadd.f32 %v10677_v25, %v10676_v4  ;;  %v14544_v4 = vld [vmem:[%s16660_s17 + $0x20] sm:$0xff]   ;;  %v14545_v25 = vld [vmem:[%s16660_s17 + $0x28] sm:$0xff]  }
0x1eaa   :  { %v10679_v9 = vrot.slane %v10678_v23, 2 }
0x1eac   :  { %v10680_v14 = vadd.f32 %v10679_v9, %v10678_v23  ;;  %v14546_v23 = vld [vmem:[%s16660_s17 + $0x30] sm:$0xff]   ;;  %v14547_v9 = vld [vmem:[%s16660_s17 + $0x38] sm:$0xff]  }
0x1eae   :  { %v10681_v11 = vrot.slane %v10680_v14, 1 }
0x1eb0   :  { %v10532_v58 = vpop.xlane.xlu1 %10531  ;;  %v10682_v19 = vadd.f32 %v10681_v11, %v10680_v14 }
0x1eb1   :  { %v10533_v0 = vrot.slane %v10532_v58, 4 }
0x1eb3   :  { %v10534_v34 = vadd.f32 %v10533_v0, %v10532_v58 }
0x1eb5   :  { %v10535_v62 = vrot.slane %v10534_v34, 2 }
0x1eb7   :  { %v10536_v63 = vadd.f32 %v10535_v62, %v10534_v34 }
0x1eb9   :  { %v10537_v3 = vrot.slane %v10536_v63, 1 }
0x1ebb   :  { %v10538_v24 = vadd.f32 %v10537_v3, %v10536_v63  ;;  %v14541_v3 = vld [vmem:[%s16660_s17 + $0x8] sm:$0xff]  }
0x1ebd   :  { %13297 = vpush %v10538_v24  ;;  %v14543_v24 = vld [vmem:[%s16660_s17 + $0x18] sm:$0xff]  }
0x1eee   :  { %s13298_s24 = spop %13297 }
0x1eef   :  { %s10542_s13 = smul.f32 0.00390625, %s13298_s24  ;;  %s14660_s24 = smov [#allocation8]  }
0x1ef1   :  { %s10543_s18 = sadd.f32 1e-05, %s10542_s13  ;;  %s11409_s13 = sshll.u32 %s14660_s24, 4  ;;  %s11410_s13 = int_to_ptr.vmem [resolvable:$true] %s11409_s13 }
0x1ef2   :  { %p14605_p1 = scmp.lt.s32.totalorder %s11410_s13, %s11410_s13 }
0x1ef3   :  { %v10544_v61 = vstv %s10543_s18 }
0x1ef4   :  { %14574 = vrsqrt.f32 %v10544_v61 }
0x1efe   :  { %v14575_v36 = vpop.eup %14574 }
0x1eff   :  { %13299 = vpush %v14575_v36 }
0x1f00   :  { %13301 = vpush %v10682_v19 }
0x1f30   :  { %s13300_s23 = spop %13299 }
0x1f31   :  { %v10547_v50 = vstv %s13300_s23  ;;  %s13302_s21 = spop %13301 }
0x1f32   :  { %v10548_v5 = vmul.f32 %v10547_v50, %v10528_v16  ;;  %s10686_s4 = smul.f32 0.00390625, %s13302_s21 }
0x1f34   :  { %v10556_v13 = vmul.f32 %v16515_v40, %v10548_v5  ;;  %v10687_v12 = vstv %s10686_s4 }
0x1f35   :  { %v16522_v37 = vsub.f32 %v16493_v18, %v10687_v12  ;;  %v14539_v18 = vld [vmem:[%s16657_s5 + $0x38] sm:$0xff]  }
0x1f36   :  { %v10564_v52 = vadd.f32 %v16518_v41, %v10556_v13  ;;  %13042 = vmatpush3.bf16.msra.mxu0 %v14539_v18 }
0x1f37   :  { %v10689_v39 = vmul.f32 %v16522_v37, %v16522_v37  ;;  %13047 = vmatprep.subr.bf16.mxu0 %v14657_v2 }
0x1f38   :  { %v10565_v42 = vmax.f32 %v10564_v52, 0.0 }
0x1f39   :  { %v10690_v33 = vsel %vm9540_vm10, %v10689_v39, 0.0 }
0x1f3a   :  { %v10712_v43 = vpack.c.bf16 %v10565_v42, %v10565_v42  ;;  %10691 = vadd.xlane.f32.xlu1 %v10690_v33 }
0x1f3c   :  { %v10746_v27 = vshrl.u32 %v10712_v43, 16 }
0x1f3e   :  { %13004 = vmatmul.mubr.bf16.vlgmr.msra.gmra.mrb[76].mxu1 %v10746_v27 }
0x1f3f   :  { %13008 = vmatpush3.bf16.msra.mxu1 %v14524_v21  ;;  %13023 = vmatprep.mubr.msk.bf16.mxu1 %vm14659_vm5, %v14657_v2 }
0x1f40   :  { %13009 = vmatprep.subr.bf16.mxu1 %v14657_v2 }
0x1f43   :  { %13010 = vmatpush3.bf16.msra.mxu1 %v14525_v30 }
0x1f44   :  { %13011 = vmatprep.subr.bf16.mxu1 %v14657_v2 }
0x1f47   :  { %13012 = vmatpush3.bf16.msra.mxu1 %v14526_v46 }
0x1f48   :  { %13013 = vmatprep.subr.bf16.mxu1 %v14657_v2 }
0x1f4b   :  { %13014 = vmatpush3.bf16.msra.mxu1 %v14527_v47 }
0x1f4c   :  { %13015 = vmatprep.subr.bf16.mxu1 %v14657_v2 }
0x1f4f   :  { %13016 = vmatpush3.bf16.msra.mxu1 %v14528_v38 }
0x1f50   :  { %13017 = vmatprep.subr.bf16.mxu1 %v14657_v2 }
0x1f53   :  { %13018 = vmatpush3.bf16.msra.mxu1 %v14529_v22 }
0x1f54   :  { %13019 = vmatprep.subr.bf16.mxu1 %v14657_v2 }
0x1f57   :  { %13020 = vmatpush3.bf16.msra.mxu1 %v14530_v35 }
0x1f58   :  { %13021 = vmatprep.subr.bf16.mxu1 %v14657_v2 }
0x1f5b   :  { %13022 = vmatpush3.bf16.msra.mxu1 %v14531_v49 }
0x1f5c   :  { %13067 = vmatprep.subr.bf16.mxu1 %v14657_v2 }
0x1f5e   :  { %13024 = vmatmul.mubr.bf16.vlgmr.msra.gmra.mrb[76].mxu1 %v10712_v43 }
0x1f5f   :  { %13083 = vmatprep.mubr.msk.bf16.mxu1 %vm14659_vm5, %v14657_v2 }
0x1fc7   :  { %v10692_v59 = vpop.xlane.xlu1 %10691 }
0x1fc8   :  { %v10693_v8 = vrot.slane %v10692_v59, 4 }
0x1fca   :  { %v10694_v26 = vadd.f32 %v10693_v8, %v10692_v59  ;;  %v10960_v8 = vld [vmem:[%s16661_s0] sm:$0x1] }
0x1fcc   :  { %v10695_v29 = vrot.slane %v10694_v26, 2 }
0x1fce   :  { %v10696_v60 = vadd.f32 %v10695_v29, %v10694_v26 }
0x1fd0   :  { %v10697_v17 = vrot.slane %v10696_v60, 1 }
0x1fd2   :  { %v10698_v48 = vadd.f32 %v10697_v17, %v10696_v60 }
0x1fd4   :  { %13303 = vpush %v10698_v48 }
0x2005   :  { %s13304_s26 = spop %13303 }
0x2006   :  { %s10702_s28 = smul.f32 0.00390625, %s13304_s26 }
0x2008   :  { %s10703_s1 = sadd.f32 1e-05, %s10702_s28 }
0x200a   :  { %v10704_v16 = vstv %s10703_s1 }
0x200b   :  { %14576 = vrsqrt.f32 %v10704_v16 }
0x2015   :  { %v14577_v28 = vpop.eup %14576 }
0x2016   :  { %13305 = vpush %v14577_v28 }
0x2031   :  { %v10919_v54 = vpop.f32.mrb[76].mxu1 }
0x2032   :  { %v13025_v1 = vpop.f32.mrb[77].mxu1  ;;  %v10925_v56 = vsel %vm321_vm0, %v10919_v54, 0.0 }
0x2033   :  { %10926 = vadd.xlane.f32.xlu0 %v10925_v56  ;;  %v10922_v15 = vpop.f32.mrb[78].mxu1  ;;  %v14549_v1 = vld [vmem:[%s16663_s11 + $0x8] sm:$0xff]   ;;  %v14550_v56 = vld [vmem:[%s16663_s11 + $0x10] sm:$0xff]  }
0x2034   :  { %v13026_v51 = vpop.f32.mrb[79].mxu1  ;;  %v14551_v15 = vld [vmem:[%s16663_s11 + $0x18] sm:$0xff]  }
0x2047   :  { %s13306_s25 = spop %13305 }
0x2048   :  { %v10707_v10 = vstv %s13306_s25 }
0x2049   :  { %v10708_v58 = vmul.f32 %v10707_v10, %v16522_v37 }
0x204b   :  { %v10709_v0 = vmul.f32 %v16515_v40, %v10708_v58 }
0x204d   :  { %v10710_v32 = vadd.f32 %v16518_v41, %v10709_v0  ;;  %v14552_v0 = vld [vmem:[%s16663_s11 + $0x20] sm:$0xff]  }
0x204f   :  { %v10711_v34 = vmax.f32 %v10710_v32, 0.0 }
0x2051   :  { %v10966_v62 = vpack.c.bf16 %v10711_v34, %v10711_v34 }
0x2053   :  { %v11000_v63 = vshrl.u32 %v10966_v62, 16 }
0x2055   :  { %13044 = vmatmul.mubr.bf16.vlgmr.msra.gmra.mrb[84].mxu0 %v11000_v63  ;;  %v14554_v63 = vld [vmem:[%s16663_s11 + $0x30] sm:$0xff]  }
0x2056   :  { %13048 = vmatpush3.bf16.msra.mxu0 %v14540_v20  ;;  %13063 = vmatprep.mubr.msk.bf16.mxu0 %vm14659_vm5, %v14657_v2 }
0x2057   :  { %13049 = vmatprep.subr.bf16.mxu0 %v14657_v2 }
0x205a   :  { %13050 = vmatpush3.bf16.msra.mxu0 %v14541_v3 }
0x205b   :  { %13051 = vmatprep.subr.bf16.mxu0 %v14657_v2 }
0x205e   :  { %13052 = vmatpush3.bf16.msra.mxu0 %v14542_v31  ;;  %v14555_v31 = vld [vmem:[%s16663_s11 + $0x38] sm:$0xff]  }
0x205f   :  { %13053 = vmatprep.subr.bf16.mxu0 %v14657_v2 }
0x2062   :  { %13054 = vmatpush3.bf16.msra.mxu0 %v14543_v24 }
0x2063   :  { %13055 = vmatprep.subr.bf16.mxu0 %v14657_v2 }
0x2066   :  { %13056 = vmatpush3.bf16.msra.mxu0 %v14544_v4 }
0x2067   :  { %13057 = vmatprep.subr.bf16.mxu0 %v14657_v2 }
0x206a   :  { %13058 = vmatpush3.bf16.msra.mxu0 %v14545_v25 }
0x206b   :  { %13059 = vmatprep.subr.bf16.mxu0 %v14657_v2 }
0x206e   :  { %13060 = vmatpush3.bf16.msra.mxu0 %v14546_v23  ;;  %v11214_v23 = vld [vmem:[%s16661_s0] sm:$0x1] }
0x206f   :  { %13061 = vmatprep.subr.bf16.mxu0 %v14657_v2 }
0x2072   :  { %13062 = vmatpush3.bf16.msra.mxu0 %v14547_v9 }
0x2073   :  { %13087 = vmatprep.subr.bf16.mxu0 %v14657_v2 }
0x2075   :  { %13064 = vmatmul.mubr.bf16.vlgmr.msra.gmra.mrb[84].mxu0 %v10966_v62  ;;  %v14553_v62 = vld [vmem:[%s16663_s11 + $0x28] sm:$0xff]  }
0x2076   :  { %13091 = vmatprep.mubr.msk.bf16.mxu0 %vm14659_vm5, %v14657_v2 }
0x20c0   :  { %v10927_v61 = vpop.xlane.xlu0 %10926 }
0x20c1   :  { %v10928_v14 = vrot.slane %v10927_v61, 4 }
0x20c3   :  { %v10929_v11 = vadd.f32 %v10928_v14, %v10927_v61  ;;  %v11216_v61 = vld [vmem:[%s16662_s7] sm:$0x1] }
0x20c5   :  { %v10930_v36 = vrot.slane %v10929_v11, 2 }
0x20c7   :  { %v10931_v19 = vadd.f32 %v10930_v36, %v10929_v11 }
0x20c9   :  { %v10932_v50 = vrot.slane %v10931_v19, 1 }
0x20cb   :  { %v10933_v40 = vadd.f32 %v10932_v50, %v10931_v19 }
0x20cd   :  { %13307 = vpush %v10933_v40  ;;  %v14556_v40 = vld [vmem:[%s14824_s20] sm:$0xff]  }
0x20ce   :  { %13088 = vmatpush3.bf16.msra.mxu0 %v14556_v40 }
0x20cf   :  { %13089 = vmatprep.subr.bf16.mxu0 %v14657_v2 }
0x20fe   :  { %s13308_s29 = spop %13307 }
0x20ff   :  { %s10937_s3 = smul.f32 0.0078125, %s13308_s29 }
0x2101   :  { %v10938_v5 = vstv %s10937_s3 }
0x2102   :  { %v10939_v41 = vsub.f32 %v10919_v54, %v10938_v5  ;;  %v14548_v54 = vld [vmem:[%s16663_s11] sm:$0xff]   ;;  %v14557_v5 = vld [vmem:[%s14824_s20 + $0x8] sm:$0xff]  }
0x2103   :  { %13068 = vmatpush3.bf16.msra.mxu1 %v14548_v54  ;;  %13090 = vmatpush3.bf16.msra.mxu0 %v14557_v5 }
0x2104   :  { %v10940_v13 = vmul.f32 %v10939_v41, %v10939_v41  ;;  %13069 = vmatprep.subr.bf16.mxu1 %v14657_v2 }
0x2106   :  { %v10941_v12 = vsel %vm321_vm0, %v10940_v13, 0.0 }
0x2107   :  { %10942 = vadd.xlane.f32.xlu1 %v10941_v12  ;;  %13070 = vmatpush3.bf16.msra.mxu1 %v14549_v1 }
0x2108   :  { %13071 = vmatprep.subr.bf16.mxu1 %v14657_v2 }
0x210b   :  { %13072 = vmatpush3.bf16.msra.mxu1 %v14550_v56 }
0x210c   :  { %13073 = vmatprep.subr.bf16.mxu1 %v14657_v2 }
0x210f   :  { %13074 = vmatpush3.bf16.msra.mxu1 %v14551_v15 }
0x2110   :  { %13075 = vmatprep.subr.bf16.mxu1 %v14657_v2 }
0x2113   :  { %13076 = vmatpush3.bf16.msra.mxu1 %v14552_v0 }
0x2114   :  { %13077 = vmatprep.subr.bf16.mxu1 %v14657_v2 }
0x2117   :  { %13078 = vmatpush3.bf16.msra.mxu1 %v14553_v62 }
0x2118   :  { %13079 = vmatprep.subr.bf16.mxu1 %v14657_v2 }
0x211b   :  { %13080 = vmatpush3.bf16.msra.mxu1 %v14554_v63 }
0x211c   :  { %13081 = vmatprep.subr.bf16.mxu1 %v14657_v2 }
0x211f   :  { %13082 = vmatpush3.bf16.msra.mxu1 %v14555_v31 }
0x2148   :  { %v11173_v37 = vpop.f32.mrb[84].mxu0 }
0x2149   :  { %v13065_v52 = vpop.f32.mrb[85].mxu0  ;;  %v11179_v39 = vsel %vm321_vm0, %v11173_v37, 0.0 }
0x214a   :  { %11180 = vadd.xlane.f32.xlu0 %v11179_v39  ;;  %v11176_v42 = vpop.f32.mrb[86].mxu0 }
0x214b   :  { %v13066_v33 = vpop.f32.mrb[87].mxu0 }
0x2194   :  { %v10943_v43 = vpop.xlane.xlu1 %10942 }
0x2195   :  { %v10944_v21 = vrot.slane %v10943_v43, 4 }
0x2197   :  { %v10945_v27 = vadd.f32 %v10944_v21, %v10943_v43  ;;  %v12399_v43 = vld [vmem:[%s14829_s27] ss:$0 sm:$0xff] }
0x2199   :  { %v10946_v30 = vrot.slane %v10945_v27, 2 }
0x219b   :  { %v10947_v46 = vadd.f32 %v10946_v30, %v10945_v27 }
0x219d   :  { %v10948_v47 = vrot.slane %v10947_v46, 1 }
0x219f   :  { %v10949_v38 = vadd.f32 %v10948_v47, %v10947_v46 }
0x21a1   :  { %13309 = vpush %v10949_v38 }
0x21d2   :  { %s13310_s8 = spop %13309 }
0x21d3   :  { %s10953_s2 = smul.f32 0.0078125, %s13310_s8 }
0x21d5   :  { %s10954_s12 = sadd.f32 1e-05, %s10953_s2 }
0x21d7   :  { %v10955_v22 = vstv %s10954_s12  ;;  %v11181_v35 = vpop.xlane.xlu0 %11180 }
0x21d8   :  { %14578 = vrsqrt.f32 %v10955_v22  ;;  %v11182_v49 = vrot.slane %v11181_v35, 4 }
0x21da   :  { %v11183_v53 = vadd.f32 %v11182_v49, %v11181_v35 }
0x21dc   :  { %v11184_v44 = vrot.slane %v11183_v53, 2 }
0x21de   :  { %v11185_v55 = vadd.f32 %v11184_v44, %v11183_v53 }
0x21e0   :  { %v11186_v45 = vrot.slane %v11185_v55, 1 }
0x21e2   :  { %v14579_v6 = vpop.eup %14578  ;;  %v11187_v59 = vadd.f32 %v11186_v45, %v11185_v55 }
0x21e3   :  { %13311 = vpush %v14579_v6 }
0x21e4   :  { %13313 = vpush %v11187_v59 }
0x2214   :  { %s13312_s10 = spop %13311 }
0x2215   :  { %v10958_v7 = vstv %s13312_s10  ;;  %s13314_s15 = spop %13313 }
0x2216   :  { %v10959_v26 = vmul.f32 %v10958_v7, %v10939_v41  ;;  %s11191_s16 = smul.f32 0.0078125, %s13314_s15  ;;  %v12390_v41 = vld [vmem:[%s14819_s30] ss:$0 sm:$0xff]  ;;  %s14600_s30 = scalar_lea.vmem %s11410_s13, 32 }
0x2217   :  { %p14601_p0 = scmp.ne.s32.totalorder %s11410_s13, %s14600_s30  ;;  %p14606_p2 = scmp.lt.s32.totalorder %s14600_s30, %s14600_s30 }
0x2218   :  { %v10961_v29 = vmul.f32 %v10960_v8, %v10959_v26  ;;  %v11192_v60 = vstv %s11191_s16 }
0x2219   :  { %v11193_v18 = vsub.f32 %v11173_v37, %v11192_v60  ;;  %p14607_p3 = por %p14606_p2, %p14605_p1 }
0x221a   :  { %v10963_v17 = vadd.f32 %v10962_v57, %v10961_v29 }
0x221b   :  { %v11194_v48 = vmul.f32 %v11193_v18, %v11193_v18  ;;  %p14608_p4 = pnand %p14607_p3, %p14601_p0 }
0x221c   :  { %v10964_v16 = vmax.f32 %v10963_v17, 0.0 }
0x221d   :  { %v11195_v28 = vsel %vm321_vm0, %v11194_v48, 0.0 }
0x221e   :  { %10965 = vst [vmem:[#allocation7] sm:$0x1] %v10964_v16  ;;  %11196 = vadd.xlane.f32.xlu1 %v11195_v28 }
0x22ab   :  { %v11197_v51 = vpop.xlane.xlu1 %11196 }
0x22ac   :  { %v11198_v10 = vrot.slane %v11197_v51, 4 }
0x22ae   :  { %v11199_v58 = vadd.f32 %v11198_v10, %v11197_v51 }
0x22b0   :  { %v11200_v32 = vrot.slane %v11199_v58, 2 }
0x22b2   :  { %v11201_v34 = vadd.f32 %v11200_v32, %v11199_v58 }
0x22b4   :  { %v11202_v20 = vrot.slane %v11201_v34, 1 }
0x22b6   :  { %v11203_v3 = vadd.f32 %v11202_v20, %v11201_v34 }
0x22b8   :  { %13315 = vpush %v11203_v3 }
0x22e9   :  { %s13316_s5 = spop %13315 }
0x22ea   :  { %s11207_s9 = smul.f32 0.0078125, %s13316_s5 }
0x22ec   :  { %s11208_s14 = sadd.f32 1e-05, %s11207_s9 }
0x22ee   :  { %v11209_v24 = vstv %s11208_s14 }
0x22ef   :  { %14580 = vrsqrt.f32 %v11209_v24 }
0x22f9   :  { %v14581_v4 = vpop.eup %14580 }
0x22fa   :  { %13317 = vpush %v14581_v4 }
0x232b   :  { %s13318_s19 = spop %13317 }
0x232c   :  { %v11212_v25 = vstv %s13318_s19 }
0x232d   :  { %v11213_v9 = vmul.f32 %v11212_v25, %v11193_v18 }
0x232f   :  { %v11215_v14 = vmul.f32 %v11214_v23, %v11213_v9 }
0x2331   :  { %v11217_v11 = vadd.f32 %v11216_v61, %v11215_v14 }
0x2333   :  { %v11218_v36 = vmax.f32 %v11217_v11, 0.0 }
0x2335   :  { %11219 = vst [vmem:[#allocation7 + $0x1] sm:$0x1] %v11218_v36 }
0x233c   :  { %v11220_v19 = vld [vmem:[#allocation7] sm:$0x3] }
0x233d   :  { %v11221_v50 = vpack.c.bf16 %v11220_v19, %v11220_v19 }
0x233f   :  { %13084 = vmatmul.mubr.bf16.vlgmr.msra.gmra.mrb[80].mxu1 %v11221_v50 }
0x2412   :  { %v11327_v13 = vpop.f32.mrb[80].mxu1 }
0x2413   :  { %v11328_v12 = vadd.f32 %v12390_v41, %v11327_v13  ;;  %v13085_v37 = vpop.f32.mrb[81].mxu1 }
0x2414   :  { %v11330_v52 = vpop.f32.mrb[82].mxu1 }
0x2415   :  { %v11333_v39 = vmax.f32 %v11328_v12, 0.0  ;;  %v13086_v42 = vpop.f32.mrb[83].mxu1 }
0x2417   :  { %v11334_v33 = vpack.c.bf16 %v11333_v39, %v11333_v39 }
0x2419   :  { %13092 = vmatmul.mubr.msk.bf16.vlgmr.msra.gmra.mrb[88].mxu0 %vm3302_vm3, %v11334_v33 }
0x24ec   :  { %v11395_v21 = vpop.f32.mrb[88].mxu0 }
0x24ed   :  { %v11396_v27 = vadd.f32 %v12399_v43, %v11395_v21  ;;  %v13093_v30 = vpop.f32.mrb[89].mxu0 }
0x24ee   :  { %v11398_v2 = vpop.f32.mrb[90].mxu0 }
0x24ef   :  { %v13094_v46 = vpop.f32.mrb[91].mxu0  ;;  %11402 = vst.msk [vmem:[#allocation8] sm:$0x3] %vm11401_vm12, %v11396_v27 }
0x24f0   :  { %14611 = shalt.err (!%p14608_p4)
}
0x24f1   :  { %s14612_s20 = scalar_lea.hbm %s14834_s6, 32 }
0x24f2   :  { %p14613_p5 = scmp.ne.s32.totalorder %s14834_s6, %s14612_s20  ;;  %p14616_p6 = scmp.lt.u32.totalorder %s14612_s20, %s14834_s6 }
0x24f4   :  { %p14618_p7 = pnand %p14616_p6, %p14613_p5 }
0x24f6   :  { %14621 = shalt.err (!%p14618_p7)
}
0x24f7   :  { %11412 = dma.vmem_to_hbm [thread:$0]  %s11410_s13, 32, %s14834_s6, [#allocation9]  }
0x24f8   :  { %14622 = dma.done.wait [#allocation9], 32  }
0x24f9   :  { %14623 = vsyncadd [#allocation9], 4294967264 }
0x24fa   :  { %11416 = vsyncpa [#allocation9], 1 }

</bundles_post_ra>
